<compile_context>
chip_gen: v7x
topology: tpu7x:2x2x1
jax: 0.10.0
libtpu: 0.0.40
codegen_flags: <defaults>
</compile_context>

<pallas_src>
import functools

import numpy as np
import jax
import jax.numpy as jnp
from jax import lax
from jax.experimental import pallas as pl
from jax.experimental.pallas import tpu as pltpu

BN_EPS = 1e-5
VMEM_LIMIT = 32 * 1024 * 1024   # explicit (safe on v5e/v6e/v7x); do not rely on default


# ----------------------------------------------------------------------------
# In-kernel helpers
# ----------------------------------------------------------------------------
def _bn_relu(y, g, b):
    """Train-mode BatchNorm over rows (axis 0), single-pass stats, + affine + ReLU."""
    mean = jnp.mean(y, axis=0, keepdims=True)
    msq = jnp.mean(y * y, axis=0, keepdims=True)
    var = jnp.maximum(msq - mean * mean, 0.0)        # biased var (PyTorch train mode)
    yhat = (y - mean) * lax.rsqrt(var + BN_EPS)
    return jnp.maximum(yhat * g + b, 0.0)


# ----------------------------------------------------------------------------
# Kernel G: stand-in backbone matmul + ReLU + 7x7 mean + premodel global half.
# Single grid step (B folded into M); everything resident in VMEM.
# ----------------------------------------------------------------------------
def _global_kernel(cols_ref, w_ref, b_ref, pool_ref, wg_ref, o_ref):
    # (B*S, 256) bf16 @ (256, 2304) bf16 -> f32, + bias, ReLU.
    acc = jnp.dot(cols_ref[...], w_ref[...], preferred_element_type=jnp.float32)
    acc = jnp.maximum(acc + b_ref[...], 0.0)
    # Per-image spatial mean via a (B, B*S) block-averaging matrix.
    glob = jnp.dot(pool_ref[...], acc, preferred_element_type=jnp.float32)    # (B, 2304)
    # Premodel global half for ALL keypoints at once (weights stacked & padded).
    o_ref[...] = jnp.dot(glob, wg_ref[...], preferred_element_type=jnp.float32)  # (B, WPRE)


# ----------------------------------------------------------------------------
# Kernel L: fully fused per-keypoint local branch, grid=(K,).
# ----------------------------------------------------------------------------
def _local_fused_kernel(msel_ref, gsel_ref, asel_ref, cols1_ref,
                        w1_ref, b1_ref, g1_ref, e1_ref,
                        w2_ref, b2_ref, g2_ref, e2_ref,
                        w3_ref, b3_ref, g3_ref, e3_ref,
                        w4_ref, b4_ref, wl_ref, pb_ref, o_ref):
    f32 = jnp.float32

    # conv1 (6x6/s2) as matmul + BN(train) + ReLU                 -> (B*169, 16)
    a1 = _bn_relu(
        jnp.dot(cols1_ref[...], w1_ref[...], preferred_element_type=f32) + b1_ref[...],
        g1_ref[...], e1_ref[...])

    # 2x2/s2 ceil-mode MaxPool: max of 4 row-selection matmuls.  a1 >= 0 (post
    # ReLU), so all-zero rows for out-of-bounds window taps are neutral.
    p1 = jnp.dot(msel_ref[0], a1, preferred_element_type=f32)                 # (B*49, 16)
    for t in range(1, 4):
        p1 = jnp.maximum(p1, jnp.dot(msel_ref[t], a1, preferred_element_type=f32))

    # conv2 (3x3/s1): im2col folded into 9 row-selection matmuls  -> (B*25, 16)
    w2 = w2_ref[...]                                                          # (144, 16)
    z2 = None
    for d in range(9):
        sel = jnp.dot(gsel_ref[d], p1, preferred_element_type=f32)            # (B*25, 16)
        term = jnp.dot(sel, w2[d * 16:(d + 1) * 16, :], preferred_element_type=f32)
        z2 = term if z2 is None else z2 + term
    a2 = _bn_relu(z2 + b2_ref[...], g2_ref[...], e2_ref[...])                 # (B*25, 16)

    # 2x2/s2 ceil-mode AvgPool (valid-count divisor) + NCHW flatten, both
    # folded into linear1 via 9 averaging matmuls + weight-row blocks.
    w3 = w3_ref[...]                                                          # (144, 128)
    z3 = None
    for h in range(9):
        pooled = jnp.dot(asel_ref[h], a2, preferred_element_type=f32)         # (B, 16)
        term = jnp.dot(pooled, w3[h * 16:(h + 1) * 16, :], preferred_element_type=f32)
        z3 = term if z3 is None else z3 + term
    hid = _bn_relu(z3 + b3_ref[...], g3_ref[...], e3_ref[...])                # (B, 128)

    # linear2 -> localfea (B,136); premodel local half (pre_wl zero-padded to
    # 128 lanes so the HBM store is lane-dense).
    localfea = jnp.dot(hid, w4_ref[...], preferred_element_type=f32) + b4_ref[...]
    o_ref[...] = jnp.dot(localfea, wl_ref[...], preferred_element_type=f32) + pb_ref[...]


# ----------------------------------------------------------------------------
# Host-side constant selection matrices (depend only on static B)
# ----------------------------------------------------------------------------
def _maxpool_select(B, H, W):
    """(4, B*OH*OW, B*H*W) 0/1 matrices; one per 2x2 window tap, ceil mode."""
    OH, OW = -(-H // 2), -(-W // 2)
    M = np.zeros((4, B * OH * OW, B * H * W), np.float32)
    for b in range(B):
        for ph in range(OH):
            for pw in range(OW):
                r = b * OH * OW + ph * OW + pw
                for t, (dy, dx) in enumerate(((0, 0), (0, 1), (1, 0), (1, 1))):
                    ih, iw = 2 * ph + dy, 2 * pw + dx
                    if ih < H and iw < W:
                        M[t, r, b * H * W + ih * W + iw] = 1.0
    return M


def _im2col_select(B, H, W, kh, kw):
    """(kh*kw, B*OH*OW, B*H*W) 0/1 matrices for a stride-1 valid conv im2col."""
    OH, OW = H - kh + 1, W - kw + 1
    G = np.zeros((kh * kw, B * OH * OW, B * H * W), np.float32)
    for b in range(B):
        for oh in range(OH):
            for ow in range(OW):
                r = b * OH * OW + oh * OW + ow
                for di in range(kh):
                    for dj in range(kw):
                        G[di * kw + dj, r, b * H * W + (oh + di) * W + (ow + dj)] = 1.0
    return G


def _avgpool_select(B, H, W):
    """(OH*OW, B, B*H*W): 2x2/s2 ceil-mode average with valid-count divisor
    (matches PyTorch AvgPool2d(ceil_mode=True, padding=0))."""
    OH, OW = -(-H // 2), -(-W // 2)
    A = np.zeros((OH * OW, B, B * H * W), np.float32)
    for qh in range(OH):
        for qw in range(OW):
            hs = [h for h in (2 * qh, 2 * qh + 1) if h < H]
            ws = [w for w in (2 * qw, 2 * qw + 1) if w < W]
            inv = 1.0 / float(len(hs) * len(ws))
            for b in range(B):
                for h in hs:
                    for w in ws:
                        A[qh * OW + qw, b, b * H * W + h * W + w] = inv
    return A


# ----------------------------------------------------------------------------
# Thin XLA glue: im2col for conv1 (tiny tensors)
# ----------------------------------------------------------------------------
def _im2col_6x6s2(p):
    """p: (K,B,31,31,C) -> (K, B*13*13, 36*C); column order (kh, kw, C)."""
    K, B, H, W, C = p.shape
    OH = (H - 6) // 2 + 1
    OW = (W - 6) // 2 + 1
    parts = []
    for i in range(6):
        for j in range(6):
            parts.append(p[:, :, i:i + 2 * (OH - 1) + 1:2, j:j + 2 * (OW - 1) + 1:2, :])
    cols = jnp.stack(parts, axis=4)                       # (K,B,OH,OW,36,C)
    return cols.reshape(K, B * OH * OW, 36 * C)


# ----------------------------------------------------------------------------
# Forward
# ----------------------------------------------------------------------------
def localfea_from_image_forward(x, points, params, num_keypoints):
    B, C, size, _ = x.shape
    K = num_keypoints
    assert C == 3, "module expects RGB input"
    assert size % 8 == 0 and size >= 31
    lp = params["local"]
    WPRE = lp["pre_wl"].shape[-1]

    # ---------------- global branch ----------------
    # TODO(synk): pretrained densenet161 backbone is not translated; replaced by a
    # deterministic 8x8/stride-8 conv stand-in producing a 2208-channel 7x7-style map.
    ph = pw = size // 8
    S = ph * pw
    x_nhwc = jnp.transpose(x, (0, 2, 3, 1))
    cols = x_nhwc.reshape(B, ph, 8, pw, 8, 3).transpose(0, 1, 3, 2, 4, 5)
    cols = cols.reshape(B * S, 8 * 8 * 3)
    cols = jnp.pad(cols, ((0, 0), (0, 64))).astype(jnp.bfloat16)      # 192 -> 256 deep
    pool_mat = jnp.asarray(
        np.kron(np.eye(B, dtype=np.float32), np.ones((1, S), np.float32)) / float(S))

    pre_glob = pl.pallas_call(
        _global_kernel,
        out_shape=jax.ShapeDtypeStruct((B, WPRE), jnp.float32),
        compiler_params=pltpu.CompilerParams(vmem_limit_bytes=VMEM_LIMIT),
    )(cols, params["dense_w"], params["dense_b"], pool_mat, params["pre_wg_all"])

    # ---------------- patch gather + conv1 im2col (XLA glue) ----------------
    lx = ((points[:, 0::2] + 0.5) * size).astype(jnp.int32)            # (B,K)
    ly = ((points[:, 1::2] + 0.5) * size).astype(jnp.int32)
    sx = jnp.clip(lx - 15, 0, size - 31)
    sy = jnp.clip(ly - 15, 0, size - 31)
    crop = lambda img, a, b: lax.dynamic_slice(img, (0, a, b), (3, 31, 31))
    patches = jax.vmap(jax.vmap(crop, in_axes=(None, 0, 0)),
                       in_axes=(0, 0, 0))(x, sx, sy)                   # (B,K,3,31,31)
    patches = jnp.transpose(patches, (1, 0, 3, 4, 2))                  # (K,B,31,31,3)
    cols1 = _im2col_6x6s2(patches)                                     # (K, B*169, 108)

    # ---------------- fused local branch ----------------
    msel = jnp.asarray(_maxpool_select(B, 13, 13))                     # (4, B*49, B*169)
    gsel = jnp.asarray(_im2col_select(B, 7, 7, 3, 3))                  # (9, B*25, B*49)
    asel = jnp.asarray(_avgpool_select(B, 5, 5))                       # (9, B,    B*25)

    def _const(a):
        return pl.BlockSpec(a.shape, lambda k: (0,) * a.ndim)

    def _perk(a):
        return pl.BlockSpec((None,) + a.shape[1:], lambda k: (k, 0, 0))

    out_local = pl.pallas_call(
        _local_fused_kernel,
        out_shape=jax.ShapeDtypeStruct((K, B, WPRE), jnp.float32),
        grid=(K,),
        in_specs=[
            _const(msel), _const(gsel), _const(asel), _perk(cols1),
            _perk(lp["conv1_w"]), _perk(lp["conv1_b"]), _perk(lp["bn1_g"]), _perk(lp["bn1_b"]),
            _perk(lp["conv2_w"]), _perk(lp["conv2_b"]), _perk(lp["bn2_g"]), _perk(lp["bn2_b"]),
            _perk(lp["lin1_w"]), _perk(lp["lin1_b"]), _perk(lp["bn3_g"]), _perk(lp["bn3_b"]),
            _perk(lp["lin2_w"]), _perk(lp["lin2_b"]),
            _perk(lp["pre_wl"]), _perk(lp["pre_b"]),
        ],
        out_specs=pl.BlockSpec((None, B, WPRE), lambda k: (k, 0, 0)),
        compiler_params=pltpu.CompilerParams(
            dimension_semantics=("parallel",), vmem_limit_bytes=VMEM_LIMIT),
    )(msel, gsel, asel, cols1,
      lp["conv1_w"], lp["conv1_b"], lp["bn1_g"], lp["bn1_b"],
      lp["conv2_w"], lp["conv2_b"], lp["bn2_g"], lp["bn2_b"],
      lp["lin1_w"], lp["lin1_b"], lp["bn3_g"], lp["bn3_b"],
      lp["lin2_w"], lp["lin2_b"], lp["pre_wl"], lp["pre_b"])

    # predicts[:, 2k+t] = glob@pre_wg_k + localfea_k@pre_wl_k + pre_b_k
    pre_local = jnp.transpose(out_local[:, :, :2], (1, 0, 2)).reshape(B, 2 * K)
    return pre_local + pre_glob[:, :2 * K]


# ----------------------------------------------------------------------------
# Deterministic synthetic parameters.  Weights are generated in PyTorch-flatten
# layout and permuted/padded once here into the kernel layouts.
# ----------------------------------------------------------------------------
def _linear_init(key, fan_in, fan_out):
    k1, k2 = jax.random.split(key)
    w = jax.random.normal(k1, (fan_in, fan_out), jnp.float32) / jnp.sqrt(float(fan_in))
    b = jax.random.normal(k2, (fan_out,), jnp.float32) * 0.01
    return w, b


def _bn_init(key, n):
    k1, k2 = jax.random.split(key)
    g = 1.0 + 0.1 * jax.random.normal(k1, (n,), jnp.float32)
    b = 0.1 * jax.random.normal(k2, (n,), jnp.float32)
    return g, b


def init_params(key, num_keypoints):
    K = num_keypoints
    WPRE = max(128, ((2 * K + 127) // 128) * 128)   # lane-dense head width
    keys = jax.random.split(key, 2 + K)

    # Stand-in backbone: pad (192,2208) -> MXU/lane-aligned (256,2304), bf16.
    dense_w, dense_b = _linear_init(keys[0], 8 * 8 * 3, 2208)
    dense_w_p = jnp.pad(dense_w, ((0, 64), (0, 96))).astype(jnp.bfloat16)
    dense_b_p = jnp.pad(dense_b, (0, 96)).reshape(1, 2304)

    per_kp, wg_list = [], []
    for i in range(K):
        ks = jax.random.split(keys[2 + i], 8)
        p = {}
        # conv1: PyTorch reduction order (c, kh, kw) -> kernel order (kh, kw, c).
        w, b = _linear_init(ks[0], 3 * 6 * 6, 16)
        p["conv1_w"] = w.reshape(3, 6, 6, 16).transpose(1, 2, 0, 3).reshape(108, 16)
        p["conv1_b"] = b
        p["bn1_g"], p["bn1_b"] = _bn_init(ks[1], 16)
        # conv2: (c, kh, kw) -> (kh, kw, c).
        w, b = _linear_init(ks[2], 16 * 3 * 3, 16)
        p["conv2_w"] = w.reshape(16, 3, 3, 16).transpose(1, 2, 0, 3).reshape(144, 16)
        p["conv2_b"] = b
        p["bn2_g"], p["bn2_b"] = _bn_init(ks[3], 16)
        # linear1: PyTorch flatten order (c, h, w) -> kernel order (hw, c).
        w, b = _linear_init(ks[4], 16 * 3 * 3, 128)
        p["lin1_w"] = w.reshape(16, 9, 128).transpose(1, 0, 2).reshape(144, 128)
        p["lin1_b"] = b
        p["bn3_g"], p["bn3_b"] = _bn_init(ks[5], 128)
        p["lin2_w"], p["lin2_b"] = _linear_init(ks[6], 128, 136)
        # premodel: split cat([global, local]) weight; pad local half to WPRE lanes.
        pre_w, pre_b = _linear_init(ks[7], 2208 + 136, 2)
        wg_list.append(pre_w[:2208])                                   # (2208, 2)
        p["pre_wl"] = jnp.pad(pre_w[2208:], ((0, 0), (0, WPRE - 2)))   # (136, WPRE)
        p["pre_b"] = jnp.pad(pre_b, (0, WPRE - 2))                     # (WPRE,)
        per_kp.append(p)

    # Stack per-keypoint params; vectors -> (K,1,N).
    stk = {}
    for name in per_kp[0]:
        a = jnp.stack([p[name] for p in per_kp], axis=0)
        if a.ndim == 2:
            a = a[:, None, :]
        stk[name] = a

    # Stacked premodel global half: (2208, 2K) -> padded (2304, WPRE), f32.
    wg_all = jnp.transpose(jnp.stack(wg_list, axis=0), (1, 0, 2)).reshape(2208, 2 * K)
    wg_all = jnp.pad(wg_all, ((0, 96), (0, WPRE - 2 * K)))

    return {"dense_w": dense_w_p, "dense_b": dense_b_p,
            "pre_wg_all": wg_all, "local": stk}


# ----------------------------------------------------------------------------
if __name__ == "__main__":
    num_keypoints = 3
    B, C, H = 2, 3, 56   # H >= 31 and a multiple of 8 for the 7x7-style stand-in map

    root = jax.random.PRNGKey(0)
    k_x, k_pts, k_par = jax.random.split(root, 3)
    x = jax.random.normal(k_x, (B, C, H, H), jnp.float32)
    points = jax.random.uniform(k_pts, (B, 2 * num_keypoints),
                                minval=-0.45, maxval=0.45, dtype=jnp.float32)
    params = init_params(k_par, num_keypoints)

    fwd = jax.jit(functools.partial(localfea_from_image_forward,
                                    num_keypoints=num_keypoints))
    predicts = fwd(x, points, params)
    predicts = jax.block_until_ready(predicts)

    assert predicts.shape == (B, 2 * num_keypoints), predicts.shape
    assert bool(jnp.all(jnp.isfinite(predicts)))
    print("KERNEL_OK")
</pallas_src>

<mosaic_0001>
module attributes {stable_mosaic.version = 11 : i64} {
  func.func @_local_fused_kernel(%arg0: i32, %arg1: memref<4x98x338xf32, #tpu.memory_space<vmem>>, %arg2: memref<9x50x98xf32, #tpu.memory_space<vmem>>, %arg3: memref<9x2x50xf32, #tpu.memory_space<vmem>>, %arg4: memref<1x338x108xf32, #tpu.memory_space<vmem>>, %arg5: memref<1x108x16xf32, #tpu.memory_space<vmem>>, %arg6: memref<1x1x16xf32, #tpu.memory_space<vmem>>, %arg7: memref<1x1x16xf32, #tpu.memory_space<vmem>>, %arg8: memref<1x1x16xf32, #tpu.memory_space<vmem>>, %arg9: memref<1x144x16xf32, #tpu.memory_space<vmem>>, %arg10: memref<1x1x16xf32, #tpu.memory_space<vmem>>, %arg11: memref<1x1x16xf32, #tpu.memory_space<vmem>>, %arg12: memref<1x1x16xf32, #tpu.memory_space<vmem>>, %arg13: memref<1x144x128xf32, #tpu.memory_space<vmem>>, %arg14: memref<1x1x128xf32, #tpu.memory_space<vmem>>, %arg15: memref<1x1x128xf32, #tpu.memory_space<vmem>>, %arg16: memref<1x1x128xf32, #tpu.memory_space<vmem>>, %arg17: memref<1x128x136xf32, #tpu.memory_space<vmem>>, %arg18: memref<1x1x136xf32, #tpu.memory_space<vmem>>, %arg19: memref<1x136x128xf32, #tpu.memory_space<vmem>>, %arg20: memref<1x1x128xf32, #tpu.memory_space<vmem>>, %arg21: memref<1x2x128xf32, #tpu.memory_space<vmem>>) attributes {dimension_semantics = [#tpu.dimension_semantics<parallel>], iteration_bounds = array<i64: 3>, scalar_prefetch = 0 : i64, scratch_operands = 0 : i64, tpu.core_type = #tpu.core_type<tc>, window_params = [{pipeline_mode = #tpu.pipeline_mode<synchronous>, transform_indices = @transform_0, window_bounds = array<i64: 4, 98, 338>}, {pipeline_mode = #tpu.pipeline_mode<synchronous>, transform_indices = @transform_1, window_bounds = array<i64: 9, 50, 98>}, {pipeline_mode = #tpu.pipeline_mode<synchronous>, transform_indices = @transform_2, window_bounds = array<i64: 9, 2, 50>}, {transform_indices = @transform_3, window_bounds = array<i64: 1, 338, 108>}, {transform_indices = @transform_4, window_bounds = array<i64: 1, 108, 16>}, {transform_indices = @transform_5, window_bounds = array<i64: 1, 1, 16>}, {transform_indices = @transform_6, window_bounds = array<i64: 1, 1, 16>}, {transform_indices = @transform_7, window_bounds = array<i64: 1, 1, 16>}, {transform_indices = @transform_8, window_bounds = array<i64: 1, 144, 16>}, {transform_indices = @transform_9, window_bounds = array<i64: 1, 1, 16>}, {transform_indices = @transform_10, window_bounds = array<i64: 1, 1, 16>}, {transform_indices = @transform_11, window_bounds = array<i64: 1, 1, 16>}, {transform_indices = @transform_12, window_bounds = array<i64: 1, 144, 128>}, {transform_indices = @transform_13, window_bounds = array<i64: 1, 1, 128>}, {transform_indices = @transform_14, window_bounds = array<i64: 1, 1, 128>}, {transform_indices = @transform_15, window_bounds = array<i64: 1, 1, 128>}, {transform_indices = @transform_16, window_bounds = array<i64: 1, 128, 136>}, {transform_indices = @transform_17, window_bounds = array<i64: 1, 1, 136>}, {transform_indices = @transform_18, window_bounds = array<i64: 1, 136, 128>}, {transform_indices = @transform_19, window_bounds = array<i64: 1, 1, 128>}, {transform_indices = @transform_20, window_bounds = array<i64: 1, 2, 128>}]} {
    %c0 = arith.constant 0 : index
    %c0_0 = arith.constant 0 : index
    %c0_1 = arith.constant 0 : index
    %0 = vector.load %arg4[%c0, %c0_0, %c0_1] : memref<1x338x108xf32, #tpu.memory_space<vmem>>, vector<1x338x108xf32>
    %1 = vector.shape_cast %0 : vector<1x338x108xf32> to vector<338x108xf32>
    %c0_2 = arith.constant 0 : index
    %c0_3 = arith.constant 0 : index
    %c0_4 = arith.constant 0 : index
    %2 = vector.load %arg5[%c0_2, %c0_3, %c0_4] : memref<1x108x16xf32, #tpu.memory_space<vmem>>, vector<1x108x16xf32>
    %3 = vector.shape_cast %2 : vector<1x108x16xf32> to vector<108x16xf32>
    %cst = arith.constant dense<0.000000e+00> : vector<338x16xf32>
    %4 = tpu.matmul %1, %3, %cst {dimension_numbers = #tpu.dot_dimension_numbers<[1], [0], [0], [1], [0, 0, 1, 1], [], []>} : vector<338x108xf32>, vector<108x16xf32>, vector<338x16xf32> -> vector<338x16xf32>
    %c0_5 = arith.constant 0 : index
    %c0_6 = arith.constant 0 : index
    %c0_7 = arith.constant 0 : index
    %5 = vector.load %arg6[%c0_5, %c0_6, %c0_7] : memref<1x1x16xf32, #tpu.memory_space<vmem>>, vector<1x1x16xf32>
    %6 = vector.shape_cast %5 : vector<1x1x16xf32> to vector<1x16xf32>
    %7 = vector.broadcast %6 : vector<1x16xf32> to vector<338x16xf32>
    %8 = arith.addf %4, %7 : vector<338x16xf32>
    %c0_8 = arith.constant 0 : index
    %c0_9 = arith.constant 0 : index
    %c0_10 = arith.constant 0 : index
    %9 = vector.load %arg7[%c0_8, %c0_9, %c0_10] : memref<1x1x16xf32, #tpu.memory_space<vmem>>, vector<1x1x16xf32>
    %10 = vector.shape_cast %9 : vector<1x1x16xf32> to vector<1x16xf32>
    %c0_11 = arith.constant 0 : index
    %c0_12 = arith.constant 0 : index
    %c0_13 = arith.constant 0 : index
    %11 = vector.load %arg8[%c0_11, %c0_12, %c0_13] : memref<1x1x16xf32, #tpu.memory_space<vmem>>, vector<1x1x16xf32>
    %12 = vector.shape_cast %11 : vector<1x1x16xf32> to vector<1x16xf32>
    %cst_14 = arith.constant dense<0.000000e+00> : vector<16xf32>
    %13 = vector.multi_reduction <add>, %8, %cst_14 [0] : vector<338x16xf32> to vector<16xf32>
    %14 = vector.shape_cast %13 : vector<16xf32> to vector<1x16xf32>
    %cst_15 = arith.constant 3.380000e+02 : f32
    %15 = vector.broadcast %cst_15 : f32 to vector<1x16xf32>
    %16 = arith.divf %14, %15 : vector<1x16xf32>
    %17 = arith.mulf %8, %8 : vector<338x16xf32>
    %cst_16 = arith.constant dense<0.000000e+00> : vector<16xf32>
    %18 = vector.multi_reduction <add>, %17, %cst_16 [0] : vector<338x16xf32> to vector<16xf32>
    %19 = vector.shape_cast %18 : vector<16xf32> to vector<1x16xf32>
    %cst_17 = arith.constant 3.380000e+02 : f32
    %20 = vector.broadcast %cst_17 : f32 to vector<1x16xf32>
    %21 = arith.divf %19, %20 : vector<1x16xf32>
    %22 = arith.mulf %16, %16 : vector<1x16xf32>
    %23 = arith.subf %21, %22 : vector<1x16xf32>
    %cst_18 = arith.constant 0.000000e+00 : f32
    %24 = vector.broadcast %cst_18 : f32 to vector<1x16xf32>
    %25 = arith.maximumf %23, %24 : vector<1x16xf32>
    %26 = vector.broadcast %16 : vector<1x16xf32> to vector<338x16xf32>
    %27 = arith.subf %8, %26 : vector<338x16xf32>
    %cst_19 = arith.constant 9.99999974E-6 : f32
    %28 = vector.broadcast %cst_19 : f32 to vector<1x16xf32>
    %29 = arith.addf %25, %28 : vector<1x16xf32>
    %30 = math.rsqrt %29 : vector<1x16xf32>
    %31 = vector.broadcast %30 : vector<1x16xf32> to vector<338x16xf32>
    %32 = arith.mulf %27, %31 : vector<338x16xf32>
    %33 = vector.broadcast %10 : vector<1x16xf32> to vector<338x16xf32>
    %34 = arith.mulf %32, %33 : vector<338x16xf32>
    %35 = vector.broadcast %12 : vector<1x16xf32> to vector<338x16xf32>
    %36 = arith.addf %34, %35 : vector<338x16xf32>
    %cst_20 = arith.constant 0.000000e+00 : f32
    %37 = vector.broadcast %cst_20 : f32 to vector<338x16xf32>
    %38 = arith.maximumf %36, %37 : vector<338x16xf32>
    %c0_21 = arith.constant 0 : index
    %c0_22 = arith.constant 0 : index
    %c0_23 = arith.constant 0 : index
    %39 = vector.load %arg1[%c0_21, %c0_22, %c0_23] : memref<4x98x338xf32, #tpu.memory_space<vmem>>, vector<1x98x338xf32>
    %40 = vector.shape_cast %39 : vector<1x98x338xf32> to vector<98x338xf32>
    %cst_24 = arith.constant dense<0.000000e+00> : vector<98x16xf32>
    %41 = tpu.matmul %40, %38, %cst_24 {dimension_numbers = #tpu.dot_dimension_numbers<[1], [0], [0], [1], [0, 0, 1, 1], [], []>} : vector<98x338xf32>, vector<338x16xf32>, vector<98x16xf32> -> vector<98x16xf32>
    %c1 = arith.constant 1 : index
    %c0_25 = arith.constant 0 : index
    %c0_26 = arith.constant 0 : index
    %42 = vector.load %arg1[%c1, %c0_25, %c0_26] : memref<4x98x338xf32, #tpu.memory_space<vmem>>, vector<1x98x338xf32>
    %43 = vector.shape_cast %42 : vector<1x98x338xf32> to vector<98x338xf32>
    %cst_27 = arith.constant dense<0.000000e+00> : vector<98x16xf32>
    %44 = tpu.matmul %43, %38, %cst_27 {dimension_numbers = #tpu.dot_dimension_numbers<[1], [0], [0], [1], [0, 0, 1, 1], [], []>} : vector<98x338xf32>, vector<338x16xf32>, vector<98x16xf32> -> vector<98x16xf32>
    %45 = arith.maximumf %41, %44 : vector<98x16xf32>
    %c2 = arith.constant 2 : index
    %c0_28 = arith.constant 0 : index
    %c0_29 = arith.constant 0 : index
    %46 = vector.load %arg1[%c2, %c0_28, %c0_29] : memref<4x98x338xf32, #tpu.memory_space<vmem>>, vector<1x98x338xf32>
    %47 = vector.shape_cast %46 : vector<1x98x338xf32> to vector<98x338xf32>
    %cst_30 = arith.constant dense<0.000000e+00> : vector<98x16xf32>
    %48 = tpu.matmul %47, %38, %cst_30 {dimension_numbers = #tpu.dot_dimension_numbers<[1], [0], [0], [1], [0, 0, 1, 1], [], []>} : vector<98x338xf32>, vector<338x16xf32>, vector<98x16xf32> -> vector<98x16xf32>
    %49 = arith.maximumf %45, %48 : vector<98x16xf32>
    %c3 = arith.constant 3 : index
    %c0_31 = arith.constant 0 : index
    %c0_32 = arith.constant 0 : index
    %50 = vector.load %arg1[%c3, %c0_31, %c0_32] : memref<4x98x338xf32, #tpu.memory_space<vmem>>, vector<1x98x338xf32>
    %51 = vector.shape_cast %50 : vector<1x98x338xf32> to vector<98x338xf32>
    %cst_33 = arith.constant dense<0.000000e+00> : vector<98x16xf32>
    %52 = tpu.matmul %51, %38, %cst_33 {dimension_numbers = #tpu.dot_dimension_numbers<[1], [0], [0], [1], [0, 0, 1, 1], [], []>} : vector<98x338xf32>, vector<338x16xf32>, vector<98x16xf32> -> vector<98x16xf32>
    %53 = arith.maximumf %49, %52 : vector<98x16xf32>
    %c0_34 = arith.constant 0 : index
    %c0_35 = arith.constant 0 : index
    %c0_36 = arith.constant 0 : index
    %54 = vector.load %arg9[%c0_34, %c0_35, %c0_36] : memref<1x144x16xf32, #tpu.memory_space<vmem>>, vector<1x144x16xf32>
    %55 = vector.shape_cast %54 : vector<1x144x16xf32> to vector<144x16xf32>
    %c0_37 = arith.constant 0 : index
    %c0_38 = arith.constant 0 : index
    %c0_39 = arith.constant 0 : index
    %56 = vector.load %arg2[%c0_37, %c0_38, %c0_39] : memref<9x50x98xf32, #tpu.memory_space<vmem>>, vector<1x50x98xf32>
    %57 = vector.shape_cast %56 : vector<1x50x98xf32> to vector<50x98xf32>
    %cst_40 = arith.constant dense<0.000000e+00> : vector<50x16xf32>
    %58 = tpu.matmul %57, %53, %cst_40 {dimension_numbers = #tpu.dot_dimension_numbers<[1], [0], [0], [1], [0, 0, 1, 1], [], []>} : vector<50x98xf32>, vector<98x16xf32>, vector<50x16xf32> -> vector<50x16xf32>
    %59 = vector.extract_strided_slice %55 {offsets = [0, 0], sizes = [16, 16], strides = [1, 1]} : vector<144x16xf32> to vector<16x16xf32>
    %cst_41 = arith.constant dense<0.000000e+00> : vector<50x16xf32>
    %60 = tpu.matmul %58, %59, %cst_41 {dimension_numbers = #tpu.dot_dimension_numbers<[1], [0], [0], [1], [0, 0, 1, 1], [], []>} : vector<50x16xf32>, vector<16x16xf32>, vector<50x16xf32> -> vector<50x16xf32>
    %c1_42 = arith.constant 1 : index
    %c0_43 = arith.constant 0 : index
    %c0_44 = arith.constant 0 : index
    %61 = vector.load %arg2[%c1_42, %c0_43, %c0_44] : memref<9x50x98xf32, #tpu.memory_space<vmem>>, vector<1x50x98xf32>
    %62 = vector.shape_cast %61 : vector<1x50x98xf32> to vector<50x98xf32>
    %cst_45 = arith.constant dense<0.000000e+00> : vector<50x16xf32>
    %63 = tpu.matmul %62, %53, %cst_45 {dimension_numbers = #tpu.dot_dimension_numbers<[1], [0], [0], [1], [0, 0, 1, 1], [], []>} : vector<50x98xf32>, vector<98x16xf32>, vector<50x16xf32> -> vector<50x16xf32>
    %64 = vector.extract_strided_slice %55 {offsets = [16, 0], sizes = [16, 16], strides = [1, 1]} : vector<144x16xf32> to vector<16x16xf32>
    %cst_46 = arith.constant dense<0.000000e+00> : vector<50x16xf32>
    %65 = tpu.matmul %63, %64, %cst_46 {dimension_numbers = #tpu.dot_dimension_numbers<[1], [0], [0], [1], [0, 0, 1, 1], [], []>} : vector<50x16xf32>, vector<16x16xf32>, vector<50x16xf32> -> vector<50x16xf32>
    %66 = arith.addf %60, %65 : vector<50x16xf32>
    %c2_47 = arith.constant 2 : index
    %c0_48 = arith.constant 0 : index
    %c0_49 = arith.constant 0 : index
    %67 = vector.load %arg2[%c2_47, %c0_48, %c0_49] : memref<9x50x98xf32, #tpu.memory_space<vmem>>, vector<1x50x98xf32>
    %68 = vector.shape_cast %67 : vector<1x50x98xf32> to vector<50x98xf32>
    %cst_50 = arith.constant dense<0.000000e+00> : vector<50x16xf32>
    %69 = tpu.matmul %68, %53, %cst_50 {dimension_numbers = #tpu.dot_dimension_numbers<[1], [0], [0], [1], [0, 0, 1, 1], [], []>} : vector<50x98xf32>, vector<98x16xf32>, vector<50x16xf32> -> vector<50x16xf32>
    %70 = vector.extract_strided_slice %55 {offsets = [32, 0], sizes = [16, 16], strides = [1, 1]} : vector<144x16xf32> to vector<16x16xf32>
    %cst_51 = arith.constant dense<0.000000e+00> : vector<50x16xf32>
    %71 = tpu.matmul %69, %70, %cst_51 {dimension_numbers = #tpu.dot_dimension_numbers<[1], [0], [0], [1], [0, 0, 1, 1], [], []>} : vector<50x16xf32>, vector<16x16xf32>, vector<50x16xf32> -> vector<50x16xf32>
    %72 = arith.addf %66, %71 : vector<50x16xf32>
    %c3_52 = arith.constant 3 : index
    %c0_53 = arith.constant 0 : index
    %c0_54 = arith.constant 0 : index
    %73 = vector.load %arg2[%c3_52, %c0_53, %c0_54] : memref<9x50x98xf32, #tpu.memory_space<vmem>>, vector<1x50x98xf32>
    %74 = vector.shape_cast %73 : vector<1x50x98xf32> to vector<50x98xf32>
    %cst_55 = arith.constant dense<0.000000e+00> : vector<50x16xf32>
    %75 = tpu.matmul %74, %53, %cst_55 {dimension_numbers = #tpu.dot_dimension_numbers<[1], [0], [0], [1], [0, 0, 1, 1], [], []>} : vector<50x98xf32>, vector<98x16xf32>, vector<50x16xf32> -> vector<50x16xf32>
    %76 = vector.extract_strided_slice %55 {offsets = [48, 0], sizes = [16, 16], strides = [1, 1]} : vector<144x16xf32> to vector<16x16xf32>
    %cst_56 = arith.constant dense<0.000000e+00> : vector<50x16xf32>
    %77 = tpu.matmul %75, %76, %cst_56 {dimension_numbers = #tpu.dot_dimension_numbers<[1], [0], [0], [1], [0, 0, 1, 1], [], []>} : vector<50x16xf32>, vector<16x16xf32>, vector<50x16xf32> -> vector<50x16xf32>
    %78 = arith.addf %72, %77 : vector<50x16xf32>
    %c4 = arith.constant 4 : index
    %c0_57 = arith.constant 0 : index
    %c0_58 = arith.constant 0 : index
    %79 = vector.load %arg2[%c4, %c0_57, %c0_58] : memref<9x50x98xf32, #tpu.memory_space<vmem>>, vector<1x50x98xf32>
    %80 = vector.shape_cast %79 : vector<1x50x98xf32> to vector<50x98xf32>
    %cst_59 = arith.constant dense<0.000000e+00> : vector<50x16xf32>
    %81 = tpu.matmul %80, %53, %cst_59 {dimension_numbers = #tpu.dot_dimension_numbers<[1], [0], [0], [1], [0, 0, 1, 1], [], []>} : vector<50x98xf32>, vector<98x16xf32>, vector<50x16xf32> -> vector<50x16xf32>
    %82 = vector.extract_strided_slice %55 {offsets = [64, 0], sizes = [16, 16], strides = [1, 1]} : vector<144x16xf32> to vector<16x16xf32>
    %cst_60 = arith.constant dense<0.000000e+00> : vector<50x16xf32>
    %83 = tpu.matmul %81, %82, %cst_60 {dimension_numbers = #tpu.dot_dimension_numbers<[1], [0], [0], [1], [0, 0, 1, 1], [], []>} : vector<50x16xf32>, vector<16x16xf32>, vector<50x16xf32> -> vector<50x16xf32>
    %84 = arith.addf %78, %83 : vector<50x16xf32>
    %c5 = arith.constant 5 : index
    %c0_61 = arith.constant 0 : index
    %c0_62 = arith.constant 0 : index
    %85 = vector.load %arg2[%c5, %c0_61, %c0_62] : memref<9x50x98xf32, #tpu.memory_space<vmem>>, vector<1x50x98xf32>
    %86 = vector.shape_cast %85 : vector<1x50x98xf32> to vector<50x98xf32>
    %cst_63 = arith.constant dense<0.000000e+00> : vector<50x16xf32>
    %87 = tpu.matmul %86, %53, %cst_63 {dimension_numbers = #tpu.dot_dimension_numbers<[1], [0], [0], [1], [0, 0, 1, 1], [], []>} : vector<50x98xf32>, vector<98x16xf32>, vector<50x16xf32> -> vector<50x16xf32>
    %88 = vector.extract_strided_slice %55 {offsets = [80, 0], sizes = [16, 16], strides = [1, 1]} : vector<144x16xf32> to vector<16x16xf32>
    %cst_64 = arith.constant dense<0.000000e+00> : vector<50x16xf32>
    %89 = tpu.matmul %87, %88, %cst_64 {dimension_numbers = #tpu.dot_dimension_numbers<[1], [0], [0], [1], [0, 0, 1, 1], [], []>} : vector<50x16xf32>, vector<16x16xf32>, vector<50x16xf32> -> vector<50x16xf32>
    %90 = arith.addf %84, %89 : vector<50x16xf32>
    %c6 = arith.constant 6 : index
    %c0_65 = arith.constant 0 : index
    %c0_66 = arith.constant 0 : index
    %91 = vector.load %arg2[%c6, %c0_65, %c0_66] : memref<9x50x98xf32, #tpu.memory_space<vmem>>, vector<1x50x98xf32>
    %92 = vector.shape_cast %91 : vector<1x50x98xf32> to vector<50x98xf32>
    %cst_67 = arith.constant dense<0.000000e+00> : vector<50x16xf32>
    %93 = tpu.matmul %92, %53, %cst_67 {dimension_numbers = #tpu.dot_dimension_numbers<[1], [0], [0], [1], [0, 0, 1, 1], [], []>} : vector<50x98xf32>, vector<98x16xf32>, vector<50x16xf32> -> vector<50x16xf32>
    %94 = vector.extract_strided_slice %55 {offsets = [96, 0], sizes = [16, 16], strides = [1, 1]} : vector<144x16xf32> to vector<16x16xf32>
    %cst_68 = arith.constant dense<0.000000e+00> : vector<50x16xf32>
    %95 = tpu.matmul %93, %94, %cst_68 {dimension_numbers = #tpu.dot_dimension_numbers<[1], [0], [0], [1], [0, 0, 1, 1], [], []>} : vector<50x16xf32>, vector<16x16xf32>, vector<50x16xf32> -> vector<50x16xf32>
    %96 = arith.addf %90, %95 : vector<50x16xf32>
    %c7 = arith.constant 7 : index
    %c0_69 = arith.constant 0 : index
    %c0_70 = arith.constant 0 : index
    %97 = vector.load %arg2[%c7, %c0_69, %c0_70] : memref<9x50x98xf32, #tpu.memory_space<vmem>>, vector<1x50x98xf32>
    %98 = vector.shape_cast %97 : vector<1x50x98xf32> to vector<50x98xf32>
    %cst_71 = arith.constant dense<0.000000e+00> : vector<50x16xf32>
    %99 = tpu.matmul %98, %53, %cst_71 {dimension_numbers = #tpu.dot_dimension_numbers<[1], [0], [0], [1], [0, 0, 1, 1], [], []>} : vector<50x98xf32>, vector<98x16xf32>, vector<50x16xf32> -> vector<50x16xf32>
    %100 = vector.extract_strided_slice %55 {offsets = [112, 0], sizes = [16, 16], strides = [1, 1]} : vector<144x16xf32> to vector<16x16xf32>
    %cst_72 = arith.constant dense<0.000000e+00> : vector<50x16xf32>
    %101 = tpu.matmul %99, %100, %cst_72 {dimension_numbers = #tpu.dot_dimension_numbers<[1], [0], [0], [1], [0, 0, 1, 1], [], []>} : vector<50x16xf32>, vector<16x16xf32>, vector<50x16xf32> -> vector<50x16xf32>
    %102 = arith.addf %96, %101 : vector<50x16xf32>
    %c8 = arith.constant 8 : index
    %c0_73 = arith.constant 0 : index
    %c0_74 = arith.constant 0 : index
    %103 = vector.load %arg2[%c8, %c0_73, %c0_74] : memref<9x50x98xf32, #tpu.memory_space<vmem>>, vector<1x50x98xf32>
    %104 = vector.shape_cast %103 : vector<1x50x98xf32> to vector<50x98xf32>
    %cst_75 = arith.constant dense<0.000000e+00> : vector<50x16xf32>
    %105 = tpu.matmul %104, %53, %cst_75 {dimension_numbers = #tpu.dot_dimension_numbers<[1], [0], [0], [1], [0, 0, 1, 1], [], []>} : vector<50x98xf32>, vector<98x16xf32>, vector<50x16xf32> -> vector<50x16xf32>
    %106 = vector.extract_strided_slice %55 {offsets = [128, 0], sizes = [16, 16], strides = [1, 1]} : vector<144x16xf32> to vector<16x16xf32>
    %cst_76 = arith.constant dense<0.000000e+00> : vector<50x16xf32>
    %107 = tpu.matmul %105, %106, %cst_76 {dimension_numbers = #tpu.dot_dimension_numbers<[1], [0], [0], [1], [0, 0, 1, 1], [], []>} : vector<50x16xf32>, vector<16x16xf32>, vector<50x16xf32> -> vector<50x16xf32>
    %108 = arith.addf %102, %107 : vector<50x16xf32>
    %c0_77 = arith.constant 0 : index
    %c0_78 = arith.constant 0 : index
    %c0_79 = arith.constant 0 : index
    %109 = vector.load %arg10[%c0_77, %c0_78, %c0_79] : memref<1x1x16xf32, #tpu.memory_space<vmem>>, vector<1x1x16xf32>
    %110 = vector.shape_cast %109 : vector<1x1x16xf32> to vector<1x16xf32>
    %111 = vector.broadcast %110 : vector<1x16xf32> to vector<50x16xf32>
    %112 = arith.addf %108, %111 : vector<50x16xf32>
    %c0_80 = arith.constant 0 : index
    %c0_81 = arith.constant 0 : index
    %c0_82 = arith.constant 0 : index
    %113 = vector.load %arg11[%c0_80, %c0_81, %c0_82] : memref<1x1x16xf32, #tpu.memory_space<vmem>>, vector<1x1x16xf32>
    %114 = vector.shape_cast %113 : vector<1x1x16xf32> to vector<1x16xf32>
    %c0_83 = arith.constant 0 : index
    %c0_84 = arith.constant 0 : index
    %c0_85 = arith.constant 0 : index
    %115 = vector.load %arg12[%c0_83, %c0_84, %c0_85] : memref<1x1x16xf32, #tpu.memory_space<vmem>>, vector<1x1x16xf32>
    %116 = vector.shape_cast %115 : vector<1x1x16xf32> to vector<1x16xf32>
    %cst_86 = arith.constant dense<0.000000e+00> : vector<16xf32>
    %117 = vector.multi_reduction <add>, %112, %cst_86 [0] : vector<50x16xf32> to vector<16xf32>
    %118 = vector.shape_cast %117 : vector<16xf32> to vector<1x16xf32>
    %cst_87 = arith.constant 5.000000e+01 : f32
    %119 = vector.broadcast %cst_87 : f32 to vector<1x16xf32>
    %120 = arith.divf %118, %119 : vector<1x16xf32>
    %121 = arith.mulf %112, %112 : vector<50x16xf32>
    %cst_88 = arith.constant dense<0.000000e+00> : vector<16xf32>
    %122 = vector.multi_reduction <add>, %121, %cst_88 [0] : vector<50x16xf32> to vector<16xf32>
    %123 = vector.shape_cast %122 : vector<16xf32> to vector<1x16xf32>
    %cst_89 = arith.constant 5.000000e+01 : f32
    %124 = vector.broadcast %cst_89 : f32 to vector<1x16xf32>
    %125 = arith.divf %123, %124 : vector<1x16xf32>
    %126 = arith.mulf %120, %120 : vector<1x16xf32>
    %127 = arith.subf %125, %126 : vector<1x16xf32>
    %cst_90 = arith.constant 0.000000e+00 : f32
    %128 = vector.broadcast %cst_90 : f32 to vector<1x16xf32>
    %129 = arith.maximumf %127, %128 : vector<1x16xf32>
    %130 = vector.broadcast %120 : vector<1x16xf32> to vector<50x16xf32>
    %131 = arith.subf %112, %130 : vector<50x16xf32>
    %cst_91 = arith.constant 9.99999974E-6 : f32
    %132 = vector.broadcast %cst_91 : f32 to vector<1x16xf32>
    %133 = arith.addf %129, %132 : vector<1x16xf32>
    %134 = math.rsqrt %133 : vector<1x16xf32>
    %135 = vector.broadcast %134 : vector<1x16xf32> to vector<50x16xf32>
    %136 = arith.mulf %131, %135 : vector<50x16xf32>
    %137 = vector.broadcast %114 : vector<1x16xf32> to vector<50x16xf32>
    %138 = arith.mulf %136, %137 : vector<50x16xf32>
    %139 = vector.broadcast %116 : vector<1x16xf32> to vector<50x16xf32>
    %140 = arith.addf %138, %139 : vector<50x16xf32>
    %cst_92 = arith.constant 0.000000e+00 : f32
    %141 = vector.broadcast %cst_92 : f32 to vector<50x16xf32>
    %142 = arith.maximumf %140, %141 : vector<50x16xf32>
    %c0_93 = arith.constant 0 : index
    %c0_94 = arith.constant 0 : index
    %c0_95 = arith.constant 0 : index
    %143 = vector.load %arg13[%c0_93, %c0_94, %c0_95] : memref<1x144x128xf32, #tpu.memory_space<vmem>>, vector<1x144x128xf32>
    %144 = vector.shape_cast %143 : vector<1x144x128xf32> to vector<144x128xf32>
    %c0_96 = arith.constant 0 : index
    %c0_97 = arith.constant 0 : index
    %c0_98 = arith.constant 0 : index
    %145 = vector.load %arg3[%c0_96, %c0_97, %c0_98] : memref<9x2x50xf32, #tpu.memory_space<vmem>>, vector<1x2x50xf32>
    %146 = vector.shape_cast %145 : vector<1x2x50xf32> to vector<2x50xf32>
    %cst_99 = arith.constant dense<0.000000e+00> : vector<2x16xf32>
    %147 = tpu.matmul %146, %142, %cst_99 {dimension_numbers = #tpu.dot_dimension_numbers<[1], [0], [0], [1], [0, 0, 1, 1], [], []>} : vector<2x50xf32>, vector<50x16xf32>, vector<2x16xf32> -> vector<2x16xf32>
    %148 = vector.extract_strided_slice %144 {offsets = [0, 0], sizes = [16, 128], strides = [1, 1]} : vector<144x128xf32> to vector<16x128xf32>
    %cst_100 = arith.constant dense<0.000000e+00> : vector<2x128xf32>
    %149 = tpu.matmul %147, %148, %cst_100 {dimension_numbers = #tpu.dot_dimension_numbers<[1], [0], [0], [1], [0, 0, 1, 1], [], []>} : vector<2x16xf32>, vector<16x128xf32>, vector<2x128xf32> -> vector<2x128xf32>
    %c1_101 = arith.constant 1 : index
    %c0_102 = arith.constant 0 : index
    %c0_103 = arith.constant 0 : index
    %150 = vector.load %arg3[%c1_101, %c0_102, %c0_103] : memref<9x2x50xf32, #tpu.memory_space<vmem>>, vector<1x2x50xf32>
    %151 = vector.shape_cast %150 : vector<1x2x50xf32> to vector<2x50xf32>
    %cst_104 = arith.constant dense<0.000000e+00> : vector<2x16xf32>
    %152 = tpu.matmul %151, %142, %cst_104 {dimension_numbers = #tpu.dot_dimension_numbers<[1], [0], [0], [1], [0, 0, 1, 1], [], []>} : vector<2x50xf32>, vector<50x16xf32>, vector<2x16xf32> -> vector<2x16xf32>
    %153 = vector.extract_strided_slice %144 {offsets = [16, 0], sizes = [16, 128], strides = [1, 1]} : vector<144x128xf32> to vector<16x128xf32>
    %cst_105 = arith.constant dense<0.000000e+00> : vector<2x128xf32>
    %154 = tpu.matmul %152, %153, %cst_105 {dimension_numbers = #tpu.dot_dimension_numbers<[1], [0], [0], [1], [0, 0, 1, 1], [], []>} : vector<2x16xf32>, vector<16x128xf32>, vector<2x128xf32> -> vector<2x128xf32>
    %155 = arith.addf %149, %154 : vector<2x128xf32>
    %c2_106 = arith.constant 2 : index
    %c0_107 = arith.constant 0 : index
    %c0_108 = arith.constant 0 : index
    %156 = vector.load %arg3[%c2_106, %c0_107, %c0_108] : memref<9x2x50xf32, #tpu.memory_space<vmem>>, vector<1x2x50xf32>
    %157 = vector.shape_cast %156 : vector<1x2x50xf32> to vector<2x50xf32>
    %cst_109 = arith.constant dense<0.000000e+00> : vector<2x16xf32>
    %158 = tpu.matmul %157, %142, %cst_109 {dimension_numbers = #tpu.dot_dimension_numbers<[1], [0], [0], [1], [0, 0, 1, 1], [], []>} : vector<2x50xf32>, vector<50x16xf32>, vector<2x16xf32> -> vector<2x16xf32>
    %159 = vector.extract_strided_slice %144 {offsets = [32, 0], sizes = [16, 128], strides = [1, 1]} : vector<144x128xf32> to vector<16x128xf32>
    %cst_110 = arith.constant dense<0.000000e+00> : vector<2x128xf32>
    %160 = tpu.matmul %158, %159, %cst_110 {dimension_numbers = #tpu.dot_dimension_numbers<[1], [0], [0], [1], [0, 0, 1, 1], [], []>} : vector<2x16xf32>, vector<16x128xf32>, vector<2x128xf32> -> vector<2x128xf32>
    %161 = arith.addf %155, %160 : vector<2x128xf32>
    %c3_111 = arith.constant 3 : index
    %c0_112 = arith.constant 0 : index
    %c0_113 = arith.constant 0 : index
    %162 = vector.load %arg3[%c3_111, %c0_112, %c0_113] : memref<9x2x50xf32, #tpu.memory_space<vmem>>, vector<1x2x50xf32>
    %163 = vector.shape_cast %162 : vector<1x2x50xf32> to vector<2x50xf32>
    %cst_114 = arith.constant dense<0.000000e+00> : vector<2x16xf32>
    %164 = tpu.matmul %163, %142, %cst_114 {dimension_numbers = #tpu.dot_dimension_numbers<[1], [0], [0], [1], [0, 0, 1, 1], [], []>} : vector<2x50xf32>, vector<50x16xf32>, vector<2x16xf32> -> vector<2x16xf32>
    %165 = vector.extract_strided_slice %144 {offsets = [48, 0], sizes = [16, 128], strides = [1, 1]} : vector<144x128xf32> to vector<16x128xf32>
    %cst_115 = arith.constant dense<0.000000e+00> : vector<2x128xf32>
    %166 = tpu.matmul %164, %165, %cst_115 {dimension_numbers = #tpu.dot_dimension_numbers<[1], [0], [0], [1], [0, 0, 1, 1], [], []>} : vector<2x16xf32>, vector<16x128xf32>, vector<2x128xf32> -> vector<2x128xf32>
    %167 = arith.addf %161, %166 : vector<2x128xf32>
    %c4_116 = arith.constant 4 : index
    %c0_117 = arith.constant 0 : index
    %c0_118 = arith.constant 0 : index
    %168 = vector.load %arg3[%c4_116, %c0_117, %c0_118] : memref<9x2x50xf32, #tpu.memory_space<vmem>>, vector<1x2x50xf32>
    %169 = vector.shape_cast %168 : vector<1x2x50xf32> to vector<2x50xf32>
    %cst_119 = arith.constant dense<0.000000e+00> : vector<2x16xf32>
    %170 = tpu.matmul %169, %142, %cst_119 {dimension_numbers = #tpu.dot_dimension_numbers<[1], [0], [0], [1], [0, 0, 1, 1], [], []>} : vector<2x50xf32>, vector<50x16xf32>, vector<2x16xf32> -> vector<2x16xf32>
    %171 = vector.extract_strided_slice %144 {offsets = [64, 0], sizes = [16, 128], strides = [1, 1]} : vector<144x128xf32> to vector<16x128xf32>
    %cst_120 = arith.constant dense<0.000000e+00> : vector<2x128xf32>
    %172 = tpu.matmul %170, %171, %cst_120 {dimension_numbers = #tpu.dot_dimension_numbers<[1], [0], [0], [1], [0, 0, 1, 1], [], []>} : vector<2x16xf32>, vector<16x128xf32>, vector<2x128xf32> -> vector<2x128xf32>
    %173 = arith.addf %167, %172 : vector<2x128xf32>
    %c5_121 = arith.constant 5 : index
    %c0_122 = arith.constant 0 : index
    %c0_123 = arith.constant 0 : index
    %174 = vector.load %arg3[%c5_121, %c0_122, %c0_123] : memref<9x2x50xf32, #tpu.memory_space<vmem>>, vector<1x2x50xf32>
    %175 = vector.shape_cast %174 : vector<1x2x50xf32> to vector<2x50xf32>
    %cst_124 = arith.constant dense<0.000000e+00> : vector<2x16xf32>
    %176 = tpu.matmul %175, %142, %cst_124 {dimension_numbers = #tpu.dot_dimension_numbers<[1], [0], [0], [1], [0, 0, 1, 1], [], []>} : vector<2x50xf32>, vector<50x16xf32>, vector<2x16xf32> -> vector<2x16xf32>
    %177 = vector.extract_strided_slice %144 {offsets = [80, 0], sizes = [16, 128], strides = [1, 1]} : vector<144x128xf32> to vector<16x128xf32>
    %cst_125 = arith.constant dense<0.000000e+00> : vector<2x128xf32>
    %178 = tpu.matmul %176, %177, %cst_125 {dimension_numbers = #tpu.dot_dimension_numbers<[1], [0], [0], [1], [0, 0, 1, 1], [], []>} : vector<2x16xf32>, vector<16x128xf32>, vector<2x128xf32> -> vector<2x128xf32>
    %179 = arith.addf %173, %178 : vector<2x128xf32>
    %c6_126 = arith.constant 6 : index
    %c0_127 = arith.constant 0 : index
    %c0_128 = arith.constant 0 : index
    %180 = vector.load %arg3[%c6_126, %c0_127, %c0_128] : memref<9x2x50xf32, #tpu.memory_space<vmem>>, vector<1x2x50xf32>
    %181 = vector.shape_cast %180 : vector<1x2x50xf32> to vector<2x50xf32>
    %cst_129 = arith.constant dense<0.000000e+00> : vector<2x16xf32>
    %182 = tpu.matmul %181, %142, %cst_129 {dimension_numbers = #tpu.dot_dimension_numbers<[1], [0], [0], [1], [0, 0, 1, 1], [], []>} : vector<2x50xf32>, vector<50x16xf32>, vector<2x16xf32> -> vector<2x16xf32>
    %183 = vector.extract_strided_slice %144 {offsets = [96, 0], sizes = [16, 128], strides = [1, 1]} : vector<144x128xf32> to vector<16x128xf32>
    %cst_130 = arith.constant dense<0.000000e+00> : vector<2x128xf32>
    %184 = tpu.matmul %182, %183, %cst_130 {dimension_numbers = #tpu.dot_dimension_numbers<[1], [0], [0], [1], [0, 0, 1, 1], [], []>} : vector<2x16xf32>, vector<16x128xf32>, vector<2x128xf32> -> vector<2x128xf32>
    %185 = arith.addf %179, %184 : vector<2x128xf32>
    %c7_131 = arith.constant 7 : index
    %c0_132 = arith.constant 0 : index
    %c0_133 = arith.constant 0 : index
    %186 = vector.load %arg3[%c7_131, %c0_132, %c0_133] : memref<9x2x50xf32, #tpu.memory_space<vmem>>, vector<1x2x50xf32>
    %187 = vector.shape_cast %186 : vector<1x2x50xf32> to vector<2x50xf32>
    %cst_134 = arith.constant dense<0.000000e+00> : vector<2x16xf32>
    %188 = tpu.matmul %187, %142, %cst_134 {dimension_numbers = #tpu.dot_dimension_numbers<[1], [0], [0], [1], [0, 0, 1, 1], [], []>} : vector<2x50xf32>, vector<50x16xf32>, vector<2x16xf32> -> vector<2x16xf32>
    %189 = vector.extract_strided_slice %144 {offsets = [112, 0], sizes = [16, 128], strides = [1, 1]} : vector<144x128xf32> to vector<16x128xf32>
    %cst_135 = arith.constant dense<0.000000e+00> : vector<2x128xf32>
    %190 = tpu.matmul %188, %189, %cst_135 {dimension_numbers = #tpu.dot_dimension_numbers<[1], [0], [0], [1], [0, 0, 1, 1], [], []>} : vector<2x16xf32>, vector<16x128xf32>, vector<2x128xf32> -> vector<2x128xf32>
    %191 = arith.addf %185, %190 : vector<2x128xf32>
    %c8_136 = arith.constant 8 : index
    %c0_137 = arith.constant 0 : index
    %c0_138 = arith.constant 0 : index
    %192 = vector.load %arg3[%c8_136, %c0_137, %c0_138] : memref<9x2x50xf32, #tpu.memory_space<vmem>>, vector<1x2x50xf32>
    %193 = vector.shape_cast %192 : vector<1x2x50xf32> to vector<2x50xf32>
    %cst_139 = arith.constant dense<0.000000e+00> : vector<2x16xf32>
    %194 = tpu.matmul %193, %142, %cst_139 {dimension_numbers = #tpu.dot_dimension_numbers<[1], [0], [0], [1], [0, 0, 1, 1], [], []>} : vector<2x50xf32>, vector<50x16xf32>, vector<2x16xf32> -> vector<2x16xf32>
    %195 = vector.extract_strided_slice %144 {offsets = [128, 0], sizes = [16, 128], strides = [1, 1]} : vector<144x128xf32> to vector<16x128xf32>
    %cst_140 = arith.constant dense<0.000000e+00> : vector<2x128xf32>
    %196 = tpu.matmul %194, %195, %cst_140 {dimension_numbers = #tpu.dot_dimension_numbers<[1], [0], [0], [1], [0, 0, 1, 1], [], []>} : vector<2x16xf32>, vector<16x128xf32>, vector<2x128xf32> -> vector<2x128xf32>
    %197 = arith.addf %191, %196 : vector<2x128xf32>
    %c0_141 = arith.constant 0 : index
    %c0_142 = arith.constant 0 : index
    %c0_143 = arith.constant 0 : index
    %198 = vector.load %arg14[%c0_141, %c0_142, %c0_143] : memref<1x1x128xf32, #tpu.memory_space<vmem>>, vector<1x1x128xf32>
    %199 = vector.shape_cast %198 : vector<1x1x128xf32> to vector<1x128xf32>
    %200 = vector.broadcast %199 : vector<1x128xf32> to vector<2x128xf32>
    %201 = arith.addf %197, %200 : vector<2x128xf32>
    %c0_144 = arith.constant 0 : index
    %c0_145 = arith.constant 0 : index
    %c0_146 = arith.constant 0 : index
    %202 = vector.load %arg15[%c0_144, %c0_145, %c0_146] : memref<1x1x128xf32, #tpu.memory_space<vmem>>, vector<1x1x128xf32>
    %203 = vector.shape_cast %202 : vector<1x1x128xf32> to vector<1x128xf32>
    %c0_147 = arith.constant 0 : index
    %c0_148 = arith.constant 0 : index
    %c0_149 = arith.constant 0 : index
    %204 = vector.load %arg16[%c0_147, %c0_148, %c0_149] : memref<1x1x128xf32, #tpu.memory_space<vmem>>, vector<1x1x128xf32>
    %205 = vector.shape_cast %204 : vector<1x1x128xf32> to vector<1x128xf32>
    %cst_150 = arith.constant dense<0.000000e+00> : vector<128xf32>
    %206 = vector.multi_reduction <add>, %201, %cst_150 [0] : vector<2x128xf32> to vector<128xf32>
    %207 = vector.shape_cast %206 : vector<128xf32> to vector<1x128xf32>
    %cst_151 = arith.constant 2.000000e+00 : f32
    %208 = vector.broadcast %cst_151 : f32 to vector<1x128xf32>
    %209 = arith.divf %207, %208 : vector<1x128xf32>
    %210 = arith.mulf %201, %201 : vector<2x128xf32>
    %cst_152 = arith.constant dense<0.000000e+00> : vector<128xf32>
    %211 = vector.multi_reduction <add>, %210, %cst_152 [0] : vector<2x128xf32> to vector<128xf32>
    %212 = vector.shape_cast %211 : vector<128xf32> to vector<1x128xf32>
    %cst_153 = arith.constant 2.000000e+00 : f32
    %213 = vector.broadcast %cst_153 : f32 to vector<1x128xf32>
    %214 = arith.divf %212, %213 : vector<1x128xf32>
    %215 = arith.mulf %209, %209 : vector<1x128xf32>
    %216 = arith.subf %214, %215 : vector<1x128xf32>
    %cst_154 = arith.constant 0.000000e+00 : f32
    %217 = vector.broadcast %cst_154 : f32 to vector<1x128xf32>
    %218 = arith.maximumf %216, %217 : vector<1x128xf32>
    %219 = vector.broadcast %209 : vector<1x128xf32> to vector<2x128xf32>
    %220 = arith.subf %201, %219 : vector<2x128xf32>
    %cst_155 = arith.constant 9.99999974E-6 : f32
    %221 = vector.broadcast %cst_155 : f32 to vector<1x128xf32>
    %222 = arith.addf %218, %221 : vector<1x128xf32>
    %223 = math.rsqrt %222 : vector<1x128xf32>
    %224 = vector.broadcast %223 : vector<1x128xf32> to vector<2x128xf32>
    %225 = arith.mulf %220, %224 : vector<2x128xf32>
    %226 = vector.broadcast %203 : vector<1x128xf32> to vector<2x128xf32>
    %227 = arith.mulf %225, %226 : vector<2x128xf32>
    %228 = vector.broadcast %205 : vector<1x128xf32> to vector<2x128xf32>
    %229 = arith.addf %227, %228 : vector<2x128xf32>
    %cst_156 = arith.constant 0.000000e+00 : f32
    %230 = vector.broadcast %cst_156 : f32 to vector<2x128xf32>
    %231 = arith.maximumf %229, %230 : vector<2x128xf32>
    %c0_157 = arith.constant 0 : index
    %c0_158 = arith.constant 0 : index
    %c0_159 = arith.constant 0 : index
    %232 = vector.load %arg17[%c0_157, %c0_158, %c0_159] : memref<1x128x136xf32, #tpu.memory_space<vmem>>, vector<1x128x136xf32>
    %233 = vector.shape_cast %232 : vector<1x128x136xf32> to vector<128x136xf32>
    %cst_160 = arith.constant dense<0.000000e+00> : vector<2x136xf32>
    %234 = tpu.matmul %231, %233, %cst_160 {dimension_numbers = #tpu.dot_dimension_numbers<[1], [0], [0], [1], [0, 0, 1, 1], [], []>} : vector<2x128xf32>, vector<128x136xf32>, vector<2x136xf32> -> vector<2x136xf32>
    %c0_161 = arith.constant 0 : index
    %c0_162 = arith.constant 0 : index
    %c0_163 = arith.constant 0 : index
    %235 = vector.load %arg18[%c0_161, %c0_162, %c0_163] : memref<1x1x136xf32, #tpu.memory_space<vmem>>, vector<1x1x136xf32>
    %236 = vector.shape_cast %235 : vector<1x1x136xf32> to vector<1x136xf32>
    %237 = vector.broadcast %236 : vector<1x136xf32> to vector<2x136xf32>
    %238 = arith.addf %234, %237 : vector<2x136xf32>
    %c0_164 = arith.constant 0 : index
    %c0_165 = arith.constant 0 : index
    %c0_166 = arith.constant 0 : index
    %239 = vector.load %arg19[%c0_164, %c0_165, %c0_166] : memref<1x136x128xf32, #tpu.memory_space<vmem>>, vector<1x136x128xf32>
    %240 = vector.shape_cast %239 : vector<1x136x128xf32> to vector<136x128xf32>
    %cst_167 = arith.constant dense<0.000000e+00> : vector<2x128xf32>
    %241 = tpu.matmul %238, %240, %cst_167 {dimension_numbers = #tpu.dot_dimension_numbers<[1], [0], [0], [1], [0, 0, 1, 1], [], []>} : vector<2x136xf32>, vector<136x128xf32>, vector<2x128xf32> -> vector<2x128xf32>
    %c0_168 = arith.constant 0 : index
    %c0_169 = arith.constant 0 : index
    %c0_170 = arith.constant 0 : index
    %242 = vector.load %arg20[%c0_168, %c0_169, %c0_170] : memref<1x1x128xf32, #tpu.memory_space<vmem>>, vector<1x1x128xf32>
    %243 = vector.shape_cast %242 : vector<1x1x128xf32> to vector<1x128xf32>
    %244 = vector.broadcast %243 : vector<1x128xf32> to vector<2x128xf32>
    %245 = arith.addf %241, %244 : vector<2x128xf32>
    %c0_171 = arith.constant 0 : index
    %c0_172 = arith.constant 0 : index
    %c0_173 = arith.constant 0 : index
    %246 = vector.load %arg21[%c0_171, %c0_172, %c0_173] : memref<1x2x128xf32, #tpu.memory_space<vmem>>, vector<1x2x128xf32>
    %247 = vector.shape_cast %246 : vector<1x2x128xf32> to vector<2x128xf32>
    %248 = vector.shape_cast %245 : vector<2x128xf32> to vector<1x2x128xf32>
    tpu.vector_store %arg21[%c0_171, %c0_172, %c0_173], %248 {strides = array<i32>} : memref<1x2x128xf32, #tpu.memory_space<vmem>>, vector<1x2x128xf32>,
    return
  }
  func.func @transform_0(%arg0: i32) -> (i32, i32, i32) {
    %c0_i32 = arith.constant 0 : i32
    %c0_i32_0 = arith.constant 0 : i32
    %c0_i32_1 = arith.constant 0 : i32
    %c0_i32_2 = arith.constant 0 : i32
    return %c0_i32, %c0_i32_0, %c0_i32_1 : i32, i32, i32
  }
  func.func @transform_1(%arg0: i32) -> (i32, i32, i32) {
    %c0_i32 = arith.constant 0 : i32
    %c0_i32_0 = arith.constant 0 : i32
    %c0_i32_1 = arith.constant 0 : i32
    %c0_i32_2 = arith.constant 0 : i32
    return %c0_i32, %c0_i32_0, %c0_i32_1 : i32, i32, i32
  }
  func.func @transform_2(%arg0: i32) -> (i32, i32, i32) {
    %c0_i32 = arith.constant 0 : i32
    %c0_i32_0 = arith.constant 0 : i32
    %c0_i32_1 = arith.constant 0 : i32
    %c0_i32_2 = arith.constant 0 : i32
    return %c0_i32, %c0_i32_0, %c0_i32_1 : i32, i32, i32
  }
  func.func @transform_3(%arg0: i32) -> (i32, i32, i32) {
    %c0_i32 = arith.constant 0 : i32
    %c0_i32_0 = arith.constant 0 : i32
    %c0_i32_1 = arith.constant 0 : i32
    return %arg0, %c0_i32, %c0_i32_0 : i32, i32, i32
  }
  func.func @transform_4(%arg0: i32) -> (i32, i32, i32) {
    %c0_i32 = arith.constant 0 : i32
    %c0_i32_0 = arith.constant 0 : i32
    %c0_i32_1 = arith.constant 0 : i32
    return %arg0, %c0_i32, %c0_i32_0 : i32, i32, i32
  }
  func.func @transform_5(%arg0: i32) -> (i32, i32, i32) {
    %c0_i32 = arith.constant 0 : i32
    %c0_i32_0 = arith.constant 0 : i32
    %c0_i32_1 = arith.constant 0 : i32
    return %arg0, %c0_i32, %c0_i32_0 : i32, i32, i32
  }
  func.func @transform_6(%arg0: i32) -> (i32, i32, i32) {
    %c0_i32 = arith.constant 0 : i32
    %c0_i32_0 = arith.constant 0 : i32
    %c0_i32_1 = arith.constant 0 : i32
    return %arg0, %c0_i32, %c0_i32_0 : i32, i32, i32
  }
  func.func @transform_7(%arg0: i32) -> (i32, i32, i32) {
    %c0_i32 = arith.constant 0 : i32
    %c0_i32_0 = arith.constant 0 : i32
    %c0_i32_1 = arith.constant 0 : i32
    return %arg0, %c0_i32, %c0_i32_0 : i32, i32, i32
  }
  func.func @transform_8(%arg0: i32) -> (i32, i32, i32) {
    %c0_i32 = arith.constant 0 : i32
    %c0_i32_0 = arith.constant 0 : i32
    %c0_i32_1 = arith.constant 0 : i32
    return %arg0, %c0_i32, %c0_i32_0 : i32, i32, i32
  }
  func.func @transform_9(%arg0: i32) -> (i32, i32, i32) {
    %c0_i32 = arith.constant 0 : i32
    %c0_i32_0 = arith.constant 0 : i32
    %c0_i32_1 = arith.constant 0 : i32
    return %arg0, %c0_i32, %c0_i32_0 : i32, i32, i32
  }
  func.func @transform_10(%arg0: i32) -> (i32, i32, i32) {
    %c0_i32 = arith.constant 0 : i32
    %c0_i32_0 = arith.constant 0 : i32
    %c0_i32_1 = arith.constant 0 : i32
    return %arg0, %c0_i32, %c0_i32_0 : i32, i32, i32
  }
  func.func @transform_11(%arg0: i32) -> (i32, i32, i32) {
    %c0_i32 = arith.constant 0 : i32
    %c0_i32_0 = arith.constant 0 : i32
    %c0_i32_1 = arith.constant 0 : i32
    return %arg0, %c0_i32, %c0_i32_0 : i32, i32, i32
  }
  func.func @transform_12(%arg0: i32) -> (i32, i32, i32) {
    %c0_i32 = arith.constant 0 : i32
    %c0_i32_0 = arith.constant 0 : i32
    %c0_i32_1 = arith.constant 0 : i32
    return %arg0, %c0_i32, %c0_i32_0 : i32, i32, i32
  }
  func.func @transform_13(%arg0: i32) -> (i32, i32, i32) {
    %c0_i32 = arith.constant 0 : i32
    %c0_i32_0 = arith.constant 0 : i32
    %c0_i32_1 = arith.constant 0 : i32
    return %arg0, %c0_i32, %c0_i32_0 : i32, i32, i32
  }
  func.func @transform_14(%arg0: i32) -> (i32, i32, i32) {
    %c0_i32 = arith.constant 0 : i32
    %c0_i32_0 = arith.constant 0 : i32
    %c0_i32_1 = arith.constant 0 : i32
    return %arg0, %c0_i32, %c0_i32_0 : i32, i32, i32
  }
  func.func @transform_15(%arg0: i32) -> (i32, i32, i32) {
    %c0_i32 = arith.constant 0 : i32
    %c0_i32_0 = arith.constant 0 : i32
    %c0_i32_1 = arith.constant 0 : i32
    return %arg0, %c0_i32, %c0_i32_0 : i32, i32, i32
  }
  func.func @transform_16(%arg0: i32) -> (i32, i32, i32) {
    %c0_i32 = arith.constant 0 : i32
    %c0_i32_0 = arith.constant 0 : i32
    %c0_i32_1 = arith.constant 0 : i32
    return %arg0, %c0_i32, %c0_i32_0 : i32, i32, i32
  }
  func.func @transform_17(%arg0: i32) -> (i32, i32, i32) {
    %c0_i32 = arith.constant 0 : i32
    %c0_i32_0 = arith.constant 0 : i32
    %c0_i32_1 = arith.constant 0 : i32
    return %arg0, %c0_i32, %c0_i32_0 : i32, i32, i32
  }
  func.func @transform_18(%arg0: i32) -> (i32, i32, i32) {
    %c0_i32 = arith.constant 0 : i32
    %c0_i32_0 = arith.constant 0 : i32
    %c0_i32_1 = arith.constant 0 : i32
    return %arg0, %c0_i32, %c0_i32_0 : i32, i32, i32
  }
  func.func @transform_19(%arg0: i32) -> (i32, i32, i32) {
    %c0_i32 = arith.constant 0 : i32
    %c0_i32_0 = arith.constant 0 : i32
    %c0_i32_1 = arith.constant 0 : i32
    return %arg0, %c0_i32, %c0_i32_0 : i32, i32, i32
  }
  func.func @transform_20(%arg0: i32) -> (i32, i32, i32) {
    %c0_i32 = arith.constant 0 : i32
    %c0_i32_0 = arith.constant 0 : i32
    %c0_i32_1 = arith.constant 0 : i32
    return %arg0, %c0_i32, %c0_i32_0 : i32, i32, i32
  }
}

module attributes {stable_mosaic.version = 11 : i64} {
  func.func @_global_kernel(%arg0: memref<98x256xbf16, #tpu.memory_space<vmem>>, %arg1: memref<256x2304xbf16, #tpu.memory_space<vmem>>, %arg2: memref<1x2304xf32, #tpu.memory_space<vmem>>, %arg3: memref<2x98xf32, #tpu.memory_space<vmem>>, %arg4: memref<2304x128xf32, #tpu.memory_space<vmem>>, %arg5: memref<2x128xf32, #tpu.memory_space<vmem>>) attributes {dimension_semantics = [], scalar_prefetch = 0 : i64, scratch_operands = 0 : i64, tpu.core_type = #tpu.core_type<tc>} {
    %c0 = arith.constant 0 : index
    %c0_0 = arith.constant 0 : index
    %0 = vector.load %arg0[%c0, %c0_0] : memref<98x256xbf16, #tpu.memory_space<vmem>>, vector<98x256xbf16>
    %c0_1 = arith.constant 0 : index
    %c0_2 = arith.constant 0 : index
    %1 = vector.load %arg1[%c0_1, %c0_2] : memref<256x2304xbf16, #tpu.memory_space<vmem>>, vector<256x2304xbf16>
    %cst = arith.constant dense<0.000000e+00> : vector<98x2304xf32>
    %2 = tpu.matmul %0, %1, %cst {dimension_numbers = #tpu.dot_dimension_numbers<[1], [0], [0], [1], [0, 0, 1, 1], [], []>} : vector<98x256xbf16>, vector<256x2304xbf16>, vector<98x2304xf32> -> vector<98x2304xf32>
    %c0_3 = arith.constant 0 : index
    %c0_4 = arith.constant 0 : index
    %3 = vector.load %arg2[%c0_3, %c0_4] : memref<1x2304xf32, #tpu.memory_space<vmem>>, vector<1x2304xf32>
    %4 = vector.broadcast %3 : vector<1x2304xf32> to vector<98x2304xf32>
    %5 = arith.addf %2, %4 : vector<98x2304xf32>
    %cst_5 = arith.constant 0.000000e+00 : f32
    %6 = vector.broadcast %cst_5 : f32 to vector<98x2304xf32>
    %7 = arith.maximumf %5, %6 : vector<98x2304xf32>
    %c0_6 = arith.constant 0 : index
    %c0_7 = arith.constant 0 : index
    %8 = vector.load %arg3[%c0_6, %c0_7] : memref<2x98xf32, #tpu.memory_space<vmem>>, vector<2x98xf32>
    %cst_8 = arith.constant dense<0.000000e+00> : vector<2x2304xf32>
    %9 = tpu.matmul %8, %7, %cst_8 {dimension_numbers = #tpu.dot_dimension_numbers<[1], [0], [0], [1], [0, 0, 1, 1], [], []>} : vector<2x98xf32>, vector<98x2304xf32>, vector<2x2304xf32> -> vector<2x2304xf32>
    %c0_9 = arith.constant 0 : index
    %c0_10 = arith.constant 0 : index
    %10 = vector.load %arg4[%c0_9, %c0_10] : memref<2304x128xf32, #tpu.memory_space<vmem>>, vector<2304x128xf32>
    %cst_11 = arith.constant dense<0.000000e+00> : vector<2x128xf32>
    %11 = tpu.matmul %9, %10, %cst_11 {dimension_numbers = #tpu.dot_dimension_numbers<[1], [0], [0], [1], [0, 0, 1, 1], [], []>} : vector<2x2304xf32>, vector<2304x128xf32>, vector<2x128xf32> -> vector<2x128xf32>
    %c0_12 = arith.constant 0 : index
    %c0_13 = arith.constant 0 : index
    %12 = vector.load %arg5[%c0_12, %c0_13] : memref<2x128xf32, #tpu.memory_space<vmem>>, vector<2x128xf32>
    tpu.vector_store %arg5[%c0_12, %c0_13], %11 {strides = array<i32>} : memref<2x128xf32, #tpu.memory_space<vmem>>, vector<2x128xf32>,
    return
  }
}

</mosaic_0001>

<bundles_post_ra>
// kernel: custom-call.1
= control target key start
LH: loop header
LB: loop body
LE: loop exit
PB: predicated region body
PF: predicated region fallthrough
CT: control target
= control target key end

     0   :  { %s6_s0 = inlined_call_operand.vmem [shape: f32[6,3,31,31], index: 0, kind: output, shape index: {}]  }

// kernel: localfea_from_image_forward.3
= control target key start
LH: loop header
LB: loop body
LE: loop exit
PB: predicated region body
PF: predicated region fallthrough
CT: control target
= control target key end

     0   :  { %s13883_s0 = inlined_call_operand.vmem [shape: f32[4,98,338], index: 0, kind: input, shape index: {}]   ;;  %s13884_s1 = inlined_call_operand.vmem [shape: f32[9,50,98], index: 1, kind: input, shape index: {}]   ;;  %s13885_s2 = inlined_call_operand.vmem [shape: f32[9,2,50], index: 2, kind: input, shape index: {}]   ;;  %s13886_s3 = inlined_call_operand.vmem [shape: f32[3,338,108], index: 3, kind: input, shape index: {}]   ;;  %s13887_s4 = inlined_call_operand.vmem [shape: f32[3,108,16], index: 4, kind: input, shape index: {}]   ;;  %s13888_s5 = inlined_call_operand.vmem [shape: f32[3,1,16], index: 5, kind: input, shape index: {}]   ;;  %s13889_s6 = inlined_call_operand.vmem [shape: f32[3,1,16], index: 6, kind: input, shape index: {}]   ;;  %s13890_s7 = inlined_call_operand.vmem [shape: f32[3,1,16], index: 7, kind: input, shape index: {}]   ;;  %s13891_s8 = inlined_call_operand.vmem [shape: f32[3,144,16], index: 8, kind: input, shape index: {}]   ;;  %s13892_s9 = inlined_call_operand.vmem [shape: f32[3,1,16], index: 9, kind: input, shape index: {}]   ;;  %s13893_s10 = inlined_call_operand.vmem [shape: f32[3,1,16], index: 10, kind: input, shape index: {}]   ;;  %s13894_s11 = inlined_call_operand.vmem [shape: f32[3,1,16], index: 11, kind: input, shape index: {}]   ;;  %s13895_s12 = inlined_call_operand.vmem [shape: f32[3,144,128], index: 12, kind: input, shape index: {}]   ;;  %s13896_s13 = inlined_call_operand.vmem [shape: f32[3,1,128], index: 13, kind: input, shape index: {}]   ;;  %s13897_s14 = inlined_call_operand.vmem [shape: f32[3,1,128], index: 14, kind: input, shape index: {}]   ;;  %s13898_s15 = inlined_call_operand.vmem [shape: f32[3,1,128], index: 15, kind: input, shape index: {}]   ;;  %s13899_s16 = inlined_call_operand.vmem [shape: f32[3,128,136], index: 16, kind: input, shape index: {}]   ;;  %s13900_s17 = inlined_call_operand.vmem [shape: f32[3,1,136], index: 17, kind: input, shape index: {}]   ;;  %s13901_s18 = inlined_call_operand.vmem [shape: f32[3,136,128], index: 18, kind: input, shape index: {}]   ;;  %s13902_s19 = inlined_call_operand.vmem [shape: f32[3,1,128], index: 19, kind: input, shape index: {}]   ;;  %s13903_s20 = inlined_call_operand.vmem [shape: f32[3,2,128], index: 20, kind: output, shape index: {}]  }
   0x1   :  { %13912 = sst [smem:[#allocation4_spill]] %s13883_s0 }
   0x2   :  { %13913 = sst [smem:[#allocation5_spill]] %s13884_s1  ;;  %s10750_s1 = smov 0  }
   0x3   :  { %13914 = sst [smem:[#allocation6_spill]] %s13885_s2 }
   0x4   :  { %13915 = sst [smem:[#allocation7_spill]] %s13886_s3 }
   0x5   :  { %13916 = sst [smem:[#allocation8_spill]] %s13887_s4 }
   0x6 LB: > { %s7501_s22 = sadd.s32 4294967295, %s10639_s1   ;;  %p7505_p0 = scmp.ge.s32.totalorder %s10639_s1, 1  ;;  %s10639_s1 = sphi %s10750_s1, %s30_s1  }
   0x7   : > { %p701_p1 = scmp.lt.s32.totalorder %s10639_s1, 4 }
   0x9   : > { %p702_p2 = pnand %p7505_p0, %p701_p1 }
   0xb   : > { %705 = sbr.rel (%p702_p2) target bundleno = 4495 (0x118f), region = 100 }
  0x12   : > { %p817_p3 = scmp.lt.s32.totalorder %s7501_s22, 2  ;;  %v13909_v0 = vmov 0.0|0.0   ;;  %vm10642_vm0 = vmmov 0   ;;  %v13907_v1 = vmov 0.0   ;;  %s13917_s25 = sld [smem:[#allocation8_spill]]  ;;  %vm1079_vm1 = vcmask 1043456  }
  0x13   : > { %10034 = vmatprep.subr.bf16.mxu0 %v13909_v0  ;;  %8797 = vmatprep.mubr.msk.f32.mxu0 %vm10642_vm0, %v13907_v1  ;;  %s13918_s4 = sld [smem:[#allocation7_spill]]  ;;  %vm10644_vm2 = vmmov 1   ;;  %vm949_vm4 = vcmask 883712   ;;  %vm1365_vm5 = vcmask 130048   ;;  %s13919_s2 = sld [smem:[#allocation4_spill]]  ;;  %vm1449_vm6 = vcmask 123904  }
  0x14   : > { %s13939_s22 = smov (!%p817_p3, %s7501_s22), 2  ;;  %vm10054_vm3 = vmpackc.low %vm1079_vm1, %vm10644_vm2  ;;  %vm1906_vm7 = vcmask 1041408   ;;  %vm1866_vm8 = vcmask 670720   ;;  %vm3251_vm9 = vcmask 801792   ;;  %s13937_s0 = sld [smem:[#allocation6_spill]]  ;;  %vm5681_vm10 = vcmask 408576  }
  0x15   : > { %s10612_s23 = smul.u32 112, %s13939_s22  ;;  %s829_s21 = scalar_lea.vmem %s13888_s5, %s13939_s22  ;;  %vm7211_vm11 = vcmask 64512  }
  0x16   : > { %s10611_s26 = smul.u32 344, %s13939_s22  ;;  %s832_s28 = scalar_lea.vmem %s13889_s6, %s13939_s22 }
  0x17   : > { %s835_s30 = scalar_lea.vmem %s13890_s7, %s13939_s22  ;;  %s863_s27 = scalar_lea.vmem %s13898_s15, %s13939_s22 }
  0x18   : > { %s10767_s3 = scalar_lea.vmem %s13917_s25, %s10612_s23  ;;  %s13936_s23 = sld [smem:[#allocation5_spill]] }
  0x19   : > { %v928_v2 = vld [vmem:[%s10767_s3] sm:$0xff]  ;;  %v929_v3 = vld [vmem:[%s10767_s3 + $0x8] sm:$0xff]  ;;  %v930_v4 = vld [vmem:[%s10767_s3 + $0x10] sm:$0xff]  ;;  %s10792_s29 = scalar_lea.vmem %s13918_s4, %s10611_s26  ;;  %s849_s4 = scalar_lea.vmem %s13894_s11, %s13939_s22 }
  0x1a   : > { %v10035_v5 = vpack.c.bf16 %v929_v3, %v928_v2  ;;  %v931_v6 = vld [vmem:[%s10767_s3 + $0x18] sm:$0xff]  ;;  %v932_v8 = vld [vmem:[%s10767_s3 + $0x20] sm:$0xff]  ;;  %v933_v9 = vld [vmem:[%s10767_s3 + $0x28] sm:$0xff] }
  0x1b   : > { %v10038_v7 = vpack.c.bf16 %v931_v6, %v930_v4  ;;  %v10041_v10 = vpack.c.bf16 %v933_v9, %v932_v8  ;;  %v934_v11 = vld [vmem:[%s10767_s3 + $0x30] sm:$0xff]  ;;  %v935_v12 = vld [vmem:[%s10767_s3 + $0x38] sm:$0xff]  ;;  %v936_v14 = vld [vmem:[%s10767_s3 + $0x40] sm:$0xff] }
  0x1c   : > { %10036 = vmatpush3.bf16.msra.mxu0 %v10035_v5  ;;  %v10044_v13 = vpack.c.bf16 %v935_v12, %v934_v11  ;;  %v937_v15 = vld [vmem:[%s10767_s3 + $0x48] sm:$0xff]  ;;  %v938_v17 = vld [vmem:[%s10767_s3 + $0x50] sm:$0xff]  ;;  %v939_v18 = vld [vmem:[%s10767_s3 + $0x58] sm:$0xff] }
  0x1d   : > { %10037 = vmatprep.subr.bf16.mxu0 %v13909_v0  ;;  %v10047_v16 = vpack.c.bf16 %v937_v15, %v936_v14  ;;  %v10050_v19 = vpack.c.bf16 %v939_v18, %v938_v17  ;;  %v940_v20 = vld [vmem:[%s10767_s3 + $0x60] sm:$0xff]  ;;  %v941_v21 = vld [vmem:[%s10767_s3 + $0x68] sm:$0xf]  ;;  %v887_v25 = vld [vmem:[%s10792_s29 + $0x10] sm:$0xff]  ;;  %s846_s3 = scalar_lea.vmem %s13893_s10, %s13939_s22 }
  0x1e   : > { %v10053_v22 = vpack.c.bf16 %v941_v21, %v940_v20  ;;  %v885_v23 = vld [vmem:[%s10792_s29] sm:$0xff]  ;;  %v886_v24 = vld [vmem:[%s10792_s29 + $0x8] sm:$0xff]  ;;  %v888_v26 = vld [vmem:[%s10792_s29 + $0x18] sm:$0xff] }
  0x1f   : > { %v889_v27 = vld [vmem:[%s10792_s29 + $0x20] sm:$0xff]  ;;  %v890_v28 = vld [vmem:[%s10792_s29 + $0x28] sm:$0xff]  ;;  %v891_v29 = vld [vmem:[%s10792_s29 + $0x30] sm:$0xff] }
  0x20   : > { %10039 = vmatpush3.bf16.msra.mxu0 %v10038_v7  ;;  %v892_v30 = vld [vmem:[%s10792_s29 + $0x38] sm:$0xff]  ;;  %v893_v31 = vld [vmem:[%s10792_s29 + $0x40] sm:$0xff]  ;;  %v894_v32 = vld [vmem:[%s10792_s29 + $0x48] sm:$0xff] }
  0x21   : > { %10040 = vmatprep.subr.bf16.mxu0 %v13909_v0  ;;  %v895_v33 = vld [vmem:[%s10792_s29 + $0x50] sm:$0xff]  ;;  %v896_v34 = vld [vmem:[%s10792_s29 + $0x58] sm:$0xff]  ;;  %v897_v35 = vld [vmem:[%s10792_s29 + $0x60] sm:$0xff] }
  0x22   : > { %v898_v36 = vld [vmem:[%s10792_s29 + $0x68] sm:$0xff]  ;;  %v899_v37 = vld [vmem:[%s10792_s29 + $0x70] sm:$0xff]  ;;  %v900_v38 = vld [vmem:[%s10792_s29 + $0x78] sm:$0xff] }
  0x23   : > { %v901_v39 = vld [vmem:[%s10792_s29 + $0x80] sm:$0xff]  ;;  %v902_v40 = vld [vmem:[%s10792_s29 + $0x88] sm:$0xff]  ;;  %v903_v41 = vld [vmem:[%s10792_s29 + $0x90] sm:$0xff] }
  0x24   : > { %10042 = vmatpush3.bf16.msra.mxu0 %v10041_v10  ;;  %v904_v42 = vld [vmem:[%s10792_s29 + $0x98] sm:$0xff]  ;;  %v905_v43 = vld [vmem:[%s10792_s29 + $0xa0] sm:$0xff]  ;;  %v906_v44 = vld [vmem:[%s10792_s29 + $0xa8] sm:$0xff] }
  0x25   : > { %10043 = vmatprep.subr.bf16.mxu0 %v13909_v0  ;;  %v907_v45 = vld [vmem:[%s10792_s29 + $0xb0] sm:$0xff]  ;;  %v908_v46 = vld [vmem:[%s10792_s29 + $0xb8] sm:$0xff]  ;;  %v909_v47 = vld [vmem:[%s10792_s29 + $0xc0] sm:$0xff] }
  0x26   : > { %v910_v48 = vld [vmem:[%s10792_s29 + $0xc8] sm:$0xff]  ;;  %v911_v49 = vld [vmem:[%s10792_s29 + $0xd0] sm:$0xff]  ;;  %v912_v50 = vld [vmem:[%s10792_s29 + $0xd8] sm:$0xff] }
  0x27   : > { %v913_v51 = vld [vmem:[%s10792_s29 + $0xe0] sm:$0xff]  ;;  %v914_v52 = vld [vmem:[%s10792_s29 + $0xe8] sm:$0xff]  ;;  %v915_v53 = vld [vmem:[%s10792_s29 + $0xf0] sm:$0xff] }
  0x28   : > { %10045 = vmatpush3.bf16.msra.mxu0 %v10044_v13  ;;  %v916_v54 = vld [vmem:[%s10792_s29 + $0xf8] sm:$0xff]  ;;  %v917_v55 = vld [vmem:[%s10792_s29 + $0x100] sm:$0xff]  ;;  %v918_v56 = vld [vmem:[%s10792_s29 + $0x108] sm:$0xff] }
  0x29   : > { %10046 = vmatprep.subr.bf16.mxu0 %v13909_v0  ;;  %v919_v57 = vld [vmem:[%s10792_s29 + $0x110] sm:$0xff]  ;;  %v920_v58 = vld [vmem:[%s10792_s29 + $0x118] sm:$0xff]  ;;  %v921_v59 = vld [vmem:[%s10792_s29 + $0x120] sm:$0xff] }
  0x2a   : > { %v922_v60 = vld [vmem:[%s10792_s29 + $0x128] sm:$0xff]  ;;  %v923_v61 = vld [vmem:[%s10792_s29 + $0x130] sm:$0xff]  ;;  %v924_v62 = vld [vmem:[%s10792_s29 + $0x138] sm:$0xff] }
  0x2b   : > { %v925_v63 = vld [vmem:[%s10792_s29 + $0x140] sm:$0xff]  ;;  %v926_v2 = vld [vmem:[%s10792_s29 + $0x148] sm:$0xff]  ;;  %v927_v3 = vld [vmem:[%s10792_s29 + $0x150] sm:$0x3]  ;;  %s7512_s29 = sshll.u32 %s13939_s22, 1 }
  0x2c   : > { %10048 = vmatpush3.bf16.msra.mxu0 %v10047_v16  ;;  %s872_s24 = scalar_lea.vmem %s13900_s17, %s7512_s29 }
  0x2d   : > { %10049 = vmatprep.subr.bf16.mxu0 %v13909_v0 }
  0x30   : > { %10051 = vmatpush3.bf16.msra.mxu0 %v10050_v19 }
  0x31   : > { %10052 = vmatprep.subr.bf16.mxu0 %v13909_v0 }
  0x34   : > { %10055 = vmatpush3.bf16.msk.msra.mxu0 %vm10054_vm3, %v10053_v22 }
  0x37   : > { %8798 = vmatmul.mubr.msk.f32.vlgmr.msra.gmra.mrb[0].mxu0 %vm949_vm4, %v885_v23 }
  0x38   : > { %8800 = vmatprep.mubr.msk.f32.mxu0 %vm10642_vm0, %v13907_v1 }
  0x3b   : > { %8801 = vmatmul.mubr.msk.f32.gmra.mrb[2].mxu0 %vm949_vm4, %v886_v24 }
  0x3c   : > { %8803 = vmatprep.mubr.msk.f32.mxu0 %vm10642_vm0, %v13907_v1 }
  0x3f   : > { %8804 = vmatmul.mubr.msk.f32.gmra.mrb[4].mxu0 %vm949_vm4, %v887_v25 }
  0x40   : > { %8806 = vmatprep.mubr.msk.f32.mxu0 %vm10642_vm0, %v13907_v1 }
  0x43   : > { %8807 = vmatmul.mubr.msk.f32.gmra.mrb[6].mxu0 %vm949_vm4, %v888_v26 }
  0x44   : > { %8809 = vmatprep.mubr.msk.f32.mxu0 %vm10642_vm0, %v13907_v1 }
  0x47   : > { %8810 = vmatmul.mubr.msk.f32.gmra.mrb[8].mxu0 %vm949_vm4, %v889_v27 }
  0x48   : > { %8812 = vmatprep.mubr.msk.f32.mxu0 %vm10642_vm0, %v13907_v1 }
  0x4b   : > { %8813 = vmatmul.mubr.msk.f32.gmra.mrb[10].mxu0 %vm949_vm4, %v890_v28 }
  0x4c   : > { %8815 = vmatprep.mubr.msk.f32.mxu0 %vm10642_vm0, %v13907_v1 }
  0x4f   : > { %8816 = vmatmul.mubr.msk.f32.gmra.mrb[12].mxu0 %vm949_vm4, %v891_v29 }
  0x50   : > { %8818 = vmatprep.mubr.msk.f32.mxu0 %vm10642_vm0, %v13907_v1 }
  0x53   : > { %8819 = vmatmul.mubr.msk.f32.gmra.mrb[14].mxu0 %vm949_vm4, %v892_v30 }
  0x54   : > { %8821 = vmatprep.mubr.msk.f32.mxu0 %vm10642_vm0, %v13907_v1 }
  0x57   : > { %8822 = vmatmul.mubr.msk.f32.gmra.mrb[16].mxu0 %vm949_vm4, %v893_v31 }
  0x58   : > { %8824 = vmatprep.mubr.msk.f32.mxu0 %vm10642_vm0, %v13907_v1 }
  0x5b   : > { %8825 = vmatmul.mubr.msk.f32.gmra.mrb[18].mxu0 %vm949_vm4, %v894_v32 }
  0x5c   : > { %8827 = vmatprep.mubr.msk.f32.mxu0 %vm10642_vm0, %v13907_v1 }
  0x5f   : > { %8828 = vmatmul.mubr.msk.f32.gmra.mrb[20].mxu0 %vm949_vm4, %v895_v33 }
  0x60   : > { %8830 = vmatprep.mubr.msk.f32.mxu0 %vm10642_vm0, %v13907_v1 }
  0x63   : > { %8831 = vmatmul.mubr.msk.f32.gmra.mrb[22].mxu0 %vm949_vm4, %v896_v34 }
  0x64   : > { %8833 = vmatprep.mubr.msk.f32.mxu0 %vm10642_vm0, %v13907_v1 }
  0x67   : > { %8834 = vmatmul.mubr.msk.f32.gmra.mrb[24].mxu0 %vm949_vm4, %v897_v35 }
  0x68   : > { %8836 = vmatprep.mubr.msk.f32.mxu0 %vm10642_vm0, %v13907_v1 }
  0x6b   : > { %8837 = vmatmul.mubr.msk.f32.gmra.mrb[26].mxu0 %vm949_vm4, %v898_v36  ;;  %v10983_v36 = vld [vmem:[%s829_s21] ss:$0 sm:$0xff]  ;;  %s843_s21 = scalar_lea.vmem %s13892_s9, %s13939_s22 }
  0x6c   : > { %8839 = vmatprep.mubr.msk.f32.mxu0 %vm10642_vm0, %v13907_v1 }
  0x6f   : > { %8840 = vmatmul.mubr.msk.f32.gmra.mrb[28].mxu0 %vm949_vm4, %v899_v37 }
  0x70   : > { %8842 = vmatprep.mubr.msk.f32.mxu0 %vm10642_vm0, %v13907_v1 }
  0x73   : > { %8843 = vmatmul.mubr.msk.f32.gmra.mrb[30].mxu0 %vm949_vm4, %v900_v38 }
  0x74   : > { %8845 = vmatprep.mubr.msk.f32.mxu0 %vm10642_vm0, %v13907_v1 }
  0x77   : > { %8846 = vmatmul.mubr.msk.f32.gmra.mrb[32].mxu0 %vm949_vm4, %v901_v39 }
  0x78   : > { %8848 = vmatprep.mubr.msk.f32.mxu0 %vm10642_vm0, %v13907_v1 }
  0x7b   : > { %8849 = vmatmul.mubr.msk.f32.gmra.mrb[34].mxu0 %vm949_vm4, %v902_v40 }
  0x7c   : > { %8851 = vmatprep.mubr.msk.f32.mxu0 %vm10642_vm0, %v13907_v1 }
  0x7f   : > { %8852 = vmatmul.mubr.msk.f32.gmra.mrb[36].mxu0 %vm949_vm4, %v903_v41 }
  0x80   : > { %8854 = vmatprep.mubr.msk.f32.mxu0 %vm10642_vm0, %v13907_v1 }
  0x83   : > { %8855 = vmatmul.mubr.msk.f32.gmra.mrb[38].mxu0 %vm949_vm4, %v904_v42 }
  0x84   : > { %8857 = vmatprep.mubr.msk.f32.mxu0 %vm10642_vm0, %v13907_v1 }
  0x87   : > { %8858 = vmatmul.mubr.msk.f32.gmra.mrb[40].mxu0 %vm949_vm4, %v905_v43 }
  0x88   : > { %8860 = vmatprep.mubr.msk.f32.mxu0 %vm10642_vm0, %v13907_v1 }
  0x8b   : > { %8861 = vmatmul.mubr.msk.f32.gmra.mrb[42].mxu0 %vm949_vm4, %v906_v44 }
  0x8c   : > { %8863 = vmatprep.mubr.msk.f32.mxu0 %vm10642_vm0, %v13907_v1 }
  0x8f   : > { %8864 = vmatmul.mubr.msk.f32.gmra.mrb[44].mxu0 %vm949_vm4, %v907_v45 }
  0x90   : > { %8866 = vmatprep.mubr.msk.f32.mxu0 %vm10642_vm0, %v13907_v1 }
  0x93   : > { %8867 = vmatmul.mubr.msk.f32.gmra.mrb[46].mxu0 %vm949_vm4, %v908_v46 }
  0x94   : > { %8869 = vmatprep.mubr.msk.f32.mxu0 %vm10642_vm0, %v13907_v1 }
  0x97   : > { %8870 = vmatmul.mubr.msk.f32.gmra.mrb[48].mxu0 %vm949_vm4, %v909_v47 }
  0x98   : > { %8872 = vmatprep.mubr.msk.f32.mxu0 %vm10642_vm0, %v13907_v1 }
  0x9b   : > { %8873 = vmatmul.mubr.msk.f32.gmra.mrb[50].mxu0 %vm949_vm4, %v910_v48 }
  0x9c   : > { %8875 = vmatprep.mubr.msk.f32.mxu0 %vm10642_vm0, %v13907_v1 }
  0x9f   : > { %8876 = vmatmul.mubr.msk.f32.gmra.mrb[52].mxu0 %vm949_vm4, %v911_v49 }
  0xa0   : > { %8878 = vmatprep.mubr.msk.f32.mxu0 %vm10642_vm0, %v13907_v1 }
  0xa3   : > { %8879 = vmatmul.mubr.msk.f32.gmra.mrb[54].mxu0 %vm949_vm4, %v912_v50 }
  0xa4   : > { %8881 = vmatprep.mubr.msk.f32.mxu0 %vm10642_vm0, %v13907_v1 }
  0xa7   : > { %8882 = vmatmul.mubr.msk.f32.gmra.mrb[56].mxu0 %vm949_vm4, %v913_v51 }
  0xa8   : > { %8884 = vmatprep.mubr.msk.f32.mxu0 %vm10642_vm0, %v13907_v1 }
  0xab   : > { %8885 = vmatmul.mubr.msk.f32.gmra.mrb[58].mxu0 %vm949_vm4, %v914_v52 }
  0xac   : > { %8887 = vmatprep.mubr.msk.f32.mxu0 %vm10642_vm0, %v13907_v1 }
  0xaf   : > { %8888 = vmatmul.mubr.msk.f32.gmra.mrb[60].mxu0 %vm949_vm4, %v915_v53 }
  0xb0   : > { %8890 = vmatprep.mubr.msk.f32.mxu0 %vm10642_vm0, %v13907_v1 }
  0xb3   : > { %8891 = vmatmul.mubr.msk.f32.gmra.mrb[62].mxu0 %vm949_vm4, %v916_v54 }
  0xb4   : > { %8893 = vmatprep.mubr.msk.f32.mxu0 %vm10642_vm0, %v13907_v1 }
  0xb7   : > { %8894 = vmatmul.mubr.msk.f32.gmra.mrb[64].mxu0 %vm949_vm4, %v917_v55 }
  0xb8   : > { %8896 = vmatprep.mubr.msk.f32.mxu0 %vm10642_vm0, %v13907_v1 }
  0xbb   : > { %8897 = vmatmul.mubr.msk.f32.gmra.mrb[66].mxu0 %vm949_vm4, %v918_v56 }
  0xbc   : > { %8899 = vmatprep.mubr.msk.f32.mxu0 %vm10642_vm0, %v13907_v1 }
  0xbf   : > { %8900 = vmatmul.mubr.msk.f32.gmra.mrb[68].mxu0 %vm949_vm4, %v919_v57 }
  0xc0   : > { %8902 = vmatprep.mubr.msk.f32.mxu0 %vm10642_vm0, %v13907_v1 }
  0xc3   : > { %8903 = vmatmul.mubr.msk.f32.gmra.mrb[70].mxu0 %vm949_vm4, %v920_v58 }
  0xc4   : > { %8905 = vmatprep.mubr.msk.f32.mxu0 %vm10642_vm0, %v13907_v1 }
  0xc7   : > { %8906 = vmatmul.mubr.msk.f32.gmra.mrb[72].mxu0 %vm949_vm4, %v921_v59 }
  0xc8   : > { %8908 = vmatprep.mubr.msk.f32.mxu0 %vm10642_vm0, %v13907_v1 }
  0xcb   : > { %8909 = vmatmul.mubr.msk.f32.gmra.mrb[74].mxu0 %vm949_vm4, %v922_v60 }
  0xcc   : > { %8911 = vmatprep.mubr.msk.f32.mxu0 %vm10642_vm0, %v13907_v1 }
  0xcf   : > { %8912 = vmatmul.mubr.msk.f32.gmra.mrb[76].mxu0 %vm949_vm4, %v923_v61 }
  0xd0   : > { %8914 = vmatprep.mubr.msk.f32.mxu0 %vm10642_vm0, %v13907_v1 }
  0xd3   : > { %8915 = vmatmul.mubr.msk.f32.gmra.mrb[78].mxu0 %vm949_vm4, %v924_v62 }
  0xd4   : > { %8917 = vmatprep.mubr.msk.f32.mxu0 %vm10642_vm0, %v13907_v1 }
  0xd7   : > { %8918 = vmatmul.mubr.msk.f32.gmra.mrb[80].mxu0 %vm949_vm4, %v925_v63 }
  0xd8   : > { %8920 = vmatprep.mubr.msk.f32.mxu0 %vm10642_vm0, %v13907_v1 }
  0xdb   : > { %8921 = vmatmul.mubr.msk.f32.gmra.mrb[82].mxu0 %vm949_vm4, %v926_v2 }
  0xdc   : > { %8923 = vmatprep.mubr.msk.f32.mxu0 %vm10642_vm0, %v13907_v1 }
  0xdf   : > { %8924 = vmatmul.mubr.msk.f32.gmra.mrb[84].mxu0 %vm949_vm4, %v927_v3 }
 0x10a   : > { %v1149_v4 = vpop.f32.mrb[0].mxu0 }
 0x10b   : > { %v8799_v5 = vpop.f32.mrb[1].mxu0  ;;  %v10991_v40 = vadd.f32 %v10983_v36, %v1149_v4 }
 0x10d   : > { %v1460_v46 = vmul.f32 %v10991_v40, %v10991_v40  ;;  %v1366_v50 = vsel %vm1365_vm5, %v10991_v40, 0.0 }
 0x10e   : > { %v1154_v6 = vpop.f32.mrb[2].mxu0 }
 0x10f   : > { %v8802_v7 = vpop.f32.mrb[3].mxu0  ;;  %v10988_v38 = vadd.f32 %v10983_v36, %v1154_v6  ;;  %v1503_v57 = vsel %vm1365_vm5, %v1460_v46, 0.0 }
 0x111   : > { %v1461_v43 = vmul.f32 %v10988_v38, %v10988_v38  ;;  %v1367_v47 = vsel %vm1365_vm5, %v10988_v38, 0.0 }
 0x112   : > { %v1159_v8 = vpop.f32.mrb[4].mxu0  ;;  %v1368_v58 = vadd.f32 %v1367_v47, %v1366_v50 }
 0x113   : > { %v8805_v9 = vpop.f32.mrb[5].mxu0  ;;  %v10994_v41 = vadd.f32 %v10983_v36, %v1159_v8  ;;  %v1504_v52 = vsel %vm1365_vm5, %v1461_v43, 0.0 }
 0x114   : > { %v1505_v63 = vadd.f32 %v1504_v52, %v1503_v57 }
 0x115   : > { %v1462_v48 = vmul.f32 %v10994_v41, %v10994_v41  ;;  %v1369_v53 = vsel %vm1365_vm5, %v10994_v41, 0.0 }
 0x116   : > { %v1164_v10 = vpop.f32.mrb[6].mxu0  ;;  %v1370_v2 = vadd.f32 %v1369_v53, %v1368_v58 }
 0x117   : > { %v8808_v11 = vpop.f32.mrb[7].mxu0  ;;  %v11001_v44 = vadd.f32 %v10983_v36, %v1164_v10  ;;  %v1506_v59 = vsel %vm1365_vm5, %v1462_v48, 0.0 }
 0x118   : > { %v1507_v9 = vadd.f32 %v1506_v59, %v1505_v63 }
 0x119   : > { %v1463_v54 = vmul.f32 %v11001_v44, %v11001_v44  ;;  %v1371_v60 = vsel %vm1365_vm5, %v11001_v44, 0.0 }
 0x11a   : > { %v1169_v12 = vpop.f32.mrb[8].mxu0  ;;  %v1372_v10 = vadd.f32 %v1371_v60, %v1370_v2 }
 0x11b   : > { %v8811_v13 = vpop.f32.mrb[9].mxu0  ;;  %v11010_v49 = vadd.f32 %v10983_v36, %v1169_v12  ;;  %v1508_v4 = vsel %vm1365_vm5, %v1463_v54, 0.0 }
 0x11d   : > { %v1464_v61 = vmul.f32 %v11010_v49, %v11010_v49  ;;  %v1373_v5 = vsel %vm1365_vm5, %v11010_v49, 0.0 }
 0x11e   : > { %v1174_v14 = vpop.f32.mrb[10].mxu0 }
 0x11f   : > { %v8814_v15 = vpop.f32.mrb[11].mxu0  ;;  %v11022_v55 = vadd.f32 %v10983_v36, %v1174_v14  ;;  %v1510_v11 = vsel %vm1365_vm5, %v1464_v61, 0.0 }
 0x120   : > { %v1509_v15 = vadd.f32 %v1508_v4, %v1507_v9 }
 0x121   : > { %v1465_v6 = vmul.f32 %v11022_v55, %v11022_v55  ;;  %v1375_v12 = vsel %vm1365_vm5, %v11022_v55, 0.0 }
 0x122   : > { %v1179_v16 = vpop.f32.mrb[12].mxu0 }
 0x123   : > { %v8817_v17 = vpop.f32.mrb[13].mxu0  ;;  %v11031_v62 = vadd.f32 %v10983_v36, %v1179_v16  ;;  %v1374_v16 = vadd.f32 %v1373_v5, %v1372_v10 }
 0x125   : > { %v1466_v13 = vmul.f32 %v11031_v62, %v11031_v62 }
 0x126   : > { %v1184_v18 = vpop.f32.mrb[14].mxu0 }
 0x127   : > { %v8820_v19 = vpop.f32.mrb[15].mxu0  ;;  %v11041_v7 = vadd.f32 %v10983_v36, %v1184_v18  ;;  %v1512_v18 = vsel %vm1365_vm5, %v1465_v6, 0.0 }
 0x128   : > { %v1377_v19 = vsel %vm1365_vm5, %v11031_v62, 0.0 }
 0x12a   : > { %v1189_v20 = vpop.f32.mrb[16].mxu0 }
 0x12b   : > { %v8823_v21 = vpop.f32.mrb[17].mxu0  ;;  %v11049_v14 = vadd.f32 %v10983_v36, %v1189_v20  ;;  %v1376_v20 = vadd.f32 %v1375_v12, %v1374_v16 }
 0x12c   : > { %v1467_v21 = vmul.f32 %v11041_v7, %v11041_v7 }
 0x12d   : > { %v1378_v43 = vadd.f32 %v1377_v19, %v1376_v20  ;;  %v1381_v46 = vsel %vm1365_vm5, %v11049_v14, 0.0 }
 0x12e   : > { %v10965_v22 = vpop.f32.mrb[18].mxu0 }
 0x12f   : > { %v8826_v23 = vpop.f32.mrb[19].mxu0 }
 0x130   : > { %v11060_v23 = vadd.f32 %v10983_v36, %v10965_v22  ;;  %v1516_v22 = vsel %vm1365_vm5, %v1467_v21, 0.0 }
 0x132   : > { %v10967_v24 = vpop.f32.mrb[20].mxu0  ;;  %v1469_v47 = vmul.f32 %v11060_v23, %v11060_v23  ;;  %v1383_v54 = vsel %vm1365_vm5, %v11060_v23, 0.0 }
 0x133   : > { %v8829_v25 = vpop.f32.mrb[21].mxu0 }
 0x136   : > { %v10969_v26 = vpop.f32.mrb[22].mxu0 }
 0x137   : > { %v8832_v27 = vpop.f32.mrb[23].mxu0  ;;  %v11080_v48 = vadd.f32 %v10983_v36, %v10969_v26  ;;  %v1520_v26 = vsel %vm1365_vm5, %v1469_v47, 0.0 }
 0x138   : > { %v1511_v27 = vadd.f32 %v1510_v11, %v1509_v15 }
 0x139   : > { %v1471_v63 = vmul.f32 %v11080_v48, %v11080_v48 }
 0x13a   : > { %v10971_v28 = vpop.f32.mrb[24].mxu0 }
 0x13b   : > { %v8835_v29 = vpop.f32.mrb[25].mxu0  ;;  %v11089_v57 = vadd.f32 %v10983_v36, %v10971_v28 }
 0x13c   : > { %v1514_v29 = vsel %vm1365_vm5, %v1466_v13, 0.0 }
 0x13d   : > { %v1472_v9 = vmul.f32 %v11089_v57, %v11089_v57  ;;  %v1389_v15 = vsel %vm1365_vm5, %v11089_v57, 0.0 }
 0x13e   : > { %v10973_v30 = vpop.f32.mrb[26].mxu0 }
 0x13f   : > { %v8838_v31 = vpop.f32.mrb[27].mxu0  ;;  %v11100_v2 = vadd.f32 %v10983_v36, %v10973_v30  ;;  %v1524_v30 = vsel %vm1365_vm5, %v1471_v63, 0.0 }
 0x140   : > { %v1379_v31 = vsel %vm1365_vm5, %v11041_v7, 0.0 }
 0x141   : > { %v1473_v16 = vmul.f32 %v11100_v2, %v11100_v2 }
 0x142   : > { %v10975_v32 = vpop.f32.mrb[28].mxu0 }
 0x143   : > { %v8841_v33 = vpop.f32.mrb[29].mxu0  ;;  %v11109_v10 = vadd.f32 %v10983_v36, %v10975_v32  ;;  %v1526_v32 = vsel %vm1365_vm5, %v1472_v9, 0.0 }
 0x144   : > { %v1468_v33 = vmul.f32 %v11049_v14, %v11049_v14 }
 0x145   : > { %v1474_v20 = vmul.f32 %v11109_v10, %v11109_v10 }
 0x146   : > { %v10981_v34 = vpop.f32.mrb[30].mxu0  ;;  %v1518_v53 = vsel %vm1365_vm5, %v1468_v33, 0.0 }
 0x147   : > { %v8844_v35 = vpop.f32.mrb[31].mxu0 }
 0x148   : > { %v11069_v35 = vadd.f32 %v10983_v36, %v10967_v24  ;;  %v1380_v24 = vadd.f32 %v1379_v31, %v1378_v43  ;;  %v1393_v43 = vsel %vm1365_vm5, %v11109_v10, 0.0 }
 0x14a   : > { %v10985_v37 = vpop.f32.mrb[32].mxu0  ;;  %v1382_v59 = vadd.f32 %v1381_v46, %v1380_v24  ;;  %v1385_v61 = vsel %vm1365_vm5, %v11069_v35, 0.0 }
 0x14b   : > { %v8847_v39 = vpop.f32.mrb[33].mxu0 }
 0x14c   : > { %v1513_v39 = vadd.f32 %v1512_v18, %v1511_v27  ;;  %v1384_v28 = vadd.f32 %v1383_v54, %v1382_v59  ;;  %v11118_v18 = vadd.f32 %v10983_v36, %v10981_v34  ;;  %v1391_v27 = vsel %vm1365_vm5, %v11100_v2, 0.0 }
 0x14d   : > { %v1528_v34 = vsel %vm1365_vm5, %v1473_v16, 0.0 }
 0x14e   : > { %v10996_v42 = vpop.f32.mrb[34].mxu0  ;;  %v1515_v52 = vadd.f32 %v1514_v29, %v1513_v39  ;;  %v1386_v12 = vadd.f32 %v1385_v61, %v1384_v28  ;;  %v11127_v29 = vadd.f32 %v10983_v36, %v10985_v37  ;;  %v1530_v37 = vsel %vm1365_vm5, %v1474_v20, 0.0 }
 0x14f   : > { %v8850_v45 = vpop.f32.mrb[35].mxu0  ;;  %v11136_v46 = vadd.f32 %v10983_v36, %v10996_v42  ;;  %v1395_v24 = vsel %vm1365_vm5, %v11118_v18, 0.0 }
 0x150   : > { %v1517_v58 = vadd.f32 %v1516_v22, %v1515_v52  ;;  %v1475_v22 = vmul.f32 %v11118_v18, %v11118_v18 }
 0x151   : > { %v1477_v61 = vmul.f32 %v11136_v46, %v11136_v46 }
 0x152   : > { %v11014_v51 = vpop.f32.mrb[36].mxu0  ;;  %v1519_v5 = vadd.f32 %v1518_v53, %v1517_v58  ;;  %v1476_v53 = vmul.f32 %v11127_v29, %v11127_v29  ;;  %v1532_v42 = vsel %vm1365_vm5, %v1475_v22, 0.0 }
 0x153   : > { %v8853_v56 = vpop.f32.mrb[37].mxu0  ;;  %v11145_v54 = vadd.f32 %v10983_v36, %v11014_v51 }
 0x154   : > { %v1470_v56 = vmul.f32 %v11069_v35, %v11069_v35  ;;  %v1521_v11 = vadd.f32 %v1520_v26, %v1519_v5  ;;  %v1397_v26 = vsel %vm1365_vm5, %v11127_v29, 0.0  ;;  %v1534_v51 = vsel %vm1365_vm5, %v1476_v53, 0.0 }
 0x156   : > { %v11033_v3 = vpop.f32.mrb[38].mxu0  ;;  %v1522_v6 = vsel %vm1365_vm5, %v1470_v56, 0.0 }
 0x157   : > { %v8856_v8 = vpop.f32.mrb[39].mxu0  ;;  %v1523_v21 = vadd.f32 %v1522_v6, %v1521_v11  ;;  %v11154_v63 = vadd.f32 %v10983_v36, %v11033_v3  ;;  %v1399_v6 = vsel %vm1365_vm5, %v11136_v46, 0.0  ;;  %v1536_v3 = vsel %vm1365_vm5, %v1477_v61, 0.0 }
 0x158   : > { %v1387_v8 = vsel %vm1365_vm5, %v11080_v48, 0.0 }
 0x159   : > { %v1525_v31 = vadd.f32 %v1524_v30, %v1523_v21  ;;  %v1479_v16 = vmul.f32 %v11154_v63, %v11154_v63 }
 0x15a   : > { %v11051_v17 = vpop.f32.mrb[40].mxu0 }
 0x15b   : > { %v8859_v25 = vpop.f32.mrb[41].mxu0  ;;  %v11163_v9 = vadd.f32 %v10983_v36, %v11051_v17 }
 0x15c   : > { %v1388_v25 = vadd.f32 %v1387_v8, %v1386_v12  ;;  %v1478_v8 = vmul.f32 %v11145_v54, %v11145_v54 }
 0x15d   : > { %v1480_v20 = vmul.f32 %v11163_v9, %v11163_v9  ;;  %v1405_v22 = vsel %vm1365_vm5, %v11163_v9, 0.0 }
 0x15e   : > { %v11071_v45 = vpop.f32.mrb[42].mxu0  ;;  %v1390_v33 = vadd.f32 %v1389_v15, %v1388_v25  ;;  %v1401_v15 = vsel %vm1365_vm5, %v11145_v54, 0.0  ;;  %v1538_v17 = vsel %vm1365_vm5, %v1478_v8, 0.0 }
 0x15f   : > { %v8862_v50 = vpop.f32.mrb[43].mxu0 }
 0x160   : > { %v1527_v50 = vadd.f32 %v1526_v32, %v1525_v31  ;;  %v1392_v52 = vadd.f32 %v1391_v27, %v1390_v33  ;;  %v1403_v27 = vsel %vm1365_vm5, %v11154_v63, 0.0 }
 0x162   : > { %v11091_v60 = vpop.f32.mrb[44].mxu0  ;;  %v1529_v56 = vadd.f32 %v1528_v34, %v1527_v50  ;;  %v1394_v58 = vadd.f32 %v1393_v43, %v1392_v52 }
 0x163   : > { %v8865_v4 = vpop.f32.mrb[45].mxu0  ;;  %v11181_v31 = vadd.f32 %v10983_v36, %v11091_v60  ;;  %v1542_v60 = vsel %vm1365_vm5, %v1480_v20, 0.0 }
 0x164   : > { %v1531_v5 = vadd.f32 %v1530_v37, %v1529_v56  ;;  %v1396_v28 = vadd.f32 %v1395_v24, %v1394_v58 }
 0x165   : > { %v1482_v56 = vmul.f32 %v11181_v31, %v11181_v31 }
 0x166   : > { %v1264_v13 = vpop.f32.mrb[46].mxu0  ;;  %v1533_v11 = vadd.f32 %v1532_v42, %v1531_v5  ;;  %v1398_v12 = vadd.f32 %v1397_v26, %v1396_v28 }
 0x167   : > { %v8868_v19 = vpop.f32.mrb[47].mxu0  ;;  %v11189_v50 = vadd.f32 %v10983_v36, %v1264_v13 }
 0x168   : > { %v11172_v19 = vadd.f32 %v10983_v36, %v11071_v45  ;;  %v1535_v25 = vadd.f32 %v1534_v51, %v1533_v11  ;;  %v1400_v32 = vadd.f32 %v1399_v6, %v1398_v12  ;;  %v1540_v45 = vsel %vm1365_vm5, %v1479_v16, 0.0 }
 0x169   : > { %v1483_v5 = vmul.f32 %v11189_v50, %v11189_v50  ;;  %v1411_v11 = vsel %vm1365_vm5, %v11189_v50, 0.0 }
 0x16a   : > { %v1269_v39 = vpop.f32.mrb[48].mxu0  ;;  %v1537_v33 = vadd.f32 %v1536_v3, %v1535_v25  ;;  %v1402_v34 = vadd.f32 %v1401_v15, %v1400_v32  ;;  %v1407_v53 = vsel %vm1365_vm5, %v11172_v19, 0.0 }
 0x16b   : > { %v8871_v47 = vpop.f32.mrb[49].mxu0  ;;  %v11197_v58 = vadd.f32 %v10983_v36, %v1269_v39  ;;  %v1546_v39 = vsel %vm1365_vm5, %v1482_v56, 0.0 }
 0x16c   : > { %v1481_v47 = vmul.f32 %v11172_v19, %v11172_v19  ;;  %v1539_v37 = vadd.f32 %v1538_v17, %v1537_v33  ;;  %v1404_v24 = vadd.f32 %v1403_v27, %v1402_v34 }
 0x16d   : > { %v1484_v12 = vmul.f32 %v11197_v58, %v11197_v58  ;;  %v1413_v25 = vsel %vm1365_vm5, %v11197_v58, 0.0 }
 0x16e   : > { %v1274_v59 = vpop.f32.mrb[50].mxu0  ;;  %v1406_v42 = vadd.f32 %v1405_v22, %v1404_v24  ;;  %v1541_v26 = vadd.f32 %v1540_v45, %v1539_v37  ;;  %v1544_v13 = vsel %vm1365_vm5, %v1481_v47, 0.0 }
 0x16f   : > { %v8874_v4 = vpop.f32.mrb[51].mxu0  ;;  %v11205_v28 = vadd.f32 %v10983_v36, %v1274_v59  ;;  %v1548_v59 = vsel %vm1365_vm5, %v1483_v5, 0.0 }
 0x170   : > { %v1409_v4 = vsel %vm1365_vm5, %v11181_v31, 0.0  ;;  %v1543_v6 = vadd.f32 %v1542_v60, %v1541_v26  ;;  %v1408_v8 = vadd.f32 %v1407_v53, %v1406_v42 }
 0x171   : > { %v1485_v32 = vmul.f32 %v11205_v28, %v11205_v28  ;;  %v1415_v34 = vsel %vm1365_vm5, %v11205_v28, 0.0 }
 0x172   : > { %v1279_v30 = vpop.f32.mrb[52].mxu0  ;;  %v1545_v15 = vadd.f32 %v1544_v13, %v1543_v6  ;;  %v1410_v16 = vadd.f32 %v1409_v4, %v1408_v8 }
 0x173   : > { %v8877_v21 = vpop.f32.mrb[53].mxu0  ;;  %v11213_v3 = vadd.f32 %v10983_v36, %v1279_v30  ;;  %v1550_v30 = vsel %vm1365_vm5, %v1484_v12, 0.0 }
 0x174   : > { %v1547_v20 = vadd.f32 %v1546_v39, %v1545_v15  ;;  %v1412_v33 = vadd.f32 %v1411_v11, %v1410_v16 }
 0x175   : > { %v1486_v45 = vmul.f32 %v11213_v3, %v11213_v3  ;;  %v1417_v24 = vsel %vm1365_vm5, %v11213_v3, 0.0 }
 0x176   : > { %v1284_v43 = vpop.f32.mrb[54].mxu0  ;;  %v1549_v47 = vadd.f32 %v1548_v59, %v1547_v20 }
 0x177   : > { %v8880_v52 = vpop.f32.mrb[55].mxu0  ;;  %v11221_v17 = vadd.f32 %v10983_v36, %v1284_v43  ;;  %v1552_v43 = vsel %vm1365_vm5, %v1485_v32, 0.0 }
 0x178   : > { %v1414_v52 = vadd.f32 %v1413_v25, %v1412_v33  ;;  %v1551_v42 = vadd.f32 %v1550_v30, %v1549_v47 }
 0x179   : > { %v1487_v60 = vmul.f32 %v11221_v17, %v11221_v17  ;;  %v1419_v13 = vsel %vm1365_vm5, %v11221_v17, 0.0 }
 0x17a   : > { %v1289_v61 = vpop.f32.mrb[56].mxu0  ;;  %v1416_v26 = vadd.f32 %v1415_v34, %v1414_v52 }
 0x17b   : > { %v8883_v51 = vpop.f32.mrb[57].mxu0  ;;  %v11229_v22 = vadd.f32 %v10983_v36, %v1289_v61  ;;  %v1554_v61 = vsel %vm1365_vm5, %v1486_v45, 0.0  ;;  %v1556_v39 = vsel %vm1365_vm5, %v1487_v60, 0.0 }
 0x17c   : > { %v1553_v51 = vadd.f32 %v1552_v43, %v1551_v42  ;;  %v1418_v6 = vadd.f32 %v1417_v24, %v1416_v26 }
 0x17d   : > { %v1488_v4 = vmul.f32 %v11229_v22, %v11229_v22  ;;  %v1421_v11 = vsel %vm1365_vm5, %v11229_v22, 0.0 }
 0x17e   : > { %v1294_v21 = vpop.f32.mrb[58].mxu0  ;;  %v1420_v59 = vadd.f32 %v1419_v13, %v1418_v6 }
 0x17f   : > { %v8886_v27 = vpop.f32.mrb[59].mxu0  ;;  %v11237_v53 = vadd.f32 %v10983_v36, %v1294_v21  ;;  %v1555_v21 = vadd.f32 %v1554_v61, %v1553_v51  ;;  %v1558_v25 = vsel %vm1365_vm5, %v1488_v4, 0.0 }
 0x180   : > { %v1422_v33 = vadd.f32 %v1421_v11, %v1420_v59 }
 0x181   : > { %v1489_v12 = vmul.f32 %v11237_v53, %v11237_v53  ;;  %v1423_v32 = vsel %vm1365_vm5, %v11237_v53, 0.0  ;;  %v1557_v20 = vadd.f32 %v1556_v39, %v1555_v21 }
 0x182   : > { %v1299_v37 = vpop.f32.mrb[60].mxu0  ;;  %v1424_v24 = vadd.f32 %v1423_v32, %v1422_v33 }
 0x183   : > { %v8889_v56 = vpop.f32.mrb[61].mxu0  ;;  %v11245_v5 = vadd.f32 %v10983_v36, %v1299_v37  ;;  %v1560_v34 = vsel %vm1365_vm5, %v1489_v12, 0.0  ;;  %v1559_v43 = vadd.f32 %v1558_v25, %v1557_v20  ;;  %v1828_v12 = vld [vmem:[%s13919_s2 + $0x8] sm:$0xff]  ;;  %v7630_v20 = vld [vmem:[%s13919_s2 + $0x278] sm:$0xff] }
 0x184   : > { %1974 = vmatprep.mubr.f32.mxu1 %v1828_v12  ;;  %2665 = vmatprep.mubr.f32.mxu0 %v7630_v20 }
 0x185   : > { %v1490_v27 = vmul.f32 %v11245_v5, %v11245_v5  ;;  %v1425_v45 = vsel %vm1365_vm5, %v11245_v5, 0.0  ;;  %v1561_v26 = vadd.f32 %v1560_v34, %v1559_v43 }
 0x186   : > { %v1304_v8 = vpop.f32.mrb[62].mxu0  ;;  %v1426_v61 = vadd.f32 %v1425_v45, %v1424_v24 }
 0x187   : > { %v11253_v15 = vadd.f32 %v10983_v36, %v1304_v8  ;;  %v8892_v16 = vpop.f32.mrb[63].mxu0  ;;  %v1562_v60 = vsel %vm1365_vm5, %v1490_v27, 0.0 }
 0x188   : > { %v1563_v39 = vadd.f32 %v1562_v60, %v1561_v26 }
 0x189   : > { %v1491_v47 = vmul.f32 %v11253_v15, %v11253_v15  ;;  %v1427_v56 = vsel %vm1365_vm5, %v11253_v15, 0.0 }
 0x18a   : > { %v1309_v30 = vpop.f32.mrb[64].mxu0  ;;  %v1428_v11 = vadd.f32 %v1427_v56, %v1426_v61 }
 0x18b   : > { %v11266_v52 = vadd.f32 %v10983_v36, %v1309_v30  ;;  %v8895_v37 = vpop.f32.mrb[65].mxu0  ;;  %v1564_v4 = vsel %vm1365_vm5, %v1491_v47, 0.0 }
 0x18c   : > { %v1565_v25 = vadd.f32 %v1564_v4, %v1563_v39 }
 0x18d   : > { %v1492_v42 = vmul.f32 %v11266_v52, %v11266_v52  ;;  %v1429_v51 = vsel %vm1365_vm5, %v11266_v52, 0.0 }
 0x18e   : > { %v1314_v13 = vpop.f32.mrb[66].mxu0  ;;  %v1430_v32 = vadd.f32 %v1429_v51, %v1428_v11 }
 0x18f   : > { %v11277_v6 = vadd.f32 %v10983_v36, %v1314_v13  ;;  %v8898_v8 = vpop.f32.mrb[67].mxu0  ;;  %v1566_v16 = vsel %vm1365_vm5, %v1492_v42, 0.0 }
 0x190   : > { %v1567_v45 = vadd.f32 %v1566_v16, %v1565_v25 }
 0x191   : > { %v1431_v21 = vsel %vm1365_vm5, %v11277_v6, 0.0  ;;  %v1493_v59 = vmul.f32 %v11277_v6, %v11277_v6 }
 0x192   : > { %v1319_v27 = vpop.f32.mrb[68].mxu0  ;;  %v1432_v47 = vadd.f32 %v1431_v21, %v1430_v32 }
 0x193   : > { %v1568_v33 = vsel %vm1365_vm5, %v1493_v59, 0.0  ;;  %v11292_v30 = vadd.f32 %v10983_v36, %v1319_v27  ;;  %v8901_v34 = vpop.f32.mrb[69].mxu0 }
 0x194   : > { %v1569_v24 = vadd.f32 %v1568_v33, %v1567_v45 }
 0x195   : > { %v1433_v37 = vsel %vm1365_vm5, %v11292_v30, 0.0  ;;  %v1494_v43 = vmul.f32 %v11292_v30, %v11292_v30 }
 0x196   : > { %v1434_v60 = vadd.f32 %v1433_v37, %v1432_v47  ;;  %v1324_v56 = vpop.f32.mrb[70].mxu0 }
 0x197   : > { %v1570_v42 = vsel %vm1365_vm5, %v1494_v43, 0.0  ;;  %v11300_v26 = vadd.f32 %v10983_v36, %v1324_v56  ;;  %v8904_v61 = vpop.f32.mrb[71].mxu0 }
 0x198   : > { %v1571_v13 = vadd.f32 %v1570_v42, %v1569_v24 }
 0x199   : > { %v1435_v4 = vsel %vm1365_vm5, %v11300_v26, 0.0  ;;  %v1495_v51 = vmul.f32 %v11300_v26, %v11300_v26 }
 0x19a   : > { %v1436_v8 = vadd.f32 %v1435_v4, %v1434_v60  ;;  %v1329_v39 = vpop.f32.mrb[72].mxu0 }
 0x19b   : > { %v1572_v11 = vsel %vm1365_vm5, %v1495_v51, 0.0  ;;  %v11308_v12 = vadd.f32 %v10983_v36, %v1329_v39  ;;  %v8907_v16 = vpop.f32.mrb[73].mxu0 }
 0x19c   : > { %v1573_v21 = vadd.f32 %v1572_v11, %v1571_v13 }
 0x19d   : > { %v1437_v59 = vsel %vm1365_vm5, %v11308_v12, 0.0  ;;  %v1496_v25 = vmul.f32 %v11308_v12, %v11308_v12 }
 0x19e   : > { %v1438_v32 = vadd.f32 %v1437_v59, %v1436_v8  ;;  %v1334_v27 = vpop.f32.mrb[74].mxu0 }
 0x19f   : > { %v1574_v20 = vsel %vm1365_vm5, %v1496_v25, 0.0  ;;  %v11316_v33 = vadd.f32 %v10983_v36, %v1334_v27  ;;  %v8910_v34 = vpop.f32.mrb[75].mxu0 }
 0x1a0   : > { %v1575_v45 = vadd.f32 %v1574_v20, %v1573_v21 }
 0x1a1   : > { %v1439_v47 = vsel %vm1365_vm5, %v11316_v33, 0.0  ;;  %v1497_v37 = vmul.f32 %v11316_v33, %v11316_v33 }
 0x1a2   : > { %v1440_v43 = vadd.f32 %v1439_v47, %v1438_v32  ;;  %v1339_v24 = vpop.f32.mrb[76].mxu0 }
 0x1a3   : > { %v1576_v60 = vsel %vm1365_vm5, %v1497_v37, 0.0  ;;  %v11324_v56 = vadd.f32 %v10983_v36, %v1339_v24  ;;  %v8913_v42 = vpop.f32.mrb[77].mxu0 }
 0x1a4   : > { %v1577_v61 = vadd.f32 %v1576_v60, %v1575_v45 }
 0x1a5   : > { %v1441_v13 = vsel %vm1365_vm5, %v11324_v56, 0.0  ;;  %v1498_v4 = vmul.f32 %v11324_v56, %v11324_v56 }
 0x1a6   : > { %v1442_v51 = vadd.f32 %v1441_v13, %v1440_v43  ;;  %v1344_v8 = vpop.f32.mrb[78].mxu0 }
 0x1a7   : > { %v1578_v39 = vsel %vm1365_vm5, %v1498_v4, 0.0  ;;  %v11332_v11 = vadd.f32 %v10983_v36, %v1344_v8  ;;  %v8916_v16 = vpop.f32.mrb[79].mxu0 }
 0x1a8   : > { %v1579_v21 = vadd.f32 %v1578_v39, %v1577_v61 }
 0x1a9   : > { %v1443_v59 = vsel %vm1365_vm5, %v11332_v11, 0.0  ;;  %v1499_v25 = vmul.f32 %v11332_v11, %v11332_v11 }
 0x1aa   : > { %v1444_v32 = vadd.f32 %v1443_v59, %v1442_v51  ;;  %v1349_v27 = vpop.f32.mrb[80].mxu0 }
 0x1ab   : > { %v1580_v20 = vsel %vm1365_vm5, %v1499_v25, 0.0  ;;  %v11340_v34 = vadd.f32 %v10983_v36, %v1349_v27  ;;  %v8919_v45 = vpop.f32.mrb[81].mxu0 }
 0x1ac   : > { %v1581_v47 = vadd.f32 %v1580_v20, %v1579_v21 }
 0x1ad   : > { %v1445_v37 = vsel %vm1365_vm5, %v11340_v34, 0.0  ;;  %v1500_v43 = vmul.f32 %v11340_v34, %v11340_v34 }
 0x1ae   : > { %v1446_v24 = vadd.f32 %v1445_v37, %v1444_v32  ;;  %v1354_v60 = vpop.f32.mrb[82].mxu0 }
 0x1af   : > { %v1582_v42 = vsel %vm1365_vm5, %v1500_v43, 0.0  ;;  %v11348_v61 = vadd.f32 %v10983_v36, %v1354_v60  ;;  %v8922_v13 = vpop.f32.mrb[83].mxu0 }
 0x1b0   : > { %v1583_v4 = vadd.f32 %v1582_v42, %v1581_v47 }
 0x1b1   : > { %v1447_v51 = vsel %vm1365_vm5, %v11348_v61, 0.0  ;;  %v1501_v8 = vmul.f32 %v11348_v61, %v11348_v61 }
 0x1b2   : > { %v1448_v39 = vadd.f32 %v1447_v51, %v1446_v24  ;;  %v1359_v16 = vpop.f32.mrb[84].mxu0 }
 0x1b3   : > { %v1584_v21 = vsel %vm1365_vm5, %v1501_v8, 0.0  ;;  %v11356_v59 = vadd.f32 %v10983_v36, %v1359_v16  ;;  %v8925_v25 = vpop.f32.mrb[85].mxu0 }
 0x1b4   : > { %v1585_v32 = vadd.f32 %v1584_v21, %v1583_v4 }
 0x1b5   : > { %v1450_v27 = vsel %vm1449_vm6, %v11356_v59, 0.0  ;;  %v1502_v20 = vmul.f32 %v11356_v59, %v11356_v59 }
 0x1b6   : > { %v1451_v45 = vadd.f32 %v1450_v27, %v1448_v39 }
 0x1b7   : > { %v1586_v47 = vsel %vm1449_vm6, %v1502_v20, 0.0 }
 0x1b8   : > { %v1452_v37 = vrot.slane %v1451_v45, 4  ;;  %v1587_v43 = vadd.f32 %v1586_v47, %v1585_v32 }
 0x1ba   : > { %v1453_v24 = vadd.f32 %v1452_v37, %v1451_v45  ;;  %v1588_v60 = vrot.slane %v1587_v43, 4 }
 0x1bc   : > { %v1454_v42 = vrot.slane %v1453_v24, 2  ;;  %v1589_v13 = vadd.f32 %v1588_v60, %v1587_v43 }
 0x1be   : > { %v1455_v51 = vadd.f32 %v1454_v42, %v1453_v24  ;;  %v1590_v36 = vrot.slane %v1589_v13, 2 }
 0x1c0   : > { %v1456_v8 = vrot.slane %v1455_v51, 1  ;;  %v1591_v16 = vadd.f32 %v1590_v36, %v1589_v13 }
 0x1c2   : > { %v1457_v4 = vadd.f32 %v1456_v8, %v1455_v51  ;;  %v1592_v21 = vrot.slane %v1591_v16, 1 }
 0x1c4   : > { %v11363_v25 = vmul.f32 0.00295858, %v1457_v4  ;;  %v1593_v1 = vadd.f32 %v1592_v21, %v1591_v16 }
 0x1c6   : > { %v1594_v0 = vmul.f32 0.00295858, %v1593_v1  ;;  %v1595_v39 = vmul.f32 %v11363_v25, %v11363_v25  ;;  %v1640_v32 = vsub.f32 %v11356_v59, %v11363_v25  ;;  %v1598_v47 = vsub.f32 %v10991_v40, %v11363_v25 }
 0x1c7   : > { %v1599_v37 = vsub.f32 %v10988_v38, %v11363_v25  ;;  %v1600_v43 = vsub.f32 %v10994_v41, %v11363_v25  ;;  %v1631_v1 = vsub.f32 %v11277_v6, %v11363_v25  ;;  %v1632_v24 = vsub.f32 %v11292_v30, %v11363_v25 }
 0x1c8   : > { %v1596_v27 = vsub.f32 %v1594_v0, %v1595_v39  ;;  %v1633_v0 = vsub.f32 %v11300_v26, %v11363_v25  ;;  %v1601_v42 = vsub.f32 %v11001_v44, %v11363_v25  ;;  %v1602_v13 = vsub.f32 %v11010_v49, %v11363_v25 }
 0x1c9   : > { %v1603_v51 = vsub.f32 %v11022_v55, %v11363_v25  ;;  %v1604_v8 = vsub.f32 %v11031_v62, %v11363_v25  ;;  %v1605_v16 = vsub.f32 %v11041_v7, %v11363_v25  ;;  %v1606_v4 = vsub.f32 %v11049_v14, %v11363_v25 }
 0x1ca   : > { %v1597_v20 = vmax.f32 %v1596_v27, 0.0  ;;  %v1607_v44 = vsub.f32 %v11060_v23, %v11363_v25  ;;  %v1608_v49 = vsub.f32 %v11069_v35, %v11363_v25  ;;  %v1609_v55 = vsub.f32 %v11080_v48, %v11363_v25 }
 0x1cb   : > { %v1610_v21 = vsub.f32 %v11089_v57, %v11363_v25  ;;  %v1611_v62 = vsub.f32 %v11100_v2, %v11363_v25  ;;  %v1612_v7 = vsub.f32 %v11109_v10, %v11363_v25  ;;  %v1613_v14 = vsub.f32 %v11118_v18, %v11363_v25 }
 0x1cc   : > { %v1641_v45 = vadd.f32 1e-05, %v1597_v20  ;;  %v1614_v23 = vsub.f32 %v11127_v29, %v11363_v25  ;;  %v1615_v35 = vsub.f32 %v11136_v46, %v11363_v25  ;;  %v1616_v48 = vsub.f32 %v11145_v54, %v11363_v25 }
 0x1cd   : > { %v1617_v57 = vsub.f32 %v11154_v63, %v11363_v25  ;;  %v1618_v2 = vsub.f32 %v11163_v9, %v11363_v25  ;;  %v1619_v10 = vsub.f32 %v11172_v19, %v11363_v25  ;;  %v1620_v18 = vsub.f32 %v11181_v31, %v11363_v25 }
 0x1ce   : > { %10627 = vrsqrt.f32 %v1641_v45  ;;  %v1621_v29 = vsub.f32 %v11189_v50, %v11363_v25  ;;  %v1622_v46 = vsub.f32 %v11197_v58, %v11363_v25  ;;  %v1623_v54 = vsub.f32 %v11205_v28, %v11363_v25 }
 0x1cf   : > { %v1624_v63 = vsub.f32 %v11213_v3, %v11363_v25  ;;  %v1625_v9 = vsub.f32 %v11221_v17, %v11363_v25  ;;  %v1626_v19 = vsub.f32 %v11229_v22, %v11363_v25  ;;  %v1627_v31 = vsub.f32 %v11237_v53, %v11363_v25 }
 0x1d0   : > { %v1628_v22 = vsub.f32 %v11245_v5, %v11363_v25  ;;  %v13922_v6 = vsub.f32 %v11324_v56, %v11363_v25  ;;  %v13923_v30 = vsub.f32 %v11332_v11, %v11363_v25  ;;  %v13924_v26 = vsub.f32 %v11340_v34, %v11363_v25 }
 0x1d8   : > { %v10628_v39 = vpop.eup %10627 }
 0x1d9   : > { %v11447_v50 = vmul.f32 %v10628_v39, %v1640_v32  ;;  %v11449_v27 = vmul.f32 %v10628_v39, %v1598_v47  ;;  %v11451_v58 = vmul.f32 %v10628_v39, %v1599_v37  ;;  %v11453_v28 = vmul.f32 %v10628_v39, %v1600_v43 }
 0x1da   : > { %v11455_v20 = vmul.f32 %v10628_v39, %v1601_v42  ;;  %v11457_v3 = vmul.f32 %v10628_v39, %v1602_v13  ;;  %v11459_v17 = vmul.f32 %v10628_v39, %v1603_v51  ;;  %v11461_v45 = vmul.f32 %v10628_v39, %v1604_v8 }
 0x1db   : > { %v11465_v53 = vmul.f32 %v10628_v39, %v1605_v16  ;;  %v11467_v32 = vmul.f32 %v10628_v39, %v1606_v4  ;;  %v11469_v47 = vmul.f32 %v10628_v39, %v1607_v44  ;;  %v11471_v37 = vmul.f32 %v10628_v39, %v1608_v49 }
 0x1dc   : > { %v11473_v43 = vmul.f32 %v10628_v39, %v1609_v55  ;;  %v11475_v42 = vmul.f32 %v10628_v39, %v1610_v21  ;;  %v11477_v13 = vmul.f32 %v10628_v39, %v1611_v62  ;;  %v1629_v51 = vsub.f32 %v11253_v15, %v11363_v25 }
 0x1dd   : > { %v11481_v8 = vmul.f32 %v10628_v39, %v1612_v7  ;;  %v11483_v5 = vmul.f32 %v10628_v39, %v1613_v14  ;;  %v1659_v16 = vmul.f32 %v10628_v39, %v1614_v23  ;;  %v1660_v4 = vmul.f32 %v10628_v39, %v1615_v35  ;;  %v11491_v23 = vld [vmem:[%s832_s28] ss:$0 sm:$0xff]  ;;  %s10613_s28 = smul.u32 144, %s13939_s22 }
 0x1de   : > { %v1661_v44 = vmul.f32 %v10628_v39, %v1616_v48  ;;  %v1662_v49 = vmul.f32 %v10628_v39, %v1617_v57  ;;  %v1663_v55 = vmul.f32 %v10628_v39, %v1618_v2  ;;  %v1630_v21 = vsub.f32 %v11266_v52, %v11363_v25 }
 0x1df   : > { %v1664_v62 = vmul.f32 %v10628_v39, %v1619_v10  ;;  %v1665_v36 = vmul.f32 %v10628_v39, %v1620_v18  ;;  %v1666_v60 = vmul.f32 %v10628_v39, %v1621_v29  ;;  %v1667_v15 = vmul.f32 %v10628_v39, %v1622_v46 }
 0x1e0   : > { %v1668_v7 = vmul.f32 %v10628_v39, %v1623_v54  ;;  %v1669_v14 = vmul.f32 %v10628_v39, %v1624_v63  ;;  %v1670_v41 = vmul.f32 %v10628_v39, %v1625_v9  ;;  %v1671_v38 = vmul.f32 %v10628_v39, %v1626_v19 }
 0x1e1   : > { %v1672_v40 = vmul.f32 %v10628_v39, %v1627_v31  ;;  %v1673_v59 = vmul.f32 %v10628_v39, %v1628_v22  ;;  %v1674_v35 = vmul.f32 %v10628_v39, %v1629_v51  ;;  %v1675_v48 = vmul.f32 %v10628_v39, %v1630_v21 }
 0x1e2   : > { %v1676_v57 = vmul.f32 %v10628_v39, %v1631_v1  ;;  %v1677_v52 = vmul.f32 %v10628_v39, %v1632_v24  ;;  %v1678_v2 = vmul.f32 %v10628_v39, %v1633_v0  ;;  %v13920_v10 = vsub.f32 %v11308_v12, %v11363_v25 }
 0x1e3   : > { %v13921_v29 = vsub.f32 %v11316_v33, %v11363_v25  ;;  %v1681_v1 = vmul.f32 %v10628_v39, %v13922_v6  ;;  %v1682_v24 = vmul.f32 %v10628_v39, %v13923_v30  ;;  %v1683_v12 = vmul.f32 %v10628_v39, %v13924_v26 }
 0x1e4   : > { %v1679_v18 = vmul.f32 %v10628_v39, %v13920_v10  ;;  %v13925_v33 = vsub.f32 %v11348_v61, %v11363_v25  ;;  %v1708_v54 = vmul.f32 %v11491_v23, %v1659_v16  ;;  %v1709_v56 = vmul.f32 %v11491_v23, %v1660_v4 }
 0x1e5   : > { %v1680_v46 = vmul.f32 %v10628_v39, %v13921_v29  ;;  %v1712_v63 = vmul.f32 %v11491_v23, %v1663_v55  ;;  %v1713_v11 = vmul.f32 %v11491_v23, %v1664_v62  ;;  %v1714_v9 = vmul.f32 %v11491_v23, %v1665_v36 }
 0x1e6   : > { %v1684_v0 = vmul.f32 %v10628_v39, %v13925_v33  ;;  %v1715_v19 = vmul.f32 %v11491_v23, %v1666_v60  ;;  %v11531_v31 = vmul.f32 %v11491_v23, %v1667_v15  ;;  %v11534_v34 = vmul.f32 %v11491_v23, %v1668_v7  ;;  %v11542_v39 = vld [vmem:[%s835_s30] ss:$0 sm:$0xff]  ;;  %s12689_s30 = scalar_lea.vmem %s13891_s8, %s10613_s28 }
 0x1e7   : > { %v11537_v61 = vmul.f32 %v11491_v23, %v1669_v14  ;;  %v11540_v25 = vmul.f32 %v11491_v23, %v1670_v41  ;;  %v11545_v22 = vmul.f32 %v11491_v23, %v1671_v38  ;;  %v11548_v36 = vmul.f32 %v11491_v23, %v1672_v40 }
 0x1e8   : > { %v11551_v60 = vmul.f32 %v11491_v23, %v1673_v59  ;;  %v11554_v51 = vmul.f32 %v11491_v23, %v1674_v35  ;;  %v11557_v16 = vmul.f32 %v11491_v23, %v1675_v48  ;;  %v11560_v41 = vmul.f32 %v11491_v23, %v1676_v57 }
 0x1e9   : > { %v11563_v4 = vmul.f32 %v11491_v23, %v1677_v52  ;;  %v11566_v38 = vmul.f32 %v11491_v23, %v1678_v2  ;;  %v11569_v40 = vmul.f32 %v11491_v23, %v1679_v18  ;;  %v11572_v59 = vmul.f32 %v11491_v23, %v1680_v46 }
 0x1ea   : > { %v11575_v55 = vmul.f32 %v11491_v23, %v1681_v1  ;;  %v11578_v21 = vmul.f32 %v11491_v23, %v1682_v24  ;;  %v11581_v62 = vmul.f32 %v11491_v23, %v1683_v12  ;;  %v11584_v15 = vmul.f32 %v11491_v23, %v1684_v0 }
 0x1eb   : > { %v1757_v7 = vadd.f32 %v11542_v39, %v1708_v54  ;;  %v1758_v14 = vadd.f32 %v11542_v39, %v1709_v56  ;;  %v1692_v35 = vmul.f32 %v11491_v23, %v11449_v27  ;;  %v1693_v48 = vmul.f32 %v11491_v23, %v11451_v58 }
 0x1ec   : > { %v1710_v57 = vmul.f32 %v11491_v23, %v1661_v44  ;;  %v1711_v52 = vmul.f32 %v11491_v23, %v1662_v49  ;;  %v1694_v18 = vmul.f32 %v11491_v23, %v11453_v28  ;;  %v1695_v29 = vmul.f32 %v11491_v23, %v11455_v20 }
 0x1ed   : > { %v1800_v2 = vmax.f32 %v1757_v7, 0.0  ;;  %v1801_v10 = vmax.f32 %v1758_v14, 0.0  ;;  %v1741_v46 = vadd.f32 %v11542_v39, %v1692_v35  ;;  %v1742_v6 = vadd.f32 %v11542_v39, %v1693_v48 }
 0x1ee   : > { %v1759_v27 = vadd.f32 %v11542_v39, %v1710_v57  ;;  %v1760_v58 = vadd.f32 %v11542_v39, %v1711_v52  ;;  %v1743_v44 = vadd.f32 %v11542_v39, %v1694_v18  ;;  %v1744_v49 = vadd.f32 %v11542_v39, %v1695_v29 }
 0x1ef   : > { %v11602_v1 = vpack.c.bf16 %v1801_v10, %v1800_v2  ;;  %v1761_v30 = vadd.f32 %v11542_v39, %v1712_v63  ;;  %v1784_v28 = vmax.f32 %v1741_v46, 0.0  ;;  %v1785_v24 = vmax.f32 %v1742_v6, 0.0 }
 0x1f0   : > { %v1802_v26 = vmax.f32 %v1759_v27, 0.0  ;;  %v1803_v20 = vmax.f32 %v1760_v58, 0.0  ;;  %v1786_v12 = vmax.f32 %v1743_v44, 0.0  ;;  %v1787_v33 = vmax.f32 %v1744_v49, 0.0 }
 0x1f1   : > { %10057 = vmatprep.subr.bf16.mxu1 %v11602_v1  ;;  %10151 = vmatprep.subr.bf16.mxu0 %v11602_v1  ;;  %v1762_v0 = vadd.f32 %v11542_v39, %v1713_v11  ;;  %v1804_v54 = vmax.f32 %v1761_v30, 0.0  ;;  %v11610_v56 = vpack.c.bf16 %v1785_v24, %v1784_v28  ;;  %v1696_v63 = vmul.f32 %v11491_v23, %v11457_v3 }
 0x1f2   : > { %v11612_v7 = vpack.c.bf16 %v1803_v20, %v1802_v26  ;;  %v1697_v14 = vmul.f32 %v11491_v23, %v11459_v17  ;;  %v11618_v35 = vpack.c.bf16 %v1787_v33, %v1786_v12  ;;  %v1763_v57 = vadd.f32 %v11542_v39, %v1714_v9 }
 0x1f3   : > { %v1805_v48 = vmax.f32 %v1762_v0, 0.0  ;;  %v1764_v52 = vadd.f32 %v11542_v39, %v1715_v19  ;;  %10059 = vmatpush3.bf16.msra.mxu1 %v11610_v56  ;;  %10153 = vmatpush3.bf16.msra.mxu0 %v11610_v56  ;;  %v1745_v11 = vadd.f32 %v11542_v39, %v1696_v63  ;;  %v1698_v3 = vmul.f32 %v11491_v23, %v11461_v45 }
 0x1f4   : > { %v1746_v2 = vadd.f32 %v11542_v39, %v1697_v14  ;;  %10061 = vmatprep.subr.bf16.mxu1 %v11612_v7  ;;  %10155 = vmatprep.subr.bf16.mxu0 %v11612_v7  ;;  %v1806_v9 = vmax.f32 %v1763_v57, 0.0  ;;  %v1699_v19 = vmul.f32 %v11491_v23, %v11465_v53  ;;  %v1765_v6 = vadd.f32 %v11542_v39, %v11531_v31 }
 0x1f5   : > { %v11630_v17 = vpack.c.bf16 %v1805_v48, %v1804_v54  ;;  %v1807_v10 = vmax.f32 %v1764_v52, 0.0  ;;  %v1788_v18 = vmax.f32 %v1745_v11, 0.0  ;;  %v1747_v46 = vadd.f32 %v11542_v39, %v1698_v3 }
 0x1f6   : > { %v1789_v29 = vmax.f32 %v1746_v2, 0.0  ;;  %v1748_v45 = vadd.f32 %v11542_v39, %v1699_v19  ;;  %v1766_v58 = vadd.f32 %v11542_v39, %v11534_v34  ;;  %v1700_v44 = vmul.f32 %v11491_v23, %v11467_v32 }
 0x1f7   : > { %v11637_v27 = vpack.c.bf16 %v1807_v10, %v1806_v9  ;;  %10063 = vmatpush3.bf16.msra.mxu1 %v11618_v35  ;;  %10157 = vmatpush3.bf16.msra.mxu0 %v11618_v35  ;;  %v1790_v49 = vmax.f32 %v1747_v46, 0.0  ;;  %v1808_v30 = vmax.f32 %v1765_v6, 0.0  ;;  %v1701_v31 = vmul.f32 %v11491_v23, %v11469_v47 }
 0x1f8   : > { %v11646_v53 = vpack.c.bf16 %v1789_v29, %v1788_v18  ;;  %10065 = vmatprep.subr.bf16.mxu1 %v11630_v17  ;;  %10159 = vmatprep.subr.bf16.mxu0 %v11630_v17  ;;  %v1791_v28 = vmax.f32 %v1748_v45, 0.0  ;;  %v1809_v34 = vmax.f32 %v1766_v58, 0.0  ;;  %v1749_v24 = vadd.f32 %v11542_v39, %v1700_v44 }
 0x1f9   : > { %v1767_v32 = vadd.f32 %v11542_v39, %v11537_v61  ;;  %v1750_v26 = vadd.f32 %v11542_v39, %v1701_v31  ;;  %v1768_v20 = vadd.f32 %v11542_v39, %v11540_v25  ;;  %v1702_v12 = vmul.f32 %v11491_v23, %v11471_v37 }
 0x1fa   : > { %v1703_v47 = vmul.f32 %v11491_v23, %v11473_v43  ;;  %v11662_v33 = vpack.c.bf16 %v1791_v28, %v1790_v49  ;;  %v11664_v0 = vpack.c.bf16 %v1809_v34, %v1808_v30  ;;  %v1792_v54 = vmax.f32 %v1749_v24, 0.0 }
 0x1fb   : > { %v1810_v63 = vmax.f32 %v1767_v32, 0.0  ;;  %10067 = vmatpush3.bf16.msra.mxu1 %v11646_v53  ;;  %10161 = vmatpush3.bf16.msra.mxu0 %v11646_v53  ;;  %v1793_v61 = vmax.f32 %v1750_v26, 0.0  ;;  %v1811_v14 = vmax.f32 %v1768_v20, 0.0  ;;  %v1751_v25 = vadd.f32 %v11542_v39, %v1702_v12 }
 0x1fc   : > { %v1752_v48 = vadd.f32 %v11542_v39, %v1703_v47  ;;  %10069 = vmatprep.subr.bf16.mxu1 %v11637_v27  ;;  %10163 = vmatprep.subr.bf16.mxu0 %v11637_v27  ;;  %v1769_v37 = vadd.f32 %v11542_v39, %v11545_v22  ;;  %v1770_v43 = vadd.f32 %v11542_v39, %v11548_v36 }
 0x1fd   : > { %v1704_v57 = vmul.f32 %v11491_v23, %v11475_v42  ;;  %v11678_v52 = vpack.c.bf16 %v1793_v61, %v1792_v54  ;;  %v11680_v11 = vpack.c.bf16 %v1811_v14, %v1810_v63  ;;  %v1794_v2 = vmax.f32 %v1751_v25, 0.0 }
 0x1fe   : > { %v1795_v3 = vmax.f32 %v1752_v48, 0.0  ;;  %v1812_v9 = vmax.f32 %v1769_v37, 0.0  ;;  %v1813_v10 = vmax.f32 %v1770_v43, 0.0  ;;  %v1705_v19 = vmul.f32 %v11491_v23, %v11477_v13 }
 0x1ff   : > { %v1753_v18 = vadd.f32 %v11542_v39, %v1704_v57  ;;  %10071 = vmatpush3.bf16.msra.mxu1 %v11662_v33  ;;  %10165 = vmatpush3.bf16.msra.mxu0 %v11662_v33  ;;  %v1771_v42 = vadd.f32 %v11542_v39, %v11551_v60  ;;  %v1772_v36 = vadd.f32 %v11542_v39, %v11554_v51 }
 0x200   : > { %v11687_v22 = vpack.c.bf16 %v1795_v3, %v1794_v2  ;;  %10073 = vmatprep.subr.bf16.mxu1 %v11664_v0  ;;  %10167 = vmatprep.subr.bf16.mxu0 %v11664_v0  ;;  %v11695_v29 = vpack.c.bf16 %v1813_v10, %v1812_v9  ;;  %v1754_v13 = vadd.f32 %v11542_v39, %v1705_v19  ;;  %v7629_v2 = vld [vmem:[%s13919_s2 + $0x270] sm:$0xff]  ;;  %v13926_v3 = vmov 0.0|0.0   ;;  %v1831_v9 = vld [vmem:[%s13919_s2 + $0x20] sm:$0xff]  ;;  %v1830_v10 = vld [vmem:[%s13919_s2 + $0x18] sm:$0xff] }
 0x201   : > { %v1796_v46 = vmax.f32 %v1753_v18, 0.0  ;;  %v1706_v6 = vmul.f32 %v11491_v23, %v11481_v8  ;;  %v1814_v45 = vmax.f32 %v1771_v42, 0.0  ;;  %v1815_v58 = vmax.f32 %v1772_v36, 0.0  ;;  %v1834_v19 = vld [vmem:[%s13919_s2 + $0x38] sm:$0xff]  ;;  %v1833_v18 = vld [vmem:[%s13919_s2 + $0x30] sm:$0xff]  ;;  %v1836_v36 = vld [vmem:[%s13919_s2 + $0x48] sm:$0xff] }
 0x202   : > { %v1707_v60 = vmul.f32 %v11491_v23, %v11483_v5  ;;  %v1773_v51 = vadd.f32 %v11542_v39, %v11557_v16  ;;  %v1797_v44 = vmax.f32 %v1754_v13, 0.0  ;;  %v1774_v30 = vadd.f32 %v11542_v39, %v11560_v41  ;;  %v1837_v42 = vld [vmem:[%s13919_s2 + $0x50] sm:$0xff] }
 0x203   : > { %v1755_v49 = vadd.f32 %v11542_v39, %v1706_v6  ;;  %v1775_v31 = vadd.f32 %v11542_v39, %v11563_v4  ;;  %10075 = vmatpush3.bf16.msra.mxu1 %v11678_v52  ;;  %10169 = vmatpush3.bf16.msra.mxu0 %v11678_v52  ;;  %v11711_v8 = vpack.c.bf16 %v1815_v58, %v1814_v45  ;;  %v1839_v6 = vld [vmem:[%s13919_s2 + $0x60] sm:$0xff]  ;;  %v1842_v45 = vld [vmem:[%s13919_s2 + $0x78] sm:$0xff]  ;;  %v13927_v58 = vmov 0.0  }
 0x204   : > { %v1756_v5 = vadd.f32 %v11542_v39, %v1707_v60  ;;  %v1816_v28 = vmax.f32 %v1773_v51, 0.0  ;;  %v1776_v16 = vadd.f32 %v11542_v39, %v11566_v38  ;;  %10077 = vmatprep.subr.bf16.mxu1 %v11680_v11  ;;  %10171 = vmatprep.subr.bf16.mxu0 %v11680_v11  ;;  %v11718_v41 = vpack.c.bf16 %v1797_v44, %v1796_v46  ;;  %v1840_v46 = vld [vmem:[%s13919_s2 + $0x68] sm:$0xff]  ;;  %v1846_v60 = vld [vmem:[%s13919_s2 + $0x98] sm:$0xff]  ;;  %v1845_v51 = vld [vmem:[%s13919_s2 + $0x90] sm:$0xff] }
 0x205   : > { %v1798_v34 = vmax.f32 %v1755_v49, 0.0  ;;  %v1817_v4 = vmax.f32 %v1774_v30, 0.0  ;;  %v1818_v24 = vmax.f32 %v1775_v31, 0.0  ;;  %v1777_v20 = vadd.f32 %v11542_v39, %v11569_v40  ;;  %v1849_v44 = vld [vmem:[%s13919_s2 + $0xb0] sm:$0xff]  ;;  %v1848_v49 = vld [vmem:[%s13919_s2 + $0xa8] sm:$0xff]  ;;  %v1851_v30 = vld [vmem:[%s13919_s2 + $0xc0] sm:$0xff] }
 0x206   : > { %v1799_v32 = vmax.f32 %v1756_v5, 0.0  ;;  %v1819_v26 = vmax.f32 %v1776_v16, 0.0  ;;  %v1778_v12 = vadd.f32 %v11542_v39, %v11572_v59  ;;  %v1779_v38 = vadd.f32 %v11542_v39, %v11575_v55  ;;  %v1855_v31 = vld [vmem:[%s13919_s2 + $0xe0] sm:$0xff]  ;;  %v1854_v5 = vld [vmem:[%s13919_s2 + $0xd8] sm:$0xff]  ;;  %v1857_v16 = vld [vmem:[%s13919_s2 + $0xf0] sm:$0xff] }
 0x207   : > { %v11724_v47 = vpack.c.bf16 %v1817_v4, %v1816_v28  ;;  %v1780_v54 = vadd.f32 %v11542_v39, %v11578_v21  ;;  %v1781_v63 = vadd.f32 %v11542_v39, %v11581_v62  ;;  %10079 = vmatpush3.bf16.msra.mxu1 %v11687_v22  ;;  %10173 = vmatpush3.bf16.msra.mxu0 %v11687_v22  ;;  %v1820_v59 = vmax.f32 %v1777_v20, 0.0  ;;  %v1858_v28 = vld [vmem:[%s13919_s2 + $0xf8] sm:$0xff]  ;;  %v1860_v4 = vld [vmem:[%s13919_s2 + $0x108] sm:$0xff] }
 0x208   : > { %v11734_v61 = vpack.c.bf16 %v1799_v32, %v1798_v34  ;;  %v11736_v40 = vpack.c.bf16 %v1819_v26, %v1818_v24  ;;  %v1821_v14 = vmax.f32 %v1778_v12, 0.0  ;;  %10081 = vmatprep.subr.bf16.mxu1 %v11695_v29  ;;  %10175 = vmatprep.subr.bf16.mxu0 %v11695_v29  ;;  %v1822_v55 = vmax.f32 %v1779_v38, 0.0  ;;  %v1861_v34 = vld [vmem:[%s13919_s2 + $0x110] sm:$0xff]  ;;  %v1864_v24 = vld [vmem:[%s13919_s2 + $0x128] sm:$0x3]  ;;  %v7638_v12 = vld [vmem:[%s13919_s2 + $0x2b8] sm:$0xff] }
 0x209   : > { %v1823_v25 = vmax.f32 %v1780_v54, 0.0  ;;  %v1782_v21 = vadd.f32 %v11542_v39, %v11584_v15  ;;  %v1824_v62 = vmax.f32 %v1781_v63, 0.0  ;;  %v1827_v15 = vld [vmem:[%s13919_s2] sm:$0xff]  ;;  %v1734_v13 = vmul.f32 %v11491_v23, %v11447_v50  ;;  %v1829_v26 = vld [vmem:[%s13919_s2 + $0x10] sm:$0xff]  ;;  %v1832_v20 = vld [vmem:[%s13919_s2 + $0x28] sm:$0xff] }
 0x20a   : > { %v11742_v48 = vpack.c.bf16 %v1821_v14, %v1820_v59  ;;  %v1843_v23 = vld [vmem:[%s13919_s2 + $0x80] sm:$0xff]  ;;  %v7642_v38 = vld [vmem:[%s13919_s2 + $0x2d8] sm:$0xff]  ;;  %v7641_v63 = vld [vmem:[%s13919_s2 + $0x2d0] sm:$0xff] }
 0x20b   : > { %v11744_v37 = vpack.c.bf16 %v1823_v25, %v1822_v55  ;;  %v1825_v43 = vmax.f32 %v1782_v21, 0.0  ;;  %10083 = vmatpush3.bf16.msra.mxu1 %v11718_v41  ;;  %10177 = vmatpush3.bf16.msra.mxu0 %v11718_v41  ;;  %v1783_v50 = vadd.f32 %v11542_v39, %v1734_v13  ;;  %v1863_v32 = vld [vmem:[%s13919_s2 + $0x120] sm:$0x3]  ;;  %v1862_v54 = vld [vmem:[%s13919_s2 + $0x118] sm:$0xff]  ;;  %v1865_v59 = vld [vmem:[%s13919_s2 + $0x130] sm:$0x3] }
 0x20c   : > { %10085 = vmatprep.subr.bf16.mxu1 %v11711_v8  ;;  %10179 = vmatprep.subr.bf16.mxu0 %v11711_v8  ;;  %v7644_v14 = vld [vmem:[%s13919_s2 + $0x2e8] sm:$0xff]  ;;  %v7577_v55 = vld [vmem:[%s13919_s2 + $0x140] sm:$0xff]  ;;  %v7657_v13 = vld [vmem:[%s13919_s2 + $0x350] sm:$0xff] }
 0x20d   : > { %v11750_v57 = vpack.c.bf16 %v1825_v43, %v1824_v62  ;;  %v11814_v39 = vmax.f32 %v1783_v50, 0.0  ;;  %v7648_v25 = vld [vmem:[%s13919_s2 + $0x308] sm:$0xff]  ;;  %v7647_v21 = vld [vmem:[%s13919_s2 + $0x300] sm:$0xff]  ;;  %v7576_v62 = vld [vmem:[%s13919_s2 + $0x138] sm:$0xff] }
 0x20e   : > { %v7580_v43 = vld [vmem:[%s13919_s2 + $0x158] sm:$0xff]  ;;  %v7589_v50 = vld [vmem:[%s13919_s2 + $0x1a0] sm:$0xff] }
 0x20f   : > { %10087 = vmatpush3.bf16.msra.mxu1 %v11734_v61  ;;  %10181 = vmatpush3.bf16.msra.mxu0 %v11734_v61 }
 0x210   : > { %10198 = vmatprep.subr.bf16.mxu0 %v11602_v1  ;;  %10088 = vmatprep.subr.bf16.mxu1 %v13926_v3 }
 0x212   : > { %1975 = vmatmul.mubr.f32.vlgmr.msra.gmra.mrb[0].mxu1 %v1827_v15  ;;  %2666 = vmatmul.mubr.f32.vlgmr.msra.gmra.mrb[86].mxu0 %v7629_v2  ;;  %v7651_v15 = vld [vmem:[%s13919_s2 + $0x320] sm:$0xff]  ;;  %v7650_v2 = vld [vmem:[%s13919_s2 + $0x318] sm:$0xff] }
 0x213   : > { %10090 = vmatpush3.bf16.msra.mxu1 %v11724_v47  ;;  %10200 = vmatpush3.bf16.msra.mxu0 %v11610_v56 }
 0x214   : > { %10202 = vmatprep.subr.bf16.mxu0 %v11612_v7  ;;  %1979 = vmatprep.mubr.f32.mxu1 %v1831_v9  ;;  %v7579_v9 = vld [vmem:[%s13919_s2 + $0x150] sm:$0xff] }
 0x215   : > { %10091 = vmatprep.subr.bf16.mxu1 %v13926_v3 }
 0x216   : > { %1980 = vmatmul.mubr.f32.gmra.mrb[2].mxu1 %v1830_v10  ;;  %v7583_v10 = vld [vmem:[%s13919_s2 + $0x170] sm:$0xff] }
 0x217   : > { %10093 = vmatpush3.bf16.msra.mxu1 %v11736_v40  ;;  %10204 = vmatpush3.bf16.msra.mxu0 %v11618_v35 }
 0x218   : > { %10206 = vmatprep.subr.bf16.mxu0 %v11630_v17  ;;  %1984 = vmatprep.mubr.f32.mxu1 %v1834_v19  ;;  %v7654_v19 = vld [vmem:[%s13919_s2 + $0x338] sm:$0xff] }
 0x219   : > { %10094 = vmatprep.subr.bf16.mxu1 %v13926_v3 }
 0x21a   : > { %1985 = vmatmul.mubr.f32.gmra.mrb[4].mxu1 %v1833_v18  ;;  %v7653_v18 = vld [vmem:[%s13919_s2 + $0x330] sm:$0xff] }
 0x21b   : > { %10096 = vmatpush3.bf16.msra.mxu1 %v11742_v48  ;;  %10208 = vmatpush3.bf16.msra.mxu0 %v11646_v53 }
 0x21c   : > { %10210 = vmatprep.subr.bf16.mxu0 %v11637_v27  ;;  %1989 = vmatprep.mubr.f32.mxu1 %v1837_v42  ;;  %v7582_v42 = vld [vmem:[%s13919_s2 + $0x168] sm:$0xff] }
 0x21d   : > { %10097 = vmatprep.subr.bf16.mxu1 %v13926_v3 }
 0x21e   : > { %1990 = vmatmul.mubr.f32.gmra.mrb[6].mxu1 %v1836_v36  ;;  %v7586_v36 = vld [vmem:[%s13919_s2 + $0x188] sm:$0xff] }
 0x21f   : > { %10099 = vmatpush3.bf16.msra.mxu1 %v11744_v37  ;;  %10212 = vmatpush3.bf16.msra.mxu0 %v11662_v33 }
 0x220   : > { %10214 = vmatprep.subr.bf16.mxu0 %v11664_v0  ;;  %1994 = vmatprep.mubr.f32.mxu1 %v1840_v46  ;;  %v7656_v46 = vld [vmem:[%s13919_s2 + $0x348] sm:$0xff] }
 0x221   : > { %10100 = vmatprep.subr.bf16.mxu1 %v13926_v3 }
 0x222   : > { %1995 = vmatmul.mubr.f32.gmra.mrb[8].mxu1 %v1839_v6  ;;  %v7585_v6 = vld [vmem:[%s13919_s2 + $0x180] sm:$0xff] }
 0x223   : > { %10102 = vmatpush3.bf16.msra.mxu1 %v11750_v57  ;;  %10216 = vmatpush3.bf16.msra.mxu0 %v11678_v52 }
 0x224   : > { %10218 = vmatprep.subr.bf16.mxu0 %v11680_v11  ;;  %1999 = vmatprep.mubr.f32.mxu1 %v1843_v23  ;;  %v7660_v23 = vld [vmem:[%s13919_s2 + $0x368] sm:$0xff] }
 0x225   : > { %8946 = vmatprep.subr.mxu1 %v13927_v58 }
 0x226   : > { %2000 = vmatmul.mubr.f32.gmra.mrb[10].mxu1 %v1842_v45  ;;  %v7659_v45 = vld [vmem:[%s13919_s2 + $0x360] sm:$0xff] }
 0x227   : > { %8947 = vmatpush3.msk.msra.mxu1 %vm1906_vm7, %v11814_v39  ;;  %10220 = vmatpush3.bf16.msra.mxu0 %v11687_v22 }
 0x228   : > { %10104 = vmatprep.subr.bf16.mxu1 %v11602_v1  ;;  %10222 = vmatprep.subr.bf16.mxu0 %v11695_v29  ;;  %v1852_v1 = vld [vmem:[%s13919_s2 + $0xc8] sm:$0xff] }
 0x229   : > { %2004 = vmatprep.mubr.f32.mxu1 %v1846_v60  ;;  %v7588_v60 = vld [vmem:[%s13919_s2 + $0x198] sm:$0xff] }
 0x22a   : > { %2005 = vmatmul.mubr.f32.gmra.mrb[12].mxu1 %v1845_v51  ;;  %v7592_v51 = vld [vmem:[%s13919_s2 + $0x1b8] sm:$0xff] }
 0x22b   : > { %10224 = vmatpush3.bf16.msra.mxu0 %v11718_v41  ;;  %2009 = vmatprep.mubr.f32.mxu1 %v1849_v44  ;;  %v7663_v44 = vld [vmem:[%s13919_s2 + $0x380] sm:$0xff] }
 0x22c   : > { %10226 = vmatprep.subr.bf16.mxu0 %v11711_v8 }
 0x22e   : > { %2010 = vmatmul.mubr.f32.gmra.mrb[14].mxu1 %v1848_v49  ;;  %v7662_v49 = vld [vmem:[%s13919_s2 + $0x378] sm:$0xff] }
 0x22f   : > { %10228 = vmatpush3.bf16.msra.mxu0 %v11734_v61  ;;  %2014 = vmatprep.mubr.f32.mxu1 %v1852_v1  ;;  %v7591_v1 = vld [vmem:[%s13919_s2 + $0x1b0] sm:$0xff] }
 0x230   : > { %10244 = vmatprep.subr.bf16.mxu0 %v13926_v3 }
 0x232   : > { %2015 = vmatmul.mubr.f32.gmra.mrb[16].mxu1 %v1851_v30  ;;  %v7595_v30 = vld [vmem:[%s13919_s2 + $0x1d0] sm:$0xff] }
 0x233   : > { %2019 = vmatprep.mubr.f32.mxu1 %v1855_v31  ;;  %v7666_v31 = vld [vmem:[%s13919_s2 + $0x398] sm:$0x3] }
 0x236   : > { %2020 = vmatmul.mubr.f32.gmra.mrb[18].mxu1 %v1854_v5  ;;  %v7665_v5 = vld [vmem:[%s13919_s2 + $0x390] sm:$0x3] }
 0x237   : > { %2024 = vmatprep.mubr.f32.mxu1 %v1858_v28  ;;  %v7594_v28 = vld [vmem:[%s13919_s2 + $0x1c8] sm:$0xff] }
 0x23a   : > { %2025 = vmatmul.mubr.f32.gmra.mrb[20].mxu1 %v1857_v16  ;;  %v7598_v16 = vld [vmem:[%s13919_s2 + $0x1e8] sm:$0xff] }
 0x23b   : > { %2029 = vmatprep.mubr.f32.mxu1 %v1861_v34  ;;  %v7683_v34 = vld [vmem:[%s13919_s2 + $0x3b0] sm:$0xff] }
 0x23e   : > { %2030 = vmatmul.mubr.f32.gmra.mrb[22].mxu1 %v1860_v4  ;;  %v7682_v4 = vld [vmem:[%s13919_s2 + $0x3a8] sm:$0xff] }
 0x23f   : > { %2034 = vmatprep.mubr.f32.mxu1 %v1864_v24  ;;  %v7597_v24 = vld [vmem:[%s13919_s2 + $0x1e0] sm:$0xff] }
 0x242   : > { %2035 = vmatmul.mubr.f32.gmra.mrb[24].mxu1 %v1863_v32  ;;  %v7601_v32 = vld [vmem:[%s13919_s2 + $0x200] sm:$0xff] }
 0x243   : > { %8948 = vmatprep.mubr.msk.f32.mxu1 %vm10642_vm0, %v13927_v58 }
 0x246   : > { %8949 = vmatmul.mubr.msk.f32.vlgmr.msra.gmra.mrb[26].mxu1 %vm1866_vm8, %v1829_v26  ;;  %v7686_v26 = vld [vmem:[%s13919_s2 + $0x3c8] sm:$0xff] }
 0x247   : > { %10106 = vmatpush3.bf16.msra.mxu1 %v11610_v56  ;;  %8951 = vmatprep.mubr.msk.f32.mxu1 %vm10642_vm0, %v13927_v58  ;;  %v1835_v56 = vld [vmem:[%s13919_s2 + $0x40] sm:$0xff] }
 0x248   : > { %10108 = vmatprep.subr.bf16.mxu1 %v11612_v7  ;;  %v1838_v7 = vld [vmem:[%s13919_s2 + $0x58] sm:$0xff] }
 0x24a   : > { %8952 = vmatmul.mubr.msk.f32.gmra.mrb[28].mxu1 %vm1866_vm8, %v1832_v20  ;;  %v7685_v20 = vld [vmem:[%s13919_s2 + $0x3c0] sm:$0xff] }
 0x24b   : > { %10110 = vmatpush3.bf16.msra.mxu1 %v11618_v35  ;;  %8954 = vmatprep.mubr.msk.f32.mxu1 %vm10642_vm0, %v13927_v58  ;;  %v1841_v35 = vld [vmem:[%s13919_s2 + $0x70] sm:$0xff] }
 0x24c   : > { %10112 = vmatprep.subr.bf16.mxu1 %v11630_v17  ;;  %v1844_v17 = vld [vmem:[%s13919_s2 + $0x88] sm:$0xff] }
 0x24e   : > { %8955 = vmatmul.mubr.msk.f32.gmra.mrb[30].mxu1 %vm1866_vm8, %v1835_v56  ;;  %v7600_v56 = vld [vmem:[%s13919_s2 + $0x1f8] sm:$0xff] }
 0x24f   : > { %10114 = vmatpush3.bf16.msra.mxu1 %v11646_v53  ;;  %8957 = vmatprep.mubr.msk.f32.mxu1 %vm10642_vm0, %v13927_v58  ;;  %v7633_v53 = vld [vmem:[%s13919_s2 + $0x290] sm:$0xff] }
 0x250   : > { %10116 = vmatprep.subr.bf16.mxu1 %v11637_v27  ;;  %v1847_v27 = vld [vmem:[%s13919_s2 + $0xa0] sm:$0xff]  ;;  %2670 = vmatprep.mubr.f32.mxu0 %v7633_v53  ;;  %v7607_v53 = vld [vmem:[%s13919_s2 + $0x230] sm:$0xff] }
 0x252   : > { %8958 = vmatmul.mubr.msk.f32.gmra.mrb[32].mxu1 %vm1866_vm8, %v1838_v7  ;;  %v7604_v7 = vld [vmem:[%s13919_s2 + $0x218] sm:$0xff] }
 0x253   : > { %10118 = vmatpush3.bf16.msra.mxu1 %v11662_v33  ;;  %8960 = vmatprep.mubr.msk.f32.mxu1 %vm10642_vm0, %v13927_v58  ;;  %v1850_v33 = vld [vmem:[%s13919_s2 + $0xb8] sm:$0xff] }
 0x254   : > { %10120 = vmatprep.subr.bf16.mxu1 %v11664_v0  ;;  %v7632_v0 = vld [vmem:[%s13919_s2 + $0x288] sm:$0xff] }
 0x255   : > { %2671 = vmatmul.mubr.f32.gmra.mrb[88].mxu0 %v7632_v0  ;;  %v7691_v0 = vld [vmem:[%s13919_s2 + $0x3f0] sm:$0xff] }
 0x256   : > { %8961 = vmatmul.mubr.msk.f32.gmra.mrb[34].mxu1 %vm1866_vm8, %v1841_v35  ;;  %v7689_v35 = vld [vmem:[%s13919_s2 + $0x3e0] sm:$0xff] }
 0x257   : > { %10122 = vmatpush3.bf16.msra.mxu1 %v11678_v52  ;;  %8963 = vmatprep.mubr.msk.f32.mxu1 %vm10642_vm0, %v13927_v58  ;;  %v1853_v52 = vld [vmem:[%s13919_s2 + $0xd0] sm:$0xff] }
 0x258   : > { %10124 = vmatprep.subr.bf16.mxu1 %v11680_v11  ;;  %v7636_v11 = vld [vmem:[%s13919_s2 + $0x2a8] sm:$0xff] }
 0x259   : > { %2675 = vmatprep.mubr.f32.mxu0 %v7636_v11  ;;  %v7610_v11 = vld [vmem:[%s13919_s2 + $0x248] sm:$0xff] }
 0x25a   : > { %8964 = vmatmul.mubr.msk.f32.gmra.mrb[36].mxu1 %vm1866_vm8, %v1844_v17  ;;  %v7688_v17 = vld [vmem:[%s13919_s2 + $0x3d8] sm:$0xff] }
 0x25b   : > { %10126 = vmatpush3.bf16.msra.mxu1 %v11687_v22  ;;  %8966 = vmatprep.mubr.msk.f32.mxu1 %vm10642_vm0, %v13927_v58  ;;  %v1856_v22 = vld [vmem:[%s13919_s2 + $0xe8] sm:$0xff] }
 0x25c   : > { %10128 = vmatprep.subr.bf16.mxu1 %v11695_v29  ;;  %v7635_v29 = vld [vmem:[%s13919_s2 + $0x2a0] sm:$0xff] }
 0x25d   : > { %2676 = vmatmul.mubr.f32.gmra.mrb[90].mxu0 %v7635_v29  ;;  %v7694_v29 = vld [vmem:[%s13919_s2 + $0x408] sm:$0xff] }
 0x25e   : > { %8967 = vmatmul.mubr.msk.f32.gmra.mrb[38].mxu1 %vm1866_vm8, %v1847_v27  ;;  %v7603_v27 = vld [vmem:[%s13919_s2 + $0x210] sm:$0xff] }
 0x25f   : > { %10130 = vmatpush3.bf16.msra.mxu1 %v11718_v41  ;;  %8969 = vmatprep.mubr.msk.f32.mxu1 %vm10642_vm0, %v13927_v58  ;;  %v1859_v41 = vld [vmem:[%s13919_s2 + $0x100] sm:$0xff] }
 0x260   : > { %10132 = vmatprep.subr.bf16.mxu1 %v11711_v8  ;;  %v7639_v8 = vld [vmem:[%s13919_s2 + $0x2c0] sm:$0xff] }
 0x261   : > { %2680 = vmatprep.mubr.f32.mxu0 %v7639_v8  ;;  %v7609_v8 = vld [vmem:[%s13919_s2 + $0x240] sm:$0xff] }
 0x262   : > { %8970 = vmatmul.mubr.msk.f32.gmra.mrb[40].mxu1 %vm1866_vm8, %v1850_v33  ;;  %2681 = vmatmul.mubr.f32.gmra.mrb[92].mxu0 %v7638_v12  ;;  %v7692_v33 = vld [vmem:[%s13919_s2 + $0x3f8] sm:$0xff]  ;;  %v7698_v12 = vld [vmem:[%s13919_s2 + $0x428] sm:$0xff] }
 0x263   : > { %10134 = vmatpush3.bf16.msra.mxu1 %v11734_v61  ;;  %8972 = vmatprep.mubr.msk.f32.mxu1 %vm10642_vm0, %v13927_v58  ;;  %v7645_v61 = vld [vmem:[%s13919_s2 + $0x2f0] sm:$0xff] }
 0x264   : > { %10135 = vmatprep.subr.bf16.mxu1 %v13926_v3  ;;  %2685 = vmatprep.mubr.f32.mxu0 %v7642_v38  ;;  %v7697_v38 = vld [vmem:[%s13919_s2 + $0x420] sm:$0xff] }
 0x266   : > { %8973 = vmatmul.mubr.msk.f32.gmra.mrb[42].mxu1 %vm1866_vm8, %v1853_v52  ;;  %2686 = vmatmul.mubr.f32.gmra.mrb[94].mxu0 %v7641_v63  ;;  %v7606_v52 = vld [vmem:[%s13919_s2 + $0x228] sm:$0xff]  ;;  %v7701_v63 = vld [vmem:[%s13919_s2 + $0x440] sm:$0xff] }
 0x267   : > { %8975 = vmatprep.mubr.msk.f32.mxu1 %vm10642_vm0, %v13927_v58  ;;  %2690 = vmatprep.mubr.f32.mxu0 %v7645_v61  ;;  %v7700_v61 = vld [vmem:[%s13919_s2 + $0x438] sm:$0xff] }
 0x26a   : > { %8976 = vmatmul.mubr.msk.f32.gmra.mrb[44].mxu1 %vm1866_vm8, %v1856_v22  ;;  %2691 = vmatmul.mubr.f32.gmra.mrb[96].mxu0 %v7644_v14  ;;  %v7695_v22 = vld [vmem:[%s13919_s2 + $0x410] sm:$0xff]  ;;  %v7704_v14 = vld [vmem:[%s13919_s2 + $0x458] sm:$0xff] }
 0x26b   : > { %8978 = vmatprep.mubr.msk.f32.mxu1 %vm10642_vm0, %v13927_v58  ;;  %2695 = vmatprep.mubr.f32.mxu0 %v7648_v25  ;;  %v7581_v25 = vld [vmem:[%s13919_s2 + $0x160] sm:$0xff] }
 0x26e   : > { %8979 = vmatmul.mubr.msk.f32.gmra.mrb[46].mxu1 %vm1866_vm8, %v1859_v41  ;;  %2696 = vmatmul.mubr.f32.gmra.mrb[98].mxu0 %v7647_v21  ;;  %v7613_v41 = vld [vmem:[%s13919_s2 + $0x260] sm:$0x3]  ;;  %v7707_v21 = vld [vmem:[%s13919_s2 + $0x470] sm:$0xff] }
 0x26f   : > { %8981 = vmatprep.mubr.msk.f32.mxu1 %vm10642_vm0, %v13927_v58  ;;  %2700 = vmatprep.mubr.f32.mxu0 %v7651_v15  ;;  %v7710_v15 = vld [vmem:[%s13919_s2 + $0x488] sm:$0xff] }
 0x272   : > { %8982 = vmatmul.mubr.msk.f32.gmra.mrb[48].mxu1 %vm1866_vm8, %v1862_v54  ;;  %2701 = vmatmul.mubr.f32.gmra.mrb[100].mxu0 %v7650_v2  ;;  %v7612_v54 = vld [vmem:[%s13919_s2 + $0x258] sm:$0x3]  ;;  %v7709_v2 = vld [vmem:[%s13919_s2 + $0x480] sm:$0xff] }
 0x273   : > { %8984 = vmatprep.mubr.msk.f32.mxu1 %vm10642_vm0, %v13927_v58  ;;  %2705 = vmatprep.mubr.f32.mxu0 %v7654_v19  ;;  %v7712_v19 = vld [vmem:[%s13919_s2 + $0x498] sm:$0xff] }
 0x276   : > { %8985 = vmatmul.mubr.msk.f32.gmra.mrb[50].mxu1 %vm1866_vm8, %v1865_v59  ;;  %2706 = vmatmul.mubr.f32.gmra.mrb[102].mxu0 %v7653_v18  ;;  %v7578_v59 = vld [vmem:[%s13919_s2 + $0x148] sm:$0xff] }
 0x277   : > { %2313 = vmatprep.mubr.f32.mxu1 %v7577_v55  ;;  %2710 = vmatprep.mubr.f32.mxu0 %v7657_v13  ;;  %v7703_v55 = vld [vmem:[%s13919_s2 + $0x450] sm:$0xff]  ;;  %v7590_v18 = vld [vmem:[%s13919_s2 + $0x1a8] sm:$0xff]  ;;  %v7593_v13 = vld [vmem:[%s13919_s2 + $0x1c0] sm:$0xff] }
 0x27a   : > { %2314 = vmatmul.mubr.f32.vlgmr.msra.gmra.mrb[52].mxu1 %v7576_v62  ;;  %2711 = vmatmul.mubr.f32.gmra.mrb[104].mxu0 %v7656_v46  ;;  %v7706_v62 = vld [vmem:[%s13919_s2 + $0x468] sm:$0xff]  ;;  %v7719_v46 = vld [vmem:[%s13919_s2 + $0x4d0] sm:$0x3] }
 0x27b   : > { %10137 = vmatpush3.bf16.msra.mxu1 %v11724_v47  ;;  %2318 = vmatprep.mubr.f32.mxu1 %v7580_v43  ;;  %v7584_v43 = vld [vmem:[%s13919_s2 + $0x178] sm:$0xff] }
 0x27c   : > { %10138 = vmatprep.subr.bf16.mxu1 %v13926_v3  ;;  %2715 = vmatprep.mubr.f32.mxu0 %v7660_v23  ;;  %v7599_v23 = vld [vmem:[%s13919_s2 + $0x1f0] sm:$0xff] }
 0x27e   : > { %2319 = vmatmul.mubr.f32.gmra.mrb[54].mxu1 %v7579_v9  ;;  %2716 = vmatmul.mubr.f32.gmra.mrb[106].mxu0 %v7659_v45  ;;  %v7587_v9 = vld [vmem:[%s13919_s2 + $0x190] sm:$0xff]  ;;  %v7602_v45 = vld [vmem:[%s13919_s2 + $0x208] sm:$0xff] }
 0x27f   : > { %10140 = vmatpush3.bf16.msra.mxu1 %v11736_v40  ;;  %2323 = vmatprep.mubr.f32.mxu1 %v7583_v10  ;;  %v7713_v10 = vld [vmem:[%s13919_s2 + $0x4a0] sm:$0xff] }
 0x280   : > { %10141 = vmatprep.subr.bf16.mxu1 %v13926_v3  ;;  %2720 = vmatprep.mubr.f32.mxu0 %v7663_v44  ;;  %v7611_v44 = vld [vmem:[%s13919_s2 + $0x250] sm:$0xff] }
 0x282   : > { %2324 = vmatmul.mubr.f32.gmra.mrb[56].mxu1 %v7582_v42  ;;  %2721 = vmatmul.mubr.f32.gmra.mrb[108].mxu0 %v7662_v49  ;;  %v7716_v42 = vld [vmem:[%s13919_s2 + $0x4b8] sm:$0xff]  ;;  %v7614_v49 = vld [vmem:[%s13919_s2 + $0x268] sm:$0x3] }
 0x283   : > { %10143 = vmatpush3.bf16.msra.mxu1 %v11742_v48  ;;  %2328 = vmatprep.mubr.f32.mxu1 %v7586_v36  ;;  %v7715_v36 = vld [vmem:[%s13919_s2 + $0x4b0] sm:$0xff] }
 0x284   : > { %10144 = vmatprep.subr.bf16.mxu1 %v13926_v3  ;;  %2725 = vmatprep.mubr.f32.mxu0 %v7666_v31 }
 0x286   : > { %2329 = vmatmul.mubr.f32.gmra.mrb[58].mxu1 %v7585_v6  ;;  %2726 = vmatmul.mubr.f32.gmra.mrb[110].mxu0 %v7665_v5  ;;  %v7718_v6 = vld [vmem:[%s13919_s2 + $0x4c8] sm:$0x3] }
 0x287   : > { %10146 = vmatpush3.bf16.msra.mxu1 %v11744_v37  ;;  %2333 = vmatprep.mubr.f32.mxu1 %v7589_v50  ;;  %v7596_v50 = vld [vmem:[%s13919_s2 + $0x1d8] sm:$0xff] }
 0x288   : > { %10147 = vmatprep.subr.bf16.mxu1 %v13926_v3  ;;  %3017 = vmatprep.mubr.f32.mxu0 %v7683_v34 }
 0x28a   : > { %2334 = vmatmul.mubr.f32.gmra.mrb[60].mxu1 %v7588_v60  ;;  %3018 = vmatmul.mubr.f32.vlgmr.msra.gmra.mrb[112].mxu0 %v7682_v4  ;;  %v7605_v60 = vld [vmem:[%s13919_s2 + $0x220] sm:$0xff] }
 0x28b   : > { %10149 = vmatpush3.bf16.msra.mxu1 %v11750_v57  ;;  %2338 = vmatprep.mubr.f32.mxu1 %v7592_v51  ;;  %v7608_v51 = vld [vmem:[%s13919_s2 + $0x238] sm:$0xff] }
 0x28c   : > { %9007 = vmatprep.subr.mxu1 %v13927_v58  ;;  %3022 = vmatprep.mubr.f32.mxu0 %v7686_v26 }
 0x28e   : > { %2339 = vmatmul.mubr.f32.gmra.mrb[62].mxu1 %v7591_v1  ;;  %3023 = vmatmul.mubr.f32.gmra.mrb[114].mxu0 %v7685_v20  ;;  %v7631_v1 = vld [vmem:[%s13919_s2 + $0x280] sm:$0xff] }
 0x28f   : > { %9008 = vmatpush3.msk.msra.mxu1 %vm1906_vm7, %v11814_v39  ;;  %2343 = vmatprep.mubr.f32.mxu1 %v7595_v30  ;;  %v7634_v30 = vld [vmem:[%s13919_s2 + $0x298] sm:$0xff] }
 0x290   : > { %10182 = vmatprep.subr.bf16.mxu1 %v13926_v3  ;;  %3027 = vmatprep.mubr.f32.mxu0 %v7689_v35 }
 0x292   : > { %2344 = vmatmul.mubr.f32.gmra.mrb[64].mxu1 %v7594_v28  ;;  %3028 = vmatmul.mubr.f32.gmra.mrb[116].mxu0 %v7688_v17 }
 0x293   : > { %2348 = vmatprep.mubr.f32.mxu1 %v7598_v16  ;;  %3032 = vmatprep.mubr.f32.mxu0 %v7692_v33 }
 0x296   : > { %2349 = vmatmul.mubr.f32.gmra.mrb[66].mxu1 %v7597_v24  ;;  %3033 = vmatmul.mubr.f32.gmra.mrb[118].mxu0 %v7691_v0 }
 0x297   : > { %2353 = vmatprep.mubr.f32.mxu1 %v7601_v32  ;;  %3037 = vmatprep.mubr.f32.mxu0 %v7695_v22  ;;  %v7655_v22 = vld [vmem:[%s13919_s2 + $0x340] sm:$0xff] }
 0x29a   : > { %2354 = vmatmul.mubr.f32.gmra.mrb[68].mxu1 %v7600_v56  ;;  %3038 = vmatmul.mubr.f32.gmra.mrb[120].mxu0 %v7694_v29 }
 0x29b   : > { %2358 = vmatprep.mubr.f32.mxu1 %v7604_v7  ;;  %3042 = vmatprep.mubr.f32.mxu0 %v7698_v12  ;;  %v7658_v12 = vld [vmem:[%s13919_s2 + $0x358] sm:$0xff] }
 0x29e   : > { %2359 = vmatmul.mubr.f32.gmra.mrb[70].mxu1 %v7603_v27  ;;  %3043 = vmatmul.mubr.f32.gmra.mrb[122].mxu0 %v7697_v38 }
 0x29f   : > { %2363 = vmatprep.mubr.f32.mxu1 %v7607_v53  ;;  %3047 = vmatprep.mubr.f32.mxu0 %v7701_v63 }
 0x2a2   : > { %2364 = vmatmul.mubr.f32.gmra.mrb[72].mxu1 %v7606_v52  ;;  %3048 = vmatmul.mubr.f32.gmra.mrb[124].mxu0 %v7700_v61  ;;  %v7661_v61 = vld [vmem:[%s13919_s2 + $0x370] sm:$0xff] }
 0x2a3   : > { %2368 = vmatprep.mubr.f32.mxu1 %v7610_v11  ;;  %3052 = vmatprep.mubr.f32.mxu0 %v7704_v14 }
 0x2a6   : > { %2369 = vmatmul.mubr.f32.gmra.mrb[74].mxu1 %v7609_v8  ;;  %3053 = vmatmul.mubr.f32.gmra.mrb[126].mxu0 %v7703_v55 }
 0x2a7   : > { %2373 = vmatprep.mubr.f32.mxu1 %v7613_v41  ;;  %3057 = vmatprep.mubr.f32.mxu0 %v7707_v21 }
 0x2aa   : > { %2374 = vmatmul.mubr.f32.gmra.mrb[76].mxu1 %v7612_v54  ;;  %3058 = vmatmul.mubr.f32.gmra.mrb[128].mxu0 %v7706_v62 }
 0x2ab   : > { %9009 = vmatprep.mubr.msk.f32.mxu1 %vm10642_vm0, %v13927_v58  ;;  %3062 = vmatprep.mubr.f32.mxu0 %v7710_v15  ;;  %v7667_v15 = vld [vmem:[%s13919_s2 + $0x3a0] sm:$0x3] }
 0x2ae   : > { %9010 = vmatmul.mubr.msk.f32.vlgmr.msra.gmra.mrb[78].mxu1 %vm1866_vm8, %v7578_v59  ;;  %3063 = vmatmul.mubr.f32.gmra.mrb[130].mxu0 %v7709_v2 }
 0x2af   : > { %10184 = vmatpush3.bf16.msra.mxu1 %v11724_v47  ;;  %9012 = vmatprep.mubr.msk.f32.mxu1 %vm10642_vm0, %v13927_v58 }
 0x2b0   : > { %10185 = vmatprep.subr.bf16.mxu1 %v13926_v3  ;;  %3067 = vmatprep.mubr.f32.mxu0 %v7713_v10 }
 0x2b2   : > { %9013 = vmatmul.mubr.msk.f32.gmra.mrb[80].mxu1 %vm1866_vm8, %v7581_v25  ;;  %3068 = vmatmul.mubr.f32.gmra.mrb[132].mxu0 %v7712_v19  ;;  %v7664_v25 = vld [vmem:[%s13919_s2 + $0x388] sm:$0xff]  ;;  %v7684_v19 = vld [vmem:[%s13919_s2 + $0x3b8] sm:$0xff] }
 0x2b3   : > { %10187 = vmatpush3.bf16.msra.mxu1 %v11736_v40  ;;  %9015 = vmatprep.mubr.msk.f32.mxu1 %vm10642_vm0, %v13927_v58 }
 0x2b4   : > { %10188 = vmatprep.subr.bf16.mxu1 %v13926_v3  ;;  %3072 = vmatprep.mubr.f32.mxu0 %v7716_v42 }
 0x2b6   : > { %9016 = vmatmul.mubr.msk.f32.gmra.mrb[82].mxu1 %vm1866_vm8, %v7584_v43  ;;  %3073 = vmatmul.mubr.f32.gmra.mrb[134].mxu0 %v7715_v36 }
 0x2b7   : > { %10190 = vmatpush3.bf16.msra.mxu1 %v11742_v48  ;;  %9018 = vmatprep.mubr.msk.f32.mxu1 %vm10642_vm0, %v13927_v58 }
 0x2b8   : > { %10191 = vmatprep.subr.bf16.mxu1 %v13926_v3  ;;  %3077 = vmatprep.mubr.f32.mxu0 %v7719_v46 }
 0x2ba   : > { %9019 = vmatmul.mubr.msk.f32.gmra.mrb[84].mxu1 %vm1866_vm8, %v7587_v9  ;;  %3078 = vmatmul.mubr.f32.gmra.mrb[136].mxu0 %v7718_v6 }
 0x2bb   : > { %10193 = vmatpush3.bf16.msra.mxu1 %v11744_v37  ;;  %9021 = vmatprep.mubr.msk.f32.mxu1 %vm10642_vm0, %v13927_v58 }
 0x2bc   : > { %10194 = vmatprep.subr.bf16.mxu1 %v13926_v3  ;;  %9196 = vmatprep.mubr.msk.f32.mxu0 %vm10642_vm0, %v13927_v58 }
 0x2be   : > { %9022 = vmatmul.mubr.msk.f32.gmra.mrb[86].mxu1 %vm1866_vm8, %v7590_v18 }
 0x2bf   : > { %10196 = vmatpush3.bf16.msra.mxu1 %v11750_v57  ;;  %9024 = vmatprep.mubr.msk.f32.mxu1 %vm10642_vm0, %v13927_v58 }
 0x2c0   : > { %9068 = vmatprep.subr.mxu1 %v13927_v58 }
 0x2c2   : > { %9025 = vmatmul.mubr.msk.f32.gmra.mrb[88].mxu1 %vm1866_vm8, %v7593_v13  ;;  %v7687_v13 = vld [vmem:[%s13919_s2 + $0x3d0] sm:$0xff] }
 0x2c3   : > { %9069 = vmatpush3.msk.msra.mxu1 %vm1906_vm7, %v11814_v39  ;;  %9027 = vmatprep.mubr.msk.f32.mxu1 %vm10642_vm0, %v13927_v58 }
 0x2c4   : > { %10229 = vmatprep.subr.bf16.mxu1 %v13926_v3 }
 0x2c6   : > { %9028 = vmatmul.mubr.msk.f32.gmra.mrb[90].mxu1 %vm1866_vm8, %v7596_v50 }
 0x2c7   : > { %9030 = vmatprep.mubr.msk.f32.mxu1 %vm10642_vm0, %v13927_v58 }
 0x2ca   : > { %9031 = vmatmul.mubr.msk.f32.gmra.mrb[92].mxu1 %vm1866_vm8, %v7599_v23 }
 0x2cb   : > { %9033 = vmatprep.mubr.msk.f32.mxu1 %vm10642_vm0, %v13927_v58 }
 0x2ce   : > { %9034 = vmatmul.mubr.msk.f32.gmra.mrb[94].mxu1 %vm1866_vm8, %v7602_v45  ;;  %v7690_v45 = vld [vmem:[%s13919_s2 + $0x3e8] sm:$0xff] }
 0x2cf   : > { %9036 = vmatprep.mubr.msk.f32.mxu1 %vm10642_vm0, %v13927_v58 }
 0x2d2   : > { %9037 = vmatmul.mubr.msk.f32.gmra.mrb[96].mxu1 %vm1866_vm8, %v7605_v60 }
 0x2d3   : > { %9039 = vmatprep.mubr.msk.f32.mxu1 %vm10642_vm0, %v13927_v58 }
 0x2d6   : > { %9040 = vmatmul.mubr.msk.f32.gmra.mrb[98].mxu1 %vm1866_vm8, %v7608_v51 }
 0x2d7   : > { %9042 = vmatprep.mubr.msk.f32.mxu1 %vm10642_vm0, %v13927_v58 }
 0x2da   : > { %9043 = vmatmul.mubr.msk.f32.gmra.mrb[100].mxu1 %vm1866_vm8, %v7611_v44 }
 0x2db   : > { %9045 = vmatprep.mubr.msk.f32.mxu1 %vm10642_vm0, %v13927_v58 }
 0x2de   : > { %9046 = vmatmul.mubr.msk.f32.gmra.mrb[102].mxu1 %vm1866_vm8, %v7614_v49  ;;  %v7693_v49 = vld [vmem:[%s13919_s2 + $0x400] sm:$0xff] }
 0x2df   : > { %9070 = vmatprep.mubr.msk.f32.mxu1 %vm10642_vm0, %v13927_v58 }
 0x2e2   : > { %9071 = vmatmul.mubr.msk.f32.vlgmr.msra.gmra.mrb[104].mxu1 %vm1866_vm8, %v7631_v1 }
 0x2e3   : > { %10231 = vmatpush3.bf16.msra.mxu1 %v11724_v47  ;;  %9073 = vmatprep.mubr.msk.f32.mxu1 %vm10642_vm0, %v13927_v58  ;;  %v7637_v47 = vld [vmem:[%s13919_s2 + $0x2b0] sm:$0xff] }
 0x2e4   : > { %10232 = vmatprep.subr.bf16.mxu1 %v13926_v3 }
 0x2e5   : > { %v8061_v31 = vpop.f32.mrb[0].mxu1 }
 0x2e6   : > { %v8062_v5 = vpop.f32.mrb[1].mxu1  ;;  %9074 = vmatmul.mubr.msk.f32.gmra.mrb[106].mxu1 %vm1866_vm8, %v7634_v30 }
 0x2e7   : > { %v12310_v28 = vadd.f32 %v8062_v5, %v8061_v31  ;;  %10234 = vmatpush3.bf16.msra.mxu1 %v11736_v40  ;;  %9076 = vmatprep.mubr.msk.f32.mxu1 %vm10642_vm0, %v13927_v58  ;;  %v7640_v40 = vld [vmem:[%s13919_s2 + $0x2c8] sm:$0xff]  ;;  %v7696_v5 = vld [vmem:[%s13919_s2 + $0x418] sm:$0xff] }
 0x2e8   : > { %10235 = vmatprep.subr.bf16.mxu1 %v13926_v3 }
 0x2e9   : > { %v8064_v16 = vpop.f32.mrb[2].mxu1 }
 0x2ea   : > { %v8065_v34 = vpop.f32.mrb[3].mxu1  ;;  %9077 = vmatmul.mubr.msk.f32.gmra.mrb[108].mxu1 %vm1866_vm8, %v7637_v47 }
 0x2eb   : > { %v12320_v4 = vadd.f32 %v8065_v34, %v8064_v16  ;;  %10237 = vmatpush3.bf16.msra.mxu1 %v11742_v48  ;;  %9079 = vmatprep.mubr.msk.f32.mxu1 %vm10642_vm0, %v13927_v58  ;;  %v7643_v48 = vld [vmem:[%s13919_s2 + $0x2e0] sm:$0xff]  ;;  %v7699_v34 = vld [vmem:[%s13919_s2 + $0x430] sm:$0xff] }
 0x2ec   : > { %10238 = vmatprep.subr.bf16.mxu1 %v13926_v3 }
 0x2ed   : > { %v8067_v24 = vpop.f32.mrb[4].mxu1 }
 0x2ee   : > { %v8068_v32 = vpop.f32.mrb[5].mxu1  ;;  %9080 = vmatmul.mubr.msk.f32.gmra.mrb[110].mxu1 %vm1866_vm8, %v7640_v40 }
 0x2ef   : > { %v12330_v26 = vadd.f32 %v8068_v32, %v8067_v24  ;;  %10240 = vmatpush3.bf16.msra.mxu1 %v11744_v37  ;;  %9082 = vmatprep.mubr.msk.f32.mxu1 %vm10642_vm0, %v13927_v58  ;;  %v7646_v37 = vld [vmem:[%s13919_s2 + $0x2f8] sm:$0xff]  ;;  %v7702_v32 = vld [vmem:[%s13919_s2 + $0x448] sm:$0xff] }
 0x2f0   : > { %10241 = vmatprep.subr.bf16.mxu1 %v13926_v3 }
 0x2f1   : > { %v8070_v20 = vpop.f32.mrb[6].mxu1 }
 0x2f2   : > { %v8071_v56 = vpop.f32.mrb[7].mxu1  ;;  %9083 = vmatmul.mubr.msk.f32.gmra.mrb[112].mxu1 %vm1866_vm8, %v7643_v48 }
 0x2f3   : > { %v12340_v7 = vadd.f32 %v8071_v56, %v8070_v20  ;;  %10243 = vmatpush3.bf16.msra.mxu1 %v11750_v57  ;;  %9085 = vmatprep.mubr.msk.f32.mxu1 %vm10642_vm0, %v13927_v58  ;;  %v7649_v57 = vld [vmem:[%s13919_s2 + $0x310] sm:$0xff]  ;;  %v7705_v56 = vld [vmem:[%s13919_s2 + $0x460] sm:$0xff] }
 0x2f4   : > { %9129 = vmatprep.subr.mxu1 %v13927_v58 }
 0x2f5   : > { %v8073_v35 = vpop.f32.mrb[8].mxu1 }
 0x2f6   : > { %v8074_v17 = vpop.f32.mrb[9].mxu1  ;;  %9086 = vmatmul.mubr.msk.f32.gmra.mrb[114].mxu1 %vm1866_vm8, %v7646_v37 }
 0x2f7   : > { %9130 = vmatpush3.msk.msra.mxu1 %vm1906_vm7, %v11814_v39  ;;  %9088 = vmatprep.mubr.msk.f32.mxu1 %vm10642_vm0, %v13927_v58  ;;  %v12357_v27 = vadd.f32 %v8074_v17, %v8073_v35  ;;  %v7652_v39 = vld [vmem:[%s13919_s2 + $0x328] sm:$0xff]  ;;  %v7708_v17 = vld [vmem:[%s13919_s2 + $0x478] sm:$0xff] }
 0x2f8   : > { %10280 = vmatprep.subr.bf16.mxu1 %v13926_v3 }
 0x2f9   : > { %v8076_v53 = vpop.f32.mrb[10].mxu1 }
 0x2fa   : > { %v8077_v33 = vpop.f32.mrb[11].mxu1  ;;  %9089 = vmatmul.mubr.msk.f32.gmra.mrb[116].mxu1 %vm1866_vm8, %v7649_v57  ;;  %v8251_v57 = vpop.f32.mrb[86].mxu0 }
 0x2fb   : > { %9091 = vmatprep.mubr.msk.f32.mxu1 %vm10642_vm0, %v13927_v58  ;;  %v12366_v0 = vadd.f32 %v8077_v33, %v8076_v53  ;;  %v8252_v53 = vpop.f32.mrb[87].mxu0 }
 0x2fd   : > { %v8079_v52 = vpop.f32.mrb[12].mxu1 }
 0x2fe   : > { %v8080_v11 = vpop.f32.mrb[13].mxu1  ;;  %9092 = vmatmul.mubr.msk.f32.gmra.mrb[118].mxu1 %vm1866_vm8, %v7652_v39 }
 0x2ff   : > { %9094 = vmatprep.mubr.msk.f32.mxu1 %vm10642_vm0, %v13927_v58  ;;  %v12374_v29 = vadd.f32 %v8080_v11, %v8079_v52  ;;  %v7711_v11 = vld [vmem:[%s13919_s2 + $0x490] sm:$0xff] }
 0x301   : > { %v8082_v8 = vpop.f32.mrb[14].mxu1 }
 0x302   : > { %v8083_v41 = vpop.f32.mrb[15].mxu1  ;;  %9095 = vmatmul.mubr.msk.f32.gmra.mrb[120].mxu1 %vm1866_vm8, %v7655_v22 }
 0x303   : > { %9097 = vmatprep.mubr.msk.f32.mxu1 %vm10642_vm0, %v13927_v58  ;;  %v12382_v38 = vadd.f32 %v8083_v41, %v8082_v8 }
 0x305   : > { %v8085_v54 = vpop.f32.mrb[16].mxu1 }
 0x306   : > { %v8086_v63 = vpop.f32.mrb[17].mxu1  ;;  %9098 = vmatmul.mubr.msk.f32.gmra.mrb[122].mxu1 %vm1866_vm8, %v7658_v12 }
 0x307   : > { %9100 = vmatprep.mubr.msk.f32.mxu1 %vm10642_vm0, %v13927_v58  ;;  %v12390_v59 = vadd.f32 %v8086_v63, %v8085_v54 }
 0x309   : > { %v8088_v14 = vpop.f32.mrb[18].mxu1 }
 0x30a   : > { %v8089_v55 = vpop.f32.mrb[19].mxu1  ;;  %9101 = vmatmul.mubr.msk.f32.gmra.mrb[124].mxu1 %vm1866_vm8, %v7661_v61 }
 0x30b   : > { %9103 = vmatprep.mubr.msk.f32.mxu1 %vm10642_vm0, %v13927_v58  ;;  %v12398_v21 = vadd.f32 %v8089_v55, %v8088_v14 }
 0x30d   : > { %v8091_v62 = vpop.f32.mrb[20].mxu1 }
 0x30e   : > { %v8092_v43 = vpop.f32.mrb[21].mxu1  ;;  %9104 = vmatmul.mubr.msk.f32.gmra.mrb[126].mxu1 %vm1866_vm8, %v7664_v25  ;;  %v7717_v25 = vld [vmem:[%s13919_s2 + $0x4c0] sm:$0xff] }
 0x30f   : > { %9106 = vmatprep.mubr.msk.f32.mxu1 %vm10642_vm0, %v13927_v58  ;;  %v12406_v2 = vadd.f32 %v8092_v43, %v8091_v62 }
 0x311   : > { %v8094_v9 = vpop.f32.mrb[22].mxu1 }
 0x312   : > { %v8095_v10 = vpop.f32.mrb[23].mxu1  ;;  %9107 = vmatmul.mubr.msk.f32.gmra.mrb[128].mxu1 %vm1866_vm8, %v7667_v15 }
 0x313   : > { %9131 = vmatprep.mubr.msk.f32.mxu1 %vm10642_vm0, %v13927_v58  ;;  %v12414_v18 = vadd.f32 %v8095_v10, %v8094_v9 }
 0x315   : > { %v8097_v42 = vpop.f32.mrb[24].mxu1 }
 0x316   : > { %v8098_v36 = vpop.f32.mrb[25].mxu1  ;;  %9132 = vmatmul.mubr.msk.f32.vlgmr.msra.gmra.mrb[130].mxu1 %vm1866_vm8, %v7684_v19  ;;  %v7720_v19 = vld [vmem:[%s13919_s2 + $0x4d8] sm:$0x3] }
 0x317   : > { %9134 = vmatprep.mubr.msk.f32.mxu1 %vm10642_vm0, %v13927_v58  ;;  %v12422_v46 = vadd.f32 %v8098_v36, %v8097_v42 }
 0x319   : > { %v2106_v6 = vpop.f32.mrb[26].mxu1 }
 0x31a   : > { %v12425_v50 = vadd.f32 %v12310_v28, %v2106_v6  ;;  %v8950_v23 = vpop.f32.mrb[27].mxu1  ;;  %9135 = vmatmul.mubr.msk.f32.gmra.mrb[132].mxu1 %vm1866_vm8, %v7687_v13 }
 0x31b   : > { %9137 = vmatprep.mubr.msk.f32.mxu1 %vm10642_vm0, %v13927_v58 }
 0x31d   : > { %v2111_v60 = vpop.f32.mrb[28].mxu1 }
 0x31e   : > { %v12434_v51 = vadd.f32 %v12320_v4, %v2111_v60  ;;  %v8953_v44 = vpop.f32.mrb[29].mxu1  ;;  %9138 = vmatmul.mubr.msk.f32.gmra.mrb[134].mxu1 %vm1866_vm8, %v7690_v45 }
 0x31f   : > { %9140 = vmatprep.mubr.msk.f32.mxu1 %vm10642_vm0, %v13927_v58 }
 0x321   : > { %v2116_v1 = vpop.f32.mrb[30].mxu1 }
 0x322   : > { %v12443_v30 = vadd.f32 %v12330_v26, %v2116_v1  ;;  %v8956_v31 = vpop.f32.mrb[31].mxu1  ;;  %9141 = vmatmul.mubr.msk.f32.gmra.mrb[136].mxu1 %vm1866_vm8, %v7693_v49 }
 0x323   : > { %9143 = vmatprep.mubr.msk.f32.mxu1 %vm10642_vm0, %v13927_v58 }
 0x325   : > { %v2121_v28 = vpop.f32.mrb[32].mxu1 }
 0x326   : > { %v12452_v47 = vadd.f32 %v12340_v7, %v2121_v28  ;;  %v8959_v16 = vpop.f32.mrb[33].mxu1  ;;  %9144 = vmatmul.mubr.msk.f32.gmra.mrb[138].mxu1 %vm1866_vm8, %v7696_v5 }
 0x327   : > { %9146 = vmatprep.mubr.msk.f32.mxu1 %vm10642_vm0, %v13927_v58 }
 0x328   : > { %v8254_v52 = vpop.f32.mrb[88].mxu0 }
 0x329   : > { %v2126_v4 = vpop.f32.mrb[34].mxu1  ;;  %v8255_v22 = vpop.f32.mrb[89].mxu0 }
 0x32a   : > { %v12461_v40 = vadd.f32 %v12357_v27, %v2126_v4  ;;  %v8962_v24 = vpop.f32.mrb[35].mxu1  ;;  %9147 = vmatmul.mubr.msk.f32.gmra.mrb[140].mxu1 %vm1866_vm8, %v7699_v34  ;;  %v12498_v8 = vadd.f32 %v8255_v22, %v8254_v52 }
 0x32b   : > { %9149 = vmatprep.mubr.msk.f32.mxu1 %vm10642_vm0, %v13927_v58 }
 0x32d   : > { %v2131_v26 = vpop.f32.mrb[36].mxu1 }
 0x32e   : > { %v12470_v48 = vadd.f32 %v12366_v0, %v2131_v26  ;;  %v8965_v20 = vpop.f32.mrb[37].mxu1  ;;  %9150 = vmatmul.mubr.msk.f32.gmra.mrb[142].mxu1 %vm1866_vm8, %v7702_v32  ;;  %v12491_v0 = vadd.f32 %v8252_v53, %v8251_v57 }
 0x32f   : > { %9152 = vmatprep.mubr.msk.f32.mxu1 %vm10642_vm0, %v13927_v58 }
 0x330   : > { %v8257_v54 = vpop.f32.mrb[90].mxu0 }
 0x331   : > { %v2136_v7 = vpop.f32.mrb[38].mxu1  ;;  %v8258_v63 = vpop.f32.mrb[91].mxu0 }
 0x332   : > { %v12479_v37 = vadd.f32 %v12374_v29, %v2136_v7  ;;  %v8968_v35 = vpop.f32.mrb[39].mxu1  ;;  %9153 = vmatmul.mubr.msk.f32.gmra.mrb[144].mxu1 %vm1866_vm8, %v7705_v56  ;;  %v12509_v14 = vadd.f32 %v8258_v63, %v8257_v54 }
 0x333   : > { %9155 = vmatprep.mubr.msk.f32.mxu1 %vm10642_vm0, %v13927_v58 }
 0x335   : > { %v2141_v27 = vpop.f32.mrb[40].mxu1  ;;  %v8260_v62 = vpop.f32.mrb[92].mxu0 }
 0x336   : > { %v12488_v33 = vadd.f32 %v12382_v38, %v2141_v27  ;;  %v8971_v39 = vpop.f32.mrb[41].mxu1  ;;  %9156 = vmatmul.mubr.msk.f32.gmra.mrb[146].mxu1 %vm1866_vm8, %v7708_v17  ;;  %v7714_v38 = vld [vmem:[%s13919_s2 + $0x4a8] sm:$0xff]  ;;  %v8261_v43 = vpop.f32.mrb[93].mxu0 }
 0x337   : > { %9158 = vmatprep.mubr.msk.f32.mxu1 %vm10642_vm0, %v13927_v58  ;;  %v12520_v9 = vadd.f32 %v8261_v43, %v8260_v62 }
 0x339   : > { %v2146_v29 = vpop.f32.mrb[42].mxu1  ;;  %v8263_v42 = vpop.f32.mrb[94].mxu0 }
 0x33a   : > { %v12501_v41 = vadd.f32 %v12390_v59, %v2146_v29  ;;  %v8974_v12 = vpop.f32.mrb[43].mxu1  ;;  %9159 = vmatmul.mubr.msk.f32.gmra.mrb[148].mxu1 %vm1866_vm8, %v7711_v11  ;;  %v8264_v36 = vpop.f32.mrb[95].mxu0 }
 0x33b   : > { %9161 = vmatprep.mubr.msk.f32.mxu1 %vm10642_vm0, %v13927_v58  ;;  %v12531_v6 = vadd.f32 %v8264_v36, %v8263_v42 }
 0x33d   : > { %v2151_v61 = vpop.f32.mrb[44].mxu1  ;;  %v8266_v45 = vpop.f32.mrb[96].mxu0 }
 0x33e   : > { %v12512_v55 = vadd.f32 %v12398_v21, %v2151_v61  ;;  %v8977_v59 = vpop.f32.mrb[45].mxu1  ;;  %9162 = vmatmul.mubr.msk.f32.gmra.mrb[150].mxu1 %vm1866_vm8, %v7714_v38  ;;  %v8267_v60 = vpop.f32.mrb[97].mxu0 }
 0x33f   : > { %9164 = vmatprep.mubr.msk.f32.mxu1 %vm10642_vm0, %v13927_v58  ;;  %v12539_v49 = vadd.f32 %v8267_v60, %v8266_v45 }
 0x341   : > { %v2156_v15 = vpop.f32.mrb[46].mxu1  ;;  %v8269_v5 = vpop.f32.mrb[98].mxu0 }
 0x342   : > { %v12523_v10 = vadd.f32 %v12406_v2, %v2156_v15  ;;  %v8980_v21 = vpop.f32.mrb[47].mxu1  ;;  %9165 = vmatmul.mubr.msk.f32.gmra.mrb[152].mxu1 %vm1866_vm8, %v7717_v25  ;;  %v8270_v28 = vpop.f32.mrb[99].mxu0 }
 0x343   : > { %9167 = vmatprep.mubr.msk.f32.mxu1 %vm10642_vm0, %v13927_v58 }
 0x345   : > { %v2161_v13 = vpop.f32.mrb[48].mxu1  ;;  %v8272_v24 = vpop.f32.mrb[100].mxu0 }
 0x346   : > { %v12534_v23 = vadd.f32 %v12414_v18, %v2161_v13  ;;  %v8983_v2 = vpop.f32.mrb[49].mxu1  ;;  %9168 = vmatmul.mubr.msk.f32.gmra.mrb[154].mxu1 %vm1866_vm8, %v7720_v19  ;;  %v12544_v18 = vadd.f32 %v8270_v28, %v8269_v5  ;;  %v8273_v32 = vpop.f32.mrb[101].mxu0 }
 0x347   : > { %9268 = vmatprep.mubr.msk.f32.mxu1 %vm10642_vm0, %v13927_v58  ;;  %v12548_v20 = vadd.f32 %v8273_v32, %v8272_v24 }
 0x349   : > { %v2166_v44 = vpop.f32.mrb[50].mxu1  ;;  %v8275_v35 = vpop.f32.mrb[102].mxu0 }
 0x34a   : > { %v12542_v1 = vadd.f32 %v12422_v46, %v2166_v44  ;;  %v8986_v31 = vpop.f32.mrb[51].mxu1  ;;  %v8276_v46 = vpop.f32.mrb[103].mxu0 }
 0x34b   : > { %v12552_v57 = vadd.f32 %v8276_v46, %v8275_v35 }
 0x34d   : > { %v8156_v16 = vpop.f32.mrb[52].mxu1  ;;  %v8278_v39 = vpop.f32.mrb[104].mxu0 }
 0x34e   : > { %v8157_v34 = vpop.f32.mrb[53].mxu1  ;;  %v8279_v52 = vpop.f32.mrb[105].mxu0 }
 0x34f   : > { %v12546_v4 = vadd.f32 %v8157_v34, %v8156_v16  ;;  %v12556_v22 = vadd.f32 %v8279_v52, %v8278_v39 }
 0x351   : > { %v8159_v26 = vpop.f32.mrb[54].mxu1  ;;  %v8281_v38 = vpop.f32.mrb[106].mxu0 }
 0x352   : > { %v8160_v56 = vpop.f32.mrb[55].mxu1  ;;  %v8282_v54 = vpop.f32.mrb[107].mxu0 }
 0x353   : > { %v12550_v7 = vadd.f32 %v8160_v56, %v8159_v26  ;;  %v12560_v61 = vadd.f32 %v8282_v54, %v8281_v38 }
 0x355   : > { %v8162_v17 = vpop.f32.mrb[56].mxu1  ;;  %v8284_v62 = vpop.f32.mrb[108].mxu0 }
 0x356   : > { %v8163_v27 = vpop.f32.mrb[57].mxu1  ;;  %v8285_v43 = vpop.f32.mrb[109].mxu0 }
 0x357   : > { %v12554_v53 = vadd.f32 %v8163_v27, %v8162_v17  ;;  %v12564_v21 = vadd.f32 %v8285_v43, %v8284_v62 }
 0x359   : > { %v8165_v11 = vpop.f32.mrb[58].mxu1  ;;  %v8287_v36 = vpop.f32.mrb[110].mxu0 }
 0x35a   : > { %v8166_v29 = vpop.f32.mrb[59].mxu1  ;;  %v8288_v13 = vpop.f32.mrb[111].mxu0 }
 0x35b   : > { %v12558_v12 = vadd.f32 %v8166_v29, %v8165_v11  ;;  %v12568_v45 = vadd.f32 %v8288_v13, %v8287_v36 }
 0x35d   : > { %v8168_v63 = vpop.f32.mrb[60].mxu1  ;;  %v8346_v31 = vpop.f32.mrb[112].mxu0 }
 0x35e   : > { %v8169_v59 = vpop.f32.mrb[61].mxu1  ;;  %v8347_v28 = vpop.f32.mrb[113].mxu0 }
 0x35f   : > { %v12562_v25 = vadd.f32 %v8169_v59, %v8168_v63  ;;  %v12572_v34 = vadd.f32 %v8347_v28, %v8346_v31 }
 0x361   : > { %v8171_v15 = vpop.f32.mrb[62].mxu1  ;;  %v8349_v32 = vpop.f32.mrb[114].mxu0 }
 0x362   : > { %v8172_v19 = vpop.f32.mrb[63].mxu1  ;;  %v8350_v26 = vpop.f32.mrb[115].mxu0 }
 0x363   : > { %v12566_v42 = vadd.f32 %v8172_v19, %v8171_v15  ;;  %v12576_v35 = vadd.f32 %v8350_v26, %v8349_v32 }
 0x365   : > { %v8174_v2 = vpop.f32.mrb[64].mxu1  ;;  %v8352_v27 = vpop.f32.mrb[116].mxu0 }
 0x366   : > { %v8175_v60 = vpop.f32.mrb[65].mxu1  ;;  %v8353_v11 = vpop.f32.mrb[117].mxu0 }
 0x367   : > { %v12570_v44 = vadd.f32 %v8175_v60, %v8174_v2  ;;  %v12582_v38 = vadd.f32 %v8353_v11, %v8352_v27 }
 0x369   : > { %v8177_v5 = vpop.f32.mrb[66].mxu1  ;;  %v8355_v54 = vpop.f32.mrb[118].mxu0 }
 0x36a   : > { %v8178_v16 = vpop.f32.mrb[67].mxu1  ;;  %v8356_v63 = vpop.f32.mrb[119].mxu0 }
 0x36b   : > { %v12574_v24 = vadd.f32 %v8178_v16, %v8177_v5  ;;  %v12584_v62 = vadd.f32 %v8356_v63, %v8355_v54 }
 0x36d   : > { %v8180_v56 = vpop.f32.mrb[68].mxu1  ;;  %v8358_v19 = vpop.f32.mrb[120].mxu0 }
 0x36e   : > { %v8181_v46 = vpop.f32.mrb[69].mxu1  ;;  %v8359_v2 = vpop.f32.mrb[121].mxu0 }
 0x36f   : > { %v12578_v17 = vadd.f32 %v8181_v46, %v8180_v56  ;;  %v12590_v31 = vadd.f32 %v8359_v2, %v8358_v19 }
 0x371   : > { %v8183_v39 = vpop.f32.mrb[70].mxu1  ;;  %v8361_v5 = vpop.f32.mrb[122].mxu0 }
 0x372   : > { %v8184_v52 = vpop.f32.mrb[71].mxu1  ;;  %v8362_v28 = vpop.f32.mrb[123].mxu0 }
 0x373   : > { %v12580_v29 = vadd.f32 %v8184_v52, %v8183_v39  ;;  %v12592_v32 = vadd.f32 %v8362_v28, %v8361_v5 }
 0x375   : > { %v8186_v59 = vpop.f32.mrb[72].mxu1  ;;  %v8364_v46 = vpop.f32.mrb[124].mxu0 }
 0x376   : > { %v8187_v43 = vpop.f32.mrb[73].mxu1  ;;  %v8365_v11 = vpop.f32.mrb[125].mxu0 }
 0x377   : > { %v12586_v15 = vadd.f32 %v8187_v43, %v8186_v59  ;;  %v12599_v54 = vadd.f32 %v8365_v11, %v8364_v46 }
 0x379   : > { %v8189_v36 = vpop.f32.mrb[74].mxu1  ;;  %v8367_v59 = vpop.f32.mrb[126].mxu0 }
 0x37a   : > { %v8190_v13 = vpop.f32.mrb[75].mxu1  ;;  %v8368_v19 = vpop.f32.mrb[127].mxu0 }
 0x37b   : > { %v12588_v60 = vadd.f32 %v8190_v13, %v8189_v36  ;;  %v12606_v2 = vadd.f32 %v8368_v19, %v8367_v59 }
 0x37d   : > { %v8192_v16 = vpop.f32.mrb[76].mxu1  ;;  %v8370_v5 = vpop.f32.mrb[128].mxu0 }
 0x37e   : > { %v8193_v26 = vpop.f32.mrb[77].mxu1  ;;  %v8371_v46 = vpop.f32.mrb[129].mxu0 }
 0x37f   : > { %v12594_v56 = vadd.f32 %v8193_v26, %v8192_v16 }
 0x381   : > { %v2445_v27 = vpop.f32.mrb[78].mxu1 }
 0x382   : > { %v12597_v39 = vadd.f32 %v12546_v4, %v2445_v27  ;;  %v9011_v52 = vpop.f32.mrb[79].mxu1  ;;  %v12613_v27 = vadd.f32 %v8371_v46, %v8370_v5 }
 0x385   : > { %v2450_v43 = vpop.f32.mrb[80].mxu1 }
 0x386   : > { %v12604_v36 = vadd.f32 %v12550_v7, %v2450_v43  ;;  %v9014_v13 = vpop.f32.mrb[81].mxu1  ;;  %v8373_v7 = vpop.f32.mrb[130].mxu0 }
 0x387   : > { %v8374_v43 = vpop.f32.mrb[131].mxu0 }
 0x388   : > { %v12620_v13 = vadd.f32 %v8374_v43, %v8373_v7 }
 0x389   : > { %v2455_v28 = vpop.f32.mrb[82].mxu1 }
 0x38a   : > { %v12611_v16 = vadd.f32 %v12554_v53, %v2455_v28  ;;  %v9017_v26 = vpop.f32.mrb[83].mxu1  ;;  %13928 = vst [vmem:[#allocation2_spill] sm:$0xff] %v12620_v13  ;;  %v8376_v28 = vpop.f32.mrb[132].mxu0 }
 0x38b   : > { %v8377_v4 = vpop.f32.mrb[133].mxu0 }
 0x38c   : > { %v12627_v52 = vadd.f32 %v8377_v4, %v8376_v28 }
 0x38d   : > { %v2460_v11 = vpop.f32.mrb[84].mxu1 }
 0x38e   : > { %v12618_v59 = vadd.f32 %v12558_v12, %v2460_v11  ;;  %v9020_v19 = vpop.f32.mrb[85].mxu1  ;;  %13929 = vst [vmem:[#allocation3_spill] sm:$0xff] %v12627_v52  ;;  %v8379_v12 = vpop.f32.mrb[134].mxu0 }
 0x38f   : > { %v8380_v19 = vpop.f32.mrb[135].mxu0 }
 0x390   : > { %v2512_v53 = vmax.f32 %v12452_v47, %v12618_v59  ;;  %v12632_v58 = vadd.f32 %v8380_v19, %v8379_v12 }
 0x391   : > { %v2465_v26 = vpop.f32.mrb[86].mxu1 }
 0x392   : > { %v12625_v5 = vadd.f32 %v12562_v25, %v2465_v26  ;;  %v9023_v46 = vpop.f32.mrb[87].mxu1 }
 0x393   : > { %v8382_v46 = vpop.f32.mrb[136].mxu0 }
 0x394   : > { %v2513_v63 = vmax.f32 %v12461_v40, %v12625_v5  ;;  %v8383_v4 = vpop.f32.mrb[137].mxu0 }
 0x395   : > { %v2470_v11 = vpop.f32.mrb[88].mxu1  ;;  %v12637_v52 = vadd.f32 %v8383_v4, %v8382_v46 }
 0x396   : > { %v2471_v7 = vadd.f32 %v12566_v42, %v2470_v11  ;;  %v9026_v43 = vpop.f32.mrb[89].mxu1 }
 0x398   : > { %v2514_v47 = vmax.f32 %v12470_v48, %v2471_v7 }
 0x399   : > { %v2475_v59 = vpop.f32.mrb[90].mxu1 }
 0x39a   : > { %v2476_v25 = vadd.f32 %v12570_v44, %v2475_v59  ;;  %v9029_v26 = vpop.f32.mrb[91].mxu1 }
 0x39c   : > { %v2515_v28 = vmax.f32 %v12479_v37, %v2476_v25 }
 0x39d   : > { %v2480_v40 = vpop.f32.mrb[92].mxu1 }
 0x39e   : > { %v2481_v5 = vadd.f32 %v12574_v24, %v2480_v40  ;;  %v9032_v13 = vpop.f32.mrb[93].mxu1 }
 0x3a0   : > { %v2516_v42 = vmax.f32 %v12488_v33, %v2481_v5 }
 0x3a1   : > { %v2485_v12 = vpop.f32.mrb[94].mxu1 }
 0x3a2   : > { %v2486_v11 = vadd.f32 %v12578_v17, %v2485_v12  ;;  %v9035_v48 = vpop.f32.mrb[95].mxu1 }
 0x3a4   : > { %v2517_v19 = vmax.f32 %v12501_v41, %v2486_v11 }
 0x3a5   : > { %v2490_v44 = vpop.f32.mrb[96].mxu1 }
 0x3a6   : > { %v2491_v7 = vadd.f32 %v12580_v29, %v2490_v44  ;;  %v9038_v43 = vpop.f32.mrb[97].mxu1 }
 0x3a8   : > { %v2518_v37 = vmax.f32 %v12512_v55, %v2491_v7 }
 0x3a9   : > { %v2495_v59 = vpop.f32.mrb[98].mxu1 }
 0x3aa   : > { %v2496_v25 = vadd.f32 %v12586_v15, %v2495_v59  ;;  %v9041_v26 = vpop.f32.mrb[99].mxu1  ;;  %v13930_v15 = vmax.f32 %v12425_v50, %v12597_v39 }
 0x3ac   : > { %v2519_v24 = vmax.f32 %v12523_v10, %v2496_v25 }
 0x3ad   : > { %v2500_v13 = vpop.f32.mrb[100].mxu1 }
 0x3ae   : > { %v2501_v33 = vadd.f32 %v12588_v60, %v2500_v13  ;;  %v9044_v46 = vpop.f32.mrb[101].mxu1 }
 0x3b0   : > { %v2520_v17 = vmax.f32 %v12534_v23, %v2501_v33  ;;  %v13931_v23 = vmax.f32 %v12434_v51, %v12604_v36 }
 0x3b1   : > { %v2505_v4 = vpop.f32.mrb[102].mxu1 }
 0x3b2   : > { %v2506_v41 = vadd.f32 %v12594_v56, %v2505_v4  ;;  %v9047_v40 = vpop.f32.mrb[103].mxu1 }
 0x3b4   : > { %v2521_v29 = vmax.f32 %v12542_v1, %v2506_v41 }
 0x3b5   : > { %v2797_v5 = vpop.f32.mrb[104].mxu1 }
 0x3b6   : > { %v2798_v55 = vadd.f32 %v12491_v0, %v2797_v5  ;;  %v9072_v12 = vpop.f32.mrb[105].mxu1  ;;  %v13932_v0 = vmax.f32 %v12443_v30, %v12611_v16 }
 0x3b8   : > { %v12655_v10 = vmax.f32 %v13930_v15, %v2798_v55 }
 0x3b9   : > { %v2802_v11 = vpop.f32.mrb[106].mxu1 }
 0x3ba   : > { %v2803_v60 = vadd.f32 %v12498_v8, %v2802_v11  ;;  %v9075_v48 = vpop.f32.mrb[107].mxu1 }
 0x3bc   : > { %v2862_v56 = vmax.f32 %v13931_v23, %v2803_v60 }
 0x3bd   : > { %v2807_v44 = vpop.f32.mrb[108].mxu1 }
 0x3be   : > { %v2808_v1 = vadd.f32 %v12509_v14, %v2807_v44  ;;  %v9078_v7 = vpop.f32.mrb[109].mxu1 }
 0x3c0   : > { %v12665_v43 = vmax.f32 %v13932_v0, %v2808_v1 }
 0x3c1   : > { %v2812_v50 = vpop.f32.mrb[110].mxu1 }
 0x3c2   : > { %v2813_v39 = vadd.f32 %v12520_v9, %v2812_v50  ;;  %v9081_v59 = vpop.f32.mrb[111].mxu1 }
 0x3c4   : > { %v12668_v25 = vmax.f32 %v2512_v53, %v2813_v39 }
 0x3c5   : > { %v2817_v8 = vpop.f32.mrb[112].mxu1 }
 0x3c6   : > { %v2818_v26 = vadd.f32 %v12531_v6, %v2817_v8  ;;  %v9084_v51 = vpop.f32.mrb[113].mxu1 }
 0x3c8   : > { %v12671_v36 = vmax.f32 %v2513_v63, %v2818_v26 }
 0x3c9   : > { %v2822_v14 = vpop.f32.mrb[114].mxu1 }
 0x3ca   : > { %v2823_v13 = vadd.f32 %v12539_v49, %v2822_v14  ;;  %v9087_v30 = vpop.f32.mrb[115].mxu1 }
 0x3cc   : > { %v12674_v16 = vmax.f32 %v2514_v47, %v2823_v13  ;;  %v3228_v47 = vld [vmem:[%s12689_s30 + $0x10] sm:$0xff] }
 0x3cd   : > { %v2827_v33 = vpop.f32.mrb[116].mxu1 }
 0x3ce   : > { %v2828_v9 = vadd.f32 %v12544_v18, %v2827_v33  ;;  %v9090_v46 = vpop.f32.mrb[117].mxu1 }
 0x3d0   : > { %v12677_v53 = vmax.f32 %v2515_v28, %v2828_v9 }
 0x3d1   : > { %v2832_v4 = vpop.f32.mrb[118].mxu1 }
 0x3d2   : > { %v2833_v6 = vadd.f32 %v12548_v20, %v2832_v4  ;;  %v9093_v41 = vpop.f32.mrb[119].mxu1  ;;  %v3229_v20 = vld [vmem:[%s12689_s30 + $0x18] sm:$0xff] }
 0x3d4   : > { %v12680_v40 = vmax.f32 %v2516_v42, %v2833_v6  ;;  %v10281_v42 = vpack.c.bf16 %v3229_v20, %v3228_v47 }
 0x3d5   : > { %v2837_v63 = vpop.f32.mrb[120].mxu1 }
 0x3d6   : > { %v2838_v5 = vadd.f32 %v12552_v57, %v2837_v63  ;;  %v9096_v49 = vpop.f32.mrb[121].mxu1  ;;  %10282 = vmatpush3.bf16.msra.mxu1 %v10281_v42  ;;  %v13933_v42 = vld [vmem:[#allocation2_spill] sm:$0xff] }
 0x3d7   : > { %10286 = vmatprep.subr.bf16.mxu1 %v13926_v3 }
 0x3d8   : > { %v12691_v18 = vmax.f32 %v2517_v19, %v2838_v5 }
 0x3d9   : > { %v2842_v28 = vpop.f32.mrb[122].mxu1 }
 0x3da   : > { %v2843_v55 = vadd.f32 %v12556_v22, %v2842_v28  ;;  %v9099_v12 = vpop.f32.mrb[123].mxu1 }
 0x3dc   : > { %v12696_v57 = vmax.f32 %v2518_v37, %v2843_v55 }
 0x3dd   : > { %v2847_v15 = vpop.f32.mrb[124].mxu1 }
 0x3de   : > { %v2848_v11 = vadd.f32 %v12560_v61, %v2847_v15  ;;  %v9102_v60 = vpop.f32.mrb[125].mxu1 }
 0x3e0   : > { %v12700_v48 = vmax.f32 %v2519_v24, %v2848_v11  ;;  %v13934_v11 = vld [vmem:[#allocation3_spill] sm:$0xff] }
 0x3e1   : > { %v2852_v19 = vpop.f32.mrb[126].mxu1 }
 0x3e2   : > { %v2853_v23 = vadd.f32 %v12564_v21, %v2852_v19  ;;  %v9105_v44 = vpop.f32.mrb[127].mxu1 }
 0x3e4   : > { %v12703_v1 = vmax.f32 %v2520_v17, %v2853_v23 }
 0x3e5   : > { %v2857_v7 = vpop.f32.mrb[128].mxu1 }
 0x3e6   : > { %v2858_v22 = vadd.f32 %v12568_v45, %v2857_v7  ;;  %v9108_v0 = vpop.f32.mrb[129].mxu1 }
 0x3e8   : > { %v12706_v37 = vmax.f32 %v2521_v29, %v2858_v22 }
 0x3e9   : > { %v3149_v50 = vpop.f32.mrb[130].mxu1 }
 0x3ea   : > { %v3150_v39 = vadd.f32 %v12572_v34, %v3149_v50  ;;  %v9133_v59 = vpop.f32.mrb[131].mxu1 }
 0x3eb   : > { %v3248_v59 = vld [vmem:[%s13936_s23 + $0x20] sm:$0xff] }
 0x3ec   : > { %v3213_v61 = vmax.f32 %v12655_v10, %v3150_v39 }
 0x3ed   : > { %v3154_v24 = vpop.f32.mrb[132].mxu1 }
 0x3ee   : > { %v3155_v8 = vadd.f32 %v12576_v35, %v3154_v24  ;;  %v9136_v26 = vpop.f32.mrb[133].mxu1  ;;  %v3250_v24 = vld [vmem:[%s13936_s23 + $0x30] sm:$0x3] }
 0x3ef   : > { %v3227_v26 = vld [vmem:[%s12689_s30 + $0x8] sm:$0xff] }
 0x3f0   : > { %v3214_v21 = vmax.f32 %v2862_v56, %v3155_v8  ;;  %v3226_v8 = vld [vmem:[%s12689_s30] sm:$0xff] }
 0x3f1   : > { %v3159_v51 = vpop.f32.mrb[134].mxu1 }
 0x3f2   : > { %v12711_v17 = vpack.c.bf16 %v3214_v21, %v3213_v61  ;;  %v3160_v14 = vadd.f32 %v12582_v38, %v3159_v51  ;;  %v9139_v45 = vpop.f32.mrb[135].mxu1  ;;  %v3249_v61 = vld [vmem:[%s13936_s23 + $0x28] sm:$0xff]  ;;  %v7743_v21 = vld [vmem:[%s13936_s23 + $0x38] sm:$0xff]  ;;  %v10284_v51 = vpack.c.bf16 %v3227_v26, %v3226_v8  ;;  %v3230_v8 = vld [vmem:[%s12689_s30 + $0x20] sm:$0xff] }
 0x3f3   : > { %v7745_v45 = vld [vmem:[%s13936_s23 + $0x48] sm:$0xff] }
 0x3f4   : > { %v3215_v29 = vmax.f32 %v12665_v43, %v3160_v14  ;;  %10246 = vmatpush3.bf16.msra.mxu0 %v12711_v17  ;;  %v7744_v14 = vld [vmem:[%s13936_s23 + $0x40] sm:$0xff]  ;;  %v3231_v26 = vld [vmem:[%s12689_s30 + $0x28] sm:$0xff] }
 0x3f5   : > { %v3164_v13 = vpop.f32.mrb[136].mxu1  ;;  %10247 = vmatprep.subr.bf16.mxu0 %v13926_v3 }
 0x3f6   : > { %v3165_v34 = vadd.f32 %v12584_v62, %v3164_v13  ;;  %v9142_v10 = vpop.f32.mrb[137].mxu1  ;;  %v7747_v13 = vld [vmem:[%s13936_s23 + $0x58] sm:$0xff] }
 0x3f7   : > { %v7749_v10 = vld [vmem:[%s13936_s23 + $0x68] sm:$0x3] }
 0x3f8   : > { %v3216_v35 = vmax.f32 %v12668_v25, %v3165_v34  ;;  %v7748_v34 = vld [vmem:[%s13936_s23 + $0x60] sm:$0xff] }
 0x3f9   : > { %v3169_v30 = vpop.f32.mrb[138].mxu1 }
 0x3fa   : > { %v12719_v56 = vpack.c.bf16 %v3216_v35, %v3215_v29  ;;  %v3170_v33 = vadd.f32 %v12590_v31, %v3169_v30  ;;  %v9145_v9 = vpop.f32.mrb[139].mxu1  ;;  %v7746_v29 = vld [vmem:[%s13936_s23 + $0x50] sm:$0xff] }
 0x3fc   : > { %v3217_v38 = vmax.f32 %v12671_v36, %v3170_v33  ;;  %10249 = vmatpush3.bf16.msra.mxu0 %v12719_v56 }
 0x3fd   : > { %v3174_v43 = vpop.f32.mrb[140].mxu1  ;;  %10250 = vmatprep.subr.bf16.mxu0 %v13926_v3 }
 0x3fe   : > { %v3175_v46 = vadd.f32 %v12592_v32, %v3174_v43  ;;  %v9148_v4 = vpop.f32.mrb[141].mxu1 }
 0x400   : > { %v3218_v62 = vmax.f32 %v12674_v16, %v3175_v46 }
 0x401   : > { %v3179_v6 = vpop.f32.mrb[142].mxu1 }
 0x402   : > { %v12727_v25 = vpack.c.bf16 %v3218_v62, %v3217_v38  ;;  %v3180_v41 = vadd.f32 %v12599_v54, %v3179_v6  ;;  %v9151_v63 = vpop.f32.mrb[143].mxu1 }
 0x404   : > { %v3219_v31 = vmax.f32 %v12677_v53, %v3180_v41  ;;  %10252 = vmatpush3.bf16.msra.mxu0 %v12727_v25 }
 0x405   : > { %v3184_v36 = vpop.f32.mrb[144].mxu1  ;;  %10253 = vmatprep.subr.bf16.mxu0 %v13926_v3 }
 0x406   : > { %v3185_v5 = vadd.f32 %v12606_v2, %v3184_v36  ;;  %v9154_v49 = vpop.f32.mrb[145].mxu1 }
 0x408   : > { %v3220_v32 = vmax.f32 %v12680_v40, %v3185_v5 }
 0x409   : > { %v3189_v47 = vpop.f32.mrb[146].mxu1 }
 0x40a   : > { %v12735_v16 = vpack.c.bf16 %v3220_v32, %v3219_v31  ;;  %v3190_v20 = vadd.f32 %v12613_v27, %v3189_v47  ;;  %v9157_v28 = vpop.f32.mrb[147].mxu1 }
 0x40c   : > { %v3221_v54 = vmax.f32 %v12691_v18, %v3190_v20  ;;  %10255 = vmatpush3.bf16.msra.mxu0 %v12735_v16 }
 0x40d   : > { %v3194_v53 = vpop.f32.mrb[148].mxu1  ;;  %10256 = vmatprep.subr.bf16.mxu0 %v13926_v3 }
 0x40e   : > { %v3195_v55 = vadd.f32 %v13933_v42, %v3194_v53  ;;  %v9160_v12 = vpop.f32.mrb[149].mxu1 }
 0x410   : > { %v3222_v2 = vmax.f32 %v12696_v57, %v3195_v55 }
 0x411   : > { %v3199_v15 = vpop.f32.mrb[150].mxu1 }
 0x412   : > { %v12743_v40 = vpack.c.bf16 %v3222_v2, %v3221_v54  ;;  %v3200_v60 = vadd.f32 %v13934_v11, %v3199_v15  ;;  %v9163_v19 = vpop.f32.mrb[151].mxu1 }
 0x413   : > { %v7773_v19 = vld [vmem:[%s13936_s23 + $0x78] sm:$0xff] }
 0x414   : > { %v3223_v27 = vmax.f32 %v12700_v48, %v3200_v60  ;;  %10258 = vmatpush3.bf16.msra.mxu0 %v12743_v40  ;;  %v13935_v48 = vmov 0.0   ;;  %v7772_v60 = vld [vmem:[%s13936_s23 + $0x70] sm:$0xff] }
 0x415   : > { %v3204_v18 = vpop.f32.mrb[152].mxu1  ;;  %10259 = vmatprep.subr.bf16.mxu0 %v13926_v3 }
 0x416   : > { %v3205_v23 = vadd.f32 %v12632_v58, %v3204_v18  ;;  %v9166_v44 = vpop.f32.mrb[153].mxu1  ;;  %v3244_v58 = vld [vmem:[%s13936_s23] sm:$0xff]  ;;  %v7775_v18 = vld [vmem:[%s13936_s23 + $0x88] sm:$0xff] }
 0x417   : > { %v7777_v44 = vld [vmem:[%s13936_s23 + $0x98] sm:$0xff] }
 0x418   : > { %v3224_v7 = vmax.f32 %v12703_v1, %v3205_v23  ;;  %v3246_v1 = vld [vmem:[%s13936_s23 + $0x10] sm:$0xff] }
 0x419   : > { %v3209_v22 = vpop.f32.mrb[154].mxu1  ;;  %v7776_v23 = vld [vmem:[%s13936_s23 + $0x90] sm:$0xff] }
 0x41a   : > { %v12751_v57 = vpack.c.bf16 %v3224_v7, %v3223_v27  ;;  %v3210_v0 = vadd.f32 %v12637_v52, %v3209_v22  ;;  %v9169_v50 = vpop.f32.mrb[155].mxu1  ;;  %v3245_v52 = vld [vmem:[%s13936_s23 + $0x8] sm:$0xff]  ;;  %v7774_v27 = vld [vmem:[%s13936_s23 + $0x80] sm:$0xff] }
 0x41b   : > { %v7778_v7 = vld [vmem:[%s13936_s23 + $0xa0] sm:$0x3]  ;;  %v7794_v22 = vld [vmem:[%s13936_s23 + $0xa8] sm:$0xff]  ;;  %v7796_v50 = vld [vmem:[%s13936_s23 + $0xb8] sm:$0xff] }
 0x41c   : > { %v12755_v39 = vmax.f32 %v12706_v37, %v3210_v0  ;;  %10261 = vmatpush3.bf16.msra.mxu0 %v12751_v57  ;;  %v3247_v37 = vld [vmem:[%s13936_s23 + $0x18] sm:$0xff]  ;;  %v7795_v0 = vld [vmem:[%s13936_s23 + $0xb0] sm:$0xff] }
 0x41d   : > { %9194 = vmatprep.subr.mxu0 %v13935_v48 }
 0x420   : > { %9195 = vmatpush3.msk.msra.mxu0 %vm1906_vm7, %v12755_v39 }
 0x421   : > { %9197 = vmatmul.mubr.msk.f32.vlgmr.msra.gmra.mrb[138].mxu0 %vm3251_vm9, %v3244_v58  ;;  %10262 = vmatprep.subr.bf16.mxu0 %v13926_v3  ;;  %v7797_v58 = vld [vmem:[%s13936_s23 + $0xc0] sm:$0xff] }
 0x422   : > { %10264 = vmatpush3.bf16.msra.mxu0 %v12711_v17  ;;  %9199 = vmatprep.mubr.msk.f32.mxu0 %vm10642_vm0, %v13935_v48 }
 0x423   : > { %10265 = vmatprep.subr.bf16.mxu0 %v13926_v3 }
 0x425   : > { %9200 = vmatmul.mubr.msk.f32.gmra.mrb[140].mxu0 %vm3251_vm9, %v3245_v52  ;;  %v7798_v52 = vld [vmem:[%s13936_s23 + $0xc8] sm:$0xff] }
 0x426   : > { %10267 = vmatpush3.bf16.msra.mxu0 %v12719_v56  ;;  %9202 = vmatprep.mubr.msk.f32.mxu0 %vm10642_vm0, %v13935_v48 }
 0x427   : > { %10268 = vmatprep.subr.bf16.mxu0 %v13926_v3 }
 0x429   : > { %9203 = vmatmul.mubr.msk.f32.gmra.mrb[142].mxu0 %vm3251_vm9, %v3246_v1  ;;  %v7799_v1 = vld [vmem:[%s13936_s23 + $0xd0] sm:$0xff] }
 0x42a   : > { %10270 = vmatpush3.bf16.msra.mxu0 %v12727_v25  ;;  %9205 = vmatprep.mubr.msk.f32.mxu0 %vm10642_vm0, %v13935_v48 }
 0x42b   : > { %10271 = vmatprep.subr.bf16.mxu0 %v13926_v3 }
 0x42d   : > { %9206 = vmatmul.mubr.msk.f32.gmra.mrb[144].mxu0 %vm3251_vm9, %v3247_v37  ;;  %v7800_v37 = vld [vmem:[%s13936_s23 + $0xd8] sm:$0x3] }
 0x42e   : > { %10273 = vmatpush3.bf16.msra.mxu0 %v12735_v16  ;;  %9208 = vmatprep.mubr.msk.f32.mxu0 %vm10642_vm0, %v13935_v48 }
 0x42f   : > { %10274 = vmatprep.subr.bf16.mxu0 %v13926_v3 }
 0x431   : > { %9209 = vmatmul.mubr.msk.f32.gmra.mrb[146].mxu0 %vm3251_vm9, %v3248_v59  ;;  %v7816_v59 = vld [vmem:[%s13936_s23 + $0xe0] sm:$0xff] }
 0x432   : > { %10276 = vmatpush3.bf16.msra.mxu0 %v12743_v40  ;;  %9211 = vmatprep.mubr.msk.f32.mxu0 %vm10642_vm0, %v13935_v48 }
 0x433   : > { %10277 = vmatprep.subr.bf16.mxu0 %v13926_v3 }
 0x435   : > { %9212 = vmatmul.mubr.msk.f32.gmra.mrb[148].mxu0 %vm3251_vm9, %v3249_v61  ;;  %v7817_v61 = vld [vmem:[%s13936_s23 + $0xe8] sm:$0xff] }
 0x436   : > { %10279 = vmatpush3.bf16.msra.mxu0 %v12751_v57  ;;  %9214 = vmatprep.mubr.msk.f32.mxu0 %vm10642_vm0, %v13935_v48 }
 0x437   : > { %9241 = vmatprep.subr.mxu0 %v13935_v48 }
 0x439   : > { %9215 = vmatmul.mubr.msk.f32.gmra.mrb[150].mxu0 %vm3251_vm9, %v3250_v24  ;;  %v7818_v24 = vld [vmem:[%s13936_s23 + $0xf0] sm:$0xff] }
 0x43a   : > { %9242 = vmatpush3.msk.msra.mxu0 %vm1906_vm7, %v12755_v39  ;;  %9243 = vmatprep.mubr.msk.f32.mxu0 %vm10642_vm0, %v13935_v48 }
 0x43b   : > { %10283 = vmatprep.subr.bf16.mxu0 %v13926_v3 }
 0x43d   : > { %9244 = vmatmul.mubr.msk.f32.vlgmr.msra.gmra.mrb[152].mxu0 %vm3251_vm9, %v7743_v21  ;;  %v7819_v21 = vld [vmem:[%s13936_s23 + $0xf8] sm:$0xff] }
 0x43e   : > { %9246 = vmatprep.mubr.msk.f32.mxu0 %vm10642_vm0, %v13935_v48  ;;  %10285 = vmatpush3.bf16.msra.mxu0 %v10284_v51  ;;  %v10305_v51 = vpack.c.bf16 %v3231_v26, %v3230_v8 }
 0x43f   : > { %10304 = vmatprep.subr.bf16.mxu0 %v13926_v3 }
 0x441   : > { %9247 = vmatmul.mubr.msk.f32.gmra.mrb[154].mxu0 %vm3251_vm9, %v7744_v14  ;;  %v7820_v14 = vld [vmem:[%s13936_s23 + $0x100] sm:$0xff] }
 0x442   : > { %9249 = vmatprep.mubr.msk.f32.mxu0 %vm10642_vm0, %v13935_v48 }
 0x445   : > { %9250 = vmatmul.mubr.msk.f32.gmra.mrb[156].mxu0 %vm3251_vm9, %v7745_v45  ;;  %v7821_v45 = vld [vmem:[%s13936_s23 + $0x108] sm:$0xff] }
 0x446   : > { %9252 = vmatprep.mubr.msk.f32.mxu0 %vm10642_vm0, %v13935_v48 }
 0x449   : > { %9253 = vmatmul.mubr.msk.f32.gmra.mrb[158].mxu0 %vm3251_vm9, %v7746_v29  ;;  %v7822_v29 = vld [vmem:[%s13936_s23 + $0x110] sm:$0x3] }
 0x44a   : > { %9255 = vmatprep.mubr.msk.f32.mxu0 %vm10642_vm0, %v13935_v48 }
 0x44d   : > { %9256 = vmatmul.mubr.msk.f32.gmra.mrb[160].mxu0 %vm3251_vm9, %v7747_v13  ;;  %v7838_v13 = vld [vmem:[%s13936_s23 + $0x118] sm:$0xff] }
 0x44e   : > { %9258 = vmatprep.mubr.msk.f32.mxu0 %vm10642_vm0, %v13935_v48 }
 0x451   : > { %9259 = vmatmul.mubr.msk.f32.gmra.mrb[162].mxu0 %vm3251_vm9, %v7748_v34  ;;  %v7839_v34 = vld [vmem:[%s13936_s23 + $0x120] sm:$0xff] }
 0x452   : > { %9261 = vmatprep.mubr.msk.f32.mxu0 %vm10642_vm0, %v13935_v48 }
 0x455   : > { %9262 = vmatmul.mubr.msk.f32.gmra.mrb[164].mxu0 %vm3251_vm9, %v7749_v10  ;;  %v7840_v10 = vld [vmem:[%s13936_s23 + $0x128] sm:$0xff] }
 0x456   : > { %9293 = vmatprep.mubr.msk.f32.mxu0 %vm10642_vm0, %v13935_v48 }
 0x4f4   : > { %v3342_v35 = vpop.f32.mrb[138].mxu0 }
 0x4f5   : > { %v9198_v30 = vpop.f32.mrb[139].mxu0  ;;  %9294 = vmatmul.mubr.msk.f32.vlgmr.msra.gmra.mrb[166].mxu0 %vm1365_vm5, %v3342_v35  ;;  %v7841_v35 = vld [vmem:[%s13936_s23 + $0x130] sm:$0xff] }
 0x4f6   : > { %9296 = vmatprep.mubr.msk.f32.mxu0 %vm10642_vm0, %v13935_v48  ;;  %10306 = vmatpush3.bf16.msra.mxu0 %v10305_v51  ;;  %v7842_v30 = vld [vmem:[%s13936_s23 + $0x138] sm:$0xff] }
 0x4f7   : > { %10325 = vmatprep.subr.bf16.mxu0 %v13926_v3 }
 0x4f8   : > { %v3347_v33 = vpop.f32.mrb[140].mxu0 }
 0x4f9   : > { %v9201_v9 = vpop.f32.mrb[141].mxu0  ;;  %9297 = vmatmul.mubr.msk.f32.gmra.mrb[168].mxu0 %vm1365_vm5, %v3347_v33  ;;  %v7843_v33 = vld [vmem:[%s13936_s23 + $0x140] sm:$0xff] }
 0x4fa   : > { %9299 = vmatprep.mubr.msk.f32.mxu0 %vm10642_vm0, %v13935_v48  ;;  %v7844_v9 = vld [vmem:[%s13936_s23 + $0x148] sm:$0x3] }
 0x4fc   : > { %v3352_v38 = vpop.f32.mrb[142].mxu0 }
 0x4fd   : > { %v9204_v43 = vpop.f32.mrb[143].mxu0  ;;  %9300 = vmatmul.mubr.msk.f32.gmra.mrb[170].mxu0 %vm1365_vm5, %v3352_v38  ;;  %v7860_v38 = vld [vmem:[%s13936_s23 + $0x150] sm:$0xff] }
 0x4fe   : > { %9302 = vmatprep.mubr.msk.f32.mxu0 %vm10642_vm0, %v13935_v48  ;;  %v7861_v43 = vld [vmem:[%s13936_s23 + $0x158] sm:$0xff] }
 0x500   : > { %v3357_v46 = vpop.f32.mrb[144].mxu0 }
 0x501   : > { %v9207_v4 = vpop.f32.mrb[145].mxu0  ;;  %9303 = vmatmul.mubr.msk.f32.gmra.mrb[172].mxu0 %vm1365_vm5, %v3357_v46  ;;  %v7862_v46 = vld [vmem:[%s13936_s23 + $0x160] sm:$0xff] }
 0x502   : > { %9305 = vmatprep.mubr.msk.f32.mxu0 %vm10642_vm0, %v13935_v48  ;;  %v7863_v4 = vld [vmem:[%s13936_s23 + $0x168] sm:$0xff] }
 0x504   : > { %v3362_v62 = vpop.f32.mrb[146].mxu0 }
 0x505   : > { %v9210_v6 = vpop.f32.mrb[147].mxu0  ;;  %9306 = vmatmul.mubr.msk.f32.gmra.mrb[174].mxu0 %vm1365_vm5, %v3362_v62  ;;  %v7864_v62 = vld [vmem:[%s13936_s23 + $0x170] sm:$0xff] }
 0x506   : > { %9308 = vmatprep.mubr.msk.f32.mxu0 %vm10642_vm0, %v13935_v48  ;;  %v7865_v6 = vld [vmem:[%s13936_s23 + $0x178] sm:$0xff] }
 0x508   : > { %v3367_v41 = vpop.f32.mrb[148].mxu0 }
 0x509   : > { %v9213_v63 = vpop.f32.mrb[149].mxu0  ;;  %9309 = vmatmul.mubr.msk.f32.gmra.mrb[176].mxu0 %vm1365_vm5, %v3367_v41  ;;  %v7866_v41 = vld [vmem:[%s13936_s23 + $0x180] sm:$0x3] }
 0x50a   : > { %9311 = vmatprep.mubr.msk.f32.mxu0 %vm10642_vm0, %v13935_v48  ;;  %v7882_v63 = vld [vmem:[%s13936_s23 + $0x188] sm:$0xff] }
 0x50c   : > { %v3372_v31 = vpop.f32.mrb[150].mxu0 }
 0x50d   : > { %v9216_v36 = vpop.f32.mrb[151].mxu0  ;;  %9312 = vmatmul.mubr.msk.f32.gmra.mrb[178].mxu0 %vm1365_vm5, %v3372_v31  ;;  %v7883_v31 = vld [vmem:[%s13936_s23 + $0x190] sm:$0xff] }
 0x50e   : > { %9365 = vmatprep.mubr.msk.f32.mxu0 %vm10642_vm0, %v13935_v48  ;;  %v7884_v36 = vld [vmem:[%s13936_s23 + $0x198] sm:$0xff] }
 0x510   : > { %v3471_v5 = vpop.f32.mrb[152].mxu0 }
 0x511   : > { %v9245_v49 = vpop.f32.mrb[153].mxu0  ;;  %9269 = vmatmul.mubr.msk.f32.vlgmr.msra.gmra.mrb[156].mxu1 %vm1365_vm5, %v3471_v5  ;;  %v7885_v5 = vld [vmem:[%s13936_s23 + $0x1a0] sm:$0xff] }
 0x512   : > { %10288 = vmatpush3.bf16.msra.mxu1 %v12711_v17  ;;  %9271 = vmatprep.mubr.msk.f32.mxu1 %vm10642_vm0, %v13935_v48  ;;  %v7886_v49 = vld [vmem:[%s13936_s23 + $0x1a8] sm:$0xff] }
 0x513   : > { %10289 = vmatprep.subr.bf16.mxu1 %v13926_v3 }
 0x514   : > { %v3476_v32 = vpop.f32.mrb[154].mxu0 }
 0x515   : > { %v9248_v47 = vpop.f32.mrb[155].mxu0  ;;  %9272 = vmatmul.mubr.msk.f32.gmra.mrb[158].mxu1 %vm1365_vm5, %v3476_v32 }
 0x516   : > { %10291 = vmatpush3.bf16.msra.mxu1 %v12719_v56  ;;  %9274 = vmatprep.mubr.msk.f32.mxu1 %vm10642_vm0, %v13935_v48 }
 0x517   : > { %10292 = vmatprep.subr.bf16.mxu1 %v13926_v3 }
 0x518   : > { %v3481_v20 = vpop.f32.mrb[156].mxu0 }
 0x519   : > { %v9251_v28 = vpop.f32.mrb[157].mxu0  ;;  %9275 = vmatmul.mubr.msk.f32.gmra.mrb[160].mxu1 %vm1365_vm5, %v3481_v20  ;;  %v7887_v20 = vld [vmem:[%s13936_s23 + $0x1b0] sm:$0xff] }
 0x51a   : > { %10294 = vmatpush3.bf16.msra.mxu1 %v12727_v25  ;;  %9277 = vmatprep.mubr.msk.f32.mxu1 %vm10642_vm0, %v13935_v48 }
 0x51b   : > { %10295 = vmatprep.subr.bf16.mxu1 %v13926_v3 }
 0x51c   : > { %v3486_v54 = vpop.f32.mrb[158].mxu0 }
 0x51d   : > { %v9254_v53 = vpop.f32.mrb[159].mxu0  ;;  %9278 = vmatmul.mubr.msk.f32.gmra.mrb[162].mxu1 %vm1365_vm5, %v3486_v54 }
 0x51e   : > { %10297 = vmatpush3.bf16.msra.mxu1 %v12735_v16  ;;  %9280 = vmatprep.mubr.msk.f32.mxu1 %vm10642_vm0, %v13935_v48  ;;  %v7888_v53 = vld [vmem:[%s13936_s23 + $0x1b8] sm:$0x3] }
 0x51f   : > { %10298 = vmatprep.subr.bf16.mxu1 %v13926_v3 }
 0x520   : > { %v3491_v42 = vpop.f32.mrb[160].mxu0 }
 0x521   : > { %v9257_v55 = vpop.f32.mrb[161].mxu0  ;;  %9281 = vmatmul.mubr.msk.f32.gmra.mrb[164].mxu1 %vm1365_vm5, %v3491_v42 }
 0x522   : > { %10300 = vmatpush3.bf16.msra.mxu1 %v12743_v40  ;;  %9283 = vmatprep.mubr.msk.f32.mxu1 %vm10642_vm0, %v13935_v48 }
 0x523   : > { %10301 = vmatprep.subr.bf16.mxu1 %v13926_v3 }
 0x524   : > { %v3496_v12 = vpop.f32.mrb[162].mxu0 }
 0x525   : > { %v9260_v2 = vpop.f32.mrb[163].mxu0  ;;  %9284 = vmatmul.mubr.msk.f32.gmra.mrb[166].mxu1 %vm1365_vm5, %v3496_v12 }
 0x526   : > { %10303 = vmatpush3.bf16.msra.mxu1 %v12751_v57  ;;  %9286 = vmatprep.mubr.msk.f32.mxu1 %vm10642_vm0, %v13935_v48 }
 0x527   : > { %9338 = vmatprep.subr.mxu1 %v13935_v48 }
 0x528   : > { %v3501_v15 = vpop.f32.mrb[164].mxu0 }
 0x529   : > { %v9263_v11 = vpop.f32.mrb[165].mxu0  ;;  %9287 = vmatmul.mubr.msk.f32.gmra.mrb[168].mxu1 %vm1365_vm5, %v3501_v15 }
 0x52a   : > { %9339 = vmatpush3.msk.msra.mxu1 %vm1906_vm7, %v12755_v39  ;;  %9340 = vmatprep.mubr.msk.f32.mxu1 %vm10642_vm0, %v13935_v48 }
 0x52b   : > { %10307 = vmatprep.subr.bf16.mxu1 %v13926_v3 }
 0x52d   : > { %9341 = vmatmul.mubr.msk.f32.vlgmr.msra.gmra.mrb[170].mxu1 %vm3251_vm9, %v7772_v60 }
 0x52e   : > { %10309 = vmatpush3.bf16.msra.mxu1 %v12711_v17  ;;  %9343 = vmatprep.mubr.msk.f32.mxu1 %vm10642_vm0, %v13935_v48 }
 0x52f   : > { %10310 = vmatprep.subr.bf16.mxu1 %v13926_v3 }
 0x531   : > { %9344 = vmatmul.mubr.msk.f32.gmra.mrb[172].mxu1 %vm3251_vm9, %v7773_v19 }
 0x532   : > { %10312 = vmatpush3.bf16.msra.mxu1 %v12719_v56  ;;  %9346 = vmatprep.mubr.msk.f32.mxu1 %vm10642_vm0, %v13935_v48 }
 0x533   : > { %10313 = vmatprep.subr.bf16.mxu1 %v13926_v3 }
 0x535   : > { %9347 = vmatmul.mubr.msk.f32.gmra.mrb[174].mxu1 %vm3251_vm9, %v7774_v27 }
 0x536   : > { %10315 = vmatpush3.bf16.msra.mxu1 %v12727_v25  ;;  %9349 = vmatprep.mubr.msk.f32.mxu1 %vm10642_vm0, %v13935_v48 }
 0x537   : > { %10316 = vmatprep.subr.bf16.mxu1 %v13926_v3 }
 0x539   : > { %9350 = vmatmul.mubr.msk.f32.gmra.mrb[176].mxu1 %vm3251_vm9, %v7775_v18 }
 0x53a   : > { %10318 = vmatpush3.bf16.msra.mxu1 %v12735_v16  ;;  %9352 = vmatprep.mubr.msk.f32.mxu1 %vm10642_vm0, %v13935_v48 }
 0x53b   : > { %10319 = vmatprep.subr.bf16.mxu1 %v13926_v3 }
 0x53d   : > { %9353 = vmatmul.mubr.msk.f32.gmra.mrb[178].mxu1 %vm3251_vm9, %v7776_v23 }
 0x53e   : > { %10321 = vmatpush3.bf16.msra.mxu1 %v12743_v40  ;;  %9355 = vmatprep.mubr.msk.f32.mxu1 %vm10642_vm0, %v13935_v48 }
 0x53f   : > { %10322 = vmatprep.subr.bf16.mxu1 %v13926_v3 }
 0x541   : > { %9356 = vmatmul.mubr.msk.f32.gmra.mrb[180].mxu1 %vm3251_vm9, %v7777_v44 }
 0x542   : > { %10324 = vmatpush3.bf16.msra.mxu1 %v12751_v57  ;;  %9358 = vmatprep.mubr.msk.f32.mxu1 %vm10642_vm0, %v13935_v48 }
 0x543   : > { %9410 = vmatprep.subr.mxu1 %v13935_v48 }
 0x545   : > { %9359 = vmatmul.mubr.msk.f32.gmra.mrb[182].mxu1 %vm3251_vm9, %v7778_v7 }
 0x546   : > { %9411 = vmatpush3.msk.msra.mxu1 %vm1906_vm7, %v12755_v39  ;;  %9412 = vmatprep.mubr.msk.f32.mxu1 %vm10642_vm0, %v13935_v48 }
 0x547   : > { %10328 = vmatprep.subr.bf16.mxu1 %v13926_v3 }
 0x549   : > { %9413 = vmatmul.mubr.msk.f32.vlgmr.msra.gmra.mrb[184].mxu1 %vm3251_vm9, %v7794_v22 }
 0x54a   : > { %10330 = vmatpush3.bf16.msra.mxu1 %v12711_v17  ;;  %9415 = vmatprep.mubr.msk.f32.mxu1 %vm10642_vm0, %v13935_v48 }
 0x54b   : > { %10331 = vmatprep.subr.bf16.mxu1 %v13926_v3 }
 0x54d   : > { %9416 = vmatmul.mubr.msk.f32.gmra.mrb[186].mxu1 %vm3251_vm9, %v7795_v0 }
 0x54e   : > { %10333 = vmatpush3.bf16.msra.mxu1 %v12719_v56  ;;  %9418 = vmatprep.mubr.msk.f32.mxu1 %vm10642_vm0, %v13935_v48 }
 0x54f   : > { %10334 = vmatprep.subr.bf16.mxu1 %v13926_v3 }
 0x551   : > { %9419 = vmatmul.mubr.msk.f32.gmra.mrb[188].mxu1 %vm3251_vm9, %v7796_v50 }
 0x552   : > { %10336 = vmatpush3.bf16.msra.mxu1 %v12727_v25  ;;  %9421 = vmatprep.mubr.msk.f32.mxu1 %vm10642_vm0, %v13935_v48 }
 0x553   : > { %10337 = vmatprep.subr.bf16.mxu1 %v13926_v3 }
 0x555   : > { %9422 = vmatmul.mubr.msk.f32.gmra.mrb[190].mxu1 %vm3251_vm9, %v7797_v58 }
 0x556   : > { %10339 = vmatpush3.bf16.msra.mxu1 %v12735_v16  ;;  %9424 = vmatprep.mubr.msk.f32.mxu1 %vm10642_vm0, %v13935_v48 }
 0x557   : > { %10340 = vmatprep.subr.bf16.mxu1 %v13926_v3 }
 0x559   : > { %9425 = vmatmul.mubr.msk.f32.gmra.mrb[192].mxu1 %vm3251_vm9, %v7798_v52 }
 0x55a   : > { %10342 = vmatpush3.bf16.msra.mxu1 %v12743_v40  ;;  %9427 = vmatprep.mubr.msk.f32.mxu1 %vm10642_vm0, %v13935_v48 }
 0x55b   : > { %10343 = vmatprep.subr.bf16.mxu1 %v13926_v3 }
 0x55d   : > { %9428 = vmatmul.mubr.msk.f32.gmra.mrb[194].mxu1 %vm3251_vm9, %v7799_v1 }
 0x55e   : > { %10345 = vmatpush3.bf16.msra.mxu1 %v12751_v57  ;;  %9430 = vmatprep.mubr.msk.f32.mxu1 %vm10642_vm0, %v13935_v48 }
 0x55f   : > { %9482 = vmatprep.subr.mxu1 %v13935_v48 }
 0x561   : > { %9431 = vmatmul.mubr.msk.f32.gmra.mrb[196].mxu1 %vm3251_vm9, %v7800_v37 }
 0x562   : > { %9483 = vmatpush3.msk.msra.mxu1 %vm1906_vm7, %v12755_v39  ;;  %9484 = vmatprep.mubr.msk.f32.mxu1 %vm10642_vm0, %v13935_v48 }
 0x563   : > { %10349 = vmatprep.subr.bf16.mxu1 %v13926_v3 }
 0x565   : > { %9485 = vmatmul.mubr.msk.f32.vlgmr.msra.gmra.mrb[198].mxu1 %vm3251_vm9, %v7816_v59 }
 0x566   : > { %10351 = vmatpush3.bf16.msra.mxu1 %v12711_v17  ;;  %9487 = vmatprep.mubr.msk.f32.mxu1 %vm10642_vm0, %v13935_v48 }
 0x567   : > { %10352 = vmatprep.subr.bf16.mxu1 %v13926_v3 }
 0x569   : > { %9488 = vmatmul.mubr.msk.f32.gmra.mrb[200].mxu1 %vm3251_vm9, %v7817_v61 }
 0x56a   : > { %10354 = vmatpush3.bf16.msra.mxu1 %v12719_v56  ;;  %9490 = vmatprep.mubr.msk.f32.mxu1 %vm10642_vm0, %v13935_v48 }
 0x56b   : > { %10355 = vmatprep.subr.bf16.mxu1 %v13926_v3 }
 0x56d   : > { %9491 = vmatmul.mubr.msk.f32.gmra.mrb[202].mxu1 %vm3251_vm9, %v7818_v24 }
 0x56e   : > { %10357 = vmatpush3.bf16.msra.mxu1 %v12727_v25  ;;  %9493 = vmatprep.mubr.msk.f32.mxu1 %vm10642_vm0, %v13935_v48 }
 0x56f   : > { %10358 = vmatprep.subr.bf16.mxu1 %v13926_v3 }
 0x571   : > { %9494 = vmatmul.mubr.msk.f32.gmra.mrb[204].mxu1 %vm3251_vm9, %v7819_v21 }
 0x572   : > { %10360 = vmatpush3.bf16.msra.mxu1 %v12735_v16  ;;  %9496 = vmatprep.mubr.msk.f32.mxu1 %vm10642_vm0, %v13935_v48 }
 0x573   : > { %10361 = vmatprep.subr.bf16.mxu1 %v13926_v3 }
 0x575   : > { %9497 = vmatmul.mubr.msk.f32.gmra.mrb[206].mxu1 %vm3251_vm9, %v7820_v14 }
 0x576   : > { %10363 = vmatpush3.bf16.msra.mxu1 %v12743_v40  ;;  %9499 = vmatprep.mubr.msk.f32.mxu1 %vm10642_vm0, %v13935_v48 }
 0x577   : > { %10364 = vmatprep.subr.bf16.mxu1 %v13926_v3 }
 0x579   : > { %9500 = vmatmul.mubr.msk.f32.gmra.mrb[208].mxu1 %vm3251_vm9, %v7821_v45  ;;  %v3232_v45 = vld [vmem:[%s12689_s30 + $0x30] sm:$0xff] }
 0x57a   : > { %10366 = vmatpush3.bf16.msra.mxu1 %v12751_v57  ;;  %9502 = vmatprep.mubr.msk.f32.mxu1 %vm10642_vm0, %v13935_v48 }
 0x57b   : > { %9554 = vmatprep.subr.mxu1 %v13935_v48 }
 0x57d   : > { %9503 = vmatmul.mubr.msk.f32.gmra.mrb[210].mxu1 %vm3251_vm9, %v7822_v29  ;;  %v3233_v29 = vld [vmem:[%s12689_s30 + $0x38] sm:$0xff] }
 0x57e   : > { %9555 = vmatpush3.msk.msra.mxu1 %vm1906_vm7, %v12755_v39  ;;  %9556 = vmatprep.mubr.msk.f32.mxu1 %vm10642_vm0, %v13935_v48 }
 0x57f   : > { %10370 = vmatprep.subr.bf16.mxu1 %v13926_v3 }
 0x581   : > { %9557 = vmatmul.mubr.msk.f32.vlgmr.msra.gmra.mrb[212].mxu1 %vm3251_vm9, %v7838_v13 }
 0x582   : > { %10372 = vmatpush3.bf16.msra.mxu1 %v12711_v17  ;;  %9559 = vmatprep.mubr.msk.f32.mxu1 %vm10642_vm0, %v13935_v48 }
 0x583   : > { %10373 = vmatprep.subr.bf16.mxu1 %v13926_v3 }
 0x585   : > { %9560 = vmatmul.mubr.msk.f32.gmra.mrb[214].mxu1 %vm3251_vm9, %v7839_v34 }
 0x586   : > { %10375 = vmatpush3.bf16.msra.mxu1 %v12719_v56  ;;  %9562 = vmatprep.mubr.msk.f32.mxu1 %vm10642_vm0, %v13935_v48 }
 0x587   : > { %10376 = vmatprep.subr.bf16.mxu1 %v13926_v3 }
 0x589   : > { %9563 = vmatmul.mubr.msk.f32.gmra.mrb[216].mxu1 %vm3251_vm9, %v7840_v10 }
 0x58a   : > { %10378 = vmatpush3.bf16.msra.mxu1 %v12727_v25  ;;  %9565 = vmatprep.mubr.msk.f32.mxu1 %vm10642_vm0, %v13935_v48 }
 0x58b   : > { %10379 = vmatprep.subr.bf16.mxu1 %v13926_v3 }
 0x58d   : > { %9566 = vmatmul.mubr.msk.f32.gmra.mrb[218].mxu1 %vm3251_vm9, %v7841_v35  ;;  %v10326_v35 = vpack.c.bf16 %v3233_v29, %v3232_v45 }
 0x58e   : > { %10381 = vmatpush3.bf16.msra.mxu1 %v12735_v16  ;;  %9568 = vmatprep.mubr.msk.f32.mxu1 %vm10642_vm0, %v13935_v48 }
 0x58f   : > { %10382 = vmatprep.subr.bf16.mxu1 %v13926_v3 }
 0x591   : > { %9569 = vmatmul.mubr.msk.f32.gmra.mrb[220].mxu1 %vm3251_vm9, %v7842_v30 }
 0x592   : > { %10384 = vmatpush3.bf16.msra.mxu1 %v12743_v40  ;;  %9571 = vmatprep.mubr.msk.f32.mxu1 %vm10642_vm0, %v13935_v48 }
 0x593   : > { %10385 = vmatprep.subr.bf16.mxu1 %v13926_v3 }
 0x595   : > { %9572 = vmatmul.mubr.msk.f32.gmra.mrb[222].mxu1 %vm3251_vm9, %v7843_v33 }
 0x596   : > { %10387 = vmatpush3.bf16.msra.mxu1 %v12751_v57  ;;  %9574 = vmatprep.mubr.msk.f32.mxu1 %vm10642_vm0, %v13935_v48 }
 0x597   : > { %9626 = vmatprep.subr.mxu1 %v13935_v48 }
 0x599   : > { %9575 = vmatmul.mubr.msk.f32.gmra.mrb[224].mxu1 %vm3251_vm9, %v7844_v9 }
 0x59a   : > { %9627 = vmatpush3.msk.msra.mxu1 %vm1906_vm7, %v12755_v39  ;;  %9628 = vmatprep.mubr.msk.f32.mxu1 %vm10642_vm0, %v13935_v48 }
 0x59b   : > { %10391 = vmatprep.subr.bf16.mxu1 %v13926_v3 }
 0x59d   : > { %9629 = vmatmul.mubr.msk.f32.vlgmr.msra.gmra.mrb[226].mxu1 %vm3251_vm9, %v7860_v38 }
 0x59e   : > { %10393 = vmatpush3.bf16.msra.mxu1 %v12711_v17  ;;  %9631 = vmatprep.mubr.msk.f32.mxu1 %vm10642_vm0, %v13935_v48 }
 0x59f   : > { %10394 = vmatprep.subr.bf16.mxu1 %v13926_v3 }
 0x5a1   : > { %9632 = vmatmul.mubr.msk.f32.gmra.mrb[228].mxu1 %vm3251_vm9, %v7861_v43 }
 0x5a2   : > { %10396 = vmatpush3.bf16.msra.mxu1 %v12719_v56  ;;  %9634 = vmatprep.mubr.msk.f32.mxu1 %vm10642_vm0, %v13935_v48 }
 0x5a3   : > { %10397 = vmatprep.subr.bf16.mxu1 %v13926_v3 }
 0x5a5   : > { %9635 = vmatmul.mubr.msk.f32.gmra.mrb[230].mxu1 %vm3251_vm9, %v7862_v46 }
 0x5a6   : > { %10399 = vmatpush3.bf16.msra.mxu1 %v12727_v25  ;;  %9637 = vmatprep.mubr.msk.f32.mxu1 %vm10642_vm0, %v13935_v48 }
 0x5a7   : > { %10400 = vmatprep.subr.bf16.mxu1 %v13926_v3 }
 0x5a9   : > { %9638 = vmatmul.mubr.msk.f32.gmra.mrb[232].mxu1 %vm3251_vm9, %v7863_v4 }
 0x5aa   : > { %10402 = vmatpush3.bf16.msra.mxu1 %v12735_v16  ;;  %9640 = vmatprep.mubr.msk.f32.mxu1 %vm10642_vm0, %v13935_v48 }
 0x5ab   : > { %10403 = vmatprep.subr.bf16.mxu1 %v13926_v3 }
 0x5ad   : > { %9641 = vmatmul.mubr.msk.f32.gmra.mrb[234].mxu1 %vm3251_vm9, %v7864_v62 }
 0x5ae   : > { %10405 = vmatpush3.bf16.msra.mxu1 %v12743_v40  ;;  %9643 = vmatprep.mubr.msk.f32.mxu1 %vm10642_vm0, %v13935_v48 }
 0x5af   : > { %10406 = vmatprep.subr.bf16.mxu1 %v13926_v3 }
 0x5b1   : > { %9644 = vmatmul.mubr.msk.f32.gmra.mrb[236].mxu1 %vm3251_vm9, %v7865_v6 }
 0x5b2   : > { %10408 = vmatpush3.bf16.msra.mxu1 %v12751_v57  ;;  %9646 = vmatprep.mubr.msk.f32.mxu1 %vm10642_vm0, %v13935_v48 }
 0x5b3   : > { %9698 = vmatprep.subr.mxu1 %v13935_v48 }
 0x5b5   : > { %9647 = vmatmul.mubr.msk.f32.gmra.mrb[238].mxu1 %vm3251_vm9, %v7866_v41 }
 0x5b6   : > { %9699 = vmatpush3.msk.msra.mxu1 %vm1906_vm7, %v12755_v39  ;;  %9700 = vmatprep.mubr.msk.f32.mxu1 %vm10642_vm0, %v13935_v48 }
 0x5b7   : > { %10597 = vmatprep.subr.bf16.mxu1 %v13926_v3 }
 0x5b9   : > { %9701 = vmatmul.mubr.msk.f32.vlgmr.msra.gmra.mrb[240].mxu1 %vm3251_vm9, %v7882_v63 }
 0x5ba   : > { %10604 = vmatpush3.bf16.msra.mxu1 %v12711_v17  ;;  %9703 = vmatprep.mubr.msk.f32.mxu1 %vm10642_vm0, %v13935_v48 }
 0x5bb   : > { %10598 = vmatprep.subr.bf16.mxu1 %v13926_v3 }
 0x5bd   : > { %9704 = vmatmul.mubr.msk.f32.gmra.mrb[242].mxu1 %vm3251_vm9, %v7883_v31 }
 0x5be   : > { %10605 = vmatpush3.bf16.msra.mxu1 %v12719_v56  ;;  %9706 = vmatprep.mubr.msk.f32.mxu1 %vm10642_vm0, %v13935_v48 }
 0x5bf   : > { %10599 = vmatprep.subr.bf16.mxu1 %v13926_v3 }
 0x5c1   : > { %9707 = vmatmul.mubr.msk.f32.gmra.mrb[244].mxu1 %vm3251_vm9, %v7884_v36  ;;  %v3234_v36 = vld [vmem:[%s12689_s30 + $0x40] sm:$0xff] }
 0x5c2   : > { %10606 = vmatpush3.bf16.msra.mxu1 %v12727_v25  ;;  %9709 = vmatprep.mubr.msk.f32.mxu1 %vm10642_vm0, %v13935_v48 }
 0x5c3   : > { %10600 = vmatprep.subr.bf16.mxu1 %v13926_v3 }
 0x5c5   : > { %9710 = vmatmul.mubr.msk.f32.gmra.mrb[246].mxu1 %vm3251_vm9, %v7885_v5  ;;  %v3235_v5 = vld [vmem:[%s12689_s30 + $0x48] sm:$0xff] }
 0x5c6   : > { %10607 = vmatpush3.bf16.msra.mxu1 %v12735_v16  ;;  %9712 = vmatprep.mubr.msk.f32.mxu1 %vm10642_vm0, %v13935_v48 }
 0x5c7   : > { %10601 = vmatprep.subr.bf16.mxu1 %v13926_v3 }
 0x5c8   : > { %v3713_v32 = vpop.f32.mrb[166].mxu0 }
 0x5c9   : > { %v9295_v47 = vpop.f32.mrb[167].mxu0  ;;  %9713 = vmatmul.mubr.msk.f32.gmra.mrb[248].mxu1 %vm3251_vm9, %v7886_v49 }
 0x5ca   : > { %10608 = vmatpush3.bf16.msra.mxu1 %v12743_v40  ;;  %9715 = vmatprep.mubr.msk.f32.mxu1 %vm10642_vm0, %v13935_v48  ;;  %v10347_v47 = vpack.c.bf16 %v3235_v5, %v3234_v36 }
 0x5cb   : > { %10602 = vmatprep.subr.bf16.mxu1 %v13926_v3 }
 0x5cc   : > { %v3718_v28 = vpop.f32.mrb[168].mxu0 }
 0x5cd   : > { %v9298_v54 = vpop.f32.mrb[169].mxu0  ;;  %9716 = vmatmul.mubr.msk.f32.gmra.mrb[250].mxu1 %vm3251_vm9, %v7887_v20 }
 0x5ce   : > { %10609 = vmatpush3.bf16.msra.mxu1 %v12751_v57  ;;  %9718 = vmatprep.mubr.msk.f32.mxu1 %vm10642_vm0, %v13935_v48 }
 0x5cf   : > { %10603 = vmatprep.subr.mxu1 %v13935_v48 }
 0x5d0   : > { %v3723_v42 = vpop.f32.mrb[170].mxu0 }
 0x5d1   : > { %v9301_v55 = vpop.f32.mrb[171].mxu0  ;;  %9719 = vmatmul.mubr.msk.f32.gmra.mrb[252].mxu1 %vm3251_vm9, %v7888_v53 }
 0x5d2   : > { %10610 = vmatpush3.msk.msra.mxu1 %vm1906_vm7, %v12755_v39  ;;  %9775 = vmatprep.mubr.msk.f32.mxu1 %vm10642_vm0, %v13935_v48 }
 0x5d3   : > { %10433 = vmatprep.subr.bf16.mxu1 %v13926_v3 }
 0x5d4   : > { %v3728_v12 = vpop.f32.mrb[172].mxu0 }
 0x5d5   : > { %v9304_v2 = vpop.f32.mrb[173].mxu0 }
 0x5d8   : > { %v3733_v15 = vpop.f32.mrb[174].mxu0 }
 0x5d9   : > { %v9307_v11 = vpop.f32.mrb[175].mxu0 }
 0x5da   : > { %v7906_v11 = vld [vmem:[%s13936_s23 + $0x1d0] sm:$0xff] }
 0x5dc   : > { %v3738_v60 = vpop.f32.mrb[176].mxu0 }
 0x5dd   : > { %v9310_v19 = vpop.f32.mrb[177].mxu0 }
 0x5e0   : > { %v3743_v27 = vpop.f32.mrb[178].mxu0 }
 0x5e1   : > { %v9313_v18 = vpop.f32.mrb[179].mxu0 }
 0x5e4   : > { %v3592_v23 = vpop.f32.mrb[156].mxu1 }
 0x5e5   : > { %v13266_v44 = vadd.f32 %v3713_v32, %v3592_v23  ;;  %v9270_v7 = vpop.f32.mrb[157].mxu1 }
 0x5e6   : > { %v3236_v7 = vld [vmem:[%s12689_s30 + $0x50] sm:$0xff] }
 0x5e8   : > { %v3597_v22 = vpop.f32.mrb[158].mxu1 }
 0x5e9   : > { %v13268_v0 = vadd.f32 %v3718_v28, %v3597_v22  ;;  %v9273_v50 = vpop.f32.mrb[159].mxu1  ;;  %v3237_v22 = vld [vmem:[%s12689_s30 + $0x58] sm:$0xff] }
 0x5ea   : > { %v7908_v50 = vld [vmem:[%s13936_s23 + $0x1e0] sm:$0xff] }
 0x5ec   : > { %v3602_v58 = vpop.f32.mrb[160].mxu1 }
 0x5ed   : > { %v13270_v52 = vadd.f32 %v3723_v42, %v3602_v58  ;;  %v9276_v1 = vpop.f32.mrb[161].mxu1 }
 0x5f0   : > { %v3607_v37 = vpop.f32.mrb[162].mxu1 }
 0x5f1   : > { %v13272_v59 = vadd.f32 %v3728_v12, %v3607_v37  ;;  %v9279_v61 = vpop.f32.mrb[163].mxu1  ;;  %v10368_v37 = vpack.c.bf16 %v3237_v22, %v3236_v7 }
 0x5f4   : > { %v3612_v24 = vpop.f32.mrb[164].mxu1 }
 0x5f5   : > { %v13274_v8 = vadd.f32 %v3733_v15, %v3612_v24  ;;  %v9282_v26 = vpop.f32.mrb[165].mxu1  ;;  %v7905_v15 = vld [vmem:[%s13936_s23 + $0x1c8] sm:$0xff] }
 0x5f6   : > { %9776 = vmatmul.mubr.msk.f32.vlgmr.msra.gmra.mrb[254].mxu1 %vm3251_vm9, %v7905_v15  ;;  %v7909_v24 = vld [vmem:[%s13936_s23 + $0x1e8] sm:$0xff] }
 0x5f7   : > { %9778 = vmatprep.mubr.msk.f32.mxu1 %vm10642_vm0, %v13935_v48 }
 0x5f8   : > { %v3617_v21 = vpop.f32.mrb[166].mxu1 }
 0x5f9   : > { %v13276_v51 = vadd.f32 %v3738_v60, %v3617_v21  ;;  %v9285_v14 = vpop.f32.mrb[167].mxu1 }
 0x5fa   : > { %9779 = vmatmul.mubr.msk.f32.gmra.mrb[0].mxu1 %vm3251_vm9, %v7906_v11  ;;  %v7910_v14 = vld [vmem:[%s13936_s23 + $0x1f0] sm:$0x3] }
 0x5fb   : > { %9781 = vmatprep.mubr.msk.f32.mxu1 %vm10642_vm0, %v13935_v48 }
 0x5fc   : > { %v3622_v13 = vpop.f32.mrb[168].mxu1 }
 0x5fd   : > { %v13280_v34 = vadd.f32 %v3743_v27, %v3622_v13  ;;  %v9288_v10 = vpop.f32.mrb[169].mxu1  ;;  %v7907_v27 = vld [vmem:[%s13936_s23 + $0x1d8] sm:$0xff] }
 0x5fe   : > { %9782 = vmatmul.mubr.msk.f32.gmra.mrb[2].mxu1 %vm3251_vm9, %v7907_v27 }
 0x5ff   : > { %9784 = vmatprep.mubr.msk.f32.mxu1 %vm10642_vm0, %v13935_v48 }
 0x600   : > { %v3842_v30 = vpop.f32.mrb[170].mxu1 }
 0x601   : > { %v9342_v33 = vpop.f32.mrb[171].mxu1  ;;  %9366 = vmatmul.mubr.msk.f32.vlgmr.msra.gmra.mrb[180].mxu0 %vm1365_vm5, %v3842_v30 }
 0x602   : > { %9368 = vmatprep.mubr.msk.f32.mxu0 %vm10642_vm0, %v13935_v48  ;;  %10327 = vmatpush3.bf16.msra.mxu0 %v10326_v35 }
 0x603   : > { %10346 = vmatprep.subr.bf16.mxu0 %v13926_v3  ;;  %9785 = vmatmul.mubr.msk.f32.gmra.mrb[4].mxu1 %vm3251_vm9, %v7908_v50 }
 0x604   : > { %v3847_v9 = vpop.f32.mrb[172].mxu1  ;;  %9787 = vmatprep.mubr.msk.f32.mxu1 %vm10642_vm0, %v13935_v48 }
 0x605   : > { %v9345_v38 = vpop.f32.mrb[173].mxu1  ;;  %9369 = vmatmul.mubr.msk.f32.gmra.mrb[182].mxu0 %vm1365_vm5, %v3847_v9 }
 0x606   : > { %9371 = vmatprep.mubr.msk.f32.mxu0 %vm10642_vm0, %v13935_v48 }
 0x607   : > { %9788 = vmatmul.mubr.msk.f32.gmra.mrb[6].mxu1 %vm3251_vm9, %v7909_v24 }
 0x608   : > { %v3852_v43 = vpop.f32.mrb[174].mxu1  ;;  %9790 = vmatprep.mubr.msk.f32.mxu1 %vm10642_vm0, %v13935_v48 }
 0x609   : > { %v9348_v46 = vpop.f32.mrb[175].mxu1  ;;  %9372 = vmatmul.mubr.msk.f32.gmra.mrb[184].mxu0 %vm1365_vm5, %v3852_v43  ;;  %v3238_v43 = vld [vmem:[%s12689_s30 + $0x60] sm:$0xff] }
 0x60a   : > { %9374 = vmatprep.mubr.msk.f32.mxu0 %vm10642_vm0, %v13935_v48  ;;  %v3239_v46 = vld [vmem:[%s12689_s30 + $0x68] sm:$0xff] }
 0x60b   : > { %9791 = vmatmul.mubr.msk.f32.gmra.mrb[8].mxu1 %vm3251_vm9, %v7910_v14 }
 0x60c   : > { %v3857_v4 = vpop.f32.mrb[176].mxu1  ;;  %9832 = vmatprep.mubr.msk.f32.mxu1 %vm10642_vm0, %v13935_v48 }
 0x60d   : > { %v9351_v62 = vpop.f32.mrb[177].mxu1  ;;  %9375 = vmatmul.mubr.msk.f32.gmra.mrb[186].mxu0 %vm1365_vm5, %v3857_v4 }
 0x60e   : > { %9377 = vmatprep.mubr.msk.f32.mxu0 %vm10642_vm0, %v13935_v48 }
 0x610   : > { %v3862_v6 = vpop.f32.mrb[178].mxu1 }
 0x611   : > { %v9354_v41 = vpop.f32.mrb[179].mxu1  ;;  %9378 = vmatmul.mubr.msk.f32.gmra.mrb[188].mxu0 %vm1365_vm5, %v3862_v6  ;;  %v10389_v6 = vpack.c.bf16 %v3239_v46, %v3238_v43 }
 0x612   : > { %9380 = vmatprep.mubr.msk.f32.mxu0 %vm10642_vm0, %v13935_v48 }
 0x614   : > { %v3867_v63 = vpop.f32.mrb[180].mxu1 }
 0x615   : > { %v9357_v31 = vpop.f32.mrb[181].mxu1  ;;  %9381 = vmatmul.mubr.msk.f32.gmra.mrb[190].mxu0 %vm1365_vm5, %v3867_v63 }
 0x616   : > { %9383 = vmatprep.mubr.msk.f32.mxu0 %vm10642_vm0, %v13935_v48 }
 0x618   : > { %v3872_v49 = vpop.f32.mrb[182].mxu1 }
 0x619   : > { %v9360_v32 = vpop.f32.mrb[183].mxu1  ;;  %9384 = vmatmul.mubr.msk.f32.gmra.mrb[192].mxu0 %vm1365_vm5, %v3872_v49 }
 0x61a   : > { %9437 = vmatprep.mubr.msk.f32.mxu0 %vm10642_vm0, %v13935_v48 }
 0x61c   : > { %v4099_v20 = vpop.f32.mrb[184].mxu1 }
 0x61d   : > { %v9414_v28 = vpop.f32.mrb[185].mxu1  ;;  %9438 = vmatmul.mubr.msk.f32.vlgmr.msra.gmra.mrb[194].mxu0 %vm1365_vm5, %v4099_v20 }
 0x61e   : > { %9440 = vmatprep.mubr.msk.f32.mxu0 %vm10642_vm0, %v13935_v48  ;;  %10348 = vmatpush3.bf16.msra.mxu0 %v10347_v47 }
 0x61f   : > { %10367 = vmatprep.subr.bf16.mxu0 %v13926_v3 }
 0x620   : > { %v4104_v54 = vpop.f32.mrb[186].mxu1 }
 0x621   : > { %v9417_v53 = vpop.f32.mrb[187].mxu1  ;;  %9441 = vmatmul.mubr.msk.f32.gmra.mrb[196].mxu0 %vm1365_vm5, %v4104_v54 }
 0x622   : > { %9443 = vmatprep.mubr.msk.f32.mxu0 %vm10642_vm0, %v13935_v48 }
 0x624   : > { %v4109_v42 = vpop.f32.mrb[188].mxu1 }
 0x625   : > { %v9420_v55 = vpop.f32.mrb[189].mxu1  ;;  %9444 = vmatmul.mubr.msk.f32.gmra.mrb[198].mxu0 %vm1365_vm5, %v4109_v42  ;;  %v3240_v42 = vld [vmem:[%s12689_s30 + $0x70] sm:$0xff] }
 0x626   : > { %9446 = vmatprep.mubr.msk.f32.mxu0 %vm10642_vm0, %v13935_v48  ;;  %v3241_v55 = vld [vmem:[%s12689_s30 + $0x78] sm:$0xff] }
 0x627   : > { %v10410_v15 = vpack.c.bf16 %v3241_v55, %v3240_v42 }
 0x628   : > { %v4114_v12 = vpop.f32.mrb[190].mxu1 }
 0x629   : > { %v9423_v2 = vpop.f32.mrb[191].mxu1  ;;  %9447 = vmatmul.mubr.msk.f32.gmra.mrb[200].mxu0 %vm1365_vm5, %v4114_v12 }
 0x62a   : > { %9449 = vmatprep.mubr.msk.f32.mxu0 %vm10642_vm0, %v13935_v48 }
 0x62c   : > { %v4119_v60 = vpop.f32.mrb[192].mxu1 }
 0x62d   : > { %v9426_v19 = vpop.f32.mrb[193].mxu1  ;;  %9450 = vmatmul.mubr.msk.f32.gmra.mrb[202].mxu0 %vm1365_vm5, %v4119_v60 }
 0x62e   : > { %9452 = vmatprep.mubr.msk.f32.mxu0 %vm10642_vm0, %v13935_v48 }
 0x630   : > { %v4124_v18 = vpop.f32.mrb[194].mxu1 }
 0x631   : > { %v9429_v23 = vpop.f32.mrb[195].mxu1  ;;  %9453 = vmatmul.mubr.msk.f32.gmra.mrb[204].mxu0 %vm1365_vm5, %v4124_v18 }
 0x632   : > { %9455 = vmatprep.mubr.msk.f32.mxu0 %vm10642_vm0, %v13935_v48 }
 0x634   : > { %v4129_v58 = vpop.f32.mrb[196].mxu1 }
 0x635   : > { %v9432_v1 = vpop.f32.mrb[197].mxu1  ;;  %9456 = vmatmul.mubr.msk.f32.gmra.mrb[206].mxu0 %vm1365_vm5, %v4129_v58 }
 0x636   : > { %9509 = vmatprep.mubr.msk.f32.mxu0 %vm10642_vm0, %v13935_v48 }
 0x638   : > { %v4356_v61 = vpop.f32.mrb[198].mxu1 }
 0x639   : > { %v9486_v26 = vpop.f32.mrb[199].mxu1  ;;  %9510 = vmatmul.mubr.msk.f32.vlgmr.msra.gmra.mrb[208].mxu0 %vm1365_vm5, %v4356_v61 }
 0x63a   : > { %9512 = vmatprep.mubr.msk.f32.mxu0 %vm10642_vm0, %v13935_v48  ;;  %10369 = vmatpush3.bf16.msra.mxu0 %v10368_v37 }
 0x63b   : > { %10388 = vmatprep.subr.bf16.mxu0 %v13926_v3 }
 0x63c   : > { %v4361_v21 = vpop.f32.mrb[200].mxu1 }
 0x63d   : > { %v9489_v45 = vpop.f32.mrb[201].mxu1  ;;  %9513 = vmatmul.mubr.msk.f32.gmra.mrb[210].mxu0 %vm1365_vm5, %v4361_v21 }
 0x63e   : > { %9515 = vmatprep.mubr.msk.f32.mxu0 %vm10642_vm0, %v13935_v48 }
 0x640   : > { %v4366_v29 = vpop.f32.mrb[202].mxu1 }
 0x641   : > { %v9492_v13 = vpop.f32.mrb[203].mxu1  ;;  %9516 = vmatmul.mubr.msk.f32.gmra.mrb[212].mxu0 %vm1365_vm5, %v4366_v29 }
 0x642   : > { %9518 = vmatprep.mubr.msk.f32.mxu0 %vm10642_vm0, %v13935_v48 }
 0x644   : > { %v4371_v10 = vpop.f32.mrb[204].mxu1 }
 0x645   : > { %v9495_v35 = vpop.f32.mrb[205].mxu1  ;;  %9519 = vmatmul.mubr.msk.f32.gmra.mrb[214].mxu0 %vm1365_vm5, %v4371_v10 }
 0x646   : > { %9521 = vmatprep.mubr.msk.f32.mxu0 %vm10642_vm0, %v13935_v48 }
 0x648   : > { %v4376_v30 = vpop.f32.mrb[206].mxu1 }
 0x649   : > { %v9498_v33 = vpop.f32.mrb[207].mxu1  ;;  %9522 = vmatmul.mubr.msk.f32.gmra.mrb[216].mxu0 %vm1365_vm5, %v4376_v30 }
 0x64a   : > { %9524 = vmatprep.mubr.msk.f32.mxu0 %vm10642_vm0, %v13935_v48 }
 0x64c   : > { %v4381_v9 = vpop.f32.mrb[208].mxu1 }
 0x64d   : > { %v9501_v38 = vpop.f32.mrb[209].mxu1  ;;  %9525 = vmatmul.mubr.msk.f32.gmra.mrb[218].mxu0 %vm1365_vm5, %v4381_v9 }
 0x64e   : > { %9527 = vmatprep.mubr.msk.f32.mxu0 %vm10642_vm0, %v13935_v48 }
 0x650   : > { %v4386_v4 = vpop.f32.mrb[210].mxu1 }
 0x651   : > { %v9504_v62 = vpop.f32.mrb[211].mxu1  ;;  %9528 = vmatmul.mubr.msk.f32.gmra.mrb[220].mxu0 %vm1365_vm5, %v4386_v4 }
 0x652   : > { %9581 = vmatprep.mubr.msk.f32.mxu0 %vm10642_vm0, %v13935_v48 }
 0x654   : > { %v4613_v41 = vpop.f32.mrb[212].mxu1 }
 0x655   : > { %v9558_v63 = vpop.f32.mrb[213].mxu1  ;;  %9582 = vmatmul.mubr.msk.f32.vlgmr.msra.gmra.mrb[222].mxu0 %vm1365_vm5, %v4613_v41 }
 0x656   : > { %9584 = vmatprep.mubr.msk.f32.mxu0 %vm10642_vm0, %v13935_v48  ;;  %10390 = vmatpush3.bf16.msra.mxu0 %v10389_v6 }
 0x657   : > { %10409 = vmatprep.subr.bf16.mxu0 %v13926_v3 }
 0x658   : > { %v4618_v31 = vpop.f32.mrb[214].mxu1 }
 0x659   : > { %v9561_v36 = vpop.f32.mrb[215].mxu1  ;;  %9585 = vmatmul.mubr.msk.f32.gmra.mrb[224].mxu0 %vm1365_vm5, %v4618_v31 }
 0x65a   : > { %9587 = vmatprep.mubr.msk.f32.mxu0 %vm10642_vm0, %v13935_v48 }
 0x65c   : > { %v4623_v5 = vpop.f32.mrb[216].mxu1 }
 0x65d   : > { %v9564_v49 = vpop.f32.mrb[217].mxu1  ;;  %9588 = vmatmul.mubr.msk.f32.gmra.mrb[226].mxu0 %vm1365_vm5, %v4623_v5 }
 0x65e   : > { %9590 = vmatprep.mubr.msk.f32.mxu0 %vm10642_vm0, %v13935_v48 }
 0x660   : > { %v4628_v32 = vpop.f32.mrb[218].mxu1 }
 0x661   : > { %v9567_v47 = vpop.f32.mrb[219].mxu1  ;;  %9591 = vmatmul.mubr.msk.f32.gmra.mrb[228].mxu0 %vm1365_vm5, %v4628_v32 }
 0x662   : > { %9593 = vmatprep.mubr.msk.f32.mxu0 %vm10642_vm0, %v13935_v48 }
 0x664   : > { %v4633_v20 = vpop.f32.mrb[220].mxu1 }
 0x665   : > { %v9570_v28 = vpop.f32.mrb[221].mxu1  ;;  %9594 = vmatmul.mubr.msk.f32.gmra.mrb[230].mxu0 %vm1365_vm5, %v4633_v20 }
 0x666   : > { %9596 = vmatprep.mubr.msk.f32.mxu0 %vm10642_vm0, %v13935_v48 }
 0x668   : > { %v4638_v54 = vpop.f32.mrb[222].mxu1 }
 0x669   : > { %v9573_v53 = vpop.f32.mrb[223].mxu1  ;;  %9597 = vmatmul.mubr.msk.f32.gmra.mrb[232].mxu0 %vm1365_vm5, %v4638_v54 }
 0x66a   : > { %9599 = vmatprep.mubr.msk.f32.mxu0 %vm10642_vm0, %v13935_v48 }
 0x66c   : > { %v4643_v12 = vpop.f32.mrb[224].mxu1 }
 0x66d   : > { %v9576_v2 = vpop.f32.mrb[225].mxu1  ;;  %9600 = vmatmul.mubr.msk.f32.gmra.mrb[234].mxu0 %vm1365_vm5, %v4643_v12 }
 0x66e   : > { %9653 = vmatprep.mubr.msk.f32.mxu0 %vm10642_vm0, %v13935_v48 }
 0x670   : > { %v4870_v11 = vpop.f32.mrb[226].mxu1 }
 0x671   : > { %v9630_v60 = vpop.f32.mrb[227].mxu1  ;;  %9654 = vmatmul.mubr.msk.f32.vlgmr.msra.gmra.mrb[236].mxu0 %vm1365_vm5, %v4870_v11  ;;  %v3243_v11 = vld [vmem:[%s12689_s30 + $0x88] sm:$0xff] }
 0x672   : > { %9656 = vmatprep.mubr.msk.f32.mxu0 %vm10642_vm0, %v13935_v48  ;;  %10411 = vmatpush3.bf16.msra.mxu0 %v10410_v15  ;;  %v3242_v15 = vld [vmem:[%s12689_s30 + $0x80] sm:$0xff] }
 0x673   : > { %10412 = vmatprep.subr.bf16.mxu0 %v13926_v3  ;;  %v10431_v60 = vpack.c.bf16 %v3243_v11, %v3242_v15 }
 0x674   : > { %v4875_v19 = vpop.f32.mrb[228].mxu1 }
 0x675   : > { %v9633_v27 = vpop.f32.mrb[229].mxu1  ;;  %9657 = vmatmul.mubr.msk.f32.gmra.mrb[238].mxu0 %vm1365_vm5, %v4875_v19 }
 0x676   : > { %9659 = vmatprep.mubr.msk.f32.mxu0 %vm10642_vm0, %v13935_v48 }
 0x678   : > { %v4880_v18 = vpop.f32.mrb[230].mxu1 }
 0x679   : > { %v9636_v23 = vpop.f32.mrb[231].mxu1  ;;  %9660 = vmatmul.mubr.msk.f32.gmra.mrb[240].mxu0 %vm1365_vm5, %v4880_v18 }
 0x67a   : > { %9662 = vmatprep.mubr.msk.f32.mxu0 %vm10642_vm0, %v13935_v48 }
 0x67c   : > { %v4885_v7 = vpop.f32.mrb[232].mxu1 }
 0x67d   : > { %v9639_v22 = vpop.f32.mrb[233].mxu1  ;;  %9663 = vmatmul.mubr.msk.f32.gmra.mrb[242].mxu0 %vm1365_vm5, %v4885_v7 }
 0x67e   : > { %9665 = vmatprep.mubr.msk.f32.mxu0 %vm10642_vm0, %v13935_v48 }
 0x680   : > { %v4890_v50 = vpop.f32.mrb[234].mxu1 }
 0x681   : > { %v9642_v58 = vpop.f32.mrb[235].mxu1  ;;  %9666 = vmatmul.mubr.msk.f32.gmra.mrb[244].mxu0 %vm1365_vm5, %v4890_v50 }
 0x682   : > { %9668 = vmatprep.mubr.msk.f32.mxu0 %vm10642_vm0, %v13935_v48 }
 0x684   : > { %v4895_v1 = vpop.f32.mrb[236].mxu1 }
 0x685   : > { %v9645_v37 = vpop.f32.mrb[237].mxu1  ;;  %9669 = vmatmul.mubr.msk.f32.gmra.mrb[246].mxu0 %vm1365_vm5, %v4895_v1 }
 0x686   : > { %9671 = vmatprep.mubr.msk.f32.mxu0 %vm10642_vm0, %v13935_v48 }
 0x688   : > { %v4900_v61 = vpop.f32.mrb[238].mxu1 }
 0x689   : > { %v9648_v24 = vpop.f32.mrb[239].mxu1  ;;  %9672 = vmatmul.mubr.msk.f32.gmra.mrb[248].mxu0 %vm1365_vm5, %v4900_v61 }
 0x68a   : > { %9725 = vmatprep.mubr.msk.f32.mxu0 %vm10642_vm0, %v13935_v48 }
 0x68c   : > { %v5127_v26 = vpop.f32.mrb[240].mxu1 }
 0x68d   : > { %v9702_v21 = vpop.f32.mrb[241].mxu1  ;;  %9726 = vmatmul.mubr.msk.f32.vlgmr.msra.gmra.mrb[250].mxu0 %vm1365_vm5, %v5127_v26 }
 0x68e   : > { %10414 = vmatpush3.bf16.msra.mxu0 %v12711_v17  ;;  %9728 = vmatprep.mubr.msk.f32.mxu0 %vm10642_vm0, %v13935_v48 }
 0x68f   : > { %10415 = vmatprep.subr.bf16.mxu0 %v13926_v3 }
 0x690   : > { %v5132_v14 = vpop.f32.mrb[242].mxu1 }
 0x691   : > { %v9705_v45 = vpop.f32.mrb[243].mxu1  ;;  %9729 = vmatmul.mubr.msk.f32.gmra.mrb[252].mxu0 %vm1365_vm5, %v5132_v14 }
 0x692   : > { %10417 = vmatpush3.bf16.msra.mxu0 %v12719_v56  ;;  %9731 = vmatprep.mubr.msk.f32.mxu0 %vm10642_vm0, %v13935_v48 }
 0x693   : > { %10418 = vmatprep.subr.bf16.mxu0 %v13926_v3 }
 0x694   : > { %v5137_v29 = vpop.f32.mrb[244].mxu1 }
 0x695   : > { %v9708_v13 = vpop.f32.mrb[245].mxu1  ;;  %9732 = vmatmul.mubr.msk.f32.gmra.mrb[254].mxu0 %vm1365_vm5, %v5137_v29 }
 0x696   : > { %10420 = vmatpush3.bf16.msra.mxu0 %v12727_v25  ;;  %9734 = vmatprep.mubr.msk.f32.mxu0 %vm10642_vm0, %v13935_v48 }
 0x697   : > { %10421 = vmatprep.subr.bf16.mxu0 %v13926_v3 }
 0x698   : > { %v5142_v17 = vpop.f32.mrb[246].mxu1 }
 0x699   : > { %v9711_v10 = vpop.f32.mrb[247].mxu1  ;;  %9735 = vmatmul.mubr.msk.f32.gmra.mrb[0].mxu0 %vm1365_vm5, %v5142_v17 }
 0x69a   : > { %10423 = vmatpush3.bf16.msra.mxu0 %v12735_v16  ;;  %9737 = vmatprep.mubr.msk.f32.mxu0 %vm10642_vm0, %v13935_v48 }
 0x69b   : > { %10424 = vmatprep.subr.bf16.mxu0 %v13926_v3 }
 0x69c   : > { %v5147_v56 = vpop.f32.mrb[248].mxu1 }
 0x69d   : > { %v9714_v35 = vpop.f32.mrb[249].mxu1  ;;  %9738 = vmatmul.mubr.msk.f32.gmra.mrb[2].mxu0 %vm1365_vm5, %v5147_v56 }
 0x69e   : > { %10426 = vmatpush3.bf16.msra.mxu0 %v12743_v40  ;;  %9740 = vmatprep.mubr.msk.f32.mxu0 %vm10642_vm0, %v13935_v48  ;;  %v7904_v40 = vld [vmem:[%s13936_s23 + $0x1c0] sm:$0xff] }
 0x69f   : > { %10427 = vmatprep.subr.bf16.mxu0 %v13926_v3 }
 0x6a0   : > { %v5152_v25 = vpop.f32.mrb[250].mxu1 }
 0x6a1   : > { %v9717_v30 = vpop.f32.mrb[251].mxu1  ;;  %9741 = vmatmul.mubr.msk.f32.gmra.mrb[4].mxu0 %vm1365_vm5, %v5152_v25 }
 0x6a2   : > { %10429 = vmatpush3.bf16.msra.mxu0 %v12751_v57  ;;  %9743 = vmatprep.mubr.msk.f32.mxu0 %vm10642_vm0, %v13935_v48 }
 0x6a3   : > { %9770 = vmatprep.subr.mxu0 %v13935_v48 }
 0x6a4   : > { %v5157_v16 = vpop.f32.mrb[252].mxu1 }
 0x6a5   : > { %v9720_v33 = vpop.f32.mrb[253].mxu1  ;;  %9744 = vmatmul.mubr.msk.f32.gmra.mrb[6].mxu0 %vm1365_vm5, %v5157_v16 }
 0x6a6   : > { %9771 = vmatpush3.msk.msra.mxu0 %vm1906_vm7, %v12755_v39  ;;  %9772 = vmatprep.mubr.msk.f32.mxu0 %vm10642_vm0, %v13935_v48 }
 0x6a7   : > { %10430 = vmatprep.subr.bf16.mxu0 %v13926_v3 }
 0x6a9   : > { %9773 = vmatmul.mubr.msk.f32.vlgmr.msra.gmra.mrb[8].mxu0 %vm3251_vm9, %v7904_v40 }
 0x6aa   : > { %9797 = vmatprep.mubr.msk.f32.mxu0 %vm10642_vm0, %v13935_v48  ;;  %10432 = vmatpush3.bf16.msra.mxu0 %v10431_v60 }
 0x6ab   : > { %10457 = vmatprep.subr.bf16.mxu0 %v13926_v3 }
 0x6c9   : > { %v13487_v18 = vpop.f32.mrb[254].mxu1 }
 0x6d4   : > { %v3963_v57 = vpop.f32.mrb[180].mxu0 }
 0x6d5   : > { %v3997_v9 = vadd.f32 %v3963_v57, %v13266_v44  ;;  %v9367_v38 = vpop.f32.mrb[181].mxu0 }
 0x6d8   : > { %v3968_v43 = vpop.f32.mrb[182].mxu0 }
 0x6d9   : > { %v3998_v39 = vadd.f32 %v3968_v43, %v13268_v0  ;;  %v9370_v46 = vpop.f32.mrb[183].mxu0 }
 0x6dc   : > { %v3973_v4 = vpop.f32.mrb[184].mxu0 }
 0x6dd   : > { %v3999_v62 = vadd.f32 %v3973_v4, %v13270_v52  ;;  %v9373_v6 = vpop.f32.mrb[185].mxu0 }
 0x6e0   : > { %v3978_v41 = vpop.f32.mrb[186].mxu0 }
 0x6e1   : > { %v4000_v63 = vadd.f32 %v3978_v41, %v13272_v59  ;;  %v9376_v31 = vpop.f32.mrb[187].mxu0 }
 0x6e4   : > { %v3983_v36 = vpop.f32.mrb[188].mxu0 }
 0x6e5   : > { %v4001_v5 = vadd.f32 %v3983_v36, %v13274_v8  ;;  %v9379_v49 = vpop.f32.mrb[189].mxu0 }
 0x6e8   : > { %v3988_v32 = vpop.f32.mrb[190].mxu0 }
 0x6e9   : > { %v4002_v44 = vadd.f32 %v3988_v32, %v13276_v51  ;;  %v9382_v47 = vpop.f32.mrb[191].mxu0 }
 0x6ec   : > { %v3993_v0 = vpop.f32.mrb[192].mxu0 }
 0x6ed   : > { %v4003_v20 = vadd.f32 %v3993_v0, %v13280_v34  ;;  %v9385_v28 = vpop.f32.mrb[193].mxu0  ;;  %v9777_v34 = vpop.f32.mrb[255].mxu1 }
 0x6ee   : > { %v13490_v50 = vpop.f32.mrb[0].mxu1 }
 0x6ef   : > { %v9780_v58 = vpop.f32.mrb[1].mxu1 }
 0x6f0   : > { %v4220_v52 = vpop.f32.mrb[194].mxu0  ;;  %v13492_v24 = vpop.f32.mrb[2].mxu1 }
 0x6f1   : > { %v4254_v54 = vadd.f32 %v4220_v52, %v3997_v9  ;;  %v9439_v53 = vpop.f32.mrb[195].mxu0  ;;  %v9783_v26 = vpop.f32.mrb[3].mxu1 }
 0x6f2   : > { %v13494_v29 = vpop.f32.mrb[4].mxu1 }
 0x6f3   : > { %v9786_v13 = vpop.f32.mrb[5].mxu1 }
 0x6f4   : > { %v4225_v42 = vpop.f32.mrb[196].mxu0  ;;  %v13496_v35 = vpop.f32.mrb[6].mxu1 }
 0x6f5   : > { %v4255_v59 = vadd.f32 %v4225_v42, %v3998_v39  ;;  %v9442_v55 = vpop.f32.mrb[197].mxu0  ;;  %v9789_v25 = vpop.f32.mrb[7].mxu1 }
 0x6f6   : > { %v13498_v40 = vpop.f32.mrb[8].mxu1 }
 0x6f7   : > { %v9792_v57 = vpop.f32.mrb[9].mxu1 }
 0x6f8   : > { %v4230_v12 = vpop.f32.mrb[198].mxu0 }
 0x6f9   : > { %v4256_v2 = vadd.f32 %v4230_v12, %v3999_v62  ;;  %v9445_v8 = vpop.f32.mrb[199].mxu0 }
 0x6fc   : > { %v4235_v19 = vpop.f32.mrb[200].mxu0 }
 0x6fd   : > { %v4257_v51 = vadd.f32 %v4235_v19, %v4000_v63  ;;  %v9448_v27 = vpop.f32.mrb[201].mxu0 }
 0x700   : > { %v4240_v23 = vpop.f32.mrb[202].mxu0 }
 0x701   : > { %v4258_v7 = vadd.f32 %v4240_v23, %v4001_v5  ;;  %v9451_v22 = vpop.f32.mrb[203].mxu0 }
 0x704   : > { %v4245_v1 = vpop.f32.mrb[204].mxu0 }
 0x705   : > { %v4259_v37 = vadd.f32 %v4245_v1, %v4002_v44  ;;  %v9454_v61 = vpop.f32.mrb[205].mxu0 }
 0x708   : > { %v4250_v21 = vpop.f32.mrb[206].mxu0 }
 0x709   : > { %v4260_v14 = vadd.f32 %v4250_v21, %v4003_v20  ;;  %v9457_v45 = vpop.f32.mrb[207].mxu0 }
 0x70c   : > { %v4477_v17 = vpop.f32.mrb[208].mxu0 }
 0x70d   : > { %v4511_v10 = vadd.f32 %v4477_v17, %v4254_v54  ;;  %v9511_v56 = vpop.f32.mrb[209].mxu0 }
 0x710   : > { %v4482_v30 = vpop.f32.mrb[210].mxu0 }
 0x711   : > { %v4512_v16 = vadd.f32 %v4482_v30, %v4255_v59  ;;  %v9514_v33 = vpop.f32.mrb[211].mxu0 }
 0x714   : > { %v4487_v9 = vpop.f32.mrb[212].mxu0 }
 0x715   : > { %v4513_v38 = vadd.f32 %v4487_v9, %v4256_v2  ;;  %v9517_v43 = vpop.f32.mrb[213].mxu0 }
 0x718   : > { %v4492_v39 = vpop.f32.mrb[214].mxu0 }
 0x719   : > { %v4514_v46 = vadd.f32 %v4492_v39, %v4257_v51  ;;  %v9520_v4 = vpop.f32.mrb[215].mxu0 }
 0x71c   : > { %v4497_v62 = vpop.f32.mrb[216].mxu0 }
 0x71d   : > { %v4515_v6 = vadd.f32 %v4497_v62, %v4258_v7  ;;  %v9523_v41 = vpop.f32.mrb[217].mxu0 }
 0x720   : > { %v4502_v63 = vpop.f32.mrb[218].mxu0 }
 0x721   : > { %v4516_v31 = vadd.f32 %v4502_v63, %v4259_v37  ;;  %v9526_v36 = vpop.f32.mrb[219].mxu0 }
 0x724   : > { %v4507_v5 = vpop.f32.mrb[220].mxu0 }
 0x725   : > { %v4517_v49 = vadd.f32 %v4507_v5, %v4260_v14  ;;  %v9529_v32 = vpop.f32.mrb[221].mxu0 }
 0x728   : > { %v4734_v44 = vpop.f32.mrb[222].mxu0 }
 0x729   : > { %v4768_v47 = vadd.f32 %v4734_v44, %v4511_v10  ;;  %v9583_v0 = vpop.f32.mrb[223].mxu0 }
 0x72c   : > { %v4739_v20 = vpop.f32.mrb[224].mxu0 }
 0x72d   : > { %v4769_v28 = vadd.f32 %v4739_v20, %v4512_v16  ;;  %v9586_v52 = vpop.f32.mrb[225].mxu0 }
 0x730   : > { %v4744_v54 = vpop.f32.mrb[226].mxu0 }
 0x731   : > { %v4770_v53 = vadd.f32 %v4744_v54, %v4513_v38  ;;  %v9589_v42 = vpop.f32.mrb[227].mxu0 }
 0x734   : > { %v4749_v59 = vpop.f32.mrb[228].mxu0 }
 0x735   : > { %v4771_v55 = vadd.f32 %v4749_v59, %v4514_v46  ;;  %v9592_v12 = vpop.f32.mrb[229].mxu0 }
 0x738   : > { %v4754_v2 = vpop.f32.mrb[230].mxu0 }
 0x739   : > { %v4772_v8 = vadd.f32 %v4754_v2, %v4515_v6  ;;  %v9595_v15 = vpop.f32.mrb[231].mxu0 }
 0x73c   : > { %v4759_v11 = vpop.f32.mrb[232].mxu0 }
 0x73d   : > { %v4773_v60 = vadd.f32 %v4759_v11, %v4516_v31  ;;  %v9598_v19 = vpop.f32.mrb[233].mxu0 }
 0x740   : > { %v4764_v51 = vpop.f32.mrb[234].mxu0 }
 0x741   : > { %v4774_v27 = vadd.f32 %v4764_v51, %v4517_v49  ;;  %v9601_v34 = vpop.f32.mrb[235].mxu0 }
 0x744   : > { %v4991_v23 = vpop.f32.mrb[236].mxu0 }
 0x745   : > { %v5025_v7 = vadd.f32 %v4991_v23, %v4768_v47  ;;  %v9655_v22 = vpop.f32.mrb[237].mxu0 }
 0x748   : > { %v4996_v58 = vpop.f32.mrb[238].mxu0 }
 0x749   : > { %v5026_v1 = vadd.f32 %v4996_v58, %v4769_v28  ;;  %v9658_v37 = vpop.f32.mrb[239].mxu0 }
 0x74c   : > { %v5001_v61 = vpop.f32.mrb[240].mxu0 }
 0x74d   : > { %v5027_v26 = vadd.f32 %v5001_v61, %v4770_v53  ;;  %v9661_v21 = vpop.f32.mrb[241].mxu0 }
 0x750   : > { %v5006_v14 = vpop.f32.mrb[242].mxu0 }
 0x751   : > { %v5028_v45 = vadd.f32 %v5006_v14, %v4771_v55  ;;  %v9664_v13 = vpop.f32.mrb[243].mxu0 }
 0x754   : > { %v5011_v17 = vpop.f32.mrb[244].mxu0 }
 0x755   : > { %v5029_v10 = vadd.f32 %v5011_v17, %v4772_v8  ;;  %v9667_v56 = vpop.f32.mrb[245].mxu0 }
 0x758   : > { %v5016_v25 = vpop.f32.mrb[246].mxu0 }
 0x759   : > { %v5030_v30 = vadd.f32 %v5016_v25, %v4773_v60  ;;  %v9670_v16 = vpop.f32.mrb[247].mxu0 }
 0x75c   : > { %v5021_v33 = vpop.f32.mrb[248].mxu0 }
 0x75d   : > { %v5031_v57 = vadd.f32 %v5021_v33, %v4774_v27  ;;  %v9673_v9 = vpop.f32.mrb[249].mxu0 }
 0x760   : > { %v5248_v38 = vpop.f32.mrb[250].mxu0 }
 0x761   : > { %v5282_v43 = vadd.f32 %v5248_v38, %v5025_v7  ;;  %v9727_v39 = vpop.f32.mrb[251].mxu0 }
 0x764   : > { %v5253_v46 = vpop.f32.mrb[252].mxu0 }
 0x765   : > { %v5283_v4 = vadd.f32 %v5253_v46, %v5026_v1  ;;  %v9730_v62 = vpop.f32.mrb[253].mxu0 }
 0x768   : > { %v5258_v6 = vpop.f32.mrb[254].mxu0 }
 0x769   : > { %v5284_v41 = vadd.f32 %v5258_v6, %v5027_v26  ;;  %v9733_v63 = vpop.f32.mrb[255].mxu0 }
 0x76c   : > { %v5263_v31 = vpop.f32.mrb[0].mxu0 }
 0x76d   : > { %v5285_v36 = vadd.f32 %v5263_v31, %v5028_v45  ;;  %v9736_v5 = vpop.f32.mrb[1].mxu0 }
 0x770   : > { %v5268_v49 = vpop.f32.mrb[2].mxu0 }
 0x771   : > { %v5286_v32 = vadd.f32 %v5268_v49, %v5029_v10  ;;  %v9739_v44 = vpop.f32.mrb[3].mxu0 }
 0x774   : > { %v5273_v47 = vpop.f32.mrb[4].mxu0 }
 0x775   : > { %v13500_v0 = vadd.f32 %v5273_v47, %v5030_v30  ;;  %v9742_v20 = vpop.f32.mrb[5].mxu0 }
 0x778   : > { %v5278_v28 = vpop.f32.mrb[6].mxu0 }
 0x779   : > { %v13502_v52 = vadd.f32 %v5278_v28, %v5031_v57  ;;  %v9745_v54 = vpop.f32.mrb[7].mxu0 }
 0x77c   : > { %v5384_v53 = vpop.f32.mrb[8].mxu0 }
 0x77d   : > { %v9774_v42 = vpop.f32.mrb[9].mxu0  ;;  %9798 = vmatmul.mubr.msk.f32.vlgmr.msra.gmra.mrb[10].mxu0 %vm1365_vm5, %v5384_v53 }
 0x77e   : > { %9800 = vmatprep.mubr.msk.f32.mxu0 %vm10642_vm0, %v13935_v48 }
 0x781   : > { %9801 = vmatmul.mubr.msk.f32.gmra.mrb[12].mxu0 %vm1365_vm5, %v13487_v18 }
 0x782   : > { %9803 = vmatprep.mubr.msk.f32.mxu0 %vm10642_vm0, %v13935_v48 }
 0x785   : > { %9804 = vmatmul.mubr.msk.f32.gmra.mrb[14].mxu0 %vm1365_vm5, %v13490_v50  ;;  %v7926_v50 = vld [vmem:[%s843_s21] ss:$0 sm:$0xff]  ;;  %s7971_s21 = sshll.u32 %s13939_s22, 8 }
 0x786   : > { %9806 = vmatprep.mubr.msk.f32.mxu0 %vm10642_vm0, %v13935_v48 }
 0x789   : > { %9807 = vmatmul.mubr.msk.f32.gmra.mrb[16].mxu0 %vm1365_vm5, %v13492_v24 }
 0x78a   : > { %9809 = vmatprep.mubr.msk.f32.mxu0 %vm10642_vm0, %v13935_v48 }
 0x78d   : > { %9810 = vmatmul.mubr.msk.f32.gmra.mrb[18].mxu0 %vm1365_vm5, %v13494_v29 }
 0x78e   : > { %9812 = vmatprep.mubr.msk.f32.mxu0 %vm10642_vm0, %v13935_v48 }
 0x791   : > { %9813 = vmatmul.mubr.msk.f32.gmra.mrb[20].mxu0 %vm1365_vm5, %v13496_v35 }
 0x792   : > { %9815 = vmatprep.mubr.msk.f32.mxu0 %vm10642_vm0, %v13935_v48 }
 0x795   : > { %9816 = vmatmul.mubr.msk.f32.gmra.mrb[22].mxu0 %vm1365_vm5, %v13498_v40 }
 0x796   : > { %9880 = vmatprep.mubr.msk.f32.mxu0 %vm10642_vm0, %v13935_v48 }
 0x850   : > { %v5505_v18 = vpop.f32.mrb[10].mxu0 }
 0x851   : > { %v5539_v24 = vadd.f32 %v5505_v18, %v5282_v43  ;;  %v9799_v29 = vpop.f32.mrb[11].mxu0 }
 0x853   : > { %v13535_v59 = vadd.f32 %v7926_v50, %v5539_v24 }
 0x854   : > { %v5510_v35 = vpop.f32.mrb[12].mxu0 }
 0x855   : > { %v5540_v55 = vadd.f32 %v5510_v35, %v5283_v4  ;;  %v9802_v12 = vpop.f32.mrb[13].mxu0  ;;  %v5583_v2 = vmul.f32 %v13535_v59, %v13535_v59  ;;  %v5562_v15 = vsel %vm1365_vm5, %v13535_v59, 0.0 }
 0x857   : > { %v13539_v40 = vadd.f32 %v7926_v50, %v5540_v55  ;;  %v5590_v34 = vsel %vm1365_vm5, %v5583_v2, 0.0 }
 0x858   : > { %v5515_v8 = vpop.f32.mrb[14].mxu0 }
 0x859   : > { %v5563_v11 = vsel %vm1365_vm5, %v13539_v40, 0.0  ;;  %v5584_v60 = vmul.f32 %v13539_v40, %v13539_v40  ;;  %v5541_v19 = vadd.f32 %v5515_v8, %v5284_v41  ;;  %v9805_v51 = vpop.f32.mrb[15].mxu0 }
 0x85a   : > { %v5564_v27 = vadd.f32 %v5563_v11, %v5562_v15 }
 0x85b   : > { %v5591_v23 = vsel %vm1365_vm5, %v5584_v60, 0.0  ;;  %v13549_v7 = vadd.f32 %v7926_v50, %v5541_v19 }
 0x85c   : > { %v5592_v22 = vadd.f32 %v5591_v23, %v5590_v34  ;;  %v5520_v58 = vpop.f32.mrb[16].mxu0 }
 0x85d   : > { %v5565_v1 = vsel %vm1365_vm5, %v13549_v7, 0.0  ;;  %v5585_v37 = vmul.f32 %v13549_v7, %v13549_v7  ;;  %v5542_v61 = vadd.f32 %v5520_v58, %v5285_v36  ;;  %v9808_v26 = vpop.f32.mrb[17].mxu0 }
 0x85e   : > { %v5566_v21 = vadd.f32 %v5565_v1, %v5564_v27 }
 0x85f   : > { %v5593_v14 = vsel %vm1365_vm5, %v5585_v37, 0.0  ;;  %v13556_v45 = vadd.f32 %v7926_v50, %v5542_v61 }
 0x860   : > { %v5594_v13 = vadd.f32 %v5593_v14, %v5592_v22  ;;  %v5525_v17 = vpop.f32.mrb[18].mxu0 }
 0x861   : > { %v5567_v10 = vsel %vm1365_vm5, %v13556_v45, 0.0  ;;  %v5586_v56 = vmul.f32 %v13556_v45, %v13556_v45  ;;  %v5543_v25 = vadd.f32 %v5525_v17, %v5286_v32  ;;  %v9811_v30 = vpop.f32.mrb[19].mxu0 }
 0x862   : > { %v5568_v16 = vadd.f32 %v5567_v10, %v5566_v21  ;;  %v7928_v10 = vld [vmem:[%s849_s4] ss:$0 sm:$0xff]  ;;  %s13641_s4 = scalar_lea.vmem %s13895_s12, %s10613_s28 }
 0x863   : > { %v5595_v33 = vsel %vm1365_vm5, %v5586_v56, 0.0  ;;  %v5557_v57 = vadd.f32 %v7926_v50, %v5543_v25 }
 0x864   : > { %v5596_v9 = vadd.f32 %v5595_v33, %v5594_v13  ;;  %v5530_v38 = vpop.f32.mrb[20].mxu0 }
 0x865   : > { %v5569_v43 = vsel %vm1365_vm5, %v5557_v57, 0.0  ;;  %v5587_v39 = vmul.f32 %v5557_v57, %v5557_v57  ;;  %v5544_v46 = vadd.f32 %v5530_v38, %v13500_v0  ;;  %v9814_v4 = vpop.f32.mrb[21].mxu0 }
 0x866   : > { %v5570_v62 = vadd.f32 %v5569_v43, %v5568_v16 }
 0x867   : > { %v5597_v6 = vsel %vm1365_vm5, %v5587_v39, 0.0  ;;  %v5558_v41 = vadd.f32 %v7926_v50, %v5544_v46 }
 0x868   : > { %v5598_v63 = vadd.f32 %v5597_v6, %v5596_v9  ;;  %v5535_v31 = vpop.f32.mrb[22].mxu0 }
 0x869   : > { %v5571_v36 = vsel %vm1365_vm5, %v5558_v41, 0.0  ;;  %v5588_v5 = vmul.f32 %v5558_v41, %v5558_v41  ;;  %v5545_v49 = vadd.f32 %v5535_v31, %v13502_v52  ;;  %v9817_v32 = vpop.f32.mrb[23].mxu0 }
 0x86a   : > { %v5572_v44 = vadd.f32 %v5571_v36, %v5570_v62 }
 0x86b   : > { %v5599_v47 = vsel %vm1365_vm5, %v5588_v5, 0.0  ;;  %v5559_v20 = vadd.f32 %v7926_v50, %v5545_v49 }
 0x86c   : > { %v5600_v28 = vadd.f32 %v5599_v47, %v5598_v63 }
 0x86d   : > { %v5573_v0 = vsel %vm1449_vm6, %v5559_v20, 0.0  ;;  %v5589_v54 = vmul.f32 %v5559_v20, %v5559_v20 }
 0x86e   : > { %v5574_v53 = vadd.f32 %v5573_v0, %v5572_v44 }
 0x86f   : > { %v5601_v42 = vsel %vm1449_vm6, %v5589_v54, 0.0 }
 0x870   : > { %v5575_v18 = vrot.slane %v5574_v53, 4  ;;  %v5602_v24 = vadd.f32 %v5601_v42, %v5600_v28  ;;  %v7936_v42 = vld [vmem:[%s13937_s0 + $0x4] sm:$0x3] }
 0x872   : > { %v5576_v29 = vadd.f32 %v5575_v18, %v5574_v53  ;;  %v5603_v35 = vrot.slane %v5602_v24, 4  ;;  %v5680_v53 = vld [vmem:[%s13937_s0] sm:$0x3]  ;;  %v7931_v18 = vld [vmem:[%s13937_s0 + $0x2] sm:$0x3] }
 0x874   : > { %v5577_v55 = vrot.slane %v5576_v29, 2  ;;  %v5604_v12 = vadd.f32 %v5603_v35, %v5602_v24  ;;  %v5664_v24 = vld [vmem:[%s13641_s4 + $0x10] sm:$0xff] }
 0x876   : > { %v5578_v2 = vadd.f32 %v5577_v55, %v5576_v29  ;;  %v5605_v52 = vrot.slane %v5604_v12, 2  ;;  %v5665_v29 = vld [vmem:[%s13641_s4 + $0x18] sm:$0xff] }
 0x877   : > { %v10452_v35 = vpack.c.bf16 %v5665_v29, %v5664_v24  ;;  %v5677_v24 = vld [vmem:[%s13641_s4 + $0x78] sm:$0xff] }
 0x878   : > { %v5579_v8 = vrot.slane %v5578_v2, 1  ;;  %v5606_v15 = vadd.f32 %v5605_v52, %v5604_v12 }
 0x87a   : > { %v5580_v11 = vadd.f32 %v5579_v8, %v5578_v2  ;;  %v5607_v60 = vrot.slane %v5606_v15, 1  ;;  %v5662_v8 = vld [vmem:[%s13641_s4] sm:$0xff] }
 0x87c   : > { %v5582_v50 = vmul.f32 0.02, %v5580_v11  ;;  %v5608_v19 = vadd.f32 %v5607_v60, %v5606_v15  ;;  %v5663_v15 = vld [vmem:[%s13641_s4 + $0x8] sm:$0xff]  ;;  %v5666_v60 = vld [vmem:[%s13641_s4 + $0x20] sm:$0xff] }
 0x87d   : > { %v10455_v11 = vpack.c.bf16 %v5663_v15, %v5662_v8  ;;  %v7960_v8 = vld [vmem:[%s13937_s0 + $0x10] sm:$0x3] }
 0x87e   : > { %v5609_v51 = vmul.f32 0.02, %v5608_v19  ;;  %v5610_v27 = vmul.f32 %v5582_v50, %v5582_v50  ;;  %v5613_v34 = vsub.f32 %v13535_v59, %v5582_v50  ;;  %v5614_v23 = vsub.f32 %v13539_v40, %v5582_v50  ;;  %v7927_v40 = vld [vmem:[%s846_s3] ss:$0 sm:$0xff]  ;;  %s13789_s3 = scalar_lea.vmem %s13899_s16, %s7971_s21  ;;  %s857_s21 = scalar_lea.vmem %s13896_s13, %s13939_s22 }
 0x87f   : > { %v5615_v22 = vsub.f32 %v13549_v7, %v5582_v50  ;;  %v5616_v58 = vsub.f32 %v13556_v45, %v5582_v50  ;;  %v5617_v1 = vsub.f32 %v5557_v57, %v5582_v50  ;;  %v5618_v37 = vsub.f32 %v5558_v41, %v5582_v50 }
 0x880   : > { %v5611_v61 = vsub.f32 %v5609_v51, %v5610_v27  ;;  %v5619_v26 = vsub.f32 %v5559_v20, %v5582_v50  ;;  %v5667_v50 = vld [vmem:[%s13641_s4 + $0x28] sm:$0xff] }
 0x881   : > { %v10467_v27 = vpack.c.bf16 %v5667_v50, %v5666_v60 }
 0x882   : > { %v5612_v21 = vmax.f32 %v5611_v61, 0.0 }
 0x884   : > { %v5620_v14 = vadd.f32 1e-05, %v5612_v21 }
 0x886   : > { %10629 = vrsqrt.f32 %v5620_v14 }
 0x890   : > { %v10630_v59 = vpop.eup %10629 }
 0x891   : > { %v5622_v7 = vmul.f32 %v10630_v59, %v5613_v34  ;;  %v5623_v13 = vmul.f32 %v10630_v59, %v5614_v23  ;;  %v5624_v45 = vmul.f32 %v10630_v59, %v5615_v22  ;;  %v5625_v17 = vmul.f32 %v10630_v59, %v5616_v58  ;;  %v7940_v34 = vld [vmem:[%s13937_s0 + $0x6] sm:$0x3]  ;;  %v5668_v23 = vld [vmem:[%s13641_s4 + $0x30] sm:$0xff]  ;;  %v5669_v22 = vld [vmem:[%s13641_s4 + $0x38] sm:$0xff] }
 0x892   : > { %v5626_v56 = vmul.f32 %v10630_v59, %v5617_v1  ;;  %v5627_v25 = vmul.f32 %v10630_v59, %v5618_v37  ;;  %v5628_v30 = vmul.f32 %v10630_v59, %v5619_v26  ;;  %v10479_v58 = vpack.c.bf16 %v5669_v22, %v5668_v23  ;;  %v7074_v23 = vld [vmem:[%s13789_s3 + $0x10] sm:$0xff] }
 0x893   : > { %v5635_v16 = vmul.f32 %v7927_v40, %v5622_v7  ;;  %v5636_v33 = vmul.f32 %v7927_v40, %v5623_v13  ;;  %v5637_v57 = vmul.f32 %v7927_v40, %v5624_v45  ;;  %v5638_v9 = vmul.f32 %v7927_v40, %v5625_v17  ;;  %v7944_v45 = vld [vmem:[%s13937_s0 + $0x8] sm:$0x3]  ;;  %v5670_v17 = vld [vmem:[%s13641_s4 + $0x40] sm:$0xff] }
 0x894   : > { %v5639_v38 = vmul.f32 %v7927_v40, %v5626_v56  ;;  %v5640_v43 = vmul.f32 %v7927_v40, %v5627_v25  ;;  %v5641_v28 = vmul.f32 %v7927_v40, %v5628_v30 }
 0x895   : > { %v5648_v39 = vadd.f32 %v7928_v10, %v5635_v16  ;;  %v5649_v46 = vadd.f32 %v7928_v10, %v5636_v33  ;;  %v5650_v4 = vadd.f32 %v7928_v10, %v5637_v57  ;;  %v5651_v62 = vadd.f32 %v7928_v10, %v5638_v9  ;;  %v7948_v9 = vld [vmem:[%s13937_s0 + $0xa] sm:$0x3] }
 0x896   : > { %v5652_v6 = vadd.f32 %v7928_v10, %v5639_v38  ;;  %v5653_v41 = vadd.f32 %v7928_v10, %v5640_v43  ;;  %v5654_v0 = vadd.f32 %v7928_v10, %v5641_v28  ;;  %v5671_v10 = vld [vmem:[%s13641_s4 + $0x48] sm:$0xff]  ;;  %v5672_v38 = vld [vmem:[%s13641_s4 + $0x50] sm:$0xff]  ;;  %v5673_v43 = vld [vmem:[%s13641_s4 + $0x58] sm:$0xff] }
 0x897   : > { %v5655_v63 = vmax.f32 %v5648_v39, 0.0  ;;  %v5656_v31 = vmax.f32 %v5649_v46, 0.0  ;;  %v5657_v36 = vmax.f32 %v5650_v4, 0.0  ;;  %v5658_v5 = vmax.f32 %v5651_v62, 0.0 }
 0x898   : > { %v5659_v49 = vmax.f32 %v5652_v6, 0.0  ;;  %v5660_v32 = vmax.f32 %v5653_v41, 0.0  ;;  %v13601_v54 = vmax.f32 %v5654_v0, 0.0  ;;  %v10491_v56 = vpack.c.bf16 %v5671_v10, %v5670_v17  ;;  %v7085_v17 = vld [vmem:[%s13789_s3 + $0x68] sm:$0xff]  ;;  %v7087_v10 = vld [vmem:[%s13789_s3 + $0x78] sm:$0xff] }
 0x899   : > { %v13583_v44 = vpack.c.bf16 %v5656_v31, %v5655_v63  ;;  %v13585_v47 = vpack.c.bf16 %v5658_v5, %v5657_v36  ;;  %v10503_v39 = vpack.c.bf16 %v5673_v43, %v5672_v38  ;;  %v7952_v63 = vld [vmem:[%s13937_s0 + $0xc] sm:$0x3]  ;;  %v5674_v31 = vld [vmem:[%s13641_s4 + $0x60] sm:$0xff]  ;;  %v7090_v43 = vld [vmem:[%s13789_s3 + $0x90] sm:$0xff] }
 0x89a   : > { %v13587_v20 = vpack.c.bf16 %v5660_v32, %v5659_v49  ;;  %v5675_v36 = vld [vmem:[%s13641_s4 + $0x68] sm:$0xff]  ;;  %v7088_v38 = vld [vmem:[%s13789_s3 + $0x80] sm:$0xff] }
 0x89b   : > { %10435 = vmatpush3.bf16.msra.mxu1 %v13583_v44  ;;  %10459 = vmatpush3.bf16.msra.mxu0 %v13583_v44  ;;  %v10515_v5 = vpack.c.bf16 %v5675_v36, %v5674_v31  ;;  %v7099_v31 = vld [vmem:[%s13789_s3 + $0xd8] sm:$0xff] }
 0x89c   : > { %10436 = vmatprep.subr.bf16.mxu1 %v13926_v3  ;;  %10460 = vmatprep.subr.bf16.mxu0 %v13926_v3 }
 0x89f   : > { %10438 = vmatpush3.bf16.msra.mxu1 %v13585_v47  ;;  %10462 = vmatpush3.bf16.msra.mxu0 %v13585_v47 }
 0x8a0   : > { %10439 = vmatprep.subr.bf16.mxu1 %v13926_v3  ;;  %10463 = vmatprep.subr.bf16.mxu0 %v13926_v3 }
 0x8a3   : > { %10441 = vmatpush3.bf16.msra.mxu1 %v13587_v20  ;;  %10465 = vmatpush3.bf16.msra.mxu0 %v13587_v20 }
 0x8a4   : > { %9830 = vmatprep.subr.mxu1 %v13935_v48  ;;  %9878 = vmatprep.subr.mxu0 %v13935_v48 }
 0x8a7   : > { %9831 = vmatpush3.msk.msra.mxu1 %vm1906_vm7, %v13601_v54  ;;  %9879 = vmatpush3.msk.msra.mxu0 %vm1906_vm7, %v13601_v54 }
 0x8a8   : > { %10442 = vmatprep.subr.bf16.mxu1 %v13926_v3  ;;  %9833 = vmatmul.mubr.msk.f32.vlgmr.msra.gmra.mrb[10].mxu1 %vm5681_vm10, %v5680_v53 }
 0x8a9   : > { %10444 = vmatpush3.bf16.msra.mxu1 %v13583_v44  ;;  %9849 = vmatprep.mubr.msk.f32.mxu1 %vm10642_vm0, %v13935_v48 }
 0x8aa   : > { %10445 = vmatprep.subr.bf16.mxu1 %v13926_v3  ;;  %9881 = vmatmul.mubr.msk.f32.vlgmr.msra.gmra.mrb[24].mxu0 %vm5681_vm10, %v7936_v42  ;;  %v7956_v42 = vld [vmem:[%s13937_s0 + $0xe] sm:$0x3] }
 0x8ab   : > { %10478 = vmatprep.subr.bf16.mxu0 %v13926_v3  ;;  %9911 = vmatprep.mubr.msk.f32.mxu0 %vm10642_vm0, %v13935_v48 }
 0x8ac   : > { %10480 = vmatpush3.bf16.msra.mxu0 %v10479_v58  ;;  %v7077_v58 = vld [vmem:[%s13789_s3 + $0x28] sm:$0xff] }
 0x8ad   : > { %10447 = vmatpush3.bf16.msra.mxu1 %v13585_v47  ;;  %10481 = vmatprep.subr.bf16.mxu0 %v13926_v3 }
 0x8ae   : > { %10448 = vmatprep.subr.bf16.mxu1 %v13926_v3 }
 0x8b1   : > { %10450 = vmatpush3.bf16.msra.mxu1 %v13587_v20 }
 0x8b2   : > { %9847 = vmatprep.subr.mxu1 %v13935_v48 }
 0x8b5   : > { %9848 = vmatpush3.msk.msra.mxu1 %vm1906_vm7, %v13601_v54 }
 0x8b6   : > { %9850 = vmatmul.mubr.msk.f32.vlgmr.msra.gmra.mrb[12].mxu1 %vm5681_vm10, %v7931_v18  ;;  %10451 = vmatprep.subr.bf16.mxu1 %v13926_v3  ;;  %v5676_v18 = vld [vmem:[%s13641_s4 + $0x70] sm:$0xff] }
 0x8b7   : > { %9856 = vmatprep.mubr.msk.f32.mxu1 %vm10642_vm0, %v13935_v48  ;;  %10453 = vmatpush3.bf16.msra.mxu1 %v10452_v35  ;;  %v10527_v29 = vpack.c.bf16 %v5677_v24, %v5676_v18  ;;  %v7098_v18 = vld [vmem:[%s13789_s3 + $0xd0] sm:$0xff]  ;;  %v7101_v24 = vld [vmem:[%s13789_s3 + $0xe8] sm:$0xff] }
 0x8b8   : > { %10454 = vmatprep.subr.bf16.mxu1 %v13926_v3 }
 0x97b   : > { %v5754_v55 = vpop.f32.mrb[10].mxu1 }
 0x97c   : > { %v9834_v12 = vpop.f32.mrb[11].mxu1 }
 0x97d   : > { %v6050_v2 = vpop.f32.mrb[24].mxu0 }
 0x97e   : > { %v9882_v52 = vpop.f32.mrb[25].mxu0 }
 0x989   : > { %v5829_v19 = vpop.f32.mrb[12].mxu1 }
 0x98a   : > { %9857 = vmatmul.mubr.msk.f32.vlgmr.msra.gmra.mrb[14].mxu1 %vm1365_vm5, %v5829_v19  ;;  %v9851_v51 = vpop.f32.mrb[13].mxu1 }
 0x98b   : > { %10456 = vmatpush3.bf16.msra.mxu1 %v10455_v11  ;;  %9863 = vmatprep.mubr.msk.f32.mxu1 %vm10642_vm0, %v13935_v48  ;;  %v7075_v51 = vld [vmem:[%s13789_s3 + $0x18] sm:$0xff] }
 0x98c   : > { %10466 = vmatprep.subr.bf16.mxu1 %v13926_v3 }
 0x98e   : > { %9864 = vmatmul.mubr.msk.f32.vlgmr.msra.gmra.mrb[16].mxu1 %vm1365_vm5, %v5754_v55 }
 0x98f   : > { %10468 = vmatpush3.bf16.msra.mxu1 %v10467_v27  ;;  %9887 = vmatprep.mubr.msk.f32.mxu1 %vm10642_vm0, %v13935_v48 }
 0x990   : > { %10469 = vmatprep.subr.bf16.mxu1 %v13926_v3 }
 0x992   : > { %9888 = vmatmul.mubr.msk.f32.vlgmr.msra.gmra.mrb[18].mxu1 %vm1365_vm5, %v6050_v2 }
 0x993   : > { %10471 = vmatpush3.bf16.msra.mxu1 %v13583_v44  ;;  %9904 = vmatprep.mubr.msk.f32.mxu1 %vm10642_vm0, %v13935_v48 }
 0x994   : > { %10472 = vmatprep.subr.bf16.mxu1 %v13926_v3 }
 0x997   : > { %10474 = vmatpush3.bf16.msra.mxu1 %v13585_v47 }
 0x998   : > { %10475 = vmatprep.subr.bf16.mxu1 %v13926_v3 }
 0x99b   : > { %10477 = vmatpush3.bf16.msra.mxu1 %v13587_v20 }
 0x99c   : > { %9902 = vmatprep.subr.mxu1 %v13935_v48 }
 0x99f   : > { %9903 = vmatpush3.msk.msra.mxu1 %vm1906_vm7, %v13601_v54 }
 0x9a0   : > { %9905 = vmatmul.mubr.msk.f32.vlgmr.msra.gmra.mrb[20].mxu1 %vm5681_vm10, %v7940_v34  ;;  %10490 = vmatprep.subr.bf16.mxu1 %v13926_v3  ;;  %v7072_v34 = vld [vmem:[%s13789_s3] sm:$0xff] }
 0x9a1   : > { %9935 = vmatprep.mubr.msk.f32.mxu1 %vm10642_vm0, %v13935_v48  ;;  %10492 = vmatpush3.bf16.msra.mxu1 %v10491_v56  ;;  %v10543_v22 = vpack.c.bf16 %v7074_v23, %v7072_v34  ;;  %v7084_v56 = vld [vmem:[%s13789_s3 + $0x60] sm:$0xff] }
 0x9a2   : > { %10493 = vmatprep.subr.bf16.mxu1 %v13926_v3 }
 0xa5d   : > { %v5902_v1 = vpop.f32.mrb[14].mxu1 }
 0xa5e   : > { %v9858_v37 = vpop.f32.mrb[15].mxu1 }
 0xa61   : > { %v5975_v61 = vpop.f32.mrb[16].mxu1 }
 0xa62   : > { %v5976_v26 = vadd.f32 %v5975_v61, %v5902_v1  ;;  %v9865_v21 = vpop.f32.mrb[17].mxu1  ;;  %v7079_v1 = vld [vmem:[%s13789_s3 + $0x38] sm:$0xff]  ;;  %v7076_v61 = vld [vmem:[%s13789_s3 + $0x20] sm:$0xff] }
 0xa63   : > { %v10545_v37 = vpack.c.bf16 %v7079_v1, %v7077_v58 }
 0xa65   : > { %v6123_v14 = vpop.f32.mrb[18].mxu1 }
 0xa66   : > { %v6127_v59 = vadd.f32 %v6123_v14, %v5976_v26  ;;  %v9889_v40 = vpop.f32.mrb[19].mxu1  ;;  %v7078_v26 = vld [vmem:[%s13789_s3 + $0x30] sm:$0xff]  ;;  %v7081_v14 = vld [vmem:[%s13789_s3 + $0x48] sm:$0xff] }
 0xa67   : > { %v10547_v21 = vpack.c.bf16 %v7078_v26, %v7076_v61  ;;  %v7964_v61 = vld [vmem:[%s857_s21] ss:$0 sm:$0xff] }
 0xa73   : > { %v6199_v7 = vpop.f32.mrb[20].mxu1 }
 0xa74   : > { %9912 = vmatmul.mubr.msk.f32.vlgmr.msra.gmra.mrb[26].mxu0 %vm1365_vm5, %v6199_v7  ;;  %v9906_v13 = vpop.f32.mrb[21].mxu1  ;;  %v7080_v7 = vld [vmem:[%s13789_s3 + $0x40] sm:$0xff] }
 0xa75   : > { %10483 = vmatpush3.bf16.msra.mxu0 %v13583_v44  ;;  %9928 = vmatprep.mubr.msk.f32.mxu0 %vm10642_vm0, %v13935_v48  ;;  %v7082_v13 = vld [vmem:[%s13789_s3 + $0x50] sm:$0xff] }
 0xa76   : > { %10484 = vmatprep.subr.bf16.mxu0 %v13926_v3 }
 0xa79   : > { %10486 = vmatpush3.bf16.msra.mxu0 %v13585_v47 }
 0xa7a   : > { %10487 = vmatprep.subr.bf16.mxu0 %v13926_v3 }
 0xa7d   : > { %10489 = vmatpush3.bf16.msra.mxu0 %v13587_v20 }
 0xa7e   : > { %9926 = vmatprep.subr.mxu0 %v13935_v48 }
 0xa81   : > { %9927 = vmatpush3.msk.msra.mxu0 %vm1906_vm7, %v13601_v54 }
 0xa82   : > { %9929 = vmatmul.mubr.msk.f32.vlgmr.msra.gmra.mrb[28].mxu0 %vm5681_vm10, %v7944_v45  ;;  %10502 = vmatprep.subr.bf16.mxu0 %v13926_v3  ;;  %v10551_v45 = vpack.c.bf16 %v7082_v13, %v7080_v7 }
 0xa83   : > { %9959 = vmatprep.mubr.msk.f32.mxu0 %vm10642_vm0, %v13935_v48  ;;  %10504 = vmatpush3.bf16.msra.mxu0 %v10503_v39  ;;  %v7093_v39 = vld [vmem:[%s13789_s3 + $0xa8] sm:$0xff] }
 0xa84   : > { %10505 = vmatprep.subr.bf16.mxu0 %v13926_v3 }
 0xb47   : > { %v6272_v25 = vpop.f32.mrb[26].mxu0 }
 0xb48   : > { %v6276_v30 = vadd.f32 %v6272_v25, %v6127_v59  ;;  %v9913_v16 = vpop.f32.mrb[27].mxu0  ;;  %v7083_v59 = vld [vmem:[%s13789_s3 + $0x58] sm:$0xff]  ;;  %v10553_v25 = vpack.c.bf16 %v7087_v10, %v7085_v17 }
 0xb49   : > { %v10549_v40 = vpack.c.bf16 %v7083_v59, %v7081_v14  ;;  %v7089_v16 = vld [vmem:[%s13789_s3 + $0x88] sm:$0xff] }
 0xb55   : > { %v6348_v33 = vpop.f32.mrb[28].mxu0 }
 0xb56   : > { %9936 = vmatmul.mubr.msk.f32.vlgmr.msra.gmra.mrb[22].mxu1 %vm1365_vm5, %v6348_v33  ;;  %v9930_v57 = vpop.f32.mrb[29].mxu0  ;;  %v7091_v33 = vld [vmem:[%s13789_s3 + $0x98] sm:$0xff] }
 0xb57   : > { %10495 = vmatpush3.bf16.msra.mxu1 %v13583_v44  ;;  %9952 = vmatprep.mubr.msk.f32.mxu1 %vm10642_vm0, %v13935_v48 }
 0xb58   : > { %10496 = vmatprep.subr.bf16.mxu1 %v13926_v3 }
 0xb5b   : > { %10498 = vmatpush3.bf16.msra.mxu1 %v13585_v47 }
 0xb5c   : > { %10499 = vmatprep.subr.bf16.mxu1 %v13926_v3 }
 0xb5f   : > { %10501 = vmatpush3.bf16.msra.mxu1 %v13587_v20 }
 0xb60   : > { %9950 = vmatprep.subr.mxu1 %v13935_v48 }
 0xb63   : > { %9951 = vmatpush3.msk.msra.mxu1 %vm1906_vm7, %v13601_v54 }
 0xb64   : > { %9953 = vmatmul.mubr.msk.f32.vlgmr.msra.gmra.mrb[24].mxu1 %vm5681_vm10, %v7948_v9  ;;  %10514 = vmatprep.subr.bf16.mxu1 %v13926_v3  ;;  %v10557_v9 = vpack.c.bf16 %v7091_v33, %v7089_v16 }
 0xb65   : > { %9983 = vmatprep.mubr.msk.f32.mxu1 %vm10642_vm0, %v13935_v48  ;;  %10516 = vmatpush3.bf16.msra.mxu1 %v10515_v5 }
 0xb66   : > { %10517 = vmatprep.subr.bf16.mxu1 %v13926_v3 }
 0xc29   : > { %v6421_v46 = vpop.f32.mrb[22].mxu1 }
 0xc2a   : > { %v6425_v4 = vadd.f32 %v6421_v46, %v6276_v30  ;;  %v9937_v62 = vpop.f32.mrb[23].mxu1  ;;  %v7086_v30 = vld [vmem:[%s13789_s3 + $0x70] sm:$0xff]  ;;  %v7095_v46 = vld [vmem:[%s13789_s3 + $0xb8] sm:$0xff] }
 0xc2b   : > { %v10555_v57 = vpack.c.bf16 %v7086_v30, %v7084_v56  ;;  %v7092_v62 = vld [vmem:[%s13789_s3 + $0xa0] sm:$0xff] }
 0xc37   : > { %v6497_v6 = vpop.f32.mrb[24].mxu1 }
 0xc38   : > { %9960 = vmatmul.mubr.msk.f32.vlgmr.msra.gmra.mrb[30].mxu0 %vm1365_vm5, %v6497_v6  ;;  %v9954_v41 = vpop.f32.mrb[25].mxu1  ;;  %v7094_v6 = vld [vmem:[%s13789_s3 + $0xb0] sm:$0xff] }
 0xc39   : > { %10507 = vmatpush3.bf16.msra.mxu0 %v13583_v44  ;;  %9976 = vmatprep.mubr.msk.f32.mxu0 %vm10642_vm0, %v13935_v48  ;;  %v10561_v41 = vpack.c.bf16 %v7095_v46, %v7093_v39 }
 0xc3a   : > { %10508 = vmatprep.subr.bf16.mxu0 %v13926_v3 }
 0xc3d   : > { %10510 = vmatpush3.bf16.msra.mxu0 %v13585_v47 }
 0xc3e   : > { %10511 = vmatprep.subr.bf16.mxu0 %v13926_v3 }
 0xc41   : > { %10513 = vmatpush3.bf16.msra.mxu0 %v13587_v20 }
 0xc42   : > { %9974 = vmatprep.subr.mxu0 %v13935_v48 }
 0xc45   : > { %9975 = vmatpush3.msk.msra.mxu0 %vm1906_vm7, %v13601_v54 }
 0xc46   : > { %9977 = vmatmul.mubr.msk.f32.vlgmr.msra.gmra.mrb[32].mxu0 %vm5681_vm10, %v7952_v63  ;;  %10526 = vmatprep.subr.bf16.mxu0 %v13926_v3  ;;  %v7097_v63 = vld [vmem:[%s13789_s3 + $0xc8] sm:$0xff] }
 0xc47   : > { %10007 = vmatprep.mubr.msk.f32.mxu0 %vm10642_vm0, %v13935_v48  ;;  %10528 = vmatpush3.bf16.msra.mxu0 %v10527_v29 }
 0xc48   : > { %10529 = vmatprep.subr.bf16.mxu0 %v13926_v3 }
 0xd0b   : > { %v6570_v49 = vpop.f32.mrb[30].mxu0 }
 0xd0c   : > { %v6574_v32 = vadd.f32 %v6570_v49, %v6425_v4  ;;  %v9961_v28 = vpop.f32.mrb[31].mxu0  ;;  %v10559_v4 = vpack.c.bf16 %v7090_v43, %v7088_v38 }
 0xd19   : > { %v6646_v0 = vpop.f32.mrb[32].mxu0 }
 0xd1a   : > { %9984 = vmatmul.mubr.msk.f32.vlgmr.msra.gmra.mrb[26].mxu1 %vm1365_vm5, %v6646_v0  ;;  %v9978_v53 = vpop.f32.mrb[33].mxu0  ;;  %v10563_v0 = vpack.c.bf16 %v7094_v6, %v7092_v62 }
 0xd1b   : > { %10519 = vmatpush3.bf16.msra.mxu1 %v13583_v44  ;;  %10000 = vmatprep.mubr.msk.f32.mxu1 %vm10642_vm0, %v13935_v48  ;;  %v10565_v53 = vpack.c.bf16 %v7099_v31, %v7097_v63  ;;  %v7966_v31 = vld [vmem:[%s863_s27] ss:$0 sm:$0xff]  ;;  %s884_s27 = scalar_lea.vmem %s13903_s20, %s7512_s29 }
 0xd1c   : > { %10520 = vmatprep.subr.bf16.mxu1 %v13926_v3 }
 0xd1f   : > { %10522 = vmatpush3.bf16.msra.mxu1 %v13585_v47 }
 0xd20   : > { %10523 = vmatprep.subr.bf16.mxu1 %v13926_v3 }
 0xd23   : > { %10525 = vmatpush3.bf16.msra.mxu1 %v13587_v20 }
 0xd24   : > { %9998 = vmatprep.subr.mxu1 %v13935_v48 }
 0xd27   : > { %9999 = vmatpush3.msk.msra.mxu1 %vm1906_vm7, %v13601_v54 }
 0xd28   : > { %10001 = vmatmul.mubr.msk.f32.vlgmr.msra.gmra.mrb[28].mxu1 %vm5681_vm10, %v7956_v42  ;;  %10538 = vmatprep.subr.bf16.mxu1 %v13926_v3  ;;  %v7096_v42 = vld [vmem:[%s13789_s3 + $0xc0] sm:$0xff] }
 0xd29   : > { %10031 = vmatprep.mubr.msk.f32.mxu1 %vm10642_vm0, %v13935_v48 }
 0xded   : > { %v6719_v35 = vpop.f32.mrb[26].mxu1 }
 0xdee   : > { %v6723_v55 = vadd.f32 %v6719_v35, %v6574_v32  ;;  %v9985_v12 = vpop.f32.mrb[27].mxu1  ;;  %v7103_v35 = vld [vmem:[%s13789_s3 + $0xf8] sm:$0xff] }
 0xdfb   : > { %v6795_v2 = vpop.f32.mrb[28].mxu1 }
 0xdfc   : > { %10008 = vmatmul.mubr.msk.f32.vlgmr.msra.gmra.mrb[34].mxu0 %vm1365_vm5, %v6795_v2  ;;  %v10002_v52 = vpop.f32.mrb[29].mxu1  ;;  %v10567_v2 = vpack.c.bf16 %v7098_v18, %v7096_v42  ;;  %v7106_v42 = vlaneseq }
 0xdfd   : > { %10531 = vmatpush3.bf16.msra.mxu0 %v13583_v44  ;;  %10024 = vmatprep.mubr.msk.f32.mxu0 %vm10642_vm0, %v13935_v48  ;;  %v5678_v44 = vld [vmem:[%s13641_s4 + $0x80] sm:$0xff]  ;;  %v10569_v52 = vpack.c.bf16 %v7103_v35, %v7101_v24 }
 0xdfe   : > { %10532 = vmatprep.subr.bf16.mxu0 %v13926_v3  ;;  %v7107_v18 = vshrl.u32 %v7106_v42, 7 }
 0xe00   : > { %v7112_v24 = vsub.s32 1, %v7107_v18  ;;  %v7108_v35 = vsub.s32 0, %v7107_v18 }
 0xe01   : > { %10534 = vmatpush3.bf16.msra.mxu0 %v13585_v47  ;;  %v5679_v47 = vld [vmem:[%s13641_s4 + $0x88] sm:$0xff]  ;;  %s10614_s4 = smul.u32 136, %s13939_s22 }
 0xe02   : > { %10535 = vmatprep.subr.bf16.mxu0 %v13926_v3  ;;  %v10539_v15 = vpack.c.bf16 %v5679_v47, %v5678_v44  ;;  %v7102_v44 = vld [vmem:[%s13789_s3 + $0xf0] sm:$0xff] }
 0xe03   : > { %s13817_s28 = scalar_lea.vmem %s13901_s18, %s10614_s4 }
 0xe04   : > { %10540 = vmatpush3.bf16.msra.mxu1 %v10539_v15  ;;  %v7187_v36 = vld [vmem:[%s13817_s28] sm:$0xff]  ;;  %v7188_v5 = vld [vmem:[%s13817_s28 + $0x8] sm:$0xff]  ;;  %v7189_v49 = vld [vmem:[%s13817_s28 + $0x10] sm:$0xff] }
 0xe05   : > { %10537 = vmatpush3.bf16.msra.mxu0 %v13587_v20  ;;  %v7190_v32 = vld [vmem:[%s13817_s28 + $0x18] sm:$0xff]  ;;  %v10574_v28 = vpack.c.bf16 %v7188_v5, %v7187_v36  ;;  %v7192_v12 = vld [vmem:[%s13817_s28 + $0x28] sm:$0xff]  ;;  %v7193_v15 = vld [vmem:[%s13817_s28 + $0x30] sm:$0xff] }
 0xe06   : > { %10022 = vmatprep.subr.mxu0 %v13935_v48  ;;  %v10577_v29 = vpack.c.bf16 %v7190_v32, %v7189_v49  ;;  %v7198_v34 = vld [vmem:[%s13817_s28 + $0x58] sm:$0xff]  ;;  %v7200_v58 = vld [vmem:[%s13817_s28 + $0x68] sm:$0xff]  ;;  %v7201_v32 = vld [vmem:[%s13817_s28 + $0x70] sm:$0xff] }
 0xe09   : > { %10023 = vmatpush3.msk.msra.mxu0 %vm1906_vm7, %v13601_v54  ;;  %v7073_v54 = vld [vmem:[%s13789_s3 + $0x8] sm:$0xff] }
 0xe0a   : > { %10025 = vmatmul.mubr.msk.f32.vlgmr.msra.gmra.mrb[36].mxu0 %vm5681_vm10, %v7960_v8  ;;  %10573 = vmatprep.subr.bf16.mxu0 %v13926_v3  ;;  %v10541_v27 = vpack.c.bf16 %v7075_v51, %v7073_v54  ;;  %v7100_v8 = vld [vmem:[%s13789_s3 + $0xe0] sm:$0xff]  ;;  %v7196_v54 = vld [vmem:[%s13817_s28 + $0x48] sm:$0xff]  ;;  %s860_s3 = scalar_lea.vmem %s13897_s14, %s13939_s22 }
 0xe0b   : > { %10575 = vmatpush1.bf16.msra.mxu0 %v10574_v28  ;;  %v7202_v28 = vld [vmem:[%s13817_s28 + $0x78] sm:$0xff] }
 0xe0c   : > { %10542 = vmatprep.subr.bf16.mxu1 %v10541_v27  ;;  %10576 = vmatprep.subr.bf16.mxu0 %v13926_v3  ;;  %v7197_v27 = vld [vmem:[%s13817_s28 + $0x50] sm:$0xff] }
 0xe0d   : > { %v10589_v23 = vpack.c.bf16 %v7198_v34, %v7197_v27 }
 0xe0f   : > { %10578 = vmatpush1.bf16.msra.mxu0 %v10577_v29  ;;  %v7104_v29 = vld [vmem:[%s872_s24] sm:$0x3] }
 0xe10   : > { %10579 = vmatprep.subr.bf16.mxu0 %v13926_v3 }
 0xecf   : > { %v6868_v11 = vpop.f32.mrb[34].mxu0 }
 0xed0   : > { %v13781_v20 = vadd.f32 %v6868_v11, %v6723_v55  ;;  %v10009_v60 = vpop.f32.mrb[35].mxu0  ;;  %v7191_v55 = vld [vmem:[%s13817_s28 + $0x20] sm:$0xff]  ;;  %v7194_v11 = vld [vmem:[%s13817_s28 + $0x38] sm:$0xff] }
 0xed1   : > { %v10580_v47 = vpack.c.bf16 %v7192_v12, %v7191_v55  ;;  %v10571_v60 = vpack.c.bf16 %v7102_v44, %v7100_v8  ;;  %v7113_v55 = vrot.slane %v7104_v29, %v7112_v24  ;;  %v7109_v12 = vrot.slane %v7104_v29, %v7108_v35 }
 0xed3   : > { %10581 = vmatpush1.bf16.msra.mxu0 %v10580_v47 }
 0xed4   : > { %10582 = vmatprep.subr.bf16.mxu0 %v13926_v3 }
 0xedd   : > { %v6944_v50 = vpop.f32.mrb[36].mxu0 }
 0xede   : > { %10032 = vmatmul.mubr.msk.f32.vlgmr.msra.gmra.mrb[30].mxu1 %vm1365_vm5, %v6944_v50  ;;  %v10026_v19 = vpop.f32.mrb[37].mxu0  ;;  %v10583_v50 = vpack.c.bf16 %v7194_v11, %v7193_v15 }
 0xedf   : > { %7180 = vmatprep.mubr.f32.mxu1 %v13935_v48  ;;  %10544 = vmatpush1.bf16.msra.mxu1 %v10543_v22  ;;  %v7195_v19 = vld [vmem:[%s13817_s28 + $0x40] sm:$0xff] }
 0xee0   : > { %10546 = vmatprep.subr.bf16.mxu1 %v10545_v37  ;;  %10584 = vmatpush1.bf16.msra.mxu0 %v10583_v50  ;;  %v10586_v51 = vpack.c.bf16 %v7196_v54, %v7195_v19  ;;  %v7199_v22 = vld [vmem:[%s13817_s28 + $0x60] sm:$0xff] }
 0xee1   : > { %10585 = vmatprep.subr.bf16.mxu0 %v13926_v3  ;;  %v10592_v1 = vpack.c.bf16 %v7200_v58, %v7199_v22 }
 0xee3   : > { %10548 = vmatpush1.bf16.msra.mxu1 %v10547_v21 }
 0xee4   : > { %10550 = vmatprep.subr.bf16.mxu1 %v10549_v40  ;;  %10587 = vmatpush1.bf16.msra.mxu0 %v10586_v51 }
 0xee5   : > { %10588 = vmatprep.subr.bf16.mxu0 %v13926_v3 }
 0xee7   : > { %10552 = vmatpush1.bf16.msra.mxu1 %v10551_v45 }
 0xee8   : > { %10554 = vmatprep.subr.bf16.mxu1 %v10553_v25  ;;  %10590 = vmatpush1.bf16.msra.mxu0 %v10589_v23 }
 0xee9   : > { %10591 = vmatprep.subr.bf16.mxu0 %v13926_v3 }
 0xeeb   : > { %10556 = vmatpush1.bf16.msra.mxu1 %v10555_v57 }
 0xeec   : > { %10558 = vmatprep.subr.bf16.mxu1 %v10557_v9  ;;  %10593 = vmatpush1.bf16.msra.mxu0 %v10592_v1 }
 0xeed   : > { %10594 = vmatprep.subr.bf16.mxu0 %v13926_v3 }
 0xeef   : > { %10560 = vmatpush1.bf16.msra.mxu1 %v10559_v4 }
 0xef0   : > { %10562 = vmatprep.subr.bf16.mxu1 %v10561_v41  ;;  %v7965_v41 = vld [vmem:[%s860_s3] ss:$0 sm:$0xff]  ;;  %s880_s3 = scalar_lea.vmem %s13902_s19, %s13939_s22 }
 0xef1   : > { %v7967_v44 = vld [vmem:[%s880_s3] ss:$0 sm:$0xff] }
 0xef3   : > { %10564 = vmatpush1.bf16.msra.mxu1 %v10563_v0  ;;  %v10595_v0 = vpack.c.bf16 %v7202_v28, %v7201_v32 }
 0xef4   : > { %10566 = vmatprep.subr.bf16.mxu1 %v10565_v53  ;;  %v7203_v53 = vld [vmem:[%s13817_s28 + $0x80] sm:$0xff] }
 0xef5   : > { %10596 = vmatpush1.bf16.msra.mxu0 %v10595_v0 }
 0xef6   : > { %7247 = vmatprep.subr.mxu0 %v13935_v48 }
 0xef7   : > { %10568 = vmatpush1.bf16.msra.mxu1 %v10567_v2 }
 0xef8   : > { %10570 = vmatprep.subr.bf16.mxu1 %v10569_v52 }
 0xef9   : > { %7248 = vmatpush1.msra.mxu0 %v7203_v53 }
 0xefb   : > { %10572 = vmatpush1.bf16.msra.mxu1 %v10571_v60 }
 0xfb1   : > { %v7017_v37 = vpop.f32.mrb[30].mxu1 }
 0xfb2   : > { %v7021_v26 = vadd.f32 %v7017_v37, %v13781_v20  ;;  %v10033_v21 = vpop.f32.mrb[31].mxu1 }
 0xfb4   : > { %v7029_v14 = vadd.f32 %v7964_v61, %v7021_v26 }
 0xfb6   : > { %v7032_v59 = vsel %vm1906_vm7, %v7029_v14, 0.0  ;;  %v7041_v40 = vmul.f32 %v7029_v14, %v7029_v14 }
 0xfb7   : > { %v7033_v7 = vrot.slane %v7032_v59, 4 }
 0xfb8   : > { %v7042_v13 = vsel %vm1906_vm7, %v7041_v40, 0.0 }
 0xfb9   : > { %v7034_v45 = vadd.f32 %v7033_v7, %v7032_v59  ;;  %v7043_v17 = vrot.slane %v7042_v13, 4 }
 0xfbb   : > { %v7035_v10 = vrot.slane %v7034_v45, 2  ;;  %v7044_v3 = vadd.f32 %v7043_v17, %v7042_v13 }
 0xfbd   : > { %v7036_v56 = vadd.f32 %v7035_v10, %v7034_v45  ;;  %v7045_v25 = vrot.slane %v7044_v3, 2 }
 0xfbf   : > { %v7037_v30 = vrot.slane %v7036_v56, 1  ;;  %v7046_v16 = vadd.f32 %v7045_v25, %v7044_v3 }
 0xfc1   : > { %v7038_v33 = vadd.f32 %v7037_v30, %v7036_v56  ;;  %v7047_v20 = vrot.slane %v7046_v16, 1 }
 0xfc3   : > { %v7040_v57 = vmul.f32 0.5, %v7038_v33  ;;  %v7048_v9 = vadd.f32 %v7047_v20, %v7046_v16 }
 0xfc5   : > { %v7049_v38 = vmul.f32 0.5, %v7048_v9  ;;  %v7050_v43 = vmul.f32 %v7040_v57, %v7040_v57  ;;  %v7053_v62 = vsub.f32 %v7029_v14, %v7040_v57 }
 0xfc7   : > { %v7051_v39 = vsub.f32 %v7049_v38, %v7050_v43 }
 0xfc9   : > { %v7052_v46 = vmax.f32 %v7051_v39, 0.0 }
 0xfcb   : > { %v7054_v4 = vadd.f32 1e-05, %v7052_v46 }
 0xfcd   : > { %10631 = vrsqrt.f32 %v7054_v4 }
 0xfd7   : > { %v10632_v6 = vpop.eup %10631 }
 0xfd8   : > { %v7056_v63 = vmul.f32 %v10632_v6, %v7053_v62 }
 0xfda   : > { %v7063_v36 = vmul.f32 %v7965_v41, %v7056_v63 }
 0xfdc   : > { %v7070_v5 = vadd.f32 %v7966_v31, %v7063_v36 }
 0xfde   : > { %v7071_v49 = vmax.f32 %v7070_v5, 0.0 }
 0xfe0   : > { %7181 = vmatmul.mubr.f32.vlgmr.msra.gmra.mrb[32].mxu1 %v7071_v49 }
0x10b3   : > { %v7182_v2 = vpop.f32.mrb[32].mxu1 }
0x10b4   : > { %v7184_v52 = vpop.f32.mrb[33].mxu1  ;;  %v7183_v48 = vadd.f32 %v7182_v2, %v7109_v12 }
0x10b5   : > { %v7185_v8 = vadd.f32 %v7184_v52, %v7113_v55 }
0x10b7   : > { %7968 = vmatprep.mubr.msk.f32.mxu0 %vm7211_vm11, %v7185_v8 }
0x10b8   : > { %7280 = vmatmul.mubr.f32.vlgmr.msra.gmra.mrb[38].mxu0 %v7183_v48 }
0x118b   : > { %v7281_v47 = vpop.f32.mrb[38].mxu0 }
0x118c   : > { %v7282_v15 = vadd.f32 %v7967_v44, %v7281_v47  ;;  %v7283_v11 = vpop.f32.mrb[39].mxu0 }
0x118e   : > { %7285 = vst [vmem:[%s884_s27] sm:$0x3] %v7282_v15 }
0x118f PF: > { %s30_s1 = sadd.s32 1, %s10639_s1  }
0x1190   : > { %p27_p4 = scmp.ge.s32.totalorder %s30_s1, 5  }
0x1192   :  { %29 = sbr.rel (!%p27_p4) target bundleno = 6 (0x6), region = 197 }

// kernel: localfea_from_image_forward.2
= control target key start
LH: loop header
LB: loop body
LE: loop exit
PB: predicated region body
PF: predicated region fallthrough
CT: control target
= control target key end

     0   :  { %vm3072_vm0 = vcmask 1041408   ;;  %vm3068_vm1 = vcmask 801792   ;;  %s8764_s1 = inlined_call_operand.vmem [shape: bf16[256,2304], index: 1, kind: input, shape index: {}]   ;;  %s8765_s0 = inlined_call_operand.vmem [shape: bf16[98,256], index: 0, kind: input, shape index: {}]   ;;  %s8766_s2 = inlined_call_operand.vmem [shape: f32[1,2304], index: 2, kind: input, shape index: {}]   ;;  %s8767_s3 = inlined_call_operand.vmem [shape: f32[2,98], index: 3, kind: input, shape index: {}]   ;;  %s8768_s4 = inlined_call_operand.vmem [shape: f32[2304,128], index: 4, kind: input, shape index: {}]   ;;  %s8769_s5 = inlined_call_operand.vmem [shape: f32[2,128], index: 5, kind: output, shape index: {}]  }
   0x1   :  { %v5838_v0 = vld [vmem:[%s8764_s1 + $0x4] ss:$72 sps:$4 sm:$0xff]   ;;  %v5840_v1 = vld [vmem:[%s8764_s1] ss:$72 sps:$4 sm:$0xff]   ;;  %v5844_v4 = vld [vmem:[%s8764_s1 + $0x94] ss:$72 sps:$4 sm:$0xff]  }
   0x2   :  { %1924 = vmatprep.subr.bf16.mxu0 %v5838_v0  ;;  %v5841_v2 = vld [vmem:[%s8764_s1 + $0xc] ss:$72 sps:$4 sm:$0xff]   ;;  %v5843_v3 = vld [vmem:[%s8764_s1 + $0x8] ss:$72 sps:$4 sm:$0xff]   ;;  %v5847_v6 = vld [vmem:[%s8764_s1 + $0x9c] ss:$72 sps:$4 sm:$0xff]  }
   0x3   :  { %1925 = vmatpush1.bf16.msra.mxu0 %v5840_v1  ;;  %v5846_v5 = vld [vmem:[%s8764_s1 + $0x90] ss:$72 sps:$4 sm:$0xff]   ;;  %2025 = vmatprep.subr.bf16.mxu1 %v5841_v2  ;;  %v5850_v8 = vld [vmem:[%s8764_s1 + $0x124] ss:$72 sps:$4 sm:$0xff]   ;;  %v5852_v9 = vld [vmem:[%s8764_s1 + $0x120] ss:$72 sps:$4 sm:$0xff]  }
   0x4   :  { %2026 = vmatpush1.bf16.msra.mxu1 %v5843_v3  ;;  %1926 = vmatprep.subr.bf16.mxu0 %v5844_v4  ;;  %v5849_v7 = vld [vmem:[%s8764_s1 + $0x98] ss:$72 sps:$4 sm:$0xff]   ;;  %v5853_v10 = vld [vmem:[%s8764_s1 + $0x12c] ss:$72 sps:$4 sm:$0xff]   ;;  %v5855_v12 = vld [vmem:[%s8764_s1 + $0x128] ss:$72 sps:$4 sm:$0xff]  }
   0x5   :  { %2027 = vmatprep.subr.bf16.mxu1 %v5847_v6  ;;  %v5856_v11 = vld [vmem:[%s8764_s1 + $0x1b4] ss:$72 sps:$4 sm:$0xff]   ;;  %v5858_v14 = vld [vmem:[%s8764_s1 + $0x1b0] ss:$72 sps:$4 sm:$0xff]   ;;  %v5862_v15 = vld [vmem:[%s8764_s1 + $0x244] ss:$72 sps:$4 sm:$0xff]  }
   0x6   :  { %v5859_v13 = vld [vmem:[%s8764_s1 + $0x1bc] ss:$72 sps:$4 sm:$0xff]   ;;  %v5861_v16 = vld [vmem:[%s8764_s1 + $0x1b8] ss:$72 sps:$4 sm:$0xff]   ;;  %v5865_v17 = vld [vmem:[%s8764_s1 + $0x24c] ss:$72 sps:$4 sm:$0xff]  }
   0x7   :  { %1927 = vmatpush1.bf16.msra.mxu0 %v5846_v5  ;;  %v5864_v18 = vld [vmem:[%s8764_s1 + $0x240] ss:$72 sps:$4 sm:$0xff]   ;;  %v5868_v19 = vld [vmem:[%s8764_s1 + $0x2d4] ss:$72 sps:$4 sm:$0xff]   ;;  %v5870_v22 = vld [vmem:[%s8764_s1 + $0x2d0] ss:$72 sps:$4 sm:$0xff]  }
   0x8   :  { %1928 = vmatprep.subr.bf16.mxu0 %v5850_v8  ;;  %2028 = vmatpush1.bf16.msra.mxu1 %v5849_v7  ;;  %v5867_v20 = vld [vmem:[%s8764_s1 + $0x248] ss:$72 sps:$4 sm:$0xff]   ;;  %v5871_v21 = vld [vmem:[%s8764_s1 + $0x2dc] ss:$72 sps:$4 sm:$0xff]   ;;  %v5873_v24 = vld [vmem:[%s8764_s1 + $0x2d8] ss:$72 sps:$4 sm:$0xff]  }
   0x9   :  { %2029 = vmatprep.subr.bf16.mxu1 %v5853_v10  ;;  %v5874_v23 = vld [vmem:[%s8764_s1 + $0x364] ss:$72 sps:$4 sm:$0xff]   ;;  %v5876_v26 = vld [vmem:[%s8764_s1 + $0x360] ss:$72 sps:$4 sm:$0xff]   ;;  %v5880_v27 = vld [vmem:[%s8764_s1 + $0x3f4] ss:$72 sps:$4 sm:$0xff]  }
   0xa   :  { %v5877_v25 = vld [vmem:[%s8764_s1 + $0x36c] ss:$72 sps:$4 sm:$0xff]   ;;  %v5879_v28 = vld [vmem:[%s8764_s1 + $0x368] ss:$72 sps:$4 sm:$0xff]   ;;  %v5883_v29 = vld [vmem:[%s8764_s1 + $0x3fc] ss:$72 sps:$4 sm:$0xff]  }
   0xb   :  { %1929 = vmatpush1.bf16.msra.mxu0 %v5852_v9  ;;  %v5882_v30 = vld [vmem:[%s8764_s1 + $0x3f0] ss:$72 sps:$4 sm:$0xff]   ;;  %v5886_v31 = vld [vmem:[%s8764_s1 + $0x484] ss:$72 sps:$4 sm:$0xff]   ;;  %v5888_v34 = vld [vmem:[%s8764_s1 + $0x480] ss:$72 sps:$4 sm:$0xff]  }
   0xc   :  { %1930 = vmatprep.subr.bf16.mxu0 %v5856_v11  ;;  %2030 = vmatpush1.bf16.msra.mxu1 %v5855_v12  ;;  %v5885_v32 = vld [vmem:[%s8764_s1 + $0x3f8] ss:$72 sps:$4 sm:$0xff]   ;;  %v5889_v33 = vld [vmem:[%s8764_s1 + $0x48c] ss:$72 sps:$4 sm:$0xff]   ;;  %v5891_v36 = vld [vmem:[%s8764_s1 + $0x488] ss:$72 sps:$4 sm:$0xff]  }
   0xd   :  { %2031 = vmatprep.subr.bf16.mxu1 %v5859_v13  ;;  %v5892_v35 = vld [vmem:[%s8764_s1 + $0x514] ss:$72 sps:$4 sm:$0xff]   ;;  %v5894_v38 = vld [vmem:[%s8764_s1 + $0x510] ss:$72 sps:$4 sm:$0xff]   ;;  %v5898_v39 = vld [vmem:[%s8764_s1 + $0x5a4] ss:$72 sps:$4 sm:$0xff]  }
   0xe   :  { %v5895_v37 = vld [vmem:[%s8764_s1 + $0x51c] ss:$72 sps:$4 sm:$0xff]   ;;  %v5897_v40 = vld [vmem:[%s8764_s1 + $0x518] ss:$72 sps:$4 sm:$0xff]   ;;  %v5901_v41 = vld [vmem:[%s8764_s1 + $0x5ac] ss:$72 sps:$4 sm:$0xff]  }
   0xf   :  { %1931 = vmatpush1.bf16.msra.mxu0 %v5858_v14  ;;  %v5900_v42 = vld [vmem:[%s8764_s1 + $0x5a0] ss:$72 sps:$4 sm:$0xff]   ;;  %v5904_v43 = vld [vmem:[%s8764_s1 + $0x634] ss:$72 sps:$4 sm:$0xff]   ;;  %v5906_v46 = vld [vmem:[%s8764_s1 + $0x630] ss:$72 sps:$4 sm:$0xff]  }
  0x10   :  { %1932 = vmatprep.subr.bf16.mxu0 %v5862_v15  ;;  %2032 = vmatpush1.bf16.msra.mxu1 %v5861_v16  ;;  %v5903_v44 = vld [vmem:[%s8764_s1 + $0x5a8] ss:$72 sps:$4 sm:$0xff]   ;;  %v5907_v45 = vld [vmem:[%s8764_s1 + $0x63c] ss:$72 sps:$4 sm:$0xff]   ;;  %v5909_v49 = vld [vmem:[%s8764_s1 + $0x638] ss:$72 sps:$4 sm:$0xff]  }
  0x11   :  { %2033 = vmatprep.subr.bf16.mxu1 %v5865_v17  ;;  %v6478_v47 = vld [vmem:[%s8765_s0 + $0x4] ss:$8 sps:$4 sm:$0xff]   ;;  %v5912_v51 = vld [vmem:[%s8764_s1 + $0x6c0] ss:$72 sps:$4 sm:$0xff]   ;;  %v5916_v52 = vld [vmem:[%s8764_s1 + $0x754] ss:$72 sps:$4 sm:$0xff]  }
  0x12   :  { %v5910_v48 = vld [vmem:[%s8764_s1 + $0x6c4] ss:$72 sps:$4 sm:$0xff]   ;;  %1956 = vmatprep.mubr.bf16.mxu0 %v6478_v47  ;;  %2057 = vmatprep.mubr.bf16.mxu1 %v6478_v47  ;;  %v5915_v53 = vld [vmem:[%s8764_s1 + $0x6c8] ss:$72 sps:$4 sm:$0xff]   ;;  %v5921_v57 = vld [vmem:[%s8764_s1 + $0x758] ss:$72 sps:$4 sm:$0xff]  }
  0x13   :  { %1933 = vmatpush1.bf16.msra.mxu0 %v5864_v18  ;;  %v5913_v50 = vld [vmem:[%s8764_s1 + $0x6cc] ss:$72 sps:$4 sm:$0xff]   ;;  %v5919_v54 = vld [vmem:[%s8764_s1 + $0x75c] ss:$72 sps:$4 sm:$0xff]   ;;  %v5918_v55 = vld [vmem:[%s8764_s1 + $0x750] ss:$72 sps:$4 sm:$0xff]  }
  0x14   :  { %1934 = vmatprep.subr.bf16.mxu0 %v5868_v19  ;;  %2034 = vmatpush1.bf16.msra.mxu1 %v5867_v20  ;;  %v5922_v56 = vld [vmem:[%s8764_s1 + $0x7e4] ss:$72 sps:$4 sm:$0xff]   ;;  %v5924_v59 = vld [vmem:[%s8764_s1 + $0x7e0] ss:$72 sps:$4 sm:$0xff]   ;;  %v5928_v60 = vld [vmem:[%s8764_s1 + $0x874] ss:$72 sps:$4 sm:$0xff]  }
  0x15   :  { %2035 = vmatprep.subr.bf16.mxu1 %v5871_v21  ;;  %v5925_v58 = vld [vmem:[%s8764_s1 + $0x7ec] ss:$72 sps:$4 sm:$0xff]   ;;  %v5927_v61 = vld [vmem:[%s8764_s1 + $0x7e8] ss:$72 sps:$4 sm:$0xff]   ;;  %v5931_v62 = vld [vmem:[%s8764_s1 + $0x87c] ss:$72 sps:$4 sm:$0xff]  }
  0x16   :  { %v5930_v63 = vld [vmem:[%s8764_s1 + $0x870] ss:$72 sps:$4 sm:$0xff]   ;;  %v5939_v0 = vld [vmem:[%s8764_s1 + $0x14] ss:$72 sps:$4 sm:$0xff]   ;;  %v6539_v2 = vld [vmem:[%s8765_s0] ss:$8 sps:$4 sm:$0xff]  }
  0x17   :  { %1935 = vmatpush1.bf16.msra.mxu0 %v5870_v22  ;;  %v5935_v1 = vld [vmem:[%s8764_s1 + $0x878] ss:$72 sps:$4 sm:$0xff]   ;;  %v5942_v3 = vld [vmem:[%s8764_s1 + $0x1c] ss:$72 sps:$4 sm:$0xff]   ;;  %v5948_v8 = vld [vmem:[%s8764_s1 + $0xac] ss:$72 sps:$4 sm:$0xff]  }
  0x18   :  { %1936 = vmatprep.subr.bf16.mxu0 %v5874_v23  ;;  %2036 = vmatpush1.bf16.msra.mxu1 %v5873_v24  ;;  %v5937_v4 = vld [vmem:[%s8764_s1 + $0x10] ss:$72 sps:$4 sm:$0xff]   ;;  %v6550_v5 = vld [vmem:[%s8765_s0 + $0x14] ss:$8 sps:$4 sm:$0xff]   ;;  %v5945_v6 = vld [vmem:[%s8764_s1 + $0xa4] ss:$72 sps:$4 sm:$0xff]  }
  0x19   :  { %2037 = vmatprep.subr.bf16.mxu1 %v5877_v25  ;;  %v5940_v7 = vld [vmem:[%s8764_s1 + $0x18] ss:$72 sps:$4 sm:$0xff]   ;;  %v5954_v10 = vld [vmem:[%s8764_s1 + $0x134] ss:$72 sps:$4 sm:$0xff]   ;;  %v5946_v11 = vld [vmem:[%s8764_s1 + $0xa8] ss:$72 sps:$4 sm:$0xff]  }
  0x1a   :  { %v5943_v9 = vld [vmem:[%s8764_s1 + $0xa0] ss:$72 sps:$4 sm:$0xff]   ;;  %v6577_v12 = vld [vmem:[%s8765_s0 + $0x10] ss:$8 sps:$4 sm:$0xff]   ;;  %v5957_v13 = vld [vmem:[%s8764_s1 + $0x13c] ss:$72 sps:$4 sm:$0xff]  }
  0x1b   :  { %1937 = vmatpush1.bf16.msra.mxu0 %v5876_v26  ;;  %v5952_v14 = vld [vmem:[%s8764_s1 + $0x130] ss:$72 sps:$4 sm:$0xff]   ;;  %v6588_v15 = vld [vmem:[%s8765_s0 + $0x24] ss:$8 sps:$4 sm:$0xff]   ;;  %v5958_v19 = vld [vmem:[%s8764_s1 + $0x1c0] ss:$72 sps:$4 sm:$0xff]  }
  0x1c   :  { %1938 = vmatprep.subr.bf16.mxu0 %v5880_v27  ;;  %2038 = vmatpush1.bf16.msra.mxu1 %v5879_v28  ;;  %v5960_v16 = vld [vmem:[%s8764_s1 + $0x1c4] ss:$72 sps:$4 sm:$0xff]   ;;  %v5955_v17 = vld [vmem:[%s8764_s1 + $0x138] ss:$72 sps:$4 sm:$0xff]   ;;  %v5969_v20 = vld [vmem:[%s8764_s1 + $0x254] ss:$72 sps:$4 sm:$0xff]  }
  0x1d   :  { %2039 = vmatprep.subr.bf16.mxu1 %v5883_v29  ;;  %v5963_v18 = vld [vmem:[%s8764_s1 + $0x1cc] ss:$72 sps:$4 sm:$0xff]   ;;  %v5961_v21 = vld [vmem:[%s8764_s1 + $0x1c8] ss:$72 sps:$4 sm:$0xff]   ;;  %v5972_v23 = vld [vmem:[%s8764_s1 + $0x25c] ss:$72 sps:$4 sm:$0xff]  }
  0x1e   :  { %v6615_v22 = vld [vmem:[%s8765_s0 + $0x20] ss:$8 sps:$4 sm:$0xff]   ;;  %v5967_v24 = vld [vmem:[%s8764_s1 + $0x250] ss:$72 sps:$4 sm:$0xff]   ;;  %v6626_v25 = vld [vmem:[%s8765_s0 + $0x34] ss:$8 sps:$4 sm:$0xff]  }
  0x1f   :  { %1939 = vmatpush1.bf16.msra.mxu0 %v5882_v30  ;;  %v5975_v26 = vld [vmem:[%s8764_s1 + $0x2e4] ss:$72 sps:$4 sm:$0xff]   ;;  %v5970_v27 = vld [vmem:[%s8764_s1 + $0x258] ss:$72 sps:$4 sm:$0xff]   ;;  %v5984_v30 = vld [vmem:[%s8764_s1 + $0x374] ss:$72 sps:$4 sm:$0xff]  }
  0x20   :  { %1940 = vmatprep.subr.bf16.mxu0 %v5886_v31  ;;  %2040 = vmatpush1.bf16.msra.mxu1 %v5885_v32  ;;  %v5978_v28 = vld [vmem:[%s8764_s1 + $0x2ec] ss:$72 sps:$4 sm:$0xff]   ;;  %v5973_v29 = vld [vmem:[%s8764_s1 + $0x2e0] ss:$72 sps:$4 sm:$0xff]   ;;  %v6652_v32 = vld [vmem:[%s8765_s0 + $0x30] ss:$8 sps:$4 sm:$0xff]  }
  0x21   :  { %2041 = vmatprep.subr.bf16.mxu1 %v5889_v33  ;;  %v5976_v31 = vld [vmem:[%s8764_s1 + $0x2e8] ss:$72 sps:$4 sm:$0xff]  }
  0x22   :  { %v5982_v33 = vld [vmem:[%s8764_s1 + $0x370] ss:$72 sps:$4 sm:$0xff]  }
  0x23   :  { %1941 = vmatpush1.bf16.msra.mxu0 %v5888_v34  ;;  %v5987_v34 = vld [vmem:[%s8764_s1 + $0x37c] ss:$72 sps:$4 sm:$0xff]  }
  0x24   :  { %1942 = vmatprep.subr.bf16.mxu0 %v5892_v35  ;;  %2042 = vmatpush1.bf16.msra.mxu1 %v5891_v36  ;;  %v6664_v35 = vld [vmem:[%s8765_s0 + $0x44] ss:$8 sps:$4 sm:$0xff]  }
  0x25   :  { %2043 = vmatprep.subr.bf16.mxu1 %v5895_v37  ;;  %v5990_v36 = vld [vmem:[%s8764_s1 + $0x404] ss:$72 sps:$4 sm:$0xff]   ;;  %v5985_v37 = vld [vmem:[%s8764_s1 + $0x378] ss:$72 sps:$4 sm:$0xff]  }
  0x27   :  { %1943 = vmatpush1.bf16.msra.mxu0 %v5894_v38  ;;  %v5993_v38 = vld [vmem:[%s8764_s1 + $0x40c] ss:$72 sps:$4 sm:$0xff]  }
  0x28   :  { %1944 = vmatprep.subr.bf16.mxu0 %v5898_v39  ;;  %2044 = vmatpush1.bf16.msra.mxu1 %v5897_v40  ;;  %v5988_v39 = vld [vmem:[%s8764_s1 + $0x400] ss:$72 sps:$4 sm:$0xff]   ;;  %v5999_v40 = vld [vmem:[%s8764_s1 + $0x494] ss:$72 sps:$4 sm:$0xff]  }
  0x29   :  { %2045 = vmatprep.subr.bf16.mxu1 %v5901_v41  ;;  %v5991_v41 = vld [vmem:[%s8764_s1 + $0x408] ss:$72 sps:$4 sm:$0xff]  }
  0x2b   :  { %1945 = vmatpush1.bf16.msra.mxu0 %v5900_v42  ;;  %v6690_v42 = vld [vmem:[%s8765_s0 + $0x40] ss:$8 sps:$4 sm:$0xff]  }
  0x2c   :  { %1946 = vmatprep.subr.bf16.mxu0 %v5904_v43  ;;  %2046 = vmatpush1.bf16.msra.mxu1 %v5903_v44  ;;  %v5997_v43 = vld [vmem:[%s8764_s1 + $0x490] ss:$72 sps:$4 sm:$0xff]   ;;  %v6002_v44 = vld [vmem:[%s8764_s1 + $0x49c] ss:$72 sps:$4 sm:$0xff]  }
  0x2d   :  { %2047 = vmatprep.subr.bf16.mxu1 %v5907_v45  ;;  %v6702_v45 = vld [vmem:[%s8765_s0 + $0x54] ss:$8 sps:$4 sm:$0xff]  }
  0x2f   :  { %1947 = vmatpush1.bf16.msra.mxu0 %v5906_v46  ;;  %v6005_v46 = vld [vmem:[%s8764_s1 + $0x524] ss:$72 sps:$4 sm:$0xff]  }
  0x30   :  { %1948 = vmatprep.subr.bf16.mxu0 %v5910_v48  ;;  %2048 = vmatpush1.bf16.msra.mxu1 %v5909_v49  ;;  %v6000_v48 = vld [vmem:[%s8764_s1 + $0x498] ss:$72 sps:$4 sm:$0xff]  }
  0x31   :  { %2049 = vmatprep.subr.bf16.mxu1 %v5913_v50  ;;  %v6003_v49 = vld [vmem:[%s8764_s1 + $0x520] ss:$72 sps:$4 sm:$0xff]   ;;  %v6008_v50 = vld [vmem:[%s8764_s1 + $0x52c] ss:$72 sps:$4 sm:$0xff]  }
  0x33   :  { %1949 = vmatpush1.bf16.msra.mxu0 %v5912_v51  ;;  %v6014_v51 = vld [vmem:[%s8764_s1 + $0x5b4] ss:$72 sps:$4 sm:$0xff]  }
  0x34   :  { %1950 = vmatprep.subr.bf16.mxu0 %v5916_v52  ;;  %2050 = vmatpush1.bf16.msra.mxu1 %v5915_v53  ;;  %v32_v52 = vld [vmem:[%s8765_s0 + $0x60] sm:$0x11]  ;;  %v6006_v53 = vld [vmem:[%s8764_s1 + $0x528] ss:$72 sps:$4 sm:$0xff]  }
  0x35   :  { %2051 = vmatprep.subr.bf16.mxu1 %v5919_v54  ;;  %v6732_v54 = vld [vmem:[%s8765_s0 + $0x50] ss:$8 sps:$4 sm:$0xff]  }
  0x37   :  { %1951 = vmatpush1.bf16.msra.mxu0 %v5918_v55  ;;  %v6017_v55 = vld [vmem:[%s8764_s1 + $0x5bc] ss:$72 sps:$4 sm:$0xff]  }
  0x38   :  { %1952 = vmatprep.subr.bf16.mxu0 %v5922_v56  ;;  %2052 = vmatpush1.bf16.msra.mxu1 %v5921_v57  ;;  %v6012_v56 = vld [vmem:[%s8764_s1 + $0x5b0] ss:$72 sps:$4 sm:$0xff]   ;;  %v6740_v57 = vcombine.high %v32_v52, %v32_v52 }
  0x39   :  { %2053 = vmatprep.subr.bf16.mxu1 %v5925_v58  ;;  %v6020_v58 = vld [vmem:[%s8764_s1 + $0x644] ss:$72 sps:$4 sm:$0xff]  }
  0x3b   :  { %1953 = vmatpush1.bf16.msra.mxu0 %v5924_v59  ;;  %v6015_v59 = vld [vmem:[%s8764_s1 + $0x5b8] ss:$72 sps:$4 sm:$0xff]  }
  0x3c   :  { %1954 = vmatprep.subr.bf16.mxu0 %v5928_v60  ;;  %2054 = vmatpush1.bf16.msra.mxu1 %v5927_v61  ;;  %v6023_v60 = vld [vmem:[%s8764_s1 + $0x64c] ss:$72 sps:$4 sm:$0xff]   ;;  %v6018_v61 = vld [vmem:[%s8764_s1 + $0x640] ss:$72 sps:$4 sm:$0xff]  }
  0x3d   :  { %2055 = vmatprep.subr.bf16.mxu1 %v5931_v62  ;;  %v6028_v62 = vld [vmem:[%s8764_s1 + $0x6d4] ss:$72 sps:$4 sm:$0xff]  }
  0x3f   :  { %1955 = vmatpush1.bf16.msra.mxu0 %v5930_v63  ;;  %v6021_v63 = vld [vmem:[%s8764_s1 + $0x648] ss:$72 sps:$4 sm:$0xff]  }
  0x40   :  { %2126 = vmatprep.subr.bf16.mxu0 %v5939_v0  ;;  %2056 = vmatpush1.bf16.msra.mxu1 %v5935_v1  ;;  %v6764_v0 = vcombine.low %v32_v52, %v32_v52  ;;  %v6031_v1 = vld [vmem:[%s8764_s1 + $0x6dc] ss:$72 sps:$4 sm:$0xff]   ;;  %v6092_v52 = vld [vmem:[%s8764_s1 + $0x410] ss:$72 sps:$4 sm:$0xff]  }
  0x41   :  { %2227 = vmatprep.subr.bf16.mxu1 %v5942_v3  ;;  %v6026_v3 = vld [vmem:[%s8764_s1 + $0x6d0] ss:$72 sps:$4 sm:$0xff]  }
  0x42   :  { %1957 = vmatmul.mubr.bf16.vlgmr.msra.gmra.mrb[0].mxu0 %v6539_v2 }
  0x43   :  { %2127 = vmatpush1.bf16.msra.mxu0 %v5937_v4  ;;  %1966 = vmatprep.mubr.bf16.mxu0 %v6550_v5  ;;  %v6034_v4 = vld [vmem:[%s8764_s1 + $0x764] ss:$72 sps:$4 sm:$0xff]  }
  0x44   :  { %2058 = vmatmul.mubr.bf16.vlgmr.msra.gmra.mrb[0].mxu1 %v6539_v2  ;;  %2128 = vmatprep.subr.bf16.mxu0 %v5945_v6  ;;  %v6029_v6 = vld [vmem:[%s8764_s1 + $0x6d8] ss:$72 sps:$4 sm:$0xff]  }
  0x45   :  { %2228 = vmatpush1.bf16.msra.mxu1 %v5940_v7  ;;  %2067 = vmatprep.mubr.bf16.mxu1 %v6550_v5  ;;  %v6037_v7 = vld [vmem:[%s8764_s1 + $0x76c] ss:$72 sps:$4 sm:$0xff]  }
  0x46   :  { %2229 = vmatprep.subr.bf16.mxu1 %v5948_v8  ;;  %v6032_v8 = vld [vmem:[%s8764_s1 + $0x760] ss:$72 sps:$4 sm:$0xff]  }
  0x47   :  { %2129 = vmatpush1.bf16.msra.mxu0 %v5943_v9  ;;  %v6040_v9 = vld [vmem:[%s8764_s1 + $0x7f4] ss:$72 sps:$4 sm:$0xff]  }
  0x48   :  { %2130 = vmatprep.subr.bf16.mxu0 %v5954_v10  ;;  %v6035_v10 = vld [vmem:[%s8764_s1 + $0x768] ss:$72 sps:$4 sm:$0xff]  }
  0x49   :  { %2230 = vmatpush1.bf16.msra.mxu1 %v5946_v11  ;;  %v6043_v11 = vld [vmem:[%s8764_s1 + $0x7fc] ss:$72 sps:$4 sm:$0xff]  }
  0x4a   :  { %1967 = vmatmul.mubr.bf16.gmra.mrb[4].mxu0 %v6577_v12  ;;  %2231 = vmatprep.subr.bf16.mxu1 %v5957_v13  ;;  %v6038_v13 = vld [vmem:[%s8764_s1 + $0x7f0] ss:$72 sps:$4 sm:$0xff]  }
  0x4b   :  { %2131 = vmatpush1.bf16.msra.mxu0 %v5952_v14  ;;  %1976 = vmatprep.mubr.bf16.mxu0 %v6588_v15  ;;  %v6046_v14 = vld [vmem:[%s8764_s1 + $0x884] ss:$72 sps:$4 sm:$0xff]  }
  0x4c   :  { %2132 = vmatprep.subr.bf16.mxu0 %v5960_v16  ;;  %2068 = vmatmul.mubr.bf16.gmra.mrb[4].mxu1 %v6577_v12  ;;  %v6049_v16 = vld [vmem:[%s8764_s1 + $0x88c] ss:$72 sps:$4 sm:$0xff]  }
  0x4d   :  { %2232 = vmatpush1.bf16.msra.mxu1 %v5955_v17  ;;  %2077 = vmatprep.mubr.bf16.mxu1 %v6588_v15  ;;  %v6044_v17 = vld [vmem:[%s8764_s1 + $0x880] ss:$72 sps:$4 sm:$0xff]  }
  0x4e   :  { %2233 = vmatprep.subr.bf16.mxu1 %v5963_v18  ;;  %v6052_v18 = vld [vmem:[%s8764_s1 + $0x24] ss:$72 sps:$4 sm:$0xff]  }
  0x4f   :  { %2133 = vmatpush1.bf16.msra.mxu0 %v5958_v19  ;;  %v6047_v19 = vld [vmem:[%s8764_s1 + $0x888] ss:$72 sps:$4 sm:$0xff]  }
  0x50   :  { %2134 = vmatprep.subr.bf16.mxu0 %v5969_v20  ;;  %v6055_v20 = vld [vmem:[%s8764_s1 + $0x2c] ss:$72 sps:$4 sm:$0xff]  }
  0x51   :  { %2234 = vmatpush1.bf16.msra.mxu1 %v5961_v21  ;;  %v6050_v21 = vld [vmem:[%s8764_s1 + $0x20] ss:$72 sps:$4 sm:$0xff]  }
  0x52   :  { %1977 = vmatmul.mubr.bf16.gmra.mrb[8].mxu0 %v6615_v22  ;;  %2235 = vmatprep.subr.bf16.mxu1 %v5972_v23  ;;  %v6058_v23 = vld [vmem:[%s8764_s1 + $0xb4] ss:$72 sps:$4 sm:$0xff]  }
  0x53   :  { %2135 = vmatpush1.bf16.msra.mxu0 %v5967_v24  ;;  %1986 = vmatprep.mubr.bf16.mxu0 %v6626_v25  ;;  %v6053_v24 = vld [vmem:[%s8764_s1 + $0x28] ss:$72 sps:$4 sm:$0xff]  }
  0x54   :  { %2136 = vmatprep.subr.bf16.mxu0 %v5975_v26  ;;  %2078 = vmatmul.mubr.bf16.gmra.mrb[8].mxu1 %v6615_v22  ;;  %v6061_v26 = vld [vmem:[%s8764_s1 + $0xbc] ss:$72 sps:$4 sm:$0xff]  }
  0x55   :  { %2236 = vmatpush1.bf16.msra.mxu1 %v5970_v27  ;;  %2087 = vmatprep.mubr.bf16.mxu1 %v6626_v25  ;;  %v6056_v27 = vld [vmem:[%s8764_s1 + $0xb0] ss:$72 sps:$4 sm:$0xff]  }
  0x56   :  { %2237 = vmatprep.subr.bf16.mxu1 %v5978_v28  ;;  %v6064_v28 = vld [vmem:[%s8764_s1 + $0x144] ss:$72 sps:$4 sm:$0xff]  }
  0x57   :  { %2137 = vmatpush1.bf16.msra.mxu0 %v5973_v29  ;;  %v6059_v29 = vld [vmem:[%s8764_s1 + $0xb8] ss:$72 sps:$4 sm:$0xff]  }
  0x58   :  { %2138 = vmatprep.subr.bf16.mxu0 %v5984_v30  ;;  %v6067_v30 = vld [vmem:[%s8764_s1 + $0x14c] ss:$72 sps:$4 sm:$0xff]  }
  0x59   :  { %2238 = vmatpush1.bf16.msra.mxu1 %v5976_v31  ;;  %v6070_v31 = vld [vmem:[%s8764_s1 + $0x1d4] ss:$72 sps:$4 sm:$0xff]  }
  0x5a   :  { %1987 = vmatmul.mubr.bf16.gmra.mrb[12].mxu0 %v6652_v32  ;;  %2239 = vmatprep.subr.bf16.mxu1 %v5987_v34  ;;  %v6068_v34 = vld [vmem:[%s8764_s1 + $0x1d0] ss:$72 sps:$4 sm:$0xff]  }
  0x5b   :  { %2139 = vmatpush1.bf16.msra.mxu0 %v5982_v33  ;;  %1996 = vmatprep.mubr.bf16.mxu0 %v6664_v35  ;;  %v6073_v33 = vld [vmem:[%s8764_s1 + $0x1dc] ss:$72 sps:$4 sm:$0xff]  }
  0x5c   :  { %2140 = vmatprep.subr.bf16.mxu0 %v5990_v36  ;;  %2088 = vmatmul.mubr.bf16.gmra.mrb[12].mxu1 %v6652_v32  ;;  %v6076_v36 = vld [vmem:[%s8764_s1 + $0x264] ss:$72 sps:$4 sm:$0xff]  }
  0x5d   :  { %2240 = vmatpush1.bf16.msra.mxu1 %v5985_v37  ;;  %2097 = vmatprep.mubr.bf16.mxu1 %v6664_v35  ;;  %v6071_v37 = vld [vmem:[%s8764_s1 + $0x1d8] ss:$72 sps:$4 sm:$0xff]  }
  0x5e   :  { %2241 = vmatprep.subr.bf16.mxu1 %v5993_v38  ;;  %v6079_v38 = vld [vmem:[%s8764_s1 + $0x26c] ss:$72 sps:$4 sm:$0xff]  }
  0x5f   :  { %2141 = vmatpush1.bf16.msra.mxu0 %v5988_v39  ;;  %v6074_v39 = vld [vmem:[%s8764_s1 + $0x260] ss:$72 sps:$4 sm:$0xff]  }
  0x60   :  { %2142 = vmatprep.subr.bf16.mxu0 %v5999_v40  ;;  %v6085_v40 = vld [vmem:[%s8764_s1 + $0x2fc] ss:$72 sps:$4 sm:$0xff]  }
  0x61   :  { %2242 = vmatpush1.bf16.msra.mxu1 %v5991_v41  ;;  %v6080_v41 = vld [vmem:[%s8764_s1 + $0x2f0] ss:$72 sps:$4 sm:$0xff]  }
  0x62   :  { %1997 = vmatmul.mubr.bf16.gmra.mrb[16].mxu0 %v6690_v42  ;;  %2243 = vmatprep.subr.bf16.mxu1 %v6002_v44  ;;  %v6083_v44 = vld [vmem:[%s8764_s1 + $0x2f8] ss:$72 sps:$4 sm:$0xff]  }
  0x63   :  { %2143 = vmatpush1.bf16.msra.mxu0 %v5997_v43  ;;  %2006 = vmatprep.mubr.bf16.mxu0 %v6702_v45  ;;  %v6088_v43 = vld [vmem:[%s8764_s1 + $0x384] ss:$72 sps:$4 sm:$0xff]  }
  0x64   :  { %2144 = vmatprep.subr.bf16.mxu0 %v6005_v46  ;;  %2098 = vmatmul.mubr.bf16.gmra.mrb[16].mxu1 %v6690_v42  ;;  %v6091_v46 = vld [vmem:[%s8764_s1 + $0x38c] ss:$72 sps:$4 sm:$0xff]  }
  0x65   :  { %2244 = vmatpush1.bf16.msra.mxu1 %v6000_v48  ;;  %2107 = vmatprep.mubr.bf16.mxu1 %v6702_v45  ;;  %v6086_v48 = vld [vmem:[%s8764_s1 + $0x380] ss:$72 sps:$4 sm:$0xff]  }
  0x66   :  { %2245 = vmatprep.subr.bf16.mxu1 %v6008_v50  ;;  %v6089_v50 = vld [vmem:[%s8764_s1 + $0x388] ss:$72 sps:$4 sm:$0xff]  }
  0x67   :  { %2145 = vmatpush1.bf16.msra.mxu0 %v6003_v49  ;;  %v6094_v49 = vld [vmem:[%s8764_s1 + $0x414] ss:$72 sps:$4 sm:$0xff]  }
  0x68   :  { %2146 = vmatprep.subr.bf16.mxu0 %v6014_v51  ;;  %v6097_v51 = vld [vmem:[%s8764_s1 + $0x41c] ss:$72 sps:$4 sm:$0xff]  }
  0x69   :  { %2246 = vmatpush1.bf16.msra.mxu1 %v6006_v53  ;;  %v6100_v53 = vld [vmem:[%s8764_s1 + $0x4a4] ss:$72 sps:$4 sm:$0xff]  }
  0x6a   :  { %2007 = vmatmul.mubr.bf16.gmra.mrb[20].mxu0 %v6732_v54  ;;  %2247 = vmatprep.subr.bf16.mxu1 %v6017_v55  ;;  %v6095_v55 = vld [vmem:[%s8764_s1 + $0x418] ss:$72 sps:$4 sm:$0xff]  }
  0x6b   :  { %2147 = vmatpush1.bf16.msra.mxu0 %v6012_v56  ;;  %2016 = vmatprep.mubr.bf16.mxu0 %v6740_v57  ;;  %v6103_v56 = vld [vmem:[%s8764_s1 + $0x4ac] ss:$72 sps:$4 sm:$0xff]  }
  0x6c   :  { %2148 = vmatprep.subr.bf16.mxu0 %v6020_v58  ;;  %2108 = vmatmul.mubr.bf16.gmra.mrb[20].mxu1 %v6732_v54  ;;  %v6098_v58 = vld [vmem:[%s8764_s1 + $0x4a0] ss:$72 sps:$4 sm:$0xff]  }
  0x6d   :  { %2248 = vmatpush1.bf16.msra.mxu1 %v6015_v59  ;;  %2117 = vmatprep.mubr.bf16.mxu1 %v6740_v57  ;;  %v6106_v59 = vld [vmem:[%s8764_s1 + $0x534] ss:$72 sps:$4 sm:$0xff]  }
  0x6e   :  { %2249 = vmatprep.subr.bf16.mxu1 %v6023_v60  ;;  %v6101_v60 = vld [vmem:[%s8764_s1 + $0x4a8] ss:$72 sps:$4 sm:$0xff]  }
  0x6f   :  { %2149 = vmatpush1.bf16.msra.mxu0 %v6018_v61  ;;  %v6109_v61 = vld [vmem:[%s8764_s1 + $0x53c] ss:$72 sps:$4 sm:$0xff]  }
  0x70   :  { %2150 = vmatprep.subr.bf16.mxu0 %v6028_v62  ;;  %v6104_v62 = vld [vmem:[%s8764_s1 + $0x530] ss:$72 sps:$4 sm:$0xff]  }
  0x71   :  { %2250 = vmatpush1.bf16.msra.mxu1 %v6021_v63  ;;  %v6112_v63 = vld [vmem:[%s8764_s1 + $0x5c4] ss:$72 sps:$4 sm:$0xff]  }
  0x72   :  { %2017 = vmatmul.mubr.bf16.gmra.mrb[24].mxu0 %v6764_v0  ;;  %2251 = vmatprep.subr.bf16.mxu1 %v6031_v1  ;;  %v6107_v1 = vld [vmem:[%s8764_s1 + $0x538] ss:$72 sps:$4 sm:$0xff]  }
  0x73   :  { %2151 = vmatpush1.bf16.msra.mxu0 %v6026_v3  ;;  %2158 = vmatprep.mubr.bf16.mxu0 %v6478_v47  ;;  %v6115_v3 = vld [vmem:[%s8764_s1 + $0x5cc] ss:$72 sps:$4 sm:$0xff]  }
  0x74   :  { %2152 = vmatprep.subr.bf16.mxu0 %v6034_v4  ;;  %2118 = vmatmul.mubr.bf16.gmra.mrb[24].mxu1 %v6764_v0  ;;  %v6110_v4 = vld [vmem:[%s8764_s1 + $0x5c0] ss:$72 sps:$4 sm:$0xff]  }
  0x75   :  { %2252 = vmatpush1.bf16.msra.mxu1 %v6029_v6  ;;  %2259 = vmatprep.mubr.bf16.mxu1 %v6478_v47  ;;  %v6041_v47 = vld [vmem:[%s8764_s1 + $0x7f8] ss:$72 sps:$4 sm:$0xff]   ;;  %v6118_v6 = vld [vmem:[%s8764_s1 + $0x654] ss:$72 sps:$4 sm:$0xff]  }
  0x76   :  { %2253 = vmatprep.subr.bf16.mxu1 %v6037_v7  ;;  %v6113_v7 = vld [vmem:[%s8764_s1 + $0x5c8] ss:$72 sps:$4 sm:$0xff]  }
  0x77   :  { %2153 = vmatpush1.bf16.msra.mxu0 %v6032_v8  ;;  %v6121_v8 = vld [vmem:[%s8764_s1 + $0x65c] ss:$72 sps:$4 sm:$0xff]  }
  0x78   :  { %2154 = vmatprep.subr.bf16.mxu0 %v6040_v9  ;;  %v6116_v9 = vld [vmem:[%s8764_s1 + $0x650] ss:$72 sps:$4 sm:$0xff]  }
  0x79   :  { %2254 = vmatpush1.bf16.msra.mxu1 %v6035_v10  ;;  %v6124_v10 = vld [vmem:[%s8764_s1 + $0x6e4] ss:$72 sps:$4 sm:$0xff]  }
  0x7a   :  { %2255 = vmatprep.subr.bf16.mxu1 %v6043_v11  ;;  %v6119_v11 = vld [vmem:[%s8764_s1 + $0x658] ss:$72 sps:$4 sm:$0xff]  }
  0x7b   :  { %2155 = vmatpush1.bf16.msra.mxu0 %v6038_v13  ;;  %v6127_v13 = vld [vmem:[%s8764_s1 + $0x6ec] ss:$72 sps:$4 sm:$0xff]  }
  0x7c   :  { %2156 = vmatprep.subr.bf16.mxu0 %v6046_v14  ;;  %v6122_v14 = vld [vmem:[%s8764_s1 + $0x6e0] ss:$72 sps:$4 sm:$0xff]  }
  0x7d   :  { %2256 = vmatpush1.bf16.msra.mxu1 %v6041_v47  ;;  %v6130_v47 = vld [vmem:[%s8764_s1 + $0x774] ss:$72 sps:$4 sm:$0xff]  }
  0x7e   :  { %2257 = vmatprep.subr.bf16.mxu1 %v6049_v16  ;;  %v6125_v16 = vld [vmem:[%s8764_s1 + $0x6e8] ss:$72 sps:$4 sm:$0xff]  }
  0x7f   :  { %2157 = vmatpush1.bf16.msra.mxu0 %v6044_v17  ;;  %v6133_v17 = vld [vmem:[%s8764_s1 + $0x77c] ss:$72 sps:$4 sm:$0xff]  }
  0x80   :  { %2328 = vmatprep.subr.bf16.mxu0 %v6052_v18  ;;  %v6128_v18 = vld [vmem:[%s8764_s1 + $0x770] ss:$72 sps:$4 sm:$0xff]  }
  0x81   :  { %2258 = vmatpush1.bf16.msra.mxu1 %v6047_v19  ;;  %v7008_v19 = vld [vmem:[%s8765_s0 + $0x4] ss:$8 sps:$4 sm:$0xff]  }
  0x82   :  { %2159 = vmatmul.mubr.bf16.vlgmr.msra.gmra.mrb[28].mxu0 %v6539_v2  ;;  %2429 = vmatprep.subr.bf16.mxu1 %v6055_v20  ;;  %v6136_v20 = vld [vmem:[%s8764_s1 + $0x804] ss:$72 sps:$4 sm:$0xff]  }
  0x83   :  { %2329 = vmatpush1.bf16.msra.mxu0 %v6050_v21  ;;  %2168 = vmatprep.mubr.bf16.mxu0 %v6550_v5  ;;  %v6131_v21 = vld [vmem:[%s8764_s1 + $0x778] ss:$72 sps:$4 sm:$0xff]  }
  0x84   :  { %2260 = vmatmul.mubr.bf16.vlgmr.msra.gmra.mrb[28].mxu1 %v6539_v2  ;;  %2330 = vmatprep.subr.bf16.mxu0 %v6058_v23  ;;  %v6062_v2 = vld [vmem:[%s8764_s1 + $0x140] ss:$72 sps:$4 sm:$0xff]   ;;  %v6139_v23 = vld [vmem:[%s8764_s1 + $0x80c] ss:$72 sps:$4 sm:$0xff]  }
  0x85   :  { %2430 = vmatpush1.bf16.msra.mxu1 %v6053_v24  ;;  %2269 = vmatprep.mubr.bf16.mxu1 %v6550_v5  ;;  %v6065_v5 = vld [vmem:[%s8764_s1 + $0x148] ss:$72 sps:$4 sm:$0xff]  }
  0x86   :  { %2431 = vmatprep.subr.bf16.mxu1 %v6061_v26  ;;  %v6134_v24 = vld [vmem:[%s8764_s1 + $0x800] ss:$72 sps:$4 sm:$0xff]   ;;  %v6142_v26 = vld [vmem:[%s8764_s1 + $0x894] ss:$72 sps:$4 sm:$0xff]  }
  0x87   :  { %2331 = vmatpush1.bf16.msra.mxu0 %v6056_v27  ;;  %v6137_v27 = vld [vmem:[%s8764_s1 + $0x808] ss:$72 sps:$4 sm:$0xff]  }
  0x88   :  { %2332 = vmatprep.subr.bf16.mxu0 %v6064_v28  ;;  %v6145_v28 = vld [vmem:[%s8764_s1 + $0x89c] ss:$72 sps:$4 sm:$0xff]  }
  0x89   :  { %2432 = vmatpush1.bf16.msra.mxu1 %v6059_v29  ;;  %v6140_v29 = vld [vmem:[%s8764_s1 + $0x890] ss:$72 sps:$4 sm:$0xff]  }
  0x8a   :  { %2433 = vmatprep.subr.bf16.mxu1 %v6067_v30  ;;  %2169 = vmatmul.mubr.bf16.gmra.mrb[32].mxu0 %v6577_v12  ;;  %v6148_v30 = vld [vmem:[%s8764_s1 + $0x34] ss:$72 sps:$4 sm:$0xff]  }
  0x8b   :  { %2333 = vmatpush1.bf16.msra.mxu0 %v6062_v2  ;;  %2178 = vmatprep.mubr.bf16.mxu0 %v6588_v15  ;;  %v6143_v2 = vld [vmem:[%s8764_s1 + $0x898] ss:$72 sps:$4 sm:$0xff]  }
  0x8c   :  { %2334 = vmatprep.subr.bf16.mxu0 %v6070_v31  ;;  %2270 = vmatmul.mubr.bf16.gmra.mrb[32].mxu1 %v6577_v12  ;;  %v6082_v12 = vld [vmem:[%s8764_s1 + $0x2f4] ss:$72 sps:$4 sm:$0xff]  }
  0x8d   :  { %2434 = vmatpush1.bf16.msra.mxu1 %v6065_v5  ;;  %2279 = vmatprep.mubr.bf16.mxu1 %v6588_v15  ;;  %v6077_v15 = vld [vmem:[%s8764_s1 + $0x268] ss:$72 sps:$4 sm:$0xff]   ;;  %v6151_v31 = vld [vmem:[%s8764_s1 + $0x3c] ss:$72 sps:$4 sm:$0xff]  }
  0x8e   :  { %2435 = vmatprep.subr.bf16.mxu1 %v6073_v33  ;;  %v6146_v5 = vld [vmem:[%s8764_s1 + $0x30] ss:$72 sps:$4 sm:$0xff]   ;;  %v6154_v33 = vld [vmem:[%s8764_s1 + $0xc4] ss:$72 sps:$4 sm:$0xff]  }
  0x8f   :  { %2335 = vmatpush1.bf16.msra.mxu0 %v6068_v34  ;;  %v6149_v34 = vld [vmem:[%s8764_s1 + $0x38] ss:$72 sps:$4 sm:$0xff]  }
  0x90   :  { %2336 = vmatprep.subr.bf16.mxu0 %v6076_v36  ;;  %v7058_v36 = vld [vmem:[%s8765_s0] ss:$8 sps:$4 sm:$0xff]  }
  0x91   :  { %2436 = vmatpush1.bf16.msra.mxu1 %v6071_v37  ;;  %v6157_v37 = vld [vmem:[%s8764_s1 + $0xcc] ss:$72 sps:$4 sm:$0xff]  }
  0x92   :  { %2437 = vmatprep.subr.bf16.mxu1 %v6079_v38  ;;  %2179 = vmatmul.mubr.bf16.gmra.mrb[36].mxu0 %v6615_v22  ;;  %v6152_v38 = vld [vmem:[%s8764_s1 + $0xc0] ss:$72 sps:$4 sm:$0xff]  }
  0x93   :  { %2337 = vmatpush1.bf16.msra.mxu0 %v6074_v39  ;;  %2188 = vmatprep.mubr.bf16.mxu0 %v6626_v25  ;;  %v7070_v39 = vld [vmem:[%s8765_s0 + $0x14] ss:$8 sps:$4 sm:$0xff]  }
  0x94   :  { %2338 = vmatprep.subr.bf16.mxu0 %v6082_v12  ;;  %2280 = vmatmul.mubr.bf16.gmra.mrb[36].mxu1 %v6615_v22  ;;  %v6160_v12 = vld [vmem:[%s8764_s1 + $0x154] ss:$72 sps:$4 sm:$0xff]  }
  0x95   :  { %2438 = vmatpush1.bf16.msra.mxu1 %v6077_v15  ;;  %2289 = vmatprep.mubr.bf16.mxu1 %v6626_v25  ;;  %v6155_v15 = vld [vmem:[%s8764_s1 + $0xc8] ss:$72 sps:$4 sm:$0xff]  }
  0x96   :  { %2439 = vmatprep.subr.bf16.mxu1 %v6085_v40  ;;  %v6163_v40 = vld [vmem:[%s8764_s1 + $0x15c] ss:$72 sps:$4 sm:$0xff]  }
  0x97   :  { %2339 = vmatpush1.bf16.msra.mxu0 %v6080_v41  ;;  %v6158_v41 = vld [vmem:[%s8764_s1 + $0x150] ss:$72 sps:$4 sm:$0xff]  }
  0x98   :  { %2340 = vmatprep.subr.bf16.mxu0 %v6088_v43  ;;  %v6166_v43 = vld [vmem:[%s8764_s1 + $0x1e4] ss:$72 sps:$4 sm:$0xff]  }
  0x99   :  { %2440 = vmatpush1.bf16.msra.mxu1 %v6083_v44  ;;  %v6161_v44 = vld [vmem:[%s8764_s1 + $0x158] ss:$72 sps:$4 sm:$0xff]  }
  0x9a   :  { %2441 = vmatprep.subr.bf16.mxu1 %v6091_v46  ;;  %2189 = vmatmul.mubr.bf16.gmra.mrb[40].mxu0 %v6652_v32  ;;  %v7096_v46 = vld [vmem:[%s8765_s0 + $0x10] ss:$8 sps:$4 sm:$0xff]  }
  0x9b   :  { %2341 = vmatpush1.bf16.msra.mxu0 %v6086_v48  ;;  %2198 = vmatprep.mubr.bf16.mxu0 %v6664_v35  ;;  %v6169_v48 = vld [vmem:[%s8764_s1 + $0x1ec] ss:$72 sps:$4 sm:$0xff]  }
  0x9c   :  { %2342 = vmatprep.subr.bf16.mxu0 %v6094_v49  ;;  %2290 = vmatmul.mubr.bf16.gmra.mrb[40].mxu1 %v6652_v32  ;;  %v6164_v49 = vld [vmem:[%s8764_s1 + $0x1e0] ss:$72 sps:$4 sm:$0xff]  }
  0x9d   :  { %2442 = vmatpush1.bf16.msra.mxu1 %v6089_v50  ;;  %2299 = vmatprep.mubr.bf16.mxu1 %v6664_v35  ;;  %v7108_v50 = vld [vmem:[%s8765_s0 + $0x24] ss:$8 sps:$4 sm:$0xff]  }
  0x9e   :  { %2443 = vmatprep.subr.bf16.mxu1 %v6097_v51  ;;  %v6172_v51 = vld [vmem:[%s8764_s1 + $0x274] ss:$72 sps:$4 sm:$0xff]  }
  0x9f   :  { %2343 = vmatpush1.bf16.msra.mxu0 %v6092_v52  ;;  %v6167_v52 = vld [vmem:[%s8764_s1 + $0x1e8] ss:$72 sps:$4 sm:$0xff]  }
  0xa0   :  { %2344 = vmatprep.subr.bf16.mxu0 %v6100_v53  ;;  %v6175_v53 = vld [vmem:[%s8764_s1 + $0x27c] ss:$72 sps:$4 sm:$0xff]  }
  0xa1   :  { %2444 = vmatpush1.bf16.msra.mxu1 %v6095_v55  ;;  %v6170_v55 = vld [vmem:[%s8764_s1 + $0x270] ss:$72 sps:$4 sm:$0xff]  }
  0xa2   :  { %2445 = vmatprep.subr.bf16.mxu1 %v6103_v56  ;;  %2199 = vmatmul.mubr.bf16.gmra.mrb[44].mxu0 %v6690_v42  ;;  %v6178_v56 = vld [vmem:[%s8764_s1 + $0x304] ss:$72 sps:$4 sm:$0xff]  }
  0xa3   :  { %2345 = vmatpush1.bf16.msra.mxu0 %v6098_v58  ;;  %2208 = vmatprep.mubr.bf16.mxu0 %v6702_v45  ;;  %v6173_v58 = vld [vmem:[%s8764_s1 + $0x278] ss:$72 sps:$4 sm:$0xff]  }
  0xa4   :  { %2346 = vmatprep.subr.bf16.mxu0 %v6106_v59  ;;  %2300 = vmatmul.mubr.bf16.gmra.mrb[44].mxu1 %v6690_v42  ;;  %v6181_v59 = vld [vmem:[%s8764_s1 + $0x30c] ss:$72 sps:$4 sm:$0xff]  }
  0xa5   :  { %2446 = vmatpush1.bf16.msra.mxu1 %v6101_v60  ;;  %2309 = vmatprep.mubr.bf16.mxu1 %v6702_v45  ;;  %v6176_v60 = vld [vmem:[%s8764_s1 + $0x300] ss:$72 sps:$4 sm:$0xff]  }
  0xa6   :  { %2447 = vmatprep.subr.bf16.mxu1 %v6109_v61  ;;  %v6184_v61 = vld [vmem:[%s8764_s1 + $0x394] ss:$72 sps:$4 sm:$0xff]  }
  0xa7   :  { %2347 = vmatpush1.bf16.msra.mxu0 %v6104_v62  ;;  %v6179_v62 = vld [vmem:[%s8764_s1 + $0x308] ss:$72 sps:$4 sm:$0xff]  }
  0xa8   :  { %2348 = vmatprep.subr.bf16.mxu0 %v6112_v63  ;;  %v6187_v63 = vld [vmem:[%s8764_s1 + $0x39c] ss:$72 sps:$4 sm:$0xff]  }
  0xa9   :  { %2448 = vmatpush1.bf16.msra.mxu1 %v6107_v1  ;;  %v6182_v1 = vld [vmem:[%s8764_s1 + $0x390] ss:$72 sps:$4 sm:$0xff]  }
  0xaa   :  { %2449 = vmatprep.subr.bf16.mxu1 %v6115_v3  ;;  %2209 = vmatmul.mubr.bf16.gmra.mrb[48].mxu0 %v6732_v54  ;;  %v6190_v3 = vld [vmem:[%s8764_s1 + $0x424] ss:$72 sps:$4 sm:$0xff]  }
  0xab   :  { %2349 = vmatpush1.bf16.msra.mxu0 %v6110_v4  ;;  %2218 = vmatprep.mubr.bf16.mxu0 %v6740_v57  ;;  %v6185_v4 = vld [vmem:[%s8764_s1 + $0x398] ss:$72 sps:$4 sm:$0xff]  }
  0xac   :  { %2350 = vmatprep.subr.bf16.mxu0 %v6118_v6  ;;  %2310 = vmatmul.mubr.bf16.gmra.mrb[48].mxu1 %v6732_v54  ;;  %v6193_v6 = vld [vmem:[%s8764_s1 + $0x42c] ss:$72 sps:$4 sm:$0xff]  }
  0xad   :  { %2450 = vmatpush1.bf16.msra.mxu1 %v6113_v7  ;;  %2319 = vmatprep.mubr.bf16.mxu1 %v6740_v57  ;;  %v6188_v7 = vld [vmem:[%s8764_s1 + $0x420] ss:$72 sps:$4 sm:$0xff]  }
  0xae   :  { %2451 = vmatprep.subr.bf16.mxu1 %v6121_v8  ;;  %v6196_v8 = vld [vmem:[%s8764_s1 + $0x4b4] ss:$72 sps:$4 sm:$0xff]  }
  0xaf   :  { %2351 = vmatpush1.bf16.msra.mxu0 %v6116_v9  ;;  %v6191_v9 = vld [vmem:[%s8764_s1 + $0x428] ss:$72 sps:$4 sm:$0xff]  }
  0xb0   :  { %2352 = vmatprep.subr.bf16.mxu0 %v6124_v10  ;;  %v6199_v10 = vld [vmem:[%s8764_s1 + $0x4bc] ss:$72 sps:$4 sm:$0xff]  }
  0xb1   :  { %2452 = vmatpush1.bf16.msra.mxu1 %v6119_v11  ;;  %v6194_v11 = vld [vmem:[%s8764_s1 + $0x4b0] ss:$72 sps:$4 sm:$0xff]  }
  0xb2   :  { %2453 = vmatprep.subr.bf16.mxu1 %v6127_v13  ;;  %2219 = vmatmul.mubr.bf16.gmra.mrb[52].mxu0 %v6764_v0  ;;  %v6205_v13 = vld [vmem:[%s8764_s1 + $0x54c] ss:$72 sps:$4 sm:$0xff]  }
  0xb3   :  { %2353 = vmatpush1.bf16.msra.mxu0 %v6122_v14  ;;  %2360 = vmatprep.mubr.bf16.mxu0 %v7008_v19  ;;  %v6200_v14 = vld [vmem:[%s8764_s1 + $0x540] ss:$72 sps:$4 sm:$0xff]  }
  0xb4   :  { %2354 = vmatprep.subr.bf16.mxu0 %v6130_v47  ;;  %2320 = vmatmul.mubr.bf16.gmra.mrb[52].mxu1 %v6764_v0  ;;  %v6208_v47 = vld [vmem:[%s8764_s1 + $0x5d4] ss:$72 sps:$4 sm:$0xff]  }
  0xb5   :  { %2454 = vmatpush1.bf16.msra.mxu1 %v6125_v16  ;;  %2461 = vmatprep.mubr.bf16.mxu1 %v7008_v19  ;;  %v6203_v16 = vld [vmem:[%s8764_s1 + $0x548] ss:$72 sps:$4 sm:$0xff]  }
  0xb6   :  { %2455 = vmatprep.subr.bf16.mxu1 %v6133_v17  ;;  %v6211_v17 = vld [vmem:[%s8764_s1 + $0x5dc] ss:$72 sps:$4 sm:$0xff]  }
  0xb7   :  { %2355 = vmatpush1.bf16.msra.mxu0 %v6128_v18  ;;  %v6206_v18 = vld [vmem:[%s8764_s1 + $0x5d0] ss:$72 sps:$4 sm:$0xff]  }
  0xb8   :  { %2356 = vmatprep.subr.bf16.mxu0 %v6136_v20  ;;  %v6217_v20 = vld [vmem:[%s8764_s1 + $0x66c] ss:$72 sps:$4 sm:$0xff]  }
  0xb9   :  { %2456 = vmatpush1.bf16.msra.mxu1 %v6131_v21  ;;  %v6212_v21 = vld [vmem:[%s8764_s1 + $0x660] ss:$72 sps:$4 sm:$0xff]  }
  0xba   :  { %2457 = vmatprep.subr.bf16.mxu1 %v6139_v23  ;;  %v6220_v23 = vld [vmem:[%s8764_s1 + $0x6f4] ss:$72 sps:$4 sm:$0xff]  }
  0xbb   :  { %2357 = vmatpush1.bf16.msra.mxu0 %v6134_v24  ;;  %v6215_v24 = vld [vmem:[%s8764_s1 + $0x668] ss:$72 sps:$4 sm:$0xff]  }
  0xbc   :  { %2358 = vmatprep.subr.bf16.mxu0 %v6142_v26  ;;  %v6223_v26 = vld [vmem:[%s8764_s1 + $0x6fc] ss:$72 sps:$4 sm:$0xff]  }
  0xbd   :  { %2458 = vmatpush1.bf16.msra.mxu1 %v6137_v27  ;;  %v6218_v27 = vld [vmem:[%s8764_s1 + $0x6f0] ss:$72 sps:$4 sm:$0xff]  }
  0xbe   :  { %2459 = vmatprep.subr.bf16.mxu1 %v6145_v28  ;;  %v6221_v28 = vld [vmem:[%s8764_s1 + $0x6f8] ss:$72 sps:$4 sm:$0xff]  }
  0xbf   :  { %2359 = vmatpush1.bf16.msra.mxu0 %v6140_v29  ;;  %v6229_v29 = vld [vmem:[%s8764_s1 + $0x78c] ss:$72 sps:$4 sm:$0xff]  }
  0xc0   :  { %2530 = vmatprep.subr.bf16.mxu0 %v6148_v30  ;;  %v6224_v30 = vld [vmem:[%s8764_s1 + $0x780] ss:$72 sps:$4 sm:$0xff]  }
  0xc1   :  { %2460 = vmatpush1.bf16.msra.mxu1 %v6143_v2  ;;  %v6232_v2 = vld [vmem:[%s8764_s1 + $0x814] ss:$72 sps:$4 sm:$0xff]  }
  0xc2   :  { %2361 = vmatmul.mubr.bf16.vlgmr.msra.gmra.mrb[56].mxu0 %v7058_v36  ;;  %2631 = vmatprep.subr.bf16.mxu1 %v6151_v31  ;;  %v6227_v31 = vld [vmem:[%s8764_s1 + $0x788] ss:$72 sps:$4 sm:$0xff]  }
  0xc3   :  { %2531 = vmatpush1.bf16.msra.mxu0 %v6146_v5  ;;  %2370 = vmatprep.mubr.bf16.mxu0 %v7070_v39  ;;  %v6235_v5 = vld [vmem:[%s8764_s1 + $0x81c] ss:$72 sps:$4 sm:$0xff]  }
  0xc4   :  { %2462 = vmatmul.mubr.bf16.vlgmr.msra.gmra.mrb[56].mxu1 %v7058_v36  ;;  %2532 = vmatprep.subr.bf16.mxu0 %v6154_v33  ;;  %v6230_v33 = vld [vmem:[%s8764_s1 + $0x810] ss:$72 sps:$4 sm:$0xff]  }
  0xc5   :  { %2632 = vmatpush1.bf16.msra.mxu1 %v6149_v34  ;;  %2471 = vmatprep.mubr.bf16.mxu1 %v7070_v39  ;;  %v6238_v34 = vld [vmem:[%s8764_s1 + $0x8a4] ss:$72 sps:$4 sm:$0xff]  }
  0xc6   :  { %2633 = vmatprep.subr.bf16.mxu1 %v6157_v37  ;;  %v6233_v37 = vld [vmem:[%s8764_s1 + $0x818] ss:$72 sps:$4 sm:$0xff]  }
  0xc7   :  { %2533 = vmatpush1.bf16.msra.mxu0 %v6152_v38  ;;  %v6241_v38 = vld [vmem:[%s8764_s1 + $0x8ac] ss:$72 sps:$4 sm:$0xff]  }
  0xc8   :  { %2534 = vmatprep.subr.bf16.mxu0 %v6160_v12  ;;  %v6236_v12 = vld [vmem:[%s8764_s1 + $0x8a0] ss:$72 sps:$4 sm:$0xff]  }
  0xc9   :  { %2634 = vmatpush1.bf16.msra.mxu1 %v6155_v15  ;;  %v6244_v15 = vld [vmem:[%s8764_s1 + $0x44] ss:$72 sps:$4 sm:$0xff]  }
  0xca   :  { %2371 = vmatmul.mubr.bf16.gmra.mrb[60].mxu0 %v7096_v46  ;;  %2635 = vmatprep.subr.bf16.mxu1 %v6163_v40  ;;  %v6239_v40 = vld [vmem:[%s8764_s1 + $0x8a8] ss:$72 sps:$4 sm:$0xff]  }
  0xcb   :  { %2535 = vmatpush1.bf16.msra.mxu0 %v6158_v41  ;;  %2380 = vmatprep.mubr.bf16.mxu0 %v7108_v50  ;;  %v6242_v41 = vld [vmem:[%s8764_s1 + $0x40] ss:$72 sps:$4 sm:$0xff]  }
  0xcc   :  { %2536 = vmatprep.subr.bf16.mxu0 %v6166_v43  ;;  %2472 = vmatmul.mubr.bf16.gmra.mrb[60].mxu1 %v7096_v46  ;;  %v6247_v43 = vld [vmem:[%s8764_s1 + $0xd4] ss:$72 sps:$4 sm:$0xff]  }
  0xcd   :  { %2636 = vmatpush1.bf16.msra.mxu1 %v6161_v44  ;;  %2481 = vmatprep.mubr.bf16.mxu1 %v7108_v50  ;;  %v6245_v44 = vld [vmem:[%s8764_s1 + $0xd0] ss:$72 sps:$4 sm:$0xff]  }
  0xce   :  { %2637 = vmatprep.subr.bf16.mxu1 %v6169_v48  ;;  %v6250_v48 = vld [vmem:[%s8764_s1 + $0x164] ss:$72 sps:$4 sm:$0xff]  }
  0xcf   :  { %2537 = vmatpush1.bf16.msra.mxu0 %v6164_v49  ;;  %v327_v49 = vlaneseq }
  0xd0   :  { %2538 = vmatprep.subr.bf16.mxu0 %v6172_v51  ;;  %v6248_v51 = vld [vmem:[%s8764_s1 + $0x160] ss:$72 sps:$4 sm:$0xff]  }
  0xd1   :  { %2638 = vmatpush1.bf16.msra.mxu1 %v6167_v52  ;;  %v6253_v52 = vld [vmem:[%s8764_s1 + $0x1f4] ss:$72 sps:$4 sm:$0xff]  }
  0xd2   :  { %2381 = vmatmul.mubr.bf16.gmra.mrb[64].mxu0 %v6615_v22  ;;  %2639 = vmatprep.subr.bf16.mxu1 %v6175_v53  ;;  %v7145_v22 = vld [vmem:[%s8765_s0 + $0x20] ss:$8 sps:$4 sm:$0xff]   ;;  %v7316_v53 = vshrl.u32 %v327_v49, 7 }
  0xd3   :  { %2539 = vmatpush1.bf16.msra.mxu0 %v6170_v55  ;;  %2390 = vmatprep.mubr.bf16.mxu0 %v6626_v25  ;;  %v7154_v25 = vld [vmem:[%s8765_s0 + $0x34] ss:$8 sps:$4 sm:$0xff]   ;;  %v6251_v55 = vld [vmem:[%s8764_s1 + $0x1f0] ss:$72 sps:$4 sm:$0xff]   ;;  %v6266_v49 = vld [vmem:[%s8764_s1 + $0x4c0] ss:$72 sps:$4 sm:$0xff]  }
  0xd4   :  { %2540 = vmatprep.subr.bf16.mxu0 %v6178_v56  ;;  %2482 = vmatmul.mubr.bf16.gmra.mrb[64].mxu1 %v7145_v22  ;;  %v6256_v56 = vld [vmem:[%s8764_s1 + $0x284] ss:$72 sps:$4 sm:$0xff]  }
  0xd5   :  { %2640 = vmatpush1.bf16.msra.mxu1 %v6173_v58  ;;  %2491 = vmatprep.mubr.bf16.mxu1 %v7154_v25  ;;  %v7328_v58 = vsub.s32 0, %v7316_v53 }
  0xd6   :  { %2641 = vmatprep.subr.bf16.mxu1 %v6181_v59  ;;  %v6254_v59 = vld [vmem:[%s8764_s1 + $0x280] ss:$72 sps:$4 sm:$0xff]  }
  0xd7   :  { %2541 = vmatpush1.bf16.msra.mxu0 %v6176_v60  ;;  %v7336_v60 = vld [vmem:[%s8766_s2] sm:$0xff] }
  0xd8   :  { %2542 = vmatprep.subr.bf16.mxu0 %v6184_v61  ;;  %v7339_v61 = vsub.s32 1, %v7316_v53 }
  0xd9   :  { %2642 = vmatpush1.bf16.msra.mxu1 %v6179_v62  ;;  %v6259_v62 = vld [vmem:[%s8764_s1 + $0x314] ss:$72 sps:$4 sm:$0xff]  }
  0xda   :  { %2391 = vmatmul.mubr.bf16.gmra.mrb[68].mxu0 %v6652_v32  ;;  %2643 = vmatprep.subr.bf16.mxu1 %v6187_v63  ;;  %v337_v63 = vsub.s32 2, %v7316_v53 }
  0xdb   :  { %2543 = vmatpush1.bf16.msra.mxu0 %v6182_v1  ;;  %2400 = vmatprep.mubr.bf16.mxu0 %v6664_v35  ;;  %v341_v1 = vsub.s32 3, %v7316_v53 }
  0xdc   :  { %2544 = vmatprep.subr.bf16.mxu0 %v6190_v3  ;;  %2492 = vmatmul.mubr.bf16.gmra.mrb[68].mxu1 %v6652_v32  ;;  %v6202_v32 = vld [vmem:[%s8764_s1 + $0x544] ss:$72 sps:$4 sm:$0xff]   ;;  %v7349_v3 = vrot.slane %v7336_v60, %v7328_v58 }
  0xdd   :  { %2644 = vmatpush1.bf16.msra.mxu1 %v6185_v4  ;;  %2501 = vmatprep.mubr.bf16.mxu1 %v6664_v35  ;;  %v6197_v35 = vld [vmem:[%s8764_s1 + $0x4b8] ss:$72 sps:$4 sm:$0xff]   ;;  %v7353_v4 = vrot.slane %v7336_v60, %v7339_v61 }
  0xde   :  { %2645 = vmatprep.subr.bf16.mxu1 %v6193_v6  ;;  %v6257_v6 = vld [vmem:[%s8764_s1 + $0x310] ss:$72 sps:$4 sm:$0xff]  }
  0xdf   :  { %2545 = vmatpush1.bf16.msra.mxu0 %v6188_v7  ;;  %v6262_v7 = vld [vmem:[%s8764_s1 + $0x3a4] ss:$72 sps:$4 sm:$0xff]  }
  0xe0   :  { %2546 = vmatprep.subr.bf16.mxu0 %v6196_v8  ;;  %v7366_v8 = vrot.slane %v7336_v60, %v337_v63 }
  0xe1   :  { %2646 = vmatpush1.bf16.msra.mxu1 %v6191_v9 }
  0xe2   :  { %2401 = vmatmul.mubr.bf16.gmra.mrb[72].mxu0 %v6690_v42  ;;  %2647 = vmatprep.subr.bf16.mxu1 %v6199_v10  ;;  %v7372_v10 = vrot.slane %v7336_v60, %v341_v1 }
  0xe3   :  { %2547 = vmatpush1.bf16.msra.mxu0 %v6194_v11  ;;  %2410 = vmatprep.mubr.bf16.mxu0 %v6702_v45 }
  0xe4   :  { %2548 = vmatprep.subr.bf16.mxu0 %v6202_v32  ;;  %2502 = vmatmul.mubr.bf16.gmra.mrb[72].mxu1 %v6690_v42  ;;  %v6214_v42 = vld [vmem:[%s8764_s1 + $0x664] ss:$72 sps:$4 sm:$0xff]  }
  0xe5   :  { %2648 = vmatpush1.bf16.msra.mxu1 %v6197_v35  ;;  %2511 = vmatprep.mubr.bf16.mxu1 %v6702_v45  ;;  %v6209_v45 = vld [vmem:[%s8764_s1 + $0x5d8] ss:$72 sps:$4 sm:$0xff]  }
  0xe6   :  { %2649 = vmatprep.subr.bf16.mxu1 %v6205_v13 }
  0xe7   :  { %2549 = vmatpush1.bf16.msra.mxu0 %v6200_v14  ;;  %v6260_v14 = vld [vmem:[%s8764_s1 + $0x3a0] ss:$72 sps:$4 sm:$0xff]  }
  0xe8   :  { %2550 = vmatprep.subr.bf16.mxu0 %v6208_v47 }
  0xe9   :  { %2650 = vmatpush1.bf16.msra.mxu1 %v6203_v16 }
  0xea   :  { %2411 = vmatmul.mubr.bf16.gmra.mrb[76].mxu0 %v6732_v54  ;;  %2651 = vmatprep.subr.bf16.mxu1 %v6211_v17 }
  0xeb   :  { %2551 = vmatpush1.bf16.msra.mxu0 %v6206_v18  ;;  %2420 = vmatprep.mubr.bf16.mxu0 %v6740_v57 }
  0xec   :  { %2552 = vmatprep.subr.bf16.mxu0 %v6214_v42  ;;  %2512 = vmatmul.mubr.bf16.gmra.mrb[76].mxu1 %v6732_v54  ;;  %v6226_v54 = vld [vmem:[%s8764_s1 + $0x784] ss:$72 sps:$4 sm:$0xff]   ;;  %v6265_v42 = vld [vmem:[%s8764_s1 + $0x434] ss:$72 sps:$4 sm:$0xff]  }
  0xed   :  { %2652 = vmatpush1.bf16.msra.mxu1 %v6209_v45  ;;  %2521 = vmatprep.mubr.bf16.mxu1 %v6740_v57 }
  0xee   :  { %2653 = vmatprep.subr.bf16.mxu1 %v6217_v20 }
  0xef   :  { %2553 = vmatpush1.bf16.msra.mxu0 %v6212_v21 }
  0xf0   :  { %2554 = vmatprep.subr.bf16.mxu0 %v6220_v23 }
  0xf1   :  { %2654 = vmatpush1.bf16.msra.mxu1 %v6215_v24 }
  0xf2   :  { %2421 = vmatmul.mubr.bf16.gmra.mrb[80].mxu0 %v6764_v0  ;;  %2655 = vmatprep.subr.bf16.mxu1 %v6223_v26 }
  0xf3   :  { %2555 = vmatpush1.bf16.msra.mxu0 %v6218_v27  ;;  %2562 = vmatprep.mubr.bf16.mxu0 %v7008_v19  ;;  %v7389_v27 = vld [vmem:[%s8765_s0 + $0x30] ss:$8 sps:$4 sm:$0xff]  }
  0xf4   :  { %2556 = vmatprep.subr.bf16.mxu0 %v6226_v54  ;;  %2522 = vmatmul.mubr.bf16.gmra.mrb[80].mxu1 %v6764_v0 }
  0xf5   :  { %2656 = vmatpush1.bf16.msra.mxu1 %v6221_v28  ;;  %2663 = vmatprep.mubr.bf16.mxu1 %v7008_v19 }
  0xf6   :  { %2657 = vmatprep.subr.bf16.mxu1 %v6229_v29 }
  0xf7   :  { %2557 = vmatpush1.bf16.msra.mxu0 %v6224_v30 }
  0xf8   :  { %2558 = vmatprep.subr.bf16.mxu0 %v6232_v2 }
  0xf9   :  { %2658 = vmatpush1.bf16.msra.mxu1 %v6227_v31  ;;  %v6263_v31 = vld [vmem:[%s8764_s1 + $0x430] ss:$72 sps:$4 sm:$0xff]  }
  0xfa   :  { %2659 = vmatprep.subr.bf16.mxu1 %v6235_v5  ;;  %v7399_v5 = vld [vmem:[%s8765_s0 + $0x44] ss:$8 sps:$4 sm:$0xff]  }
  0xfb   :  { %2559 = vmatpush1.bf16.msra.mxu0 %v6230_v33 }
  0xfc   :  { %2560 = vmatprep.subr.bf16.mxu0 %v6238_v34 }
  0xfd   :  { %2660 = vmatpush1.bf16.msra.mxu1 %v6233_v37 }
  0xfe   :  { %2661 = vmatprep.subr.bf16.mxu1 %v6241_v38  ;;  %v6268_v38 = vld [vmem:[%s8764_s1 + $0x4c4] ss:$72 sps:$4 sm:$0xff]  }
  0xff   :  { %2561 = vmatpush1.bf16.msra.mxu0 %v6236_v12 }
 0x100   :  { %2732 = vmatprep.subr.bf16.mxu0 %v6244_v15 }
 0x101   :  { %2662 = vmatpush1.bf16.msra.mxu1 %v6239_v40 }
 0x102   :  { %2563 = vmatmul.mubr.bf16.vlgmr.msra.gmra.mrb[84].mxu0 %v7058_v36 }
 0x103   :  { %2733 = vmatpush1.bf16.msra.mxu0 %v6242_v41  ;;  %2572 = vmatprep.mubr.bf16.mxu0 %v7070_v39 }
 0x104   :  { %2664 = vmatmul.mubr.bf16.vlgmr.msra.gmra.mrb[84].mxu1 %v7058_v36  ;;  %2734 = vmatprep.subr.bf16.mxu0 %v6247_v43 }
 0x105   :  { %2673 = vmatprep.mubr.bf16.mxu1 %v7070_v39 }
 0x107   :  { %2735 = vmatpush1.bf16.msra.mxu0 %v6245_v44 }
 0x108   :  { %2736 = vmatprep.subr.bf16.mxu0 %v6250_v48 }
 0x10a   :  { %2573 = vmatmul.mubr.bf16.gmra.mrb[88].mxu0 %v7096_v46 }
 0x10b   :  { %2737 = vmatpush1.bf16.msra.mxu0 %v6248_v51  ;;  %2582 = vmatprep.mubr.bf16.mxu0 %v7108_v50 }
 0x10c   :  { %2674 = vmatmul.mubr.bf16.gmra.mrb[88].mxu1 %v7096_v46  ;;  %2738 = vmatprep.subr.bf16.mxu0 %v6253_v52 }
 0x10d   :  { %2683 = vmatprep.mubr.bf16.mxu1 %v7108_v50 }
 0x10f   :  { %2739 = vmatpush1.bf16.msra.mxu0 %v6251_v55 }
 0x110   :  { %2740 = vmatprep.subr.bf16.mxu0 %v6256_v56 }
 0x112   :  { %2583 = vmatmul.mubr.bf16.gmra.mrb[92].mxu0 %v7145_v22 }
 0x113   :  { %2741 = vmatpush1.bf16.msra.mxu0 %v6254_v59  ;;  %2592 = vmatprep.mubr.bf16.mxu0 %v7154_v25 }
 0x114   :  { %2684 = vmatmul.mubr.bf16.gmra.mrb[92].mxu1 %v7145_v22  ;;  %2742 = vmatprep.subr.bf16.mxu0 %v6259_v62 }
 0x115   :  { %v1958_v9 = vpop.f32.mrb[0].mxu0  ;;  %2693 = vmatprep.mubr.bf16.mxu1 %v7154_v25 }
 0x116   :  { %v1959_v11 = vadd.f32 %v1958_v9, %v7349_v3  ;;  %v1960_v32 = vpop.f32.mrb[1].mxu0 }
 0x117   :  { %v1961_v35 = vadd.f32 %v1960_v32, %v7353_v4  ;;  %v1962_v13 = vpop.f32.mrb[2].mxu0  ;;  %2743 = vmatpush1.bf16.msra.mxu0 %v6257_v6  ;;  %v2059_v47 = vpop.f32.mrb[0].mxu1 }
 0x118   :  { %v2833_v16 = vmax.f32 %v1959_v11, 0.0  ;;  %v1963_v17 = vadd.f32 %v1962_v13, %v7349_v3  ;;  %v1964_v18 = vpop.f32.mrb[3].mxu0  ;;  %2744 = vmatprep.subr.bf16.mxu0 %v6262_v7  ;;  %v2060_v45 = vadd.f32 %v2059_v47, %v7366_v8  ;;  %v2061_v20 = vpop.f32.mrb[1].mxu1  ;;  %v6271_v7 = vld [vmem:[%s8764_s1 + $0x554] ss:$72 sps:$4 sm:$0xff]  }
 0x119   :  { %v1965_v21 = vadd.f32 %v1964_v18, %v7353_v4  ;;  %v2062_v23 = vadd.f32 %v2061_v20, %v7372_v10  ;;  %v2063_v24 = vpop.f32.mrb[2].mxu1  ;;  %v2834_v30 = vmax.f32 %v1961_v35, 0.0  ;;  %v7427_v47 = vld [vmem:[%s8765_s0 + $0x40] ss:$8 sps:$4 sm:$0xff]   ;;  %v6269_v20 = vld [vmem:[%s8764_s1 + $0x550] ss:$72 sps:$4 sm:$0xff]  }
 0x11a   :  { %v2851_v26 = vmax.f32 %v1963_v17, 0.0  ;;  %2593 = vmatmul.mubr.bf16.gmra.mrb[96].mxu0 %v7389_v27  ;;  %v2835_v54 = vmax.f32 %v2060_v45, 0.0  ;;  %v2064_v28 = vadd.f32 %v2063_v24, %v7366_v8  ;;  %v2065_v29 = vpop.f32.mrb[3].mxu1 }
 0x11b   :  { %v2852_v2 = vmax.f32 %v1965_v21, 0.0  ;;  %2745 = vmatpush1.bf16.msra.mxu0 %v6260_v14  ;;  %2602 = vmatprep.mubr.bf16.mxu0 %v7399_v5  ;;  %v2836_v33 = vmax.f32 %v2062_v23, 0.0  ;;  %v2066_v34 = vadd.f32 %v2065_v29, %v7372_v10  ;;  %v7437_v21 = vld [vmem:[%s8765_s0 + $0x54] ss:$8 sps:$4 sm:$0xff]  }
 0x11c   :  { %v5335_v37 = vpack.c.bf16 %v2851_v26, %v2833_v16  ;;  %2694 = vmatmul.mubr.bf16.gmra.mrb[96].mxu1 %v7389_v27  ;;  %2746 = vmatprep.subr.bf16.mxu0 %v6265_v42  ;;  %v2853_v12 = vmax.f32 %v2064_v28, 0.0 }
 0x11d   :  { %v5333_v15 = vpack.c.bf16 %v2852_v2, %v2834_v30  ;;  %v1968_v40 = vpop.f32.mrb[4].mxu0  ;;  %2703 = vmatprep.mubr.bf16.mxu1 %v7399_v5  ;;  %v2854_v41 = vmax.f32 %v2066_v34, 0.0 }
 0x11e   :  { %v1969_v43 = vadd.f32 %v1968_v40, %v7349_v3  ;;  %v1970_v44 = vpop.f32.mrb[5].mxu0  ;;  %v7409_v48 = vpack.c.bf16 %v2853_v12, %v2835_v54  ;;  %v6274_v54 = vld [vmem:[%s8764_s1 + $0x5e4] ss:$72 sps:$4 sm:$0xff]  }
 0x11f   :  { %2747 = vmatpush1.bf16.msra.mxu0 %v6263_v31  ;;  %5334 = vmatprep.subr.bf16.mxu1 %v5333_v15  ;;  %v1971_v51 = vadd.f32 %v1970_v44, %v7353_v4  ;;  %v1972_v52 = vpop.f32.mrb[6].mxu0  ;;  %v7415_v55 = vpack.c.bf16 %v2854_v41, %v2836_v33  ;;  %v2069_v56 = vpop.f32.mrb[4].mxu1 }
 0x120   :  { %5336 = vmatpush1.bf16.msra.mxu1 %v5335_v37  ;;  %v2869_v59 = vmax.f32 %v1969_v43, 0.0  ;;  %2748 = vmatprep.subr.bf16.mxu0 %v6268_v38  ;;  %v1973_v62 = vadd.f32 %v1972_v52, %v7349_v3  ;;  %v1974_v6 = vpop.f32.mrb[7].mxu0  ;;  %v2070_v9 = vadd.f32 %v2069_v56, %v7366_v8  ;;  %v2071_v11 = vpop.f32.mrb[5].mxu1  ;;  %v6272_v37 = vld [vmem:[%s8764_s1 + $0x5e0] ss:$72 sps:$4 sm:$0xff]  }
 0x121   :  { %v2870_v32 = vmax.f32 %v1971_v51, 0.0  ;;  %v1975_v35 = vadd.f32 %v1974_v6, %v7353_v4  ;;  %v2072_v13 = vadd.f32 %v2071_v11, %v7372_v10  ;;  %v2073_v14 = vpop.f32.mrb[6].mxu1 }
 0x122   :  { %2603 = vmatmul.mubr.bf16.gmra.mrb[100].mxu0 %v7427_v47  ;;  %v2887_v16 = vmax.f32 %v1973_v62, 0.0  ;;  %v2871_v17 = vmax.f32 %v2070_v9, 0.0  ;;  %v2074_v18 = vadd.f32 %v2073_v14, %v7366_v8  ;;  %v2075_v42 = vpop.f32.mrb[7].mxu1  ;;  %v6275_v14 = vld [vmem:[%s8764_s1 + $0x670] ss:$72 sps:$4 sm:$0xff]  }
 0x123   :  { %2749 = vmatpush1.bf16.msra.mxu0 %v6266_v49  ;;  %v2888_v45 = vmax.f32 %v1975_v35, 0.0  ;;  %2612 = vmatprep.mubr.bf16.mxu0 %v7437_v21  ;;  %v2872_v23 = vmax.f32 %v2072_v13, 0.0  ;;  %v2076_v24 = vadd.f32 %v2075_v42, %v7372_v10  ;;  %v6277_v49 = vld [vmem:[%s8764_s1 + $0x674] ss:$72 sps:$4 sm:$0xff]   ;;  %v6280_v42 = vld [vmem:[%s8764_s1 + $0x704] ss:$72 sps:$4 sm:$0xff]  }
 0x124   :  { %v5339_v26 = vpack.c.bf16 %v2887_v16, %v2869_v59  ;;  %2704 = vmatmul.mubr.bf16.gmra.mrb[100].mxu1 %v7427_v47  ;;  %2750 = vmatprep.subr.bf16.mxu0 %v6271_v7  ;;  %v2889_v28 = vmax.f32 %v2074_v18, 0.0  ;;  %v7465_v7 = vld [vmem:[%s8765_s0 + $0x50] ss:$8 sps:$4 sm:$0xff]  }
 0x125   :  { %v5337_v29 = vpack.c.bf16 %v2888_v45, %v2870_v32  ;;  %v1978_v30 = vpop.f32.mrb[8].mxu0  ;;  %2713 = vmatprep.mubr.bf16.mxu1 %v7437_v21  ;;  %v2890_v2 = vmax.f32 %v2076_v24, 0.0 }
 0x126   :  { %v1979_v31 = vadd.f32 %v1978_v30, %v7349_v3  ;;  %v1980_v33 = vpop.f32.mrb[9].mxu0  ;;  %v7447_v34 = vpack.c.bf16 %v2889_v28, %v2871_v17 }
 0x127   :  { %2751 = vmatpush1.bf16.msra.mxu0 %v6269_v20  ;;  %v1981_v38 = vadd.f32 %v1980_v33, %v7353_v4  ;;  %v1982_v12 = vpop.f32.mrb[10].mxu0  ;;  %5338 = vmatprep.subr.bf16.mxu1 %v5337_v29  ;;  %v7453_v15 = vpack.c.bf16 %v2890_v2, %v2872_v23  ;;  %v2079_v40 = vpop.f32.mrb[8].mxu1  ;;  %v6278_v29 = vld [vmem:[%s8764_s1 + $0x700] ss:$72 sps:$4 sm:$0xff]  }
 0x128   :  { %v2905_v41 = vmax.f32 %v1979_v31, 0.0  ;;  %2752 = vmatprep.subr.bf16.mxu0 %v6274_v54  ;;  %v1983_v43 = vadd.f32 %v1982_v12, %v7349_v3  ;;  %v1984_v44 = vpop.f32.mrb[11].mxu0  ;;  %5340 = vmatpush1.bf16.msra.mxu1 %v5339_v26  ;;  %v2080_v51 = vadd.f32 %v2079_v40, %v7366_v8  ;;  %v2081_v52 = vpop.f32.mrb[9].mxu1  ;;  %v6283_v40 = vld [vmem:[%s8764_s1 + $0x794] ss:$72 sps:$4 sm:$0xff]  }
 0x129   :  { %v2906_v56 = vmax.f32 %v1981_v38, 0.0  ;;  %v1985_v59 = vadd.f32 %v1984_v44, %v7353_v4  ;;  %v2082_v62 = vadd.f32 %v2081_v52, %v7372_v10  ;;  %v2083_v6 = vpop.f32.mrb[10].mxu1 }
 0x12a   :  { %2613 = vmatmul.mubr.bf16.gmra.mrb[104].mxu0 %v7465_v7  ;;  %v2923_v9 = vmax.f32 %v1983_v43, 0.0  ;;  %v2907_v11 = vmax.f32 %v2080_v51, 0.0  ;;  %v2084_v32 = vadd.f32 %v2083_v6, %v7366_v8  ;;  %v2085_v35 = vpop.f32.mrb[11].mxu1 }
 0x12b   :  { %2753 = vmatpush1.bf16.msra.mxu0 %v6272_v37  ;;  %v2924_v13 = vmax.f32 %v1985_v59, 0.0  ;;  %2622 = vmatprep.mubr.bf16.mxu0 %v6740_v57  ;;  %v2908_v16 = vmax.f32 %v2082_v62, 0.0  ;;  %v2086_v17 = vadd.f32 %v2085_v35, %v7372_v10 }
 0x12c   :  { %v5343_v18 = vpack.c.bf16 %v2923_v9, %v2905_v41  ;;  %2714 = vmatmul.mubr.bf16.gmra.mrb[104].mxu1 %v7465_v7  ;;  %2754 = vmatprep.subr.bf16.mxu0 %v6277_v49  ;;  %v2925_v45 = vmax.f32 %v2084_v32, 0.0 }
 0x12d   :  { %v5341_v20 = vpack.c.bf16 %v2924_v13, %v2906_v56  ;;  %v1988_v23 = vpop.f32.mrb[12].mxu0  ;;  %2723 = vmatprep.mubr.bf16.mxu1 %v6740_v57  ;;  %v2926_v24 = vmax.f32 %v2086_v17, 0.0 }
 0x12e   :  { %v1989_v26 = vadd.f32 %v1988_v23, %v7349_v3  ;;  %v1990_v54 = vpop.f32.mrb[13].mxu0  ;;  %v7480_v28 = vpack.c.bf16 %v2925_v45, %v2907_v11  ;;  %v6281_v11 = vld [vmem:[%s8764_s1 + $0x790] ss:$72 sps:$4 sm:$0xff]  }
 0x12f   :  { %2755 = vmatpush1.bf16.msra.mxu0 %v6275_v14  ;;  %v1991_v30 = vadd.f32 %v1990_v54, %v7353_v4  ;;  %v1992_v2 = vpop.f32.mrb[14].mxu0  ;;  %5342 = vmatprep.subr.bf16.mxu1 %v5341_v20  ;;  %v7486_v31 = vpack.c.bf16 %v2926_v24, %v2908_v16  ;;  %v2089_v33 = vpop.f32.mrb[12].mxu1  ;;  %v6286_v14 = vld [vmem:[%s8764_s1 + $0x824] ss:$72 sps:$4 sm:$0xff]  }
 0x130   :  { %v2941_v37 = vmax.f32 %v1989_v26, 0.0  ;;  %2756 = vmatprep.subr.bf16.mxu0 %v6280_v42  ;;  %v1993_v38 = vadd.f32 %v1992_v2, %v7349_v3  ;;  %v1994_v12 = vpop.f32.mrb[15].mxu0  ;;  %5344 = vmatpush1.bf16.msra.mxu1 %v5343_v18  ;;  %v2090_v41 = vadd.f32 %v2089_v33, %v7366_v8  ;;  %v2091_v43 = vpop.f32.mrb[13].mxu1  ;;  %v6303_v42 = vmov 0.0   ;;  %v6284_v26 = vld [vmem:[%s8764_s1 + $0x820] ss:$72 sps:$4 sm:$0xff]  }
 0x131   :  { %v2942_v44 = vmax.f32 %v1991_v30, 0.0  ;;  %v1995_v49 = vadd.f32 %v1994_v12, %v7353_v4  ;;  %v2092_v51 = vadd.f32 %v2091_v43, %v7372_v10  ;;  %v2093_v52 = vpop.f32.mrb[14].mxu1 }
 0x132   :  { %2623 = vmatmul.mubr.bf16.gmra.mrb[108].mxu0 %v6764_v0  ;;  %v2959_v56 = vmax.f32 %v1993_v38, 0.0  ;;  %v2943_v59 = vmax.f32 %v2090_v41, 0.0  ;;  %v2094_v62 = vadd.f32 %v2093_v52, %v7366_v8  ;;  %v2095_v6 = vpop.f32.mrb[15].mxu1  ;;  %v6289_v38 = vld [vmem:[%s8764_s1 + $0x8b4] ss:$72 sps:$4 sm:$0xff]  }
 0x133   :  { %2757 = vmatpush1.bf16.msra.mxu0 %v6278_v29  ;;  %v2960_v9 = vmax.f32 %v1995_v49, 0.0  ;;  %2764 = vmatprep.mubr.bf16.mxu0 %v7008_v19  ;;  %v2944_v32 = vmax.f32 %v2092_v51, 0.0  ;;  %v2096_v35 = vadd.f32 %v2095_v6, %v7372_v10  ;;  %v6287_v6 = vld [vmem:[%s8764_s1 + $0x8b0] ss:$72 sps:$4 sm:$0xff]  }
 0x134   :  { %v5347_v13 = vpack.c.bf16 %v2959_v56, %v2941_v37  ;;  %2724 = vmatmul.mubr.bf16.gmra.mrb[108].mxu1 %v6764_v0  ;;  %2758 = vmatprep.subr.bf16.mxu0 %v6283_v40  ;;  %v2961_v16 = vmax.f32 %v2094_v62, 0.0 }
 0x135   :  { %v5345_v17 = vpack.c.bf16 %v2960_v9, %v2942_v44  ;;  %v1998_v18 = vpop.f32.mrb[16].mxu0  ;;  %3191 = vmatprep.mubr.f32.mxu1 %v6303_v42  ;;  %v2962_v45 = vmax.f32 %v2096_v35, 0.0 }
 0x136   :  { %v1999_v19 = vadd.f32 %v1998_v18, %v7349_v3  ;;  %v2000_v20 = vpop.f32.mrb[17].mxu0  ;;  %v7508_v23 = vpack.c.bf16 %v2961_v16, %v2943_v59 }
 0x137   :  { %2759 = vmatpush1.bf16.msra.mxu0 %v6281_v11  ;;  %v2001_v24 = vadd.f32 %v2000_v20, %v7353_v4  ;;  %v2002_v54 = vpop.f32.mrb[18].mxu0  ;;  %5346 = vmatprep.subr.bf16.mxu1 %v5345_v17  ;;  %v7514_v29 = vpack.c.bf16 %v2962_v45, %v2944_v32  ;;  %v2099_v30 = vpop.f32.mrb[16].mxu1 }
 0x138   :  { %v2977_v2 = vmax.f32 %v1999_v19, 0.0  ;;  %2760 = vmatprep.subr.bf16.mxu0 %v6286_v14  ;;  %v2003_v33 = vadd.f32 %v2002_v54, %v7349_v3  ;;  %v2004_v37 = vpop.f32.mrb[19].mxu0  ;;  %5348 = vmatpush1.bf16.msra.mxu1 %v5347_v13  ;;  %v2100_v12 = vadd.f32 %v2099_v30, %v7366_v8  ;;  %v2101_v40 = vpop.f32.mrb[17].mxu1 }
 0x139   :  { %v2978_v41 = vmax.f32 %v2001_v24, 0.0  ;;  %v2005_v43 = vadd.f32 %v2004_v37, %v7353_v4  ;;  %v2102_v44 = vadd.f32 %v2101_v40, %v7372_v10  ;;  %v2103_v49 = vpop.f32.mrb[18].mxu1 }
 0x13a   :  { %v2995_v51 = vmax.f32 %v2003_v33, 0.0  ;;  %v2979_v52 = vmax.f32 %v2100_v12, 0.0  ;;  %v2104_v56 = vadd.f32 %v2103_v49, %v7366_v8  ;;  %v2105_v59 = vpop.f32.mrb[19].mxu1 }
 0x13b   :  { %2761 = vmatpush1.bf16.msra.mxu0 %v6284_v26  ;;  %v2996_v62 = vmax.f32 %v2005_v43, 0.0  ;;  %v2980_v9 = vmax.f32 %v2102_v44, 0.0  ;;  %v2106_v11 = vadd.f32 %v2105_v59, %v7372_v10 }
 0x13c   :  { %v5351_v32 = vpack.c.bf16 %v2995_v51, %v2977_v2  ;;  %2762 = vmatprep.subr.bf16.mxu0 %v6289_v38  ;;  %v2997_v35 = vmax.f32 %v2104_v56, 0.0 }
 0x13d   :  { %v5349_v13 = vpack.c.bf16 %v2996_v62, %v2978_v41  ;;  %v2008_v14 = vpop.f32.mrb[20].mxu0  ;;  %v2998_v16 = vmax.f32 %v2106_v11, 0.0 }
 0x13e   :  { %v2009_v17 = vadd.f32 %v2008_v14, %v7349_v3  ;;  %v2010_v18 = vpop.f32.mrb[21].mxu0  ;;  %v7529_v45 = vpack.c.bf16 %v2997_v35, %v2979_v52 }
 0x13f   :  { %v2011_v19 = vadd.f32 %v2010_v18, %v7353_v4  ;;  %v2012_v20 = vpop.f32.mrb[22].mxu0  ;;  %2763 = vmatpush1.bf16.msra.mxu0 %v6287_v6  ;;  %5350 = vmatprep.subr.bf16.mxu1 %v5349_v13  ;;  %v7532_v24 = vpack.c.bf16 %v2998_v16, %v2980_v9  ;;  %v2109_v26 = vpop.f32.mrb[20].mxu1 }
 0x140   :  { %v3013_v54 = vmax.f32 %v2009_v17, 0.0  ;;  %v2013_v30 = vadd.f32 %v2012_v20, %v7349_v3  ;;  %v2014_v2 = vpop.f32.mrb[23].mxu0  ;;  %5352 = vmatpush1.bf16.msra.mxu1 %v5351_v32  ;;  %v2110_v33 = vadd.f32 %v2109_v26, %v7366_v8  ;;  %v2111_v37 = vpop.f32.mrb[21].mxu1 }
 0x141   :  { %v3014_v38 = vmax.f32 %v2011_v19, 0.0  ;;  %v2015_v12 = vadd.f32 %v2014_v2, %v7353_v4  ;;  %v2112_v40 = vadd.f32 %v2111_v37, %v7372_v10  ;;  %v2113_v41 = vpop.f32.mrb[22].mxu1  ;;  %v353_v2 = vsub.s32 6, %v7316_v53 }
 0x142   :  { %v3031_v43 = vmax.f32 %v2013_v30, 0.0  ;;  %2765 = vmatmul.mubr.bf16.vlgmr.msra.gmra.mrb[112].mxu0 %v7058_v36  ;;  %v3015_v44 = vmax.f32 %v2110_v33, 0.0  ;;  %v2114_v49 = vadd.f32 %v2113_v41, %v7366_v8  ;;  %v2115_v51 = vpop.f32.mrb[23].mxu1  ;;  %v349_v30 = vsub.s32 5, %v7316_v53 }
 0x143   :  { %v3032_v52 = vmax.f32 %v2015_v12, 0.0  ;;  %2774 = vmatprep.mubr.bf16.mxu0 %v7070_v39  ;;  %v3016_v56 = vmax.f32 %v2112_v40, 0.0  ;;  %v2116_v59 = vadd.f32 %v2115_v51, %v7372_v10 }
 0x144   :  { %v5355_v62 = vpack.c.bf16 %v3031_v43, %v3013_v54  ;;  %v3033_v6 = vmax.f32 %v2114_v49, 0.0 }
 0x145   :  { %v5353_v9 = vpack.c.bf16 %v3032_v52, %v3014_v38  ;;  %v2018_v11 = vpop.f32.mrb[24].mxu0  ;;  %v3034_v32 = vmax.f32 %v2116_v59, 0.0 }
 0x146   :  { %v2019_v35 = vadd.f32 %v2018_v11, %v7349_v3  ;;  %v2020_v13 = vpop.f32.mrb[25].mxu0  ;;  %v7543_v14 = vpack.c.bf16 %v3033_v6, %v3015_v44  ;;  %v7554_v3 = vld [vmem:[%s8767_s3] sm:$0x3] }
 0x147   :  { %v2021_v36 = vadd.f32 %v2020_v13, %v7353_v4  ;;  %5354 = vmatprep.subr.bf16.mxu1 %v5353_v9  ;;  %v2022_v16 = vpop.f32.mrb[26].mxu0  ;;  %v7546_v17 = vpack.c.bf16 %v3034_v32, %v3016_v56  ;;  %v7548_v39 = vpop.f32.mrb[24].mxu1 }
 0x148   :  { %v3049_v18 = vmax.f32 %v2019_v35, 0.0  ;;  %5356 = vmatpush1.bf16.msra.mxu1 %v5355_v62  ;;  %v2023_v19 = vpop.f32.mrb[27].mxu0  ;;  %v2121_v20 = vpop.f32.mrb[25].mxu1 }
 0x149   :  { %v3050_v26 = vmax.f32 %v2021_v36, 0.0  ;;  %v2123_v54 = vpop.f32.mrb[26].mxu1 }
 0x14a   :  { %2775 = vmatmul.mubr.bf16.gmra.mrb[116].mxu0 %v7096_v46  ;;  %v2124_v4 = vpop.f32.mrb[27].mxu1  ;;  %v345_v46 = vsub.s32 4, %v7316_v53 }
 0x14b   :  { %4991 = vmatprep.subr.msk.mxu1 %vm3072_vm0, %v3050_v26  ;;  %2784 = vmatprep.mubr.bf16.mxu0 %v7108_v50  ;;  %v357_v50 = vsub.s32 7, %v7316_v53 }
 0x14c   :  { %4992 = vmatpush1.msk.msra.mxu1 %vm3072_vm0, %v3049_v18 }
 0x14d   :  { %5358 = vmatprep.subr.bf16.mxu1 %v7415_v55  ;;  %4993 = vmatmul.mubr.msk.f32.vlgmr.msra.gmra.mrb[112].mxu1 %vm3068_vm1, %v7554_v3  ;;  %v7580_v55 = vrot.slane %v7336_v60, %v349_v30 }
 0x14e   :  { %5360 = vmatpush1.bf16.msra.mxu1 %v7409_v48  ;;  %3262 = vmatprep.mubr.f32.mxu1 %v6303_v42  ;;  %v7574_v48 = vrot.slane %v7336_v60, %v345_v46 }
 0x14f   :  { %5362 = vmatprep.subr.bf16.mxu1 %v7453_v15  ;;  %v7591_v15 = vrot.slane %v7336_v60, %v357_v50 }
 0x152   :  { %2785 = vmatmul.mubr.bf16.gmra.mrb[120].mxu0 %v7145_v22  ;;  %5364 = vmatpush1.bf16.msra.mxu1 %v7447_v34  ;;  %v7586_v22 = vrot.slane %v7336_v60, %v353_v2 }
 0x153   :  { %5366 = vmatprep.subr.bf16.mxu1 %v7486_v31  ;;  %2794 = vmatprep.mubr.bf16.mxu0 %v7154_v25 }
 0x155   :  { %v2160_v34 = vpop.f32.mrb[28].mxu0 }
 0x156   :  { %v2161_v31 = vadd.f32 %v2160_v34, %v7574_v48  ;;  %v2162_v33 = vpop.f32.mrb[29].mxu0  ;;  %5368 = vmatpush1.bf16.msra.mxu1 %v7480_v28  ;;  %v2122_v28 = vadd.f32 %v2121_v20, %v7372_v10  ;;  %v2120_v10 = vadd.f32 %v7548_v39, %v7366_v8 }
 0x157   :  { %v2163_v37 = vadd.f32 %v2162_v33, %v7580_v55  ;;  %v2164_v38 = vpop.f32.mrb[30].mxu0  ;;  %5370 = vmatprep.subr.bf16.mxu1 %v7514_v29  ;;  %v2261_v25 = vpop.f32.mrb[28].mxu1 }
 0x158   :  { %v2837_v12 = vmax.f32 %v2161_v31, 0.0  ;;  %v2165_v40 = vadd.f32 %v2164_v38, %v7574_v48  ;;  %v2166_v41 = vpop.f32.mrb[31].mxu0  ;;  %v2262_v43 = vadd.f32 %v2261_v25, %v7586_v22  ;;  %v2263_v44 = vpop.f32.mrb[29].mxu1 }
 0x159   :  { %v2167_v60 = vadd.f32 %v2166_v41, %v7580_v55  ;;  %v2264_v49 = vadd.f32 %v2263_v44, %v7591_v15  ;;  %v2265_v51 = vpop.f32.mrb[30].mxu1  ;;  %v2838_v62 = vmax.f32 %v2163_v37, 0.0 }
 0x15a   :  { %v2855_v52 = vmax.f32 %v2165_v40, 0.0  ;;  %2795 = vmatmul.mubr.bf16.gmra.mrb[124].mxu0 %v7389_v27  ;;  %5372 = vmatpush1.bf16.msra.mxu1 %v7508_v23  ;;  %v2839_v29 = vmax.f32 %v2262_v43, 0.0  ;;  %v2266_v56 = vadd.f32 %v2265_v51, %v7586_v22  ;;  %v2267_v59 = vpop.f32.mrb[31].mxu1 }
 0x15b   :  { %v2856_v6 = vmax.f32 %v2167_v60, 0.0  ;;  %5374 = vmatprep.subr.bf16.mxu1 %v7532_v24  ;;  %2804 = vmatprep.mubr.bf16.mxu0 %v7399_v5  ;;  %v2840_v9 = vmax.f32 %v2264_v49, 0.0  ;;  %v2268_v11 = vadd.f32 %v2267_v59, %v7591_v15  ;;  %v3052_v24 = vmax.f32 %v2122_v28, 0.0 }
 0x15c   :  { %v5383_v32 = vpack.c.bf16 %v2855_v52, %v2837_v12  ;;  %v2857_v35 = vmax.f32 %v2266_v56, 0.0 }
 0x15d   :  { %v5381_v27 = vpack.c.bf16 %v2856_v6, %v2838_v62  ;;  %v2170_v13 = vpop.f32.mrb[32].mxu0  ;;  %v2858_v23 = vmax.f32 %v2268_v11, 0.0 }
 0x15e   :  { %5376 = vmatpush1.bf16.msra.mxu1 %v7529_v45  ;;  %v2171_v36 = vadd.f32 %v2170_v13, %v7574_v48  ;;  %v2172_v16 = vpop.f32.mrb[33].mxu0  ;;  %v5407_v18 = vpack.c.bf16 %v2857_v35, %v2839_v29 }
 0x15f   :  { %5378 = vmatprep.subr.bf16.mxu1 %v7546_v17  ;;  %v2173_v5 = vadd.f32 %v2172_v16, %v7580_v55  ;;  %v2174_v19 = vpop.f32.mrb[34].mxu0  ;;  %v5405_v20 = vpack.c.bf16 %v2858_v23, %v2840_v9  ;;  %v2271_v26 = vpop.f32.mrb[32].mxu1  ;;  %v3051_v17 = vmax.f32 %v2120_v10, 0.0 }
 0x160   :  { %v2873_v54 = vmax.f32 %v2171_v36, 0.0  ;;  %v2175_v4 = vadd.f32 %v2174_v19, %v7574_v48  ;;  %v2176_v34 = vpop.f32.mrb[35].mxu0  ;;  %v2272_v45 = vadd.f32 %v2271_v26, %v7586_v22  ;;  %v2273_v31 = vpop.f32.mrb[33].mxu1 }
 0x161   :  { %v2874_v8 = vmax.f32 %v2173_v5, 0.0  ;;  %v2177_v39 = vadd.f32 %v2176_v34, %v7580_v55  ;;  %v2274_v33 = vadd.f32 %v2273_v31, %v7591_v15  ;;  %v2275_v37 = vpop.f32.mrb[34].mxu1  ;;  %5406 = vmatprep.subr.bf16.mxu0 %v5405_v20 }
 0x162   :  { %2805 = vmatmul.mubr.bf16.gmra.mrb[128].mxu0 %v7427_v47  ;;  %5380 = vmatpush1.bf16.msra.mxu1 %v7543_v14  ;;  %v2891_v38 = vmax.f32 %v2175_v4, 0.0  ;;  %v2875_v25 = vmax.f32 %v2272_v45, 0.0  ;;  %v2276_v12 = vadd.f32 %v2275_v37, %v7586_v22  ;;  %v2277_v40 = vpop.f32.mrb[35].mxu1 }
 0x163   :  { %v2892_v41 = vmax.f32 %v2177_v39, 0.0  ;;  %4994 = vmatprep.subr.msk.mxu1 %vm3072_vm0, %v3052_v24  ;;  %2814 = vmatprep.mubr.bf16.mxu0 %v7437_v21  ;;  %v2876_v43 = vmax.f32 %v2274_v33, 0.0  ;;  %v2278_v44 = vadd.f32 %v2277_v40, %v7591_v15 }
 0x164   :  { %v5387_v60 = vpack.c.bf16 %v2891_v38, %v2873_v54  ;;  %v2893_v49 = vmax.f32 %v2276_v12, 0.0  ;;  %5408 = vmatpush1.bf16.msra.mxu0 %v5407_v18 }
 0x165   :  { %v5385_v51 = vpack.c.bf16 %v2892_v41, %v2874_v8  ;;  %v2180_v47 = vpop.f32.mrb[36].mxu0  ;;  %v2894_v52 = vmax.f32 %v2278_v44, 0.0 }
 0x166   :  { %4995 = vmatpush1.msk.msra.mxu1 %vm3072_vm0, %v3051_v17  ;;  %v2181_v14 = vadd.f32 %v2180_v47, %v7574_v48  ;;  %v2182_v28 = vpop.f32.mrb[37].mxu0  ;;  %v5411_v29 = vpack.c.bf16 %v2893_v49, %v2875_v25 }
 0x167   :  { %5382 = vmatprep.subr.bf16.mxu1 %v5381_v27  ;;  %4996 = vmatmul.mubr.msk.f32.vlgmr.msra.gmra.mrb[114].mxu1 %vm3068_vm1, %v7554_v3  ;;  %v2183_v21 = vadd.f32 %v2182_v28, %v7580_v55  ;;  %v2184_v56 = vpop.f32.mrb[38].mxu0  ;;  %v5409_v59 = vpack.c.bf16 %v2894_v52, %v2876_v43  ;;  %v2281_v62 = vpop.f32.mrb[36].mxu1 }
 0x168   :  { %5384 = vmatpush1.bf16.msra.mxu1 %v5383_v32  ;;  %v2909_v6 = vmax.f32 %v2181_v14, 0.0  ;;  %v2185_v9 = vadd.f32 %v2184_v56, %v7574_v48  ;;  %v2186_v11 = vpop.f32.mrb[39].mxu0  ;;  %v2282_v35 = vadd.f32 %v2281_v62, %v7586_v22  ;;  %v2283_v13 = vpop.f32.mrb[37].mxu1  ;;  %3333 = vmatprep.mubr.f32.mxu1 %v6303_v42 }
 0x169   :  { %v2910_v23 = vmax.f32 %v2183_v21, 0.0  ;;  %5386 = vmatprep.subr.bf16.mxu1 %v5385_v51  ;;  %v2187_v27 = vadd.f32 %v2186_v11, %v7580_v55  ;;  %v2284_v10 = vadd.f32 %v2283_v13, %v7591_v15  ;;  %v2285_v36 = vpop.f32.mrb[38].mxu1  ;;  %5410 = vmatprep.subr.bf16.mxu0 %v5409_v59 }
 0x16a   :  { %2815 = vmatmul.mubr.bf16.gmra.mrb[132].mxu0 %v7465_v7  ;;  %v2927_v32 = vmax.f32 %v2185_v9, 0.0  ;;  %v2911_v16 = vmax.f32 %v2282_v35, 0.0  ;;  %v2286_v18 = vadd.f32 %v2285_v36, %v7586_v22  ;;  %v2287_v24 = vpop.f32.mrb[39].mxu1 }
 0x16b   :  { %v2928_v5 = vmax.f32 %v2187_v27, 0.0  ;;  %2824 = vmatprep.mubr.bf16.mxu0 %v6740_v57  ;;  %v2912_v19 = vmax.f32 %v2284_v10, 0.0  ;;  %v2288_v20 = vadd.f32 %v2287_v24, %v7591_v15  ;;  %5412 = vmatpush1.bf16.msra.mxu0 %v5411_v29 }
 0x16c   :  { %v5391_v26 = vpack.c.bf16 %v2927_v32, %v2909_v6  ;;  %5388 = vmatpush1.bf16.msra.mxu1 %v5387_v60  ;;  %v2929_v54 = vmax.f32 %v2286_v18, 0.0 }
 0x16d   :  { %v5389_v4 = vpack.c.bf16 %v2928_v5, %v2910_v23  ;;  %v2190_v34 = vpop.f32.mrb[40].mxu0  ;;  %v2930_v45 = vmax.f32 %v2288_v20, 0.0 }
 0x16e   :  { %v2191_v7 = vadd.f32 %v2190_v34, %v7574_v48  ;;  %v2192_v31 = vpop.f32.mrb[41].mxu0  ;;  %v5415_v8 = vpack.c.bf16 %v2929_v54, %v2911_v16 }
 0x16f   :  { %v2193_v39 = vadd.f32 %v2192_v31, %v7580_v55  ;;  %v2194_v33 = vpop.f32.mrb[42].mxu0  ;;  %5390 = vmatprep.subr.bf16.mxu1 %v5389_v4  ;;  %v5413_v37 = vpack.c.bf16 %v2930_v45, %v2912_v19  ;;  %v2291_v57 = vpop.f32.mrb[40].mxu1 }
 0x170   :  { %v2945_v17 = vmax.f32 %v2191_v7, 0.0  ;;  %v2195_v38 = vadd.f32 %v2194_v33, %v7574_v48  ;;  %v2196_v25 = vpop.f32.mrb[43].mxu0  ;;  %5392 = vmatpush1.bf16.msra.mxu1 %v5391_v26  ;;  %v2292_v12 = vadd.f32 %v2291_v57, %v7586_v22  ;;  %v2293_v40 = vpop.f32.mrb[41].mxu1 }
 0x171   :  { %v2946_v41 = vmax.f32 %v2193_v39, 0.0  ;;  %v2197_v43 = vadd.f32 %v2196_v25, %v7580_v55  ;;  %v2294_v44 = vadd.f32 %v2293_v40, %v7591_v15  ;;  %v2295_v60 = vpop.f32.mrb[42].mxu1  ;;  %5414 = vmatprep.subr.bf16.mxu0 %v5413_v37 }
 0x172   :  { %2825 = vmatmul.mubr.bf16.gmra.mrb[136].mxu0 %v6764_v0  ;;  %v2963_v49 = vmax.f32 %v2195_v38, 0.0  ;;  %v2947_v51 = vmax.f32 %v2292_v12, 0.0  ;;  %v2296_v47 = vadd.f32 %v2295_v60, %v7586_v22  ;;  %v2297_v52 = vpop.f32.mrb[43].mxu1 }
 0x173   :  { %v2964_v14 = vmax.f32 %v2197_v43, 0.0  ;;  %v2948_v28 = vmax.f32 %v2294_v44, 0.0  ;;  %v2298_v29 = vadd.f32 %v2297_v52, %v7591_v15  ;;  %5416 = vmatpush1.bf16.msra.mxu0 %v5415_v8  ;;  %3404 = vmatprep.mubr.f32.mxu0 %v6303_v42 }
 0x174   :  { %v5395_v21 = vpack.c.bf16 %v2963_v49, %v2945_v17  ;;  %v2965_v56 = vmax.f32 %v2296_v47, 0.0 }
 0x175   :  { %v5393_v59 = vpack.c.bf16 %v2964_v14, %v2946_v41  ;;  %v2200_v62 = vpop.f32.mrb[44].mxu0  ;;  %v2966_v6 = vmax.f32 %v2298_v29, 0.0 }
 0x176   :  { %v2201_v9 = vadd.f32 %v2200_v62, %v7574_v48  ;;  %v2202_v0 = vpop.f32.mrb[45].mxu0  ;;  %v5419_v11 = vpack.c.bf16 %v2965_v56, %v2947_v51 }
 0x177   :  { %v2203_v35 = vadd.f32 %v2202_v0, %v7580_v55  ;;  %v2204_v13 = vpop.f32.mrb[46].mxu0  ;;  %5394 = vmatprep.subr.bf16.mxu1 %v5393_v59  ;;  %v5417_v23 = vpack.c.bf16 %v2966_v6, %v2948_v28  ;;  %v2301_v27 = vpop.f32.mrb[44].mxu1 }
 0x178   :  { %v2981_v10 = vmax.f32 %v2201_v9, 0.0  ;;  %v2205_v36 = vadd.f32 %v2204_v13, %v7574_v48  ;;  %v2206_v32 = vpop.f32.mrb[47].mxu0  ;;  %5396 = vmatpush1.bf16.msra.mxu1 %v5395_v21  ;;  %v2302_v16 = vadd.f32 %v2301_v27, %v7586_v22  ;;  %v2303_v18 = vpop.f32.mrb[45].mxu1 }
 0x179   :  { %v2982_v24 = vmax.f32 %v2203_v35, 0.0  ;;  %v2207_v5 = vadd.f32 %v2206_v32, %v7580_v55  ;;  %v2304_v19 = vadd.f32 %v2303_v18, %v7591_v15  ;;  %v2305_v20 = vpop.f32.mrb[46].mxu1  ;;  %5418 = vmatprep.subr.bf16.mxu0 %v5417_v23 }
 0x17a   :  { %v2999_v26 = vmax.f32 %v2205_v36, 0.0  ;;  %v2983_v54 = vmax.f32 %v2302_v16, 0.0  ;;  %v2306_v4 = vadd.f32 %v2305_v20, %v7586_v22  ;;  %v2307_v34 = vpop.f32.mrb[47].mxu1  ;;  %5420 = vmatpush1.bf16.msra.mxu0 %v5419_v11 }
 0x17b   :  { %v3000_v45 = vmax.f32 %v2207_v5, 0.0  ;;  %v2984_v7 = vmax.f32 %v2304_v19, 0.0  ;;  %v2308_v31 = vadd.f32 %v2307_v34, %v7591_v15 }
 0x17c   :  { %v5399_v8 = vpack.c.bf16 %v2999_v26, %v2981_v10  ;;  %v3001_v39 = vmax.f32 %v2306_v4, 0.0 }
 0x17d   :  { %v5397_v33 = vpack.c.bf16 %v3000_v45, %v2982_v24  ;;  %v2210_v37 = vpop.f32.mrb[48].mxu0  ;;  %v3002_v57 = vmax.f32 %v2308_v31, 0.0 }
 0x17e   :  { %v2211_v17 = vadd.f32 %v2210_v37, %v7574_v48  ;;  %v2212_v38 = vpop.f32.mrb[49].mxu0  ;;  %v5423_v25 = vpack.c.bf16 %v3001_v39, %v2983_v54 }
 0x17f   :  { %v2213_v12 = vadd.f32 %v2212_v38, %v7580_v55  ;;  %v2214_v40 = vpop.f32.mrb[50].mxu0  ;;  %5398 = vmatprep.subr.bf16.mxu1 %v5397_v33  ;;  %v5421_v41 = vpack.c.bf16 %v3002_v57, %v2984_v7  ;;  %v2311_v43 = vpop.f32.mrb[48].mxu1 }
 0x180   :  { %v3017_v44 = vmax.f32 %v2211_v17, 0.0  ;;  %v2215_v60 = vadd.f32 %v2214_v40, %v7574_v48  ;;  %v2216_v49 = vpop.f32.mrb[51].mxu0  ;;  %5400 = vmatpush1.bf16.msra.mxu1 %v5399_v8  ;;  %v2312_v51 = vadd.f32 %v2311_v43, %v7586_v22  ;;  %v2313_v47 = vpop.f32.mrb[49].mxu1 }
 0x181   :  { %v3018_v52 = vmax.f32 %v2213_v12, 0.0  ;;  %v2217_v14 = vadd.f32 %v2216_v49, %v7580_v55  ;;  %v2314_v28 = vadd.f32 %v2313_v47, %v7591_v15  ;;  %v2315_v29 = vpop.f32.mrb[50].mxu1  ;;  %5422 = vmatprep.subr.bf16.mxu0 %v5421_v41 }
 0x182   :  { %v3035_v21 = vmax.f32 %v2215_v60, 0.0  ;;  %v3019_v56 = vmax.f32 %v2312_v51, 0.0  ;;  %v2316_v59 = vadd.f32 %v2315_v29, %v7586_v22  ;;  %v2317_v62 = vpop.f32.mrb[51].mxu1  ;;  %5424 = vmatpush1.bf16.msra.mxu0 %v5423_v25 }
 0x183   :  { %v3036_v6 = vmax.f32 %v2217_v14, 0.0  ;;  %v3020_v9 = vmax.f32 %v2314_v28, 0.0  ;;  %v2318_v0 = vadd.f32 %v2317_v62, %v7591_v15 }
 0x184   :  { %v5403_v11 = vpack.c.bf16 %v3035_v21, %v3017_v44  ;;  %v3037_v35 = vmax.f32 %v2316_v59, 0.0 }
 0x185   :  { %v5401_v13 = vpack.c.bf16 %v3036_v6, %v3018_v52  ;;  %v2220_v23 = vpop.f32.mrb[52].mxu0  ;;  %v3038_v27 = vmax.f32 %v2318_v0, 0.0 }
 0x186   :  { %v2221_v10 = vadd.f32 %v2220_v23, %v7574_v48  ;;  %v2222_v36 = vpop.f32.mrb[53].mxu0  ;;  %v5427_v32 = vpack.c.bf16 %v3037_v35, %v3019_v56 }
 0x187   :  { %v2223_v16 = vadd.f32 %v2222_v36, %v7580_v55  ;;  %5402 = vmatprep.subr.bf16.mxu1 %v5401_v13  ;;  %v2224_v18 = vpop.f32.mrb[54].mxu0  ;;  %v5425_v24 = vpack.c.bf16 %v3038_v27, %v3020_v9  ;;  %v2321_v5 = vpop.f32.mrb[52].mxu1 }
 0x188   :  { %v3053_v19 = vmax.f32 %v2221_v10, 0.0  ;;  %5404 = vmatpush1.bf16.msra.mxu1 %v5403_v11  ;;  %v2225_v20 = vpop.f32.mrb[55].mxu0  ;;  %v2322_v26 = vadd.f32 %v2321_v5, %v7586_v22  ;;  %v2323_v54 = vpop.f32.mrb[53].mxu1  ;;  %v7678_v22 = vld [vmem:[%s8766_s2 + $0x8] sm:$0xff] }
 0x189   :  { %v3054_v4 = vmax.f32 %v2223_v16, 0.0  ;;  %v2324_v34 = vadd.f32 %v2323_v54, %v7591_v15  ;;  %v2325_v45 = vpop.f32.mrb[54].mxu1  ;;  %5426 = vmatprep.subr.bf16.mxu0 %v5425_v24  ;;  %v7685_v15 = vrot.slane %v7678_v22, %v7328_v58  ;;  %v7689_v31 = vrot.slane %v7678_v22, %v7339_v61 }
 0x18a   :  { %v3055_v48 = vmax.f32 %v2322_v26, 0.0  ;;  %v2326_v7 = vpop.f32.mrb[55].mxu1  ;;  %5428 = vmatpush1.bf16.msra.mxu0 %v5427_v32  ;;  %v7694_v8 = vrot.slane %v7678_v22, %v337_v63  ;;  %v7699_v33 = vrot.slane %v7678_v22, %v341_v1 }
 0x18b   :  { %4997 = vmatprep.subr.msk.mxu1 %vm3072_vm0, %v3054_v4  ;;  %v3056_v55 = vmax.f32 %v2324_v34, 0.0 }
 0x18c   :  { %4998 = vmatpush1.msk.msra.mxu1 %vm3072_vm0, %v3053_v19 }
 0x18d   :  { %4999 = vmatmul.mubr.msk.f32.vlgmr.msra.gmra.mrb[116].mxu1 %vm3068_vm1, %v7554_v3  ;;  %5000 = vmatprep.subr.msk.mxu0 %vm3072_vm0, %v3056_v55 }
 0x18e   :  { %5001 = vmatpush1.msk.msra.mxu0 %vm3072_vm0, %v3055_v48  ;;  %3475 = vmatprep.mubr.f32.mxu1 %v6303_v42 }
 0x18f   :  { %5002 = vmatmul.mubr.msk.f32.vlgmr.msra.gmra.mrb[140].mxu0 %vm3068_vm1, %v7554_v3 }
 0x190   :  { %3546 = vmatprep.mubr.f32.mxu0 %v6303_v42 }
 0x195   :  { %v2362_v39 = vpop.f32.mrb[56].mxu0 }
 0x196   :  { %v2363_v37 = vadd.f32 %v2362_v39, %v7685_v15  ;;  %v2364_v57 = vpop.f32.mrb[57].mxu0 }
 0x197   :  { %v2365_v17 = vadd.f32 %v2364_v57, %v7689_v31  ;;  %v2366_v38 = vpop.f32.mrb[58].mxu0  ;;  %v2463_v25 = vpop.f32.mrb[56].mxu1 }
 0x198   :  { %v2841_v12 = vmax.f32 %v2363_v37, 0.0  ;;  %v2367_v40 = vadd.f32 %v2366_v38, %v7685_v15  ;;  %v2368_v41 = vpop.f32.mrb[59].mxu0  ;;  %v2464_v63 = vadd.f32 %v2463_v25, %v7694_v8  ;;  %v2465_v43 = vpop.f32.mrb[57].mxu1 }
 0x199   :  { %v2369_v44 = vadd.f32 %v2368_v41, %v7689_v31  ;;  %v2466_v60 = vadd.f32 %v2465_v43, %v7699_v33  ;;  %v2467_v1 = vpop.f32.mrb[58].mxu1  ;;  %v2842_v14 = vmax.f32 %v2365_v17, 0.0 }
 0x19a   :  { %v2859_v49 = vmax.f32 %v2367_v40, 0.0  ;;  %v2843_v51 = vmax.f32 %v2464_v63, 0.0  ;;  %v2468_v47 = vadd.f32 %v2467_v1, %v7694_v8  ;;  %v2469_v52 = vpop.f32.mrb[59].mxu1 }
 0x19b   :  { %v2860_v28 = vmax.f32 %v2369_v44, 0.0  ;;  %v2844_v29 = vmax.f32 %v2466_v60, 0.0  ;;  %v2470_v21 = vadd.f32 %v2469_v52, %v7699_v33 }
 0x19c   :  { %v5431_v56 = vpack.c.bf16 %v2859_v49, %v2841_v12  ;;  %v2861_v59 = vmax.f32 %v2468_v47, 0.0 }
 0x19d   :  { %v5429_v62 = vpack.c.bf16 %v2860_v28, %v2842_v14  ;;  %v2372_v6 = vpop.f32.mrb[60].mxu0  ;;  %v2862_v9 = vmax.f32 %v2470_v21, 0.0 }
 0x19e   :  { %v2373_v0 = vadd.f32 %v2372_v6, %v7685_v15  ;;  %v2374_v11 = vpop.f32.mrb[61].mxu0  ;;  %v5455_v35 = vpack.c.bf16 %v2861_v59, %v2843_v51 }
 0x19f   :  { %5430 = vmatprep.subr.bf16.mxu1 %v5429_v62  ;;  %v2375_v13 = vadd.f32 %v2374_v11, %v7689_v31  ;;  %v2376_v23 = vpop.f32.mrb[62].mxu0  ;;  %v5453_v27 = vpack.c.bf16 %v2862_v9, %v2844_v29  ;;  %v2473_v10 = vpop.f32.mrb[60].mxu1 }
 0x1a0   :  { %5432 = vmatpush1.bf16.msra.mxu1 %v5431_v56  ;;  %v2877_v36 = vmax.f32 %v2373_v0, 0.0  ;;  %v2377_v32 = vadd.f32 %v2376_v23, %v7685_v15  ;;  %v2378_v16 = vpop.f32.mrb[63].mxu0  ;;  %v2474_v18 = vadd.f32 %v2473_v10, %v7694_v8  ;;  %v2475_v24 = vpop.f32.mrb[61].mxu1 }
 0x1a1   :  { %v2878_v5 = vmax.f32 %v2375_v13, 0.0  ;;  %v2379_v19 = vadd.f32 %v2378_v16, %v7689_v31  ;;  %v2476_v20 = vadd.f32 %v2475_v24, %v7699_v33  ;;  %v2477_v26 = vpop.f32.mrb[62].mxu1  ;;  %5454 = vmatprep.subr.bf16.mxu0 %v5453_v27 }
 0x1a2   :  { %v2895_v54 = vmax.f32 %v2377_v32, 0.0  ;;  %v2879_v4 = vmax.f32 %v2474_v18, 0.0  ;;  %v2478_v34 = vadd.f32 %v2477_v26, %v7694_v8  ;;  %v2479_v45 = vpop.f32.mrb[63].mxu1  ;;  %5456 = vmatpush1.bf16.msra.mxu0 %v5455_v35 }
 0x1a3   :  { %v2896_v48 = vmax.f32 %v2379_v19, 0.0  ;;  %v2880_v7 = vmax.f32 %v2476_v20, 0.0  ;;  %v2480_v55 = vadd.f32 %v2479_v45, %v7699_v33 }
 0x1a4   :  { %v5435_v39 = vpack.c.bf16 %v2895_v54, %v2877_v36  ;;  %v2897_v37 = vmax.f32 %v2478_v34, 0.0 }
 0x1a5   :  { %v5433_v57 = vpack.c.bf16 %v2896_v48, %v2878_v5  ;;  %v2382_v17 = vpop.f32.mrb[64].mxu0  ;;  %v2898_v38 = vmax.f32 %v2480_v55, 0.0 }
 0x1a6   :  { %v2383_v25 = vadd.f32 %v2382_v17, %v7685_v15  ;;  %v2384_v12 = vpop.f32.mrb[65].mxu0  ;;  %v5459_v40 = vpack.c.bf16 %v2897_v37, %v2879_v4 }
 0x1a7   :  { %v2385_v41 = vadd.f32 %v2384_v12, %v7689_v31  ;;  %v2386_v63 = vpop.f32.mrb[66].mxu0  ;;  %5434 = vmatprep.subr.bf16.mxu1 %v5433_v57  ;;  %v5457_v43 = vpack.c.bf16 %v2898_v38, %v2880_v7  ;;  %v2483_v44 = vpop.f32.mrb[64].mxu1 }
 0x1a8   :  { %v2913_v60 = vmax.f32 %v2383_v25, 0.0  ;;  %v2387_v1 = vadd.f32 %v2386_v63, %v7685_v15  ;;  %v2388_v49 = vpop.f32.mrb[67].mxu0  ;;  %5436 = vmatpush1.bf16.msra.mxu1 %v5435_v39  ;;  %v2484_v51 = vadd.f32 %v2483_v44, %v7694_v8  ;;  %v2485_v47 = vpop.f32.mrb[65].mxu1 }
 0x1a9   :  { %v2914_v52 = vmax.f32 %v2385_v41, 0.0  ;;  %v2389_v14 = vadd.f32 %v2388_v49, %v7689_v31  ;;  %v2486_v28 = vadd.f32 %v2485_v47, %v7699_v33  ;;  %v2487_v29 = vpop.f32.mrb[66].mxu1  ;;  %5458 = vmatprep.subr.bf16.mxu0 %v5457_v43 }
 0x1aa   :  { %v2931_v21 = vmax.f32 %v2387_v1, 0.0  ;;  %v2915_v56 = vmax.f32 %v2484_v51, 0.0  ;;  %v2488_v59 = vadd.f32 %v2487_v29, %v7694_v8  ;;  %v2489_v62 = vpop.f32.mrb[67].mxu1  ;;  %5460 = vmatpush1.bf16.msra.mxu0 %v5459_v40 }
 0x1ab   :  { %v2932_v6 = vmax.f32 %v2389_v14, 0.0  ;;  %v2916_v9 = vmax.f32 %v2486_v28, 0.0  ;;  %v2490_v0 = vadd.f32 %v2489_v62, %v7699_v33 }
 0x1ac   :  { %v5439_v11 = vpack.c.bf16 %v2931_v21, %v2913_v60  ;;  %v2933_v35 = vmax.f32 %v2488_v59, 0.0 }
 0x1ad   :  { %v5437_v13 = vpack.c.bf16 %v2932_v6, %v2914_v52  ;;  %v2392_v23 = vpop.f32.mrb[68].mxu0  ;;  %v2934_v27 = vmax.f32 %v2490_v0, 0.0 }
 0x1ae   :  { %v2393_v10 = vadd.f32 %v2392_v23, %v7685_v15  ;;  %v2394_v36 = vpop.f32.mrb[69].mxu0  ;;  %v5463_v32 = vpack.c.bf16 %v2933_v35, %v2915_v56 }
 0x1af   :  { %v2395_v16 = vadd.f32 %v2394_v36, %v7689_v31  ;;  %v2396_v18 = vpop.f32.mrb[70].mxu0  ;;  %5438 = vmatprep.subr.bf16.mxu1 %v5437_v13  ;;  %v5461_v24 = vpack.c.bf16 %v2934_v27, %v2916_v9  ;;  %v2493_v5 = vpop.f32.mrb[68].mxu1 }
 0x1b0   :  { %v2949_v19 = vmax.f32 %v2393_v10, 0.0  ;;  %v2397_v20 = vadd.f32 %v2396_v18, %v7685_v15  ;;  %v2398_v26 = vpop.f32.mrb[71].mxu0  ;;  %5440 = vmatpush1.bf16.msra.mxu1 %v5439_v11  ;;  %v2494_v54 = vadd.f32 %v2493_v5, %v7694_v8  ;;  %v2495_v4 = vpop.f32.mrb[69].mxu1 }
 0x1b1   :  { %v2950_v34 = vmax.f32 %v2395_v16, 0.0  ;;  %v2399_v45 = vadd.f32 %v2398_v26, %v7689_v31  ;;  %v2496_v48 = vadd.f32 %v2495_v4, %v7699_v33  ;;  %v2497_v7 = vpop.f32.mrb[70].mxu1  ;;  %5462 = vmatprep.subr.bf16.mxu0 %v5461_v24 }
 0x1b2   :  { %v2967_v55 = vmax.f32 %v2397_v20, 0.0  ;;  %v2951_v39 = vmax.f32 %v2494_v54, 0.0  ;;  %v2498_v37 = vadd.f32 %v2497_v7, %v7694_v8  ;;  %v2499_v57 = vpop.f32.mrb[71].mxu1  ;;  %5464 = vmatpush1.bf16.msra.mxu0 %v5463_v32 }
 0x1b3   :  { %v2968_v17 = vmax.f32 %v2399_v45, 0.0  ;;  %v2952_v38 = vmax.f32 %v2496_v48, 0.0  ;;  %v2500_v25 = vadd.f32 %v2499_v57, %v7699_v33 }
 0x1b4   :  { %v5443_v12 = vpack.c.bf16 %v2967_v55, %v2949_v19  ;;  %v2969_v40 = vmax.f32 %v2498_v37, 0.0 }
 0x1b5   :  { %v5441_v41 = vpack.c.bf16 %v2968_v17, %v2950_v34  ;;  %v2402_v63 = vpop.f32.mrb[72].mxu0  ;;  %v2970_v43 = vmax.f32 %v2500_v25, 0.0 }
 0x1b6   :  { %v2403_v44 = vadd.f32 %v2402_v63, %v7685_v15  ;;  %v2404_v60 = vpop.f32.mrb[73].mxu0  ;;  %v5467_v1 = vpack.c.bf16 %v2969_v40, %v2951_v39 }
 0x1b7   :  { %v2405_v49 = vadd.f32 %v2404_v60, %v7689_v31  ;;  %v2406_v51 = vpop.f32.mrb[74].mxu0  ;;  %5442 = vmatprep.subr.bf16.mxu1 %v5441_v41  ;;  %v5465_v47 = vpack.c.bf16 %v2970_v43, %v2952_v38  ;;  %v2503_v52 = vpop.f32.mrb[72].mxu1 }
 0x1b8   :  { %v2985_v14 = vmax.f32 %v2403_v44, 0.0  ;;  %v2407_v28 = vadd.f32 %v2406_v51, %v7685_v15  ;;  %v2408_v29 = vpop.f32.mrb[75].mxu0  ;;  %5444 = vmatpush1.bf16.msra.mxu1 %v5443_v12  ;;  %v2504_v21 = vadd.f32 %v2503_v52, %v7694_v8  ;;  %v2505_v56 = vpop.f32.mrb[73].mxu1 }
 0x1b9   :  { %v2986_v59 = vmax.f32 %v2405_v49, 0.0  ;;  %v2409_v62 = vadd.f32 %v2408_v29, %v7689_v31  ;;  %v2506_v6 = vadd.f32 %v2505_v56, %v7699_v33  ;;  %v2507_v9 = vpop.f32.mrb[74].mxu1  ;;  %5466 = vmatprep.subr.bf16.mxu0 %v5465_v47 }
 0x1ba   :  { %v3003_v0 = vmax.f32 %v2407_v28, 0.0  ;;  %v2987_v11 = vmax.f32 %v2504_v21, 0.0  ;;  %v2508_v35 = vadd.f32 %v2507_v9, %v7694_v8  ;;  %v2509_v13 = vpop.f32.mrb[75].mxu1  ;;  %5468 = vmatpush1.bf16.msra.mxu0 %v5467_v1 }
 0x1bb   :  { %v3004_v23 = vmax.f32 %v2409_v62, 0.0  ;;  %v2988_v27 = vmax.f32 %v2506_v6, 0.0  ;;  %v2510_v10 = vadd.f32 %v2509_v13, %v7699_v33 }
 0x1bc   :  { %v5447_v36 = vpack.c.bf16 %v3003_v0, %v2985_v14  ;;  %v3005_v32 = vmax.f32 %v2508_v35, 0.0 }
 0x1bd   :  { %v5445_v16 = vpack.c.bf16 %v3004_v23, %v2986_v59  ;;  %v2412_v18 = vpop.f32.mrb[76].mxu0  ;;  %v3006_v24 = vmax.f32 %v2510_v10, 0.0 }
 0x1be   :  { %v2413_v5 = vadd.f32 %v2412_v18, %v7685_v15  ;;  %v2414_v19 = vpop.f32.mrb[77].mxu0  ;;  %v5471_v20 = vpack.c.bf16 %v3005_v32, %v2987_v11 }
 0x1bf   :  { %v2415_v26 = vadd.f32 %v2414_v19, %v7689_v31  ;;  %v2416_v54 = vpop.f32.mrb[78].mxu0  ;;  %5446 = vmatprep.subr.bf16.mxu1 %v5445_v16  ;;  %v5469_v4 = vpack.c.bf16 %v3006_v24, %v2988_v27  ;;  %v2513_v34 = vpop.f32.mrb[76].mxu1  ;;  %v7776_v27 = vrot.slane %v7678_v22, %v353_v2 }
 0x1c0   :  { %v3021_v45 = vmax.f32 %v2413_v5, 0.0  ;;  %v2417_v48 = vadd.f32 %v2416_v54, %v7685_v15  ;;  %v2418_v7 = vpop.f32.mrb[79].mxu0  ;;  %5448 = vmatpush1.bf16.msra.mxu1 %v5447_v36  ;;  %v2514_v55 = vadd.f32 %v2513_v34, %v7694_v8  ;;  %v2515_v39 = vpop.f32.mrb[77].mxu1 }
 0x1c1   :  { %v3022_v37 = vmax.f32 %v2415_v26, 0.0  ;;  %v2419_v57 = vadd.f32 %v2418_v7, %v7689_v31  ;;  %v2516_v17 = vadd.f32 %v2515_v39, %v7699_v33  ;;  %v2517_v38 = vpop.f32.mrb[78].mxu1  ;;  %5470 = vmatprep.subr.bf16.mxu0 %v5469_v4 }
 0x1c2   :  { %v3039_v25 = vmax.f32 %v2417_v48, 0.0  ;;  %v3023_v12 = vmax.f32 %v2514_v55, 0.0  ;;  %v2518_v40 = vadd.f32 %v2517_v38, %v7694_v8  ;;  %v2519_v41 = vpop.f32.mrb[79].mxu1  ;;  %5472 = vmatpush1.bf16.msra.mxu0 %v5471_v20 }
 0x1c3   :  { %v3040_v63 = vmax.f32 %v2419_v57, 0.0  ;;  %v3024_v43 = vmax.f32 %v2516_v17, 0.0  ;;  %v2520_v44 = vadd.f32 %v2519_v41, %v7699_v33 }
 0x1c4   :  { %v5451_v60 = vpack.c.bf16 %v3039_v25, %v3021_v45  ;;  %v3041_v1 = vmax.f32 %v2518_v40, 0.0 }
 0x1c5   :  { %v5449_v49 = vpack.c.bf16 %v3040_v63, %v3022_v37  ;;  %v2422_v51 = vpop.f32.mrb[80].mxu0  ;;  %v3042_v47 = vmax.f32 %v2520_v44, 0.0 }
 0x1c6   :  { %v2423_v52 = vadd.f32 %v2422_v51, %v7685_v15  ;;  %v2424_v14 = vpop.f32.mrb[81].mxu0  ;;  %v5475_v28 = vpack.c.bf16 %v3041_v1, %v3023_v12 }
 0x1c7   :  { %v2425_v29 = vadd.f32 %v2424_v14, %v7689_v31  ;;  %5450 = vmatprep.subr.bf16.mxu1 %v5449_v49  ;;  %v5473_v21 = vpack.c.bf16 %v3042_v47, %v3024_v43  ;;  %v2426_v56 = vpop.f32.mrb[82].mxu0  ;;  %v2523_v59 = vpop.f32.mrb[80].mxu1 }
 0x1c8   :  { %v3057_v62 = vmax.f32 %v2423_v52, 0.0  ;;  %5452 = vmatpush1.bf16.msra.mxu1 %v5451_v60  ;;  %v2427_v6 = vpop.f32.mrb[83].mxu0  ;;  %v2524_v9 = vadd.f32 %v2523_v59, %v7694_v8  ;;  %v2525_v0 = vpop.f32.mrb[81].mxu1  ;;  %v7766_v8 = vrot.slane %v7678_v22, %v345_v46 }
 0x1c9   :  { %v3058_v11 = vmax.f32 %v2425_v29, 0.0  ;;  %v2526_v35 = vadd.f32 %v2525_v0, %v7699_v33  ;;  %5474 = vmatprep.subr.bf16.mxu0 %v5473_v21  ;;  %v2527_v13 = vpop.f32.mrb[82].mxu1  ;;  %v7771_v33 = vrot.slane %v7678_v22, %v349_v30 }
 0x1ca   :  { %v3059_v15 = vmax.f32 %v2524_v9, 0.0  ;;  %5476 = vmatpush1.bf16.msra.mxu0 %v5475_v28  ;;  %v2528_v23 = vpop.f32.mrb[83].mxu1 }
 0x1cb   :  { %5003 = vmatprep.subr.msk.mxu1 %vm3072_vm0, %v3058_v11  ;;  %v3060_v31 = vmax.f32 %v2526_v35, 0.0 }
 0x1cc   :  { %5004 = vmatpush1.msk.msra.mxu1 %vm3072_vm0, %v3057_v62 }
 0x1cd   :  { %5005 = vmatmul.mubr.msk.f32.vlgmr.msra.gmra.mrb[118].mxu1 %vm3068_vm1, %v7554_v3  ;;  %5006 = vmatprep.subr.msk.mxu0 %vm3072_vm0, %v3060_v31 }
 0x1ce   :  { %5007 = vmatpush1.msk.msra.mxu0 %vm3072_vm0, %v3059_v15  ;;  %3617 = vmatprep.mubr.f32.mxu1 %v6303_v42 }
 0x1cf   :  { %5008 = vmatmul.mubr.msk.f32.vlgmr.msra.gmra.mrb[142].mxu0 %vm3068_vm1, %v7554_v3  ;;  %v7781_v3 = vrot.slane %v7678_v22, %v357_v50 }
 0x1d0   :  { %3688 = vmatprep.mubr.f32.mxu0 %v6303_v42 }
 0x1d5   :  { %v2564_v10 = vpop.f32.mrb[84].mxu0 }
 0x1d6   :  { %v2565_v36 = vadd.f32 %v2564_v10, %v7766_v8  ;;  %v2566_v46 = vpop.f32.mrb[85].mxu0 }
 0x1d7   :  { %v2567_v32 = vadd.f32 %v2566_v46, %v7771_v33  ;;  %v2568_v16 = vpop.f32.mrb[86].mxu0  ;;  %v2665_v18 = vpop.f32.mrb[84].mxu1 }
 0x1d8   :  { %v2845_v30 = vmax.f32 %v2565_v36, 0.0  ;;  %v2569_v24 = vadd.f32 %v2568_v16, %v7766_v8  ;;  %v2570_v5 = vpop.f32.mrb[87].mxu0  ;;  %v2666_v2 = vadd.f32 %v2665_v18, %v7776_v27  ;;  %v2667_v19 = vpop.f32.mrb[85].mxu1 }
 0x1d9   :  { %v2571_v20 = vadd.f32 %v2570_v5, %v7771_v33  ;;  %v2668_v53 = vadd.f32 %v2667_v19, %v7781_v3  ;;  %v2669_v50 = vpop.f32.mrb[86].mxu1  ;;  %v2846_v34 = vmax.f32 %v2567_v32, 0.0 }
 0x1da   :  { %v2863_v22 = vmax.f32 %v2569_v24, 0.0  ;;  %v2847_v26 = vmax.f32 %v2666_v2, 0.0  ;;  %v2670_v54 = vadd.f32 %v2669_v50, %v7776_v27  ;;  %v2671_v4 = vpop.f32.mrb[87].mxu1 }
 0x1db   :  { %v2864_v45 = vmax.f32 %v2571_v20, 0.0  ;;  %v2848_v48 = vmax.f32 %v2668_v53, 0.0  ;;  %v2672_v7 = vadd.f32 %v2671_v4, %v7781_v3 }
 0x1dc   :  { %v5479_v55 = vpack.c.bf16 %v2863_v22, %v2845_v30  ;;  %v2865_v39 = vmax.f32 %v2670_v54, 0.0 }
 0x1dd   :  { %v5477_v37 = vpack.c.bf16 %v2864_v45, %v2846_v34  ;;  %v2574_v57 = vpop.f32.mrb[88].mxu0  ;;  %v2866_v17 = vmax.f32 %v2672_v7, 0.0 }
 0x1de   :  { %v2575_v38 = vadd.f32 %v2574_v57, %v7766_v8  ;;  %v2576_v25 = vpop.f32.mrb[89].mxu0  ;;  %v5503_v12 = vpack.c.bf16 %v2865_v39, %v2847_v26 }
 0x1df   :  { %5478 = vmatprep.subr.bf16.mxu1 %v5477_v37  ;;  %v2577_v40 = vadd.f32 %v2576_v25, %v7771_v33  ;;  %v2578_v41 = vpop.f32.mrb[90].mxu0  ;;  %v5501_v63 = vpack.c.bf16 %v2866_v17, %v2848_v48  ;;  %v2675_v43 = vpop.f32.mrb[88].mxu1 }
 0x1e0   :  { %5480 = vmatpush1.bf16.msra.mxu1 %v5479_v55  ;;  %v2881_v44 = vmax.f32 %v2575_v38, 0.0  ;;  %v2579_v60 = vadd.f32 %v2578_v41, %v7766_v8  ;;  %v2580_v1 = vpop.f32.mrb[91].mxu0  ;;  %v2676_v49 = vadd.f32 %v2675_v43, %v7776_v27  ;;  %v2677_v51 = vpop.f32.mrb[89].mxu1 }
 0x1e1   :  { %v2882_v47 = vmax.f32 %v2577_v40, 0.0  ;;  %v2581_v52 = vadd.f32 %v2580_v1, %v7771_v33  ;;  %v2678_v14 = vadd.f32 %v2677_v51, %v7781_v3  ;;  %v2679_v28 = vpop.f32.mrb[90].mxu1  ;;  %5502 = vmatprep.subr.bf16.mxu0 %v5501_v63 }
 0x1e2   :  { %v2899_v29 = vmax.f32 %v2579_v60, 0.0  ;;  %v2883_v21 = vmax.f32 %v2676_v49, 0.0  ;;  %v2680_v56 = vadd.f32 %v2679_v28, %v7776_v27  ;;  %v2681_v59 = vpop.f32.mrb[91].mxu1  ;;  %5504 = vmatpush1.bf16.msra.mxu0 %v5503_v12 }
 0x1e3   :  { %v2900_v62 = vmax.f32 %v2581_v52, 0.0  ;;  %v2884_v6 = vmax.f32 %v2678_v14, 0.0  ;;  %v2682_v9 = vadd.f32 %v2681_v59, %v7781_v3 }
 0x1e4   :  { %v5483_v0 = vpack.c.bf16 %v2899_v29, %v2881_v44  ;;  %v2901_v11 = vmax.f32 %v2680_v56, 0.0 }
 0x1e5   :  { %v5481_v35 = vpack.c.bf16 %v2900_v62, %v2882_v47  ;;  %v2584_v13 = vpop.f32.mrb[92].mxu0  ;;  %v2902_v15 = vmax.f32 %v2682_v9, 0.0 }
 0x1e6   :  { %v2585_v23 = vadd.f32 %v2584_v13, %v7766_v8  ;;  %v2586_v31 = vpop.f32.mrb[93].mxu0  ;;  %v5507_v10 = vpack.c.bf16 %v2901_v11, %v2883_v21 }
 0x1e7   :  { %v2587_v36 = vadd.f32 %v2586_v31, %v7771_v33  ;;  %v2588_v46 = vpop.f32.mrb[94].mxu0  ;;  %5482 = vmatprep.subr.bf16.mxu1 %v5481_v35  ;;  %v5505_v32 = vpack.c.bf16 %v2902_v15, %v2884_v6  ;;  %v2685_v16 = vpop.f32.mrb[92].mxu1 }
 0x1e8   :  { %v2917_v18 = vmax.f32 %v2585_v23, 0.0  ;;  %v2589_v30 = vadd.f32 %v2588_v46, %v7766_v8  ;;  %v2590_v24 = vpop.f32.mrb[95].mxu0  ;;  %5484 = vmatpush1.bf16.msra.mxu1 %v5483_v0  ;;  %v2686_v5 = vadd.f32 %v2685_v16, %v7776_v27  ;;  %v2687_v2 = vpop.f32.mrb[93].mxu1 }
 0x1e9   :  { %v2918_v19 = vmax.f32 %v2587_v36, 0.0  ;;  %v2591_v20 = vadd.f32 %v2590_v24, %v7771_v33  ;;  %v2688_v53 = vadd.f32 %v2687_v2, %v7781_v3  ;;  %v2689_v50 = vpop.f32.mrb[94].mxu1  ;;  %5506 = vmatprep.subr.bf16.mxu0 %v5505_v32 }
 0x1ea   :  { %v2935_v22 = vmax.f32 %v2589_v30, 0.0  ;;  %v2919_v26 = vmax.f32 %v2686_v5, 0.0  ;;  %v2690_v54 = vadd.f32 %v2689_v50, %v7776_v27  ;;  %v2691_v4 = vpop.f32.mrb[95].mxu1  ;;  %5508 = vmatpush1.bf16.msra.mxu0 %v5507_v10 }
 0x1eb   :  { %v2936_v34 = vmax.f32 %v2591_v20, 0.0  ;;  %v2920_v45 = vmax.f32 %v2688_v53, 0.0  ;;  %v2692_v48 = vadd.f32 %v2691_v4, %v7781_v3 }
 0x1ec   :  { %v5487_v7 = vpack.c.bf16 %v2935_v22, %v2917_v18  ;;  %v2937_v55 = vmax.f32 %v2690_v54, 0.0 }
 0x1ed   :  { %v5485_v39 = vpack.c.bf16 %v2936_v34, %v2918_v19  ;;  %v2594_v37 = vpop.f32.mrb[96].mxu0  ;;  %v2938_v57 = vmax.f32 %v2692_v48, 0.0 }
 0x1ee   :  { %v2595_v17 = vadd.f32 %v2594_v37, %v7766_v8  ;;  %v2596_v38 = vpop.f32.mrb[97].mxu0  ;;  %v5511_v25 = vpack.c.bf16 %v2937_v55, %v2919_v26 }
 0x1ef   :  { %v2597_v12 = vadd.f32 %v2596_v38, %v7771_v33  ;;  %v2598_v40 = vpop.f32.mrb[98].mxu0  ;;  %5486 = vmatprep.subr.bf16.mxu1 %v5485_v39  ;;  %v5509_v41 = vpack.c.bf16 %v2938_v57, %v2920_v45  ;;  %v2695_v63 = vpop.f32.mrb[96].mxu1 }
 0x1f0   :  { %v2953_v43 = vmax.f32 %v2595_v17, 0.0  ;;  %v2599_v44 = vadd.f32 %v2598_v40, %v7766_v8  ;;  %v2600_v60 = vpop.f32.mrb[99].mxu0  ;;  %5488 = vmatpush1.bf16.msra.mxu1 %v5487_v7  ;;  %v2696_v1 = vadd.f32 %v2695_v63, %v7776_v27  ;;  %v2697_v49 = vpop.f32.mrb[97].mxu1 }
 0x1f1   :  { %v2954_v51 = vmax.f32 %v2597_v12, 0.0  ;;  %v2601_v47 = vadd.f32 %v2600_v60, %v7771_v33  ;;  %v2698_v52 = vadd.f32 %v2697_v49, %v7781_v3  ;;  %v2699_v14 = vpop.f32.mrb[98].mxu1  ;;  %5510 = vmatprep.subr.bf16.mxu0 %v5509_v41 }
 0x1f2   :  { %v2971_v28 = vmax.f32 %v2599_v44, 0.0  ;;  %v2955_v29 = vmax.f32 %v2696_v1, 0.0  ;;  %v2700_v21 = vadd.f32 %v2699_v14, %v7776_v27  ;;  %v2701_v56 = vpop.f32.mrb[99].mxu1  ;;  %5512 = vmatpush1.bf16.msra.mxu0 %v5511_v25 }
 0x1f3   :  { %v2972_v59 = vmax.f32 %v2601_v47, 0.0  ;;  %v2956_v62 = vmax.f32 %v2698_v52, 0.0  ;;  %v2702_v6 = vadd.f32 %v2701_v56, %v7781_v3 }
 0x1f4   :  { %v5491_v9 = vpack.c.bf16 %v2971_v28, %v2953_v43  ;;  %v2973_v0 = vmax.f32 %v2700_v21, 0.0 }
 0x1f5   :  { %v5489_v11 = vpack.c.bf16 %v2972_v59, %v2954_v51  ;;  %v2604_v35 = vpop.f32.mrb[100].mxu0  ;;  %v2974_v13 = vmax.f32 %v2702_v6, 0.0 }
 0x1f6   :  { %v2605_v15 = vadd.f32 %v2604_v35, %v7766_v8  ;;  %v5515_v23 = vpack.c.bf16 %v2973_v0, %v2955_v29  ;;  %v2606_v31 = vpop.f32.mrb[101].mxu0 }
 0x1f7   :  { %v2607_v10 = vadd.f32 %v2606_v31, %v7771_v33  ;;  %v5513_v36 = vpack.c.bf16 %v2974_v13, %v2956_v62  ;;  %v2608_v46 = vpop.f32.mrb[102].mxu0  ;;  %v2705_v32 = vpop.f32.mrb[100].mxu1  ;;  %5490 = vmatprep.subr.bf16.mxu1 %v5489_v11 }
 0x1f8   :  { %v2989_v16 = vmax.f32 %v2605_v15, 0.0  ;;  %v2609_v18 = vadd.f32 %v2608_v46, %v7766_v8  ;;  %v2706_v30 = vadd.f32 %v2705_v32, %v7776_v27  ;;  %v2610_v24 = vpop.f32.mrb[103].mxu0  ;;  %v2707_v5 = vpop.f32.mrb[101].mxu1  ;;  %5492 = vmatpush1.bf16.msra.mxu1 %v5491_v9 }
 0x1f9   :  { %v2990_v2 = vmax.f32 %v2607_v10, 0.0  ;;  %v2611_v19 = vadd.f32 %v2610_v24, %v7771_v33  ;;  %v2708_v20 = vadd.f32 %v2707_v5, %v7781_v3  ;;  %v2709_v53 = vpop.f32.mrb[102].mxu1  ;;  %5514 = vmatprep.subr.bf16.mxu0 %v5513_v36  ;;  %v3782_v24 = vld [vmem:[%s8768_s4 + $0x80] sm:$0xff] }
 0x1fa   :  { %v3007_v50 = vmax.f32 %v2609_v18, 0.0  ;;  %v2991_v22 = vmax.f32 %v2706_v30, 0.0  ;;  %v2710_v26 = vadd.f32 %v2709_v53, %v7776_v27  ;;  %v2711_v54 = vpop.f32.mrb[103].mxu1  ;;  %5516 = vmatpush1.bf16.msra.mxu0 %v5515_v23 }
 0x1fb   :  { %v3008_v4 = vmax.f32 %v2611_v19, 0.0  ;;  %v2992_v34 = vmax.f32 %v2708_v20, 0.0  ;;  %v2712_v45 = vadd.f32 %v2711_v54, %v7781_v3  ;;  %v3767_v19 = vld [vmem:[%s8768_s4 + $0x8] sm:$0xff] }
 0x1fc   :  { %v5495_v48 = vpack.c.bf16 %v3007_v50, %v2989_v16  ;;  %v3009_v7 = vmax.f32 %v2710_v26, 0.0  ;;  %v3784_v50 = vld [vmem:[%s8768_s4 + $0x90] sm:$0xff] }
 0x1fd   :  { %v5493_v55 = vpack.c.bf16 %v3008_v4, %v2990_v2  ;;  %v2614_v39 = vpop.f32.mrb[104].mxu0  ;;  %v3010_v37 = vmax.f32 %v2712_v45, 0.0  ;;  %v7858_v4 = vld [vmem:[%s8767_s3] sm:$0x3]  ;;  %v3768_v45 = vld [vmem:[%s8768_s4 + $0x10] sm:$0xff] }
 0x1fe   :  { %v2615_v57 = vadd.f32 %v2614_v39, %v7766_v8  ;;  %v5519_v17 = vpack.c.bf16 %v3009_v7, %v2991_v22  ;;  %v2616_v38 = vpop.f32.mrb[105].mxu0  ;;  %v3786_v7 = vld [vmem:[%s8768_s4 + $0xa0] sm:$0xff]  ;;  %v323_v39 = vld [vmem:[%s8766_s2 + $0x10] sm:$0x3] }
 0x1ff   :  { %v2617_v25 = vadd.f32 %v2616_v38, %v7771_v33  ;;  %v5517_v12 = vpack.c.bf16 %v3010_v37, %v2992_v34  ;;  %v2618_v40 = vpop.f32.mrb[106].mxu0  ;;  %v2715_v41 = vpop.f32.mrb[104].mxu1  ;;  %5494 = vmatprep.subr.bf16.mxu1 %v5493_v55  ;;  %v3787_v55 = vld [vmem:[%s8768_s4 + $0xa8] sm:$0xff]  ;;  %v7889_v38 = vrot.slane %v323_v39, %v7328_v58  ;;  %v3772_v58 = vld [vmem:[%s8768_s4 + $0x30] sm:$0xff] }
 0x200   :  { %v3025_v63 = vmax.f32 %v2615_v57, 0.0  ;;  %v2619_v43 = vadd.f32 %v2618_v40, %v7766_v8  ;;  %v2716_v44 = vadd.f32 %v2715_v41, %v7776_v27  ;;  %v2620_v60 = vpop.f32.mrb[107].mxu0  ;;  %v2717_v1 = vpop.f32.mrb[105].mxu1  ;;  %5496 = vmatpush1.bf16.msra.mxu1 %v5495_v48  ;;  %v3769_v48 = vld [vmem:[%s8768_s4 + $0x18] sm:$0xff]  ;;  %v5557_v57 = vpack.c.bf16 %v3787_v55, %v3786_v7 }
 0x201   :  { %v3026_v49 = vmax.f32 %v2617_v25, 0.0  ;;  %v2621_v51 = vadd.f32 %v2620_v60, %v7771_v33  ;;  %v2718_v47 = vadd.f32 %v2717_v1, %v7781_v3  ;;  %v2719_v52 = vpop.f32.mrb[106].mxu1  ;;  %5518 = vmatprep.subr.bf16.mxu0 %v5517_v12  ;;  %v5555_v37 = vpack.c.bf16 %v3769_v48, %v3768_v45  ;;  %v3788_v25 = vld [vmem:[%s8768_s4 + $0xb0] sm:$0xff]  ;;  %v3789_v12 = vld [vmem:[%s8768_s4 + $0xb8] sm:$0xff] }
 0x202   :  { %v3043_v14 = vmax.f32 %v2619_v43, 0.0  ;;  %v3027_v28 = vmax.f32 %v2716_v44, 0.0  ;;  %v2720_v29 = vadd.f32 %v2719_v52, %v7776_v27  ;;  %v2721_v21 = vpop.f32.mrb[107].mxu1  ;;  %5520 = vmatpush1.bf16.msra.mxu0 %v5519_v17  ;;  %v3770_v17 = vld [vmem:[%s8768_s4 + $0x20] sm:$0xff]  ;;  %v7898_v40 = vrot.slane %v323_v39, %v7339_v61  ;;  %v3773_v44 = vld [vmem:[%s8768_s4 + $0x38] sm:$0xff] }
 0x203   :  { %v3044_v56 = vmax.f32 %v2621_v51, 0.0  ;;  %v3028_v59 = vmax.f32 %v2718_v47, 0.0  ;;  %v2722_v62 = vadd.f32 %v2721_v21, %v7781_v3  ;;  %v5561_v43 = vpack.c.bf16 %v3789_v12, %v3788_v25  ;;  %v3790_v61 = vld [vmem:[%s8768_s4 + $0xc0] sm:$0xff] }
 0x204   :  { %v5499_v6 = vpack.c.bf16 %v3043_v14, %v3025_v63  ;;  %v3045_v9 = vmax.f32 %v2720_v29, 0.0 }
 0x205   :  { %v5497_v0 = vpack.c.bf16 %v3044_v56, %v3026_v49  ;;  %v3046_v11 = vmax.f32 %v2722_v62, 0.0  ;;  %v2624_v35 = vpop.f32.mrb[108].mxu0  ;;  %v3791_v49 = vld [vmem:[%s8768_s4 + $0xc8] sm:$0xff]  ;;  %v3774_v56 = vld [vmem:[%s8768_s4 + $0x40] sm:$0xff] }
 0x206   :  { %v5523_v13 = vpack.c.bf16 %v3045_v9, %v3027_v28  ;;  %v2625_v15 = vadd.f32 %v2624_v35, %v7766_v8  ;;  %v2626_v23 = vpop.f32.mrb[109].mxu0  ;;  %v3783_v8 = vld [vmem:[%s8768_s4 + $0x88] sm:$0xff]  ;;  %v5563_v28 = vpack.c.bf16 %v3773_v44, %v3772_v58  ;;  %v5565_v21 = vpack.c.bf16 %v3791_v49, %v3790_v61  ;;  %v3792_v9 = vld [vmem:[%s8768_s4 + $0xd0] sm:$0xff] }
 0x207   :  { %v5521_v31 = vpack.c.bf16 %v3046_v11, %v3028_v59  ;;  %v2627_v10 = vadd.f32 %v2626_v23, %v7771_v33  ;;  %v2725_v36 = vpop.f32.mrb[108].mxu1  ;;  %5498 = vmatprep.subr.bf16.mxu1 %v5497_v0  ;;  %v2628_v46 = vpop.f32.mrb[110].mxu0  ;;  %v5549_v26 = vpack.c.bf16 %v3783_v8, %v3782_v24  ;;  %v3775_v59 = vld [vmem:[%s8768_s4 + $0x48] sm:$0xff]  ;;  %v3793_v0 = vld [vmem:[%s8768_s4 + $0xd8] sm:$0xff] }
 0x208   :  { %v3061_v32 = vmax.f32 %v2625_v15, 0.0  ;;  %v2726_v16 = vadd.f32 %v2725_v36, %v7776_v27  ;;  %v2727_v18 = vpop.f32.mrb[109].mxu1  ;;  %5500 = vmatpush1.bf16.msra.mxu1 %v5499_v6  ;;  %v2629_v30 = vpop.f32.mrb[111].mxu0  ;;  %v3766_v27 = vld [vmem:[%s8768_s4] sm:$0xff]  ;;  %v5567_v15 = vpack.c.bf16 %v3775_v59, %v3774_v56  ;;  %v3776_v36 = vld [vmem:[%s8768_s4 + $0x50] sm:$0xff]  ;;  %v3777_v46 = vld [vmem:[%s8768_s4 + $0x58] sm:$0xff] }
 0x209   :  { %v3062_v5 = vmax.f32 %v2627_v10, 0.0  ;;  %v2728_v33 = vadd.f32 %v2727_v18, %v7781_v3  ;;  %5522 = vmatprep.subr.bf16.mxu0 %v5521_v31  ;;  %v2729_v2 = vpop.f32.mrb[110].mxu1  ;;  %v3785_v3 = vld [vmem:[%s8768_s4 + $0x98] sm:$0xff]  ;;  %v5551_v54 = vpack.c.bf16 %v3767_v19, %v3766_v27  ;;  %v5569_v10 = vpack.c.bf16 %v3793_v0, %v3792_v9  ;;  %v3794_v18 = vld [vmem:[%s8768_s4 + $0xe0] sm:$0xff]  ;;  %v3795_v30 = vld [vmem:[%s8768_s4 + $0xe8] sm:$0xff] }
 0x20a   :  { %v3063_v20 = vmax.f32 %v2726_v16, 0.0  ;;  %5524 = vmatpush1.bf16.msra.mxu0 %v5523_v13  ;;  %v2730_v53 = vpop.f32.mrb[111].mxu1  ;;  %v5553_v34 = vpack.c.bf16 %v3785_v3, %v3784_v50  ;;  %v5571_v2 = vpack.c.bf16 %v3777_v46, %v3776_v36  ;;  %v3779_v50 = vld [vmem:[%s8768_s4 + $0x68] sm:$0xff] }
 0x20b   :  { %v3064_v22 = vmax.f32 %v2728_v33, 0.0  ;;  %5009 = vmatprep.subr.msk.mxu1 %vm3072_vm0, %v3062_v5  ;;  %v3778_v53 = vld [vmem:[%s8768_s4 + $0x60] sm:$0xff] }
 0x20c   :  { %5010 = vmatpush1.msk.msra.mxu1 %vm3072_vm0, %v3061_v32  ;;  %v5575_v55 = vpack.c.bf16 %v3779_v50, %v3778_v53 }
 0x20d   :  { %5011 = vmatmul.mubr.msk.f32.vlgmr.msra.gmra.mrb[120].mxu1 %vm3068_vm1, %v7858_v4  ;;  %5012 = vmatprep.subr.msk.mxu0 %vm3072_vm0, %v3064_v22 }
 0x20e   :  { %5013 = vmatpush1.msk.msra.mxu0 %vm3072_vm0, %v3063_v20  ;;  %3759 = vmatprep.mubr.f32.mxu1 %v6303_v42  ;;  %v3771_v42 = vld [vmem:[%s8768_s4 + $0x28] sm:$0xff]  ;;  %v5573_v20 = vpack.c.bf16 %v3795_v30, %v3794_v18 }
 0x20f   :  { %5014 = vmatmul.mubr.msk.f32.vlgmr.msra.gmra.mrb[144].mxu0 %vm3068_vm1, %v7858_v4  ;;  %5550 = vmatprep.subr.bf16.mxu0 %v5549_v26  ;;  %v5559_v41 = vpack.c.bf16 %v3771_v42, %v3770_v17  ;;  %v3780_v17 = vld [vmem:[%s8768_s4 + $0x70] sm:$0xff]  ;;  %v3781_v42 = vld [vmem:[%s8768_s4 + $0x78] sm:$0xff] }
 0x210   :  { %5552 = vmatpush3.bf16.msra.mxu0 %v5551_v54  ;;  %v3796_v54 = vld [vmem:[%s8768_s4 + $0xf0] sm:$0xff] }
 0x211   :  { %5554 = vmatprep.subr.bf16.mxu0 %v5553_v34  ;;  %v3797_v34 = vld [vmem:[%s8768_s4 + $0xf8] sm:$0xff] }
 0x214   :  { %5556 = vmatpush3.bf16.msra.mxu0 %v5555_v37 }
 0x215   :  { %v2766_v63 = vpop.f32.mrb[112].mxu0  ;;  %5558 = vmatprep.subr.bf16.mxu0 %v5557_v57  ;;  %v5577_v57 = vpack.c.bf16 %v3797_v34, %v3796_v54  ;;  %v3836_v54 = vld [vmem:[%s8768_s4 + $0x230] sm:$0xff]  ;;  %v3837_v34 = vld [vmem:[%s8768_s4 + $0x238] sm:$0xff] }
 0x216   :  { %v2767_v60 = vadd.f32 %v2766_v63, %v7889_v38  ;;  %v2768_v1 = vpop.f32.mrb[113].mxu0  ;;  %v3847_v63 = vld [vmem:[%s8768_s4 + $0x288] sm:$0xff] }
 0x217   :  { %v2769_v51 = vadd.f32 %v2768_v1, %v7898_v40  ;;  %v2770_v47 = vpop.f32.mrb[114].mxu0  ;;  %v5579_v1 = vpack.c.bf16 %v3781_v42, %v3780_v17  ;;  %v5627_v42 = vpack.c.bf16 %v3837_v34, %v3836_v54  ;;  %v3798_v34 = vld [vmem:[%s8768_s4 + $0x100] sm:$0xff] }
 0x218   :  { %v2771_v52 = vadd.f32 %v2770_v47, %v7889_v38  ;;  %v2772_v14 = vpop.f32.mrb[115].mxu0  ;;  %5560 = vmatpush3.bf16.msra.mxu0 %v5559_v41  ;;  %v2849_v62 = vmax.f32 %v2767_v60, 0.0  ;;  %v3846_v41 = vld [vmem:[%s8768_s4 + $0x280] sm:$0xff]  ;;  %v3831_v47 = vld [vmem:[%s8768_s4 + $0x208] sm:$0xff] }
 0x219   :  { %v2773_v29 = vadd.f32 %v2772_v14, %v7898_v40  ;;  %5562 = vmatprep.subr.bf16.mxu0 %v5561_v43  ;;  %v2850_v11 = vmax.f32 %v2769_v51, 0.0  ;;  %v5613_v49 = vpack.c.bf16 %v3847_v63, %v3846_v41  ;;  %v3830_v51 = vld [vmem:[%s8768_s4 + $0x200] sm:$0xff]  ;;  %v3839_v63 = vld [vmem:[%s8768_s4 + $0x248] sm:$0xff] }
 0x21a   :  { %v2867_v6 = vmax.f32 %v2771_v52, 0.0  ;;  %v3838_v41 = vld [vmem:[%s8768_s4 + $0x240] sm:$0xff] }
 0x21b   :  { %v2868_v35 = vmax.f32 %v2773_v29, 0.0  ;;  %v3849_v29 = vld [vmem:[%s8768_s4 + $0x298] sm:$0xff] }
 0x21c   :  { %v5527_v13 = vpack.c.bf16 %v2867_v6, %v2849_v62  ;;  %5564 = vmatpush3.bf16.msra.mxu0 %v5563_v28  ;;  %v3848_v28 = vld [vmem:[%s8768_s4 + $0x290] sm:$0xff]  ;;  %v5615_v62 = vpack.c.bf16 %v3831_v47, %v3830_v51 }
 0x21d   :  { %v5525_v23 = vpack.c.bf16 %v2868_v35, %v2850_v11  ;;  %v2776_v31 = vpop.f32.mrb[116].mxu0  ;;  %5566 = vmatprep.subr.bf16.mxu0 %v5565_v21  ;;  %v5617_v0 = vpack.c.bf16 %v3849_v29, %v3848_v28  ;;  %v3832_v11 = vld [vmem:[%s8768_s4 + $0x210] sm:$0xff]  ;;  %v3833_v35 = vld [vmem:[%s8768_s4 + $0x218] sm:$0xff] }
 0x21e   :  { %v2777_v32 = vadd.f32 %v2776_v31, %v7889_v38  ;;  %v2778_v16 = vpop.f32.mrb[117].mxu0  ;;  %v3851_v31 = vld [vmem:[%s8768_s4 + $0x2a8] sm:$0xff] }
 0x21f   :  { %v2779_v24 = vadd.f32 %v2778_v16, %v7898_v40  ;;  %v2780_v8 = vpop.f32.mrb[118].mxu0  ;;  %5526 = vmatprep.subr.bf16.mxu1 %v5525_v23  ;;  %v3850_v23 = vld [vmem:[%s8768_s4 + $0x2a0] sm:$0xff]  ;;  %v5619_v16 = vpack.c.bf16 %v3833_v35, %v3832_v11 }
 0x220   :  { %v2781_v5 = vadd.f32 %v2780_v8, %v7889_v38  ;;  %v2782_v33 = vpop.f32.mrb[119].mxu0  ;;  %5528 = vmatpush1.bf16.msra.mxu1 %v5527_v13  ;;  %5568 = vmatpush3.bf16.msra.mxu0 %v5567_v15  ;;  %v3193_v27 = vpop.f32.mrb[112].mxu1  ;;  %v2885_v22 = vmax.f32 %v2777_v32, 0.0  ;;  %v5621_v30 = vpack.c.bf16 %v3851_v31, %v3850_v23  ;;  %v3835_v8 = vld [vmem:[%s8768_s4 + $0x228] sm:$0xff] }
 0x221   :  { %v2783_v19 = vadd.f32 %v2782_v33, %v7898_v40  ;;  %5570 = vmatprep.subr.bf16.mxu0 %v5569_v10  ;;  %v3195_v3 = vpop.f32.mrb[113].mxu1  ;;  %v2886_v45 = vmax.f32 %v2779_v24, 0.0  ;;  %v3834_v24 = vld [vmem:[%s8768_s4 + $0x220] sm:$0xff] }
 0x222   :  { %v2903_v26 = vmax.f32 %v2781_v5, 0.0  ;;  %4118 = vmatprep.mubr.f32.mxu0 %v3195_v3  ;;  %v5623_v50 = vpack.c.bf16 %v3835_v8, %v3834_v24 }
 0x223   :  { %v2904_v48 = vmax.f32 %v2783_v19, 0.0 }
 0x224   :  { %v5531_v7 = vpack.c.bf16 %v2903_v26, %v2885_v22  ;;  %5572 = vmatpush3.bf16.msra.mxu0 %v5571_v2  ;;  %v3852_v2 = vld [vmem:[%s8768_s4 + $0x2b0] sm:$0xff] }
 0x225   :  { %v5529_v39 = vpack.c.bf16 %v2904_v48, %v2886_v45  ;;  %v2786_v37 = vpop.f32.mrb[120].mxu0  ;;  %5574 = vmatprep.subr.bf16.mxu0 %v5573_v20 }
 0x226   :  { %v2787_v25 = vadd.f32 %v2786_v37, %v7889_v38  ;;  %v2788_v12 = vpop.f32.mrb[121].mxu0 }
 0x227   :  { %v2789_v43 = vadd.f32 %v2788_v12, %v7898_v40  ;;  %v2790_v58 = vpop.f32.mrb[122].mxu0  ;;  %5530 = vmatprep.subr.bf16.mxu1 %v5529_v39 }
 0x228   :  { %v2791_v44 = vadd.f32 %v2790_v58, %v7889_v38  ;;  %v2792_v60 = vpop.f32.mrb[123].mxu0  ;;  %5532 = vmatpush1.bf16.msra.mxu1 %v5531_v7  ;;  %5576 = vmatpush3.bf16.msra.mxu0 %v5575_v55  ;;  %v2921_v52 = vmax.f32 %v2787_v25, 0.0  ;;  %v3854_v7 = vld [vmem:[%s8768_s4 + $0x2c0] sm:$0xff]  ;;  %v3855_v55 = vld [vmem:[%s8768_s4 + $0x2c8] sm:$0xff] }
 0x229   :  { %v2793_v61 = vadd.f32 %v2792_v60, %v7898_v40  ;;  %5578 = vmatprep.subr.bf16.mxu0 %v5577_v57  ;;  %v2922_v21 = vmax.f32 %v2789_v43, 0.0  ;;  %v5629_v12 = vpack.c.bf16 %v3855_v55, %v3854_v7  ;;  %v3856_v60 = vld [vmem:[%s8768_s4 + $0x2d0] sm:$0xff]  ;;  %v3910_v55 = vld [vmem:[%s8768_s4 + $0x480] sm:$0xff] }
 0x22a   :  { %v2939_v14 = vmax.f32 %v2791_v44, 0.0 }
 0x22b   :  { %v2940_v56 = vmax.f32 %v2793_v61, 0.0 }
 0x22c   :  { %v5535_v59 = vpack.c.bf16 %v2939_v14, %v2921_v52  ;;  %5580 = vmatpush3.bf16.msra.mxu0 %v5579_v1  ;;  %v3857_v1 = vld [vmem:[%s8768_s4 + $0x2d8] sm:$0xff]  ;;  %v5631_v52 = vpack.c.bf16 %v3839_v63, %v3838_v41 }
 0x22d   :  { %v5533_v6 = vpack.c.bf16 %v2940_v56, %v2922_v21  ;;  %v2796_v9 = vpop.f32.mrb[124].mxu0  ;;  %5614 = vmatprep.subr.bf16.mxu0 %v5613_v49  ;;  %v5633_v29 = vpack.c.bf16 %v3857_v1, %v3856_v60  ;;  %v3840_v21 = vld [vmem:[%s8768_s4 + $0x250] sm:$0xff]  ;;  %v3841_v56 = vld [vmem:[%s8768_s4 + $0x258] sm:$0xff] }
 0x22e   :  { %v2797_v13 = vadd.f32 %v2796_v9, %v7889_v38  ;;  %v2798_v15 = vpop.f32.mrb[125].mxu0  ;;  %v3859_v9 = vld [vmem:[%s8768_s4 + $0x2e8] sm:$0xff]  ;;  %v3801_v41 = vld [vmem:[%s8768_s4 + $0x118] sm:$0xff] }
 0x22f   :  { %v2799_v10 = vadd.f32 %v2798_v15, %v7898_v40  ;;  %v2800_v36 = vpop.f32.mrb[126].mxu0  ;;  %5534 = vmatprep.subr.bf16.mxu1 %v5533_v6  ;;  %4119 = vmatmul.mubr.f32.vlgmr.msra.gmra.mrb[146].mxu0 %v3193_v27  ;;  %v3853_v27 = vld [vmem:[%s8768_s4 + $0x2b8] sm:$0xff]  ;;  %v3858_v6 = vld [vmem:[%s8768_s4 + $0x2e0] sm:$0xff]  ;;  %v5635_v15 = vpack.c.bf16 %v3841_v56, %v3840_v21  ;;  %v3823_v21 = vld [vmem:[%s8768_s4 + $0x1c8] sm:$0xff] }
 0x230   :  { %v2801_v46 = vadd.f32 %v2800_v36, %v7889_v38  ;;  %v2802_v32 = vpop.f32.mrb[127].mxu0  ;;  %5536 = vmatpush1.bf16.msra.mxu1 %v5535_v59  ;;  %5616 = vmatpush3.bf16.msra.mxu0 %v5615_v62  ;;  %v2957_v5 = vmax.f32 %v2797_v13, 0.0  ;;  %v5625_v26 = vpack.c.bf16 %v3853_v27, %v3852_v2  ;;  %v5637_v31 = vpack.c.bf16 %v3859_v9, %v3858_v6  ;;  %v3843_v36 = vld [vmem:[%s8768_s4 + $0x268] sm:$0xff]  ;;  %v3824_v9 = vld [vmem:[%s8768_s4 + $0x1d0] sm:$0xff] }
 0x231   :  { %v2803_v18 = vadd.f32 %v2802_v32, %v7898_v40  ;;  %5618 = vmatprep.subr.bf16.mxu0 %v5617_v0  ;;  %v2958_v19 = vmax.f32 %v2799_v10, 0.0  ;;  %v3842_v10 = vld [vmem:[%s8768_s4 + $0x260] sm:$0xff]  ;;  %v3807_v6 = vld [vmem:[%s8768_s4 + $0x148] sm:$0xff] }
 0x232   :  { %v2975_v33 = vmax.f32 %v2801_v46, 0.0 }
 0x233   :  { %v2976_v20 = vmax.f32 %v2803_v18, 0.0  ;;  %v3861_v18 = vld [vmem:[%s8768_s4 + $0x2f8] sm:$0xff] }
 0x234   :  { %v5539_v53 = vpack.c.bf16 %v2975_v33, %v2957_v5  ;;  %5620 = vmatpush3.bf16.msra.mxu0 %v5619_v16  ;;  %v3860_v16 = vld [vmem:[%s8768_s4 + $0x2f0] sm:$0xff]  ;;  %v5639_v5 = vpack.c.bf16 %v3843_v36, %v3842_v10  ;;  %v3894_v10 = vld [vmem:[%s8768_s4 + $0x400] sm:$0xff]  ;;  %v3895_v36 = vld [vmem:[%s8768_s4 + $0x408] sm:$0xff] }
 0x235   :  { %v5537_v3 = vpack.c.bf16 %v2976_v20, %v2958_v19  ;;  %v2806_v22 = vpop.f32.mrb[128].mxu0  ;;  %5622 = vmatprep.subr.bf16.mxu0 %v5621_v30  ;;  %v5641_v27 = vpack.c.bf16 %v3861_v18, %v3860_v16  ;;  %v3844_v19 = vld [vmem:[%s8768_s4 + $0x270] sm:$0xff]  ;;  %v3845_v20 = vld [vmem:[%s8768_s4 + $0x278] sm:$0xff] }
 0x236   :  { %v2807_v45 = vadd.f32 %v2806_v22, %v7889_v38  ;;  %v2808_v48 = vpop.f32.mrb[129].mxu0  ;;  %v3815_v22 = vld [vmem:[%s8768_s4 + $0x188] sm:$0xff]  ;;  %v5643_v7 = vpack.c.bf16 %v3845_v20, %v3844_v19  ;;  %v3913_v16 = vld [vmem:[%s8768_s4 + $0x498] sm:$0xff]  ;;  %v3896_v20 = vld [vmem:[%s8768_s4 + $0x410] sm:$0xff] }
 0x237   :  { %v2809_v39 = vadd.f32 %v2808_v48, %v7898_v40  ;;  %v2810_v37 = vpop.f32.mrb[130].mxu0  ;;  %5538 = vmatprep.subr.bf16.mxu1 %v5537_v3  ;;  %v3814_v3 = vld [vmem:[%s8768_s4 + $0x180] sm:$0xff] }
 0x238   :  { %v2811_v57 = vadd.f32 %v2810_v37, %v7889_v38  ;;  %v2812_v17 = vpop.f32.mrb[131].mxu0  ;;  %5540 = vmatpush1.bf16.msra.mxu1 %v5539_v53  ;;  %5624 = vmatpush3.bf16.msra.mxu0 %v5623_v50  ;;  %v2993_v43 = vmax.f32 %v2807_v45, 0.0  ;;  %v3816_v45 = vld [vmem:[%s8768_s4 + $0x190] sm:$0xff] }
 0x239   :  { %v2813_v25 = vadd.f32 %v2812_v17, %v7898_v40  ;;  %5626 = vmatprep.subr.bf16.mxu0 %v5625_v26  ;;  %v2994_v61 = vmax.f32 %v2809_v39, 0.0  ;;  %v3911_v39 = vld [vmem:[%s8768_s4 + $0x488] sm:$0xff] }
 0x23a   :  { %v3011_v58 = vmax.f32 %v2811_v57, 0.0  ;;  %v8034_v44 = vpop.f32.mrb[114].mxu1  ;;  %v5581_v57 = vpack.c.bf16 %v3815_v22, %v3814_v3  ;;  %v5677_v63 = vpack.c.bf16 %v3911_v39, %v3910_v55  ;;  %v3914_v22 = vld [vmem:[%s8768_s4 + $0x4a0] sm:$0xff] }
 0x23b   :  { %v3012_v49 = vmax.f32 %v2813_v25, 0.0  ;;  %v8042_v51 = vpop.f32.mrb[115].mxu1  ;;  %v3898_v39 = vld [vmem:[%s8768_s4 + $0x420] sm:$0xff] }
 0x23c   :  { %v5543_v47 = vpack.c.bf16 %v3011_v58, %v2993_v43  ;;  %5628 = vmatpush3.bf16.msra.mxu0 %v5627_v42  ;;  %v3818_v43 = vld [vmem:[%s8768_s4 + $0x1a0] sm:$0xff]  ;;  %v3819_v58 = vld [vmem:[%s8768_s4 + $0x1a8] sm:$0xff] }
 0x23d   :  { %v5541_v14 = vpack.c.bf16 %v3012_v49, %v2994_v61  ;;  %v2816_v28 = vpop.f32.mrb[132].mxu0  ;;  %5630 = vmatprep.subr.bf16.mxu0 %v5629_v12  ;;  %v3800_v12 = vld [vmem:[%s8768_s4 + $0x110] sm:$0xff]  ;;  %v5589_v1 = vpack.c.bf16 %v3819_v58, %v3818_v43  ;;  %v3802_v61 = vld [vmem:[%s8768_s4 + $0x120] sm:$0xff]  ;;  %v3803_v49 = vld [vmem:[%s8768_s4 + $0x128] sm:$0xff] }
 0x23e   :  { %v2817_v59 = vadd.f32 %v2816_v28, %v7889_v38  ;;  %v2818_v62 = vpop.f32.mrb[133].mxu0  ;;  %v5587_v60 = vpack.c.bf16 %v3801_v41, %v3800_v12  ;;  %v3805_v28 = vld [vmem:[%s8768_s4 + $0x138] sm:$0xff]  ;;  %v3862_v12 = vld [vmem:[%s8768_s4 + $0x300] sm:$0xff]  ;;  %v3863_v41 = vld [vmem:[%s8768_s4 + $0x308] sm:$0xff] }
 0x23f   :  { %v2819_v0 = vadd.f32 %v2818_v62, %v7898_v40  ;;  %v2820_v11 = vpop.f32.mrb[134].mxu0  ;;  %5542 = vmatprep.subr.bf16.mxu1 %v5541_v14  ;;  %v3804_v14 = vld [vmem:[%s8768_s4 + $0x130] sm:$0xff]  ;;  %v3806_v62 = vld [vmem:[%s8768_s4 + $0x140] sm:$0xff]  ;;  %v3881_v43 = vld [vmem:[%s8768_s4 + $0x398] sm:$0xff] }
 0x240   :  { %v2821_v35 = vadd.f32 %v2820_v11, %v7889_v38  ;;  %v2822_v13 = vpop.f32.mrb[135].mxu0  ;;  %5544 = vmatpush1.bf16.msra.mxu1 %v5543_v47  ;;  %5632 = vmatpush3.bf16.msra.mxu0 %v5631_v52  ;;  %v3029_v46 = vmax.f32 %v2817_v59, 0.0  ;;  %v3821_v47 = vld [vmem:[%s8768_s4 + $0x1b8] sm:$0xff]  ;;  %v5595_v56 = vpack.c.bf16 %v3805_v28, %v3804_v14  ;;  %v5599_v11 = vpack.c.bf16 %v3807_v6, %v3806_v62  ;;  %v3882_v28 = vld [vmem:[%s8768_s4 + $0x3a0] sm:$0xff]  ;;  %v3903_v62 = vld [vmem:[%s8768_s4 + $0x448] sm:$0xff] }
 0x241   :  { %v2823_v23 = vadd.f32 %v2822_v13, %v7898_v40  ;;  %5634 = vmatprep.subr.bf16.mxu0 %v5633_v29  ;;  %v3030_v30 = vmax.f32 %v2819_v0, 0.0  ;;  %v3822_v29 = vld [vmem:[%s8768_s4 + $0x1c0] sm:$0xff]  ;;  %v3825_v0 = vld [vmem:[%s8768_s4 + $0x1d8] sm:$0xff]  ;;  %v3808_v13 = vld [vmem:[%s8768_s4 + $0x150] sm:$0xff] }
 0x242   :  { %v3047_v32 = vmax.f32 %v2821_v35, 0.0  ;;  %v5597_v59 = vpack.c.bf16 %v3823_v21, %v3822_v29  ;;  %v5601_v35 = vpack.c.bf16 %v3825_v0, %v3824_v9  ;;  %v3865_v14 = vld [vmem:[%s8768_s4 + $0x318] sm:$0xff]  ;;  %v3883_v29 = vld [vmem:[%s8768_s4 + $0x3a8] sm:$0xff]  ;;  %v3920_v9 = vld [vmem:[%s8768_s4 + $0x4d0] sm:$0xff] }
 0x243   :  { %v3048_v24 = vmax.f32 %v2823_v23, 0.0  ;;  %v3826_v23 = vld [vmem:[%s8768_s4 + $0x1e0] sm:$0xff]  ;;  %v5653_v0 = vpack.c.bf16 %v3883_v29, %v3882_v28  ;;  %v3943_v28 = vld [vmem:[%s8768_s4 + $0x588] sm:$0xff] }
 0x244   :  { %v5547_v8 = vpack.c.bf16 %v3047_v32, %v3029_v46  ;;  %5636 = vmatpush3.bf16.msra.mxu0 %v5635_v15  ;;  %v3809_v15 = vld [vmem:[%s8768_s4 + $0x158] sm:$0xff]  ;;  %v3912_v32 = vld [vmem:[%s8768_s4 + $0x490] sm:$0xff] }
 0x245   :  { %v5545_v33 = vpack.c.bf16 %v3048_v24, %v3030_v30  ;;  %v2826_v2 = vpop.f32.mrb[136].mxu0  ;;  %5638 = vmatprep.subr.bf16.mxu0 %v5637_v31  ;;  %v3827_v31 = vld [vmem:[%s8768_s4 + $0x1e8] sm:$0xff]  ;;  %v5603_v46 = vpack.c.bf16 %v3809_v15, %v3808_v13  ;;  %v3810_v30 = vld [vmem:[%s8768_s4 + $0x160] sm:$0xff]  ;;  %v5681_v19 = vpack.c.bf16 %v3913_v16, %v3912_v32  ;;  %v3884_v13 = vld [vmem:[%s8768_s4 + $0x3b0] sm:$0xff] }
 0x246   :  { %v2827_v53 = vadd.f32 %v2826_v2, %v7889_v38  ;;  %v2828_v50 = vpop.f32.mrb[137].mxu0  ;;  %v3799_v38 = vld [vmem:[%s8768_s4 + $0x108] sm:$0xff]  ;;  %v5605_v18 = vpack.c.bf16 %v3827_v31, %v3826_v23  ;;  %v5679_v2 = vpack.c.bf16 %v3895_v36, %v3894_v10  ;;  %v3885_v15 = vld [vmem:[%s8768_s4 + $0x3b8] sm:$0xff]  ;;  %v3904_v10 = vld [vmem:[%s8768_s4 + $0x450] sm:$0xff] }
 0x247   :  { %v2829_v26 = vadd.f32 %v2828_v50, %v7898_v40  ;;  %v2830_v54 = vpop.f32.mrb[138].mxu0  ;;  %5546 = vmatprep.subr.bf16.mxu1 %v5545_v33  ;;  %v3817_v40 = vld [vmem:[%s8768_s4 + $0x198] sm:$0xff]  ;;  %v5583_v42 = vpack.c.bf16 %v3799_v38, %v3798_v34  ;;  %v3811_v24 = vld [vmem:[%s8768_s4 + $0x168] sm:$0xff]  ;;  %v3812_v34 = vld [vmem:[%s8768_s4 + $0x170] sm:$0xff] }
 0x248   :  { %v2831_v48 = vpop.f32.mrb[139].mxu0  ;;  %5548 = vmatpush1.bf16.msra.mxu1 %v5547_v8  ;;  %5640 = vmatpush3.bf16.msra.mxu0 %v5639_v5  ;;  %v3065_v17 = vmax.f32 %v2827_v53, 0.0  ;;  %v5585_v25 = vpack.c.bf16 %v3817_v40, %v3816_v45  ;;  %v3828_v8 = vld [vmem:[%s8768_s4 + $0x1f0] sm:$0xff]  ;;  %v3829_v5 = vld [vmem:[%s8768_s4 + $0x1f8] sm:$0xff]  ;;  %v5607_v50 = vpack.c.bf16 %v3811_v24, %v3810_v30  ;;  %v3879_v40 = vld [vmem:[%s8768_s4 + $0x388] sm:$0xff] }
 0x249   :  { %v3066_v37 = vmax.f32 %v2829_v26, 0.0  ;;  %5642 = vmatprep.subr.bf16.mxu0 %v5641_v27  ;;  %v3897_v53 = vld [vmem:[%s8768_s4 + $0x418] sm:$0xff]  ;;  %v3915_v26 = vld [vmem:[%s8768_s4 + $0x4a8] sm:$0xff]  ;;  %v5609_v54 = vpack.c.bf16 %v3829_v5, %v3828_v8  ;;  %v3878_v48 = vld [vmem:[%s8768_s4 + $0x380] sm:$0xff] }
 0x24a   :  { %v3813_v38 = vld [vmem:[%s8768_s4 + $0x178] sm:$0xff]  ;;  %v5685_v55 = vpack.c.bf16 %v3915_v26, %v3914_v22  ;;  %v3922_v32 = vld [vmem:[%s8768_s4 + $0x4e0] sm:$0xff]  ;;  %v3923_v16 = vld [vmem:[%s8768_s4 + $0x4e8] sm:$0xff] }
 0x24b   :  { %5015 = vmatprep.subr.msk.mxu1 %vm3072_vm0, %v3066_v37  ;;  %v3899_v37 = vld [vmem:[%s8768_s4 + $0x428] sm:$0xff]  ;;  %v3905_v36 = vld [vmem:[%s8768_s4 + $0x458] sm:$0xff]  ;;  %v3868_v30 = vld [vmem:[%s8768_s4 + $0x330] sm:$0xff] }
 0x24c   :  { %5016 = vmatpush1.msk.msra.mxu1 %vm3072_vm0, %v3065_v17  ;;  %5644 = vmatpush3.bf16.msra.mxu0 %v5643_v7  ;;  %v5683_v7 = vpack.c.bf16 %v3897_v53, %v3896_v20  ;;  %v3916_v17 = vld [vmem:[%s8768_s4 + $0x4b0] sm:$0xff]  ;;  %v5687_v58 = vpack.c.bf16 %v3899_v37, %v3898_v39  ;;  %v3869_v24 = vld [vmem:[%s8768_s4 + $0x338] sm:$0xff]  ;;  %v3886_v8 = vld [vmem:[%s8768_s4 + $0x3c0] sm:$0xff] }
 0x24d   :  { %5017 = vmatmul.mubr.msk.f32.vlgmr.msra.gmra.mrb[122].mxu1 %vm3068_vm1, %v7858_v4  ;;  %5582 = vmatprep.subr.bf16.mxu1 %v5581_v57  ;;  %v3820_v4 = vld [vmem:[%s8768_s4 + $0x1b0] sm:$0xff]  ;;  %v5611_v57 = vpack.c.bf16 %v3813_v38, %v3812_v34  ;;  %v3887_v5 = vld [vmem:[%s8768_s4 + $0x3c8] sm:$0xff]  ;;  %v5659_v20 = vpack.c.bf16 %v3869_v24, %v3868_v30  ;;  %v3870_v26 = vld [vmem:[%s8768_s4 + $0x340] sm:$0xff] }
 0x24e   :  { %5584 = vmatpush3.bf16.msra.mxu1 %v5583_v42  ;;  %4188 = vmatprep.mubr.f32.mxu1 %v8042_v51  ;;  %v5591_v51 = vpack.c.bf16 %v3803_v49, %v3802_v61  ;;  %v5593_v52 = vpack.c.bf16 %v3821_v47, %v3820_v4  ;;  %v3917_v42 = vld [vmem:[%s8768_s4 + $0x4b8] sm:$0xff]  ;;  %v5647_v49 = vpack.c.bf16 %v3863_v41, %v3862_v12  ;;  %v3918_v4 = vld [vmem:[%s8768_s4 + $0x4c0] sm:$0xff]  ;;  %v3919_v47 = vld [vmem:[%s8768_s4 + $0x4c8] sm:$0xff] }
 0x24f   :  { %5586 = vmatprep.subr.bf16.mxu1 %v5585_v25  ;;  %5678 = vmatprep.subr.bf16.mxu0 %v5677_v63  ;;  %v5645_v25 = vpack.c.bf16 %v3879_v40, %v3878_v48  ;;  %v3880_v63 = vld [vmem:[%s8768_s4 + $0x390] sm:$0xff]  ;;  %v3901_v61 = vld [vmem:[%s8768_s4 + $0x438] sm:$0xff]  ;;  %v5661_v22 = vpack.c.bf16 %v3887_v5, %v3886_v8  ;;  %v3974_v39 = vld [vmem:[%s8768_s4 + $0x680] sm:$0xff] }
 0x250   :  { %v3924_v53 = vld [vmem:[%s8768_s4 + $0x4f0] sm:$0xff]  ;;  %v3889_v38 = vld [vmem:[%s8768_s4 + $0x3d8] sm:$0xff]  ;;  %v3975_v37 = vld [vmem:[%s8768_s4 + $0x688] sm:$0xff] }
 0x251   :  { %v3888_v34 = vld [vmem:[%s8768_s4 + $0x3d0] sm:$0xff]  ;;  %v3891_v12 = vld [vmem:[%s8768_s4 + $0x3e8] sm:$0xff]  ;;  %v3950_v30 = vld [vmem:[%s8768_s4 + $0x5c0] sm:$0xff] }
 0x252   :  { %5588 = vmatpush3.bf16.msra.mxu1 %v5587_v60  ;;  %v5689_v60 = vpack.c.bf16 %v3917_v42, %v3916_v17  ;;  %v3908_v40 = vld [vmem:[%s8768_s4 + $0x470] sm:$0xff]  ;;  %v3873_v42 = vld [vmem:[%s8768_s4 + $0x358] sm:$0xff]  ;;  %v3951_v24 = vld [vmem:[%s8768_s4 + $0x5c8] sm:$0xff] }
 0x253   :  { %5590 = vmatprep.subr.bf16.mxu1 %v5589_v1  ;;  %v3900_v1 = vld [vmem:[%s8768_s4 + $0x430] sm:$0xff]  ;;  %v5725_v5 = vpack.c.bf16 %v3951_v24, %v3950_v30 }
 0x254   :  { %v5691_v21 = vpack.c.bf16 %v3901_v61, %v3900_v1  ;;  %v3872_v17 = vld [vmem:[%s8768_s4 + $0x350] sm:$0xff]  ;;  %v3875_v1 = vld [vmem:[%s8768_s4 + $0x368] sm:$0xff] }
 0x255   :  { %v3892_v61 = vld [vmem:[%s8768_s4 + $0x3f0] sm:$0xff] }
 0x256   :  { %5592 = vmatpush3.bf16.msra.mxu1 %v5591_v51  ;;  %v5649_v51 = vpack.c.bf16 %v3881_v43, %v3880_v63  ;;  %v5741_v63 = vpack.c.bf16 %v3975_v37, %v3974_v39  ;;  %v5667_v43 = vpack.c.bf16 %v3873_v42, %v3872_v17  ;;  %v3939_v39 = vld [vmem:[%s8768_s4 + $0x568] sm:$0xff]  ;;  %v3957_v17 = vld [vmem:[%s8768_s4 + $0x5f8] sm:$0xff] }
 0x257   :  { %5594 = vmatprep.subr.bf16.mxu1 %v5593_v52  ;;  %v3864_v52 = vld [vmem:[%s8768_s4 + $0x310] sm:$0xff] }
 0x258   :  { %v5651_v6 = vpack.c.bf16 %v3865_v14, %v3864_v52  ;;  %v3877_v52 = vld [vmem:[%s8768_s4 + $0x378] sm:$0xff]  ;;  %v3942_v14 = vld [vmem:[%s8768_s4 + $0x580] sm:$0xff] }
 0x25a   :  { %5596 = vmatpush3.bf16.msra.mxu1 %v5595_v56  ;;  %v5693_v56 = vpack.c.bf16 %v3919_v47, %v3918_v4 }
 0x25b   :  { %5598 = vmatprep.subr.bf16.mxu1 %v5597_v59  ;;  %v3902_v59 = vld [vmem:[%s8768_s4 + $0x440] sm:$0xff] }
 0x25c   :  { %v5695_v23 = vpack.c.bf16 %v3903_v62, %v3902_v59  ;;  %v3927_v59 = vld [vmem:[%s8768_s4 + $0x508] sm:$0xff]  ;;  %v3944_v62 = vld [vmem:[%s8768_s4 + $0x590] sm:$0xff] }
 0x25e   :  { %5600 = vmatpush3.bf16.msra.mxu1 %v5599_v11  ;;  %v3866_v11 = vld [vmem:[%s8768_s4 + $0x320] sm:$0xff] }
 0x25f   :  { %5602 = vmatprep.subr.bf16.mxu1 %v5601_v35  ;;  %v3867_v35 = vld [vmem:[%s8768_s4 + $0x328] sm:$0xff] }
 0x260   :  { %v3335_v33 = vpop.f32.mrb[116].mxu1 }
 0x261   :  { %v3337_v27 = vpop.f32.mrb[117].mxu1 }
 0x262   :  { %5604 = vmatpush3.bf16.msra.mxu1 %v5603_v46  ;;  %4258 = vmatprep.mubr.f32.mxu0 %v3337_v27  ;;  %v8199_v3 = vpop.f32.mrb[140].mxu0  ;;  %v5655_v46 = vpack.c.bf16 %v3867_v35, %v3866_v11  ;;  %v3906_v27 = vld [vmem:[%s8768_s4 + $0x460] sm:$0xff]  ;;  %v3929_v11 = vld [vmem:[%s8768_s4 + $0x518] sm:$0xff] }
 0x263   :  { %5606 = vmatprep.subr.bf16.mxu1 %v5605_v18  ;;  %4259 = vmatmul.mubr.f32.vlgmr.msra.gmra.mrb[148].mxu0 %v3335_v33  ;;  %v3408_v45 = vpop.f32.mrb[141].mxu0  ;;  %v5657_v18 = vpack.c.bf16 %v3885_v15, %v3884_v13  ;;  %v5699_v33 = vpack.c.bf16 %v3905_v36, %v3904_v10  ;;  %v3946_v35 = vld [vmem:[%s8768_s4 + $0x5a0] sm:$0xff]  ;;  %v3947_v13 = vld [vmem:[%s8768_s4 + $0x5a8] sm:$0xff]  ;;  %v3948_v36 = vld [vmem:[%s8768_s4 + $0x5b0] sm:$0xff] }
 0x264   :  { %5680 = vmatpush3.bf16.msra.mxu0 %v5679_v2  ;;  %v5701_v2 = vpack.c.bf16 %v3923_v16, %v3922_v32  ;;  %v3931_v10 = vld [vmem:[%s8768_s4 + $0x528] sm:$0xff]  ;;  %v3932_v16 = vld [vmem:[%s8768_s4 + $0x530] sm:$0xff] }
 0x265   :  { %5682 = vmatprep.subr.bf16.mxu0 %v5681_v19  ;;  %v3907_v19 = vld [vmem:[%s8768_s4 + $0x468] sm:$0xff] }
 0x266   :  { %5608 = vmatpush3.bf16.msra.mxu1 %v5607_v50  ;;  %v3925_v50 = vld [vmem:[%s8768_s4 + $0x4f8] sm:$0xff] }
 0x267   :  { %5610 = vmatprep.subr.bf16.mxu1 %v5609_v54  ;;  %v3871_v54 = vld [vmem:[%s8768_s4 + $0x348] sm:$0xff]  ;;  %v5705_v48 = vpack.c.bf16 %v3925_v50, %v3924_v53  ;;  %v3936_v50 = vld [vmem:[%s8768_s4 + $0x550] sm:$0xff] }
 0x268   :  { %5684 = vmatpush3.bf16.msra.mxu0 %v5683_v7  ;;  %v3909_v7 = vld [vmem:[%s8768_s4 + $0x478] sm:$0xff] }
 0x269   :  { %5686 = vmatprep.subr.bf16.mxu0 %v5685_v55  ;;  %v5663_v55 = vpack.c.bf16 %v3871_v54, %v3870_v26  ;;  %v5707_v41 = vpack.c.bf16 %v3909_v7, %v3908_v40  ;;  %v3954_v26 = vld [vmem:[%s8768_s4 + $0x5e0] sm:$0xff]  ;;  %v3955_v54 = vld [vmem:[%s8768_s4 + $0x5e8] sm:$0xff]  ;;  %v3977_v40 = vld [vmem:[%s8768_s4 + $0x698] sm:$0xff] }
 0x26a   :  { %5612 = vmatpush3.bf16.msra.mxu1 %v5611_v57  ;;  %v5665_v57 = vpack.c.bf16 %v3889_v38, %v3888_v34  ;;  %v3958_v34 = vld [vmem:[%s8768_s4 + $0x600] sm:$0xff]  ;;  %v3959_v38 = vld [vmem:[%s8768_s4 + $0x608] sm:$0xff]  ;;  %v5733_v7 = vpack.c.bf16 %v3955_v54, %v3954_v26 }
 0x26b   :  { %5646 = vmatprep.subr.bf16.mxu1 %v5645_v25  ;;  %v3890_v25 = vld [vmem:[%s8768_s4 + $0x3e0] sm:$0xff]  ;;  %v5743_v42 = vpack.c.bf16 %v3959_v38, %v3958_v34  ;;  %v3968_v34 = vld [vmem:[%s8768_s4 + $0x650] sm:$0xff]  ;;  %v3969_v38 = vld [vmem:[%s8768_s4 + $0x658] sm:$0xff] }
 0x26c   :  { %5688 = vmatpush3.bf16.msra.mxu0 %v5687_v58  ;;  %v5669_v58 = vpack.c.bf16 %v3891_v12, %v3890_v25 }
 0x26d   :  { %4189 = vmatmul.mubr.f32.vlgmr.msra.gmra.mrb[124].mxu1 %v8034_v44  ;;  %5690 = vmatprep.subr.bf16.mxu0 %v5689_v60  ;;  %v3921_v44 = vld [vmem:[%s8768_s4 + $0x4d8] sm:$0xff]  ;;  %v3874_v60 = vld [vmem:[%s8768_s4 + $0x360] sm:$0xff] }
 0x26e   :  { %5648 = vmatpush3.bf16.msra.mxu1 %v5647_v49  ;;  %4328 = vmatprep.mubr.f32.mxu1 %v3408_v45  ;;  %v5697_v31 = vpack.c.bf16 %v3921_v44, %v3920_v9  ;;  %v5703_v45 = vpack.c.bf16 %v3907_v19, %v3906_v27  ;;  %v3893_v49 = vld [vmem:[%s8768_s4 + $0x3f8] sm:$0xff]  ;;  %v5671_v4 = vpack.c.bf16 %v3875_v1, %v3874_v60  ;;  %v3952_v27 = vld [vmem:[%s8768_s4 + $0x5d0] sm:$0xff]  ;;  %v3978_v60 = vld [vmem:[%s8768_s4 + $0x6a0] sm:$0xff] }
 0x26f   :  { %5650 = vmatprep.subr.bf16.mxu1 %v5649_v51  ;;  %v5673_v47 = vpack.c.bf16 %v3893_v49, %v3892_v61  ;;  %v3876_v51 = vld [vmem:[%s8768_s4 + $0x370] sm:$0xff]  ;;  %v3953_v19 = vld [vmem:[%s8768_s4 + $0x5d8] sm:$0xff]  ;;  %v3979_v1 = vld [vmem:[%s8768_s4 + $0x6a8] sm:$0xff] }
 0x270   :  { %5692 = vmatpush3.bf16.msra.mxu0 %v5691_v21  ;;  %v5675_v29 = vpack.c.bf16 %v3877_v52, %v3876_v51  ;;  %v5709_v21 = vpack.c.bf16 %v3943_v28, %v3942_v14  ;;  %v5729_v53 = vpack.c.bf16 %v3953_v19, %v3952_v27  ;;  %v3940_v49 = vld [vmem:[%s8768_s4 + $0x570] sm:$0xff]  ;;  %v4006_v51 = vld [vmem:[%s8768_s4 + $0x780] sm:$0xff]  ;;  %v4007_v52 = vld [vmem:[%s8768_s4 + $0x788] sm:$0xff]  ;;  %v5749_v28 = vpack.c.bf16 %v3979_v1, %v3978_v60 }
 0x271   :  { %5694 = vmatprep.subr.bf16.mxu0 %v5693_v56  ;;  %v3926_v56 = vld [vmem:[%s8768_s4 + $0x500] sm:$0xff]  ;;  %v3985_v27 = vld [vmem:[%s8768_s4 + $0x6d8] sm:$0xff]  ;;  %v3999_v1 = vld [vmem:[%s8768_s4 + $0x748] sm:$0xff] }
 0x272   :  { %5652 = vmatpush3.bf16.msra.mxu1 %v5651_v6  ;;  %v3945_v6 = vld [vmem:[%s8768_s4 + $0x598] sm:$0xff]  ;;  %v5711_v9 = vpack.c.bf16 %v3927_v59, %v3926_v56  ;;  %v3980_v59 = vld [vmem:[%s8768_s4 + $0x6b0] sm:$0xff]  ;;  %v3998_v60 = vld [vmem:[%s8768_s4 + $0x740] sm:$0xff] }
 0x273   :  { %5654 = vmatprep.subr.bf16.mxu1 %v5653_v0  ;;  %v5713_v44 = vpack.c.bf16 %v3945_v6, %v3944_v62  ;;  %v3928_v0 = vld [vmem:[%s8768_s4 + $0x510] sm:$0xff]  ;;  %v3981_v62 = vld [vmem:[%s8768_s4 + $0x6b8] sm:$0xff]  ;;  %v5773_v6 = vpack.c.bf16 %v4007_v52, %v4006_v51 }
 0x274   :  { %5696 = vmatpush3.bf16.msra.mxu0 %v5695_v23  ;;  %v5715_v15 = vpack.c.bf16 %v3929_v11, %v3928_v0  ;;  %v5717_v23 = vpack.c.bf16 %v3947_v13, %v3946_v35  ;;  %v4008_v0 = vld [vmem:[%s8768_s4 + $0x790] sm:$0xff]  ;;  %v4009_v11 = vld [vmem:[%s8768_s4 + $0x798] sm:$0xff]  ;;  %v5753_v13 = vpack.c.bf16 %v3981_v62, %v3980_v59  ;;  %v4018_v62 = vld [vmem:[%s8768_s4 + $0x7e0] sm:$0xff] }
 0x275   :  { %5698 = vmatprep.subr.bf16.mxu0 %v5697_v31  ;;  %v3930_v31 = vld [vmem:[%s8768_s4 + $0x520] sm:$0xff]  ;;  %v3972_v51 = vld [vmem:[%s8768_s4 + $0x670] sm:$0xff]  ;;  %v3973_v52 = vld [vmem:[%s8768_s4 + $0x678] sm:$0xff] }
 0x276   :  { %5656 = vmatpush3.bf16.msra.mxu1 %v5655_v46  ;;  %v5719_v46 = vpack.c.bf16 %v3931_v10, %v3930_v31  ;;  %v3982_v10 = vld [vmem:[%s8768_s4 + $0x6c0] sm:$0xff]  ;;  %v4001_v59 = vld [vmem:[%s8768_s4 + $0x758] sm:$0xff] }
 0x277   :  { %5658 = vmatprep.subr.bf16.mxu1 %v5657_v18  ;;  %v3933_v18 = vld [vmem:[%s8768_s4 + $0x538] sm:$0xff] }
 0x278   :  { %5700 = vmatpush3.bf16.msra.mxu0 %v5699_v33  ;;  %v5723_v8 = vpack.c.bf16 %v3933_v18, %v3932_v16  ;;  %v3934_v33 = vld [vmem:[%s8768_s4 + $0x540] sm:$0xff]  ;;  %v4011_v18 = vld [vmem:[%s8768_s4 + $0x7a8] sm:$0xff] }
 0x279   :  { %5702 = vmatprep.subr.bf16.mxu0 %v5701_v2  ;;  %v3935_v2 = vld [vmem:[%s8768_s4 + $0x548] sm:$0xff]  ;;  %v4010_v16 = vld [vmem:[%s8768_s4 + $0x7a0] sm:$0xff] }
 0x27a   :  { %5660 = vmatpush3.bf16.msra.mxu1 %v5659_v20  ;;  %v5727_v20 = vpack.c.bf16 %v3935_v2, %v3934_v33  ;;  %v3984_v2 = vld [vmem:[%s8768_s4 + $0x6d0] sm:$0xff]  ;;  %v5781_v19 = vpack.c.bf16 %v4011_v18, %v4010_v16  ;;  %v4023_v16 = vld [vmem:[%s8768_s4 + $0x808] sm:$0xff] }
 0x27b   :  { %5662 = vmatprep.subr.bf16.mxu1 %v5661_v22  ;;  %v3937_v22 = vld [vmem:[%s8768_s4 + $0x558] sm:$0xff]  ;;  %v5761_v54 = vpack.c.bf16 %v3985_v27, %v3984_v2  ;;  %v4040_v18 = vld [vmem:[%s8768_s4 + $0x890] sm:$0xff] }
 0x27c   :  { %5704 = vmatpush3.bf16.msra.mxu0 %v5703_v45  ;;  %v5731_v45 = vpack.c.bf16 %v3937_v22, %v3936_v50  ;;  %v4012_v50 = vld [vmem:[%s8768_s4 + $0x7b0] sm:$0xff]  ;;  %v4013_v22 = vld [vmem:[%s8768_s4 + $0x7b8] sm:$0xff] }
 0x27d   :  { %5706 = vmatprep.subr.bf16.mxu0 %v5705_v48  ;;  %v3976_v48 = vld [vmem:[%s8768_s4 + $0x690] sm:$0xff]  ;;  %v4025_v27 = vld [vmem:[%s8768_s4 + $0x818] sm:$0xff] }
 0x27e   :  { %5664 = vmatpush3.bf16.msra.mxu1 %v5663_v55  ;;  %v3938_v55 = vld [vmem:[%s8768_s4 + $0x560] sm:$0xff]  ;;  %v5745_v12 = vpack.c.bf16 %v3977_v40, %v3976_v48  ;;  %v3987_v40 = vld [vmem:[%s8768_s4 + $0x6e8] sm:$0xff]  ;;  %v4024_v2 = vld [vmem:[%s8768_s4 + $0x810] sm:$0xff] }
 0x27f   :  { %5666 = vmatprep.subr.bf16.mxu1 %v5665_v57  ;;  %v3956_v57 = vld [vmem:[%s8768_s4 + $0x5f0] sm:$0xff]  ;;  %v3986_v48 = vld [vmem:[%s8768_s4 + $0x6e0] sm:$0xff] }
 0x280   :  { %5708 = vmatpush3.bf16.msra.mxu0 %v5707_v41  ;;  %v3960_v41 = vld [vmem:[%s8768_s4 + $0x610] sm:$0xff]  ;;  %v5737_v61 = vpack.c.bf16 %v3957_v17, %v3956_v57  ;;  %v4015_v57 = vld [vmem:[%s8768_s4 + $0x7c8] sm:$0xff]  ;;  %v5763_v17 = vpack.c.bf16 %v3969_v38, %v3968_v34 }
 0x281   :  { %5742 = vmatprep.subr.bf16.mxu0 %v5741_v63  ;;  %v3961_v63 = vld [vmem:[%s8768_s4 + $0x618] sm:$0xff]  ;;  %v4027_v34 = vld [vmem:[%s8768_s4 + $0x828] sm:$0xff]  ;;  %v4044_v38 = vld [vmem:[%s8768_s4 + $0x8b0] sm:$0xff] }
 0x282   :  { %5668 = vmatpush3.bf16.msra.mxu1 %v5667_v43  ;;  %v5735_v43 = vpack.c.bf16 %v3939_v39, %v3938_v55  ;;  %v5747_v14 = vpack.c.bf16 %v3961_v63, %v3960_v41  ;;  %v3996_v55 = vld [vmem:[%s8768_s4 + $0x730] sm:$0xff]  ;;  %v3997_v39 = vld [vmem:[%s8768_s4 + $0x738] sm:$0xff] }
 0x283   :  { %5670 = vmatprep.subr.bf16.mxu1 %v5669_v58  ;;  %v5787_v41 = vpack.c.bf16 %v3997_v39, %v3996_v55  ;;  %v3988_v63 = vld [vmem:[%s8768_s4 + $0x6f0] sm:$0xff]  ;;  %v4029_v55 = vld [vmem:[%s8768_s4 + $0x838] sm:$0xff]  ;;  %v4046_v39 = vld [vmem:[%s8768_s4 + $0x8c0] sm:$0xff] }
 0x286   :  { %5672 = vmatpush3.bf16.msra.mxu1 %v5671_v4  ;;  %v3941_v4 = vld [vmem:[%s8768_s4 + $0x578] sm:$0xff] }
 0x287   :  { %5674 = vmatprep.subr.bf16.mxu1 %v5673_v47  ;;  %v5739_v56 = vpack.c.bf16 %v3941_v4, %v3940_v49  ;;  %v4017_v49 = vld [vmem:[%s8768_s4 + $0x7d8] sm:$0xff] }
 0x28a   :  { %5676 = vmatpush3.bf16.msra.mxu1 %v5675_v29  ;;  %v3962_v29 = vld [vmem:[%s8768_s4 + $0x620] sm:$0xff] }
 0x28b   :  { %5710 = vmatprep.subr.bf16.mxu1 %v5709_v21  ;;  %v3963_v21 = vld [vmem:[%s8768_s4 + $0x628] sm:$0xff] }
 0x28c   :  { %v5751_v35 = vpack.c.bf16 %v3963_v21, %v3962_v29  ;;  %v4039_v29 = vld [vmem:[%s8768_s4 + $0x888] sm:$0xff] }
 0x28d   :  { %4329 = vmatmul.mubr.f32.vlgmr.msra.gmra.mrb[126].mxu1 %v8199_v3  ;;  %v3949_v3 = vld [vmem:[%s8768_s4 + $0x5b8] sm:$0xff] }
 0x28e   :  { %5712 = vmatpush3.bf16.msra.mxu1 %v5711_v9  ;;  %v5721_v32 = vpack.c.bf16 %v3949_v3, %v3948_v36  ;;  %v3990_v9 = vld [vmem:[%s8768_s4 + $0x700] sm:$0xff]  ;;  %v3983_v36 = vld [vmem:[%s8768_s4 + $0x6c8] sm:$0xff]  ;;  %v5777_v3 = vpack.c.bf16 %v4009_v11, %v4008_v0 }
 0x28f   :  { %5714 = vmatprep.subr.bf16.mxu1 %v5713_v44  ;;  %v3991_v44 = vld [vmem:[%s8768_s4 + $0x708] sm:$0xff]  ;;  %v5757_v24 = vpack.c.bf16 %v3983_v36, %v3982_v10  ;;  %v4004_v36 = vld [vmem:[%s8768_s4 + $0x770] sm:$0xff] }
 0x290   :  { %v5775_v31 = vpack.c.bf16 %v3991_v44, %v3990_v9  ;;  %v5771_v9 = vpack.c.bf16 %v3973_v52, %v3972_v51  ;;  %v4035_v51 = vld [vmem:[%s8768_s4 + $0x868] sm:$0xff]  ;;  %v4052_v52 = vld [vmem:[%s8768_s4 + $0x8f0] sm:$0xff] }
 0x292   :  { %5716 = vmatpush3.bf16.msra.mxu1 %v5715_v15  ;;  %v3964_v15 = vld [vmem:[%s8768_s4 + $0x630] sm:$0xff] }
 0x293   :  { %5718 = vmatprep.subr.bf16.mxu1 %v5717_v23  ;;  %v3965_v23 = vld [vmem:[%s8768_s4 + $0x638] sm:$0xff] }
 0x294   :  { %v5755_v30 = vpack.c.bf16 %v3965_v23, %v3964_v15  ;;  %v4020_v15 = vld [vmem:[%s8768_s4 + $0x7f0] sm:$0xff]  ;;  %v4021_v23 = vld [vmem:[%s8768_s4 + $0x7f8] sm:$0xff] }
 0x295   :  { %v5801_v10 = vpack.c.bf16 %v4021_v23, %v4020_v15 }
 0x296   :  { %5720 = vmatpush3.bf16.msra.mxu1 %v5719_v46  ;;  %v3992_v46 = vld [vmem:[%s8768_s4 + $0x710] sm:$0xff] }
 0x297   :  { %5722 = vmatprep.subr.bf16.mxu1 %v5721_v32  ;;  %v3993_v32 = vld [vmem:[%s8768_s4 + $0x718] sm:$0xff] }
 0x298   :  { %v5779_v33 = vpack.c.bf16 %v3993_v32, %v3992_v46  ;;  %v4022_v32 = vld [vmem:[%s8768_s4 + $0x800] sm:$0xff] }
 0x29a   :  { %5724 = vmatpush3.bf16.msra.mxu1 %v5723_v8  ;;  %v3966_v8 = vld [vmem:[%s8768_s4 + $0x640] sm:$0xff] }
 0x29b   :  { %5726 = vmatprep.subr.bf16.mxu1 %v5725_v5  ;;  %v3967_v5 = vld [vmem:[%s8768_s4 + $0x648] sm:$0xff] }
 0x29c   :  { %v5759_v26 = vpack.c.bf16 %v3967_v5, %v3966_v8  ;;  %v5807_v8 = vpack.c.bf16 %v4023_v16, %v4022_v32 }
 0x29e   :  { %5728 = vmatpush3.bf16.msra.mxu1 %v5727_v20  ;;  %v3994_v20 = vld [vmem:[%s8768_s4 + $0x720] sm:$0xff] }
 0x29f   :  { %5730 = vmatprep.subr.bf16.mxu1 %v5729_v53  ;;  %v3995_v53 = vld [vmem:[%s8768_s4 + $0x728] sm:$0xff] }
 0x2a0   :  { %v3477_v37 = vpop.f32.mrb[118].mxu1 }
 0x2a1   :  { %v3479_v25 = vpop.f32.mrb[119].mxu1 }
 0x2a2   :  { %4398 = vmatprep.mubr.f32.mxu0 %v3479_v25  ;;  %5732 = vmatpush3.bf16.msra.mxu1 %v5731_v45  ;;  %v3548_v58 = vpop.f32.mrb[142].mxu0  ;;  %v5783_v45 = vpack.c.bf16 %v3995_v53, %v3994_v20  ;;  %v3970_v25 = vld [vmem:[%s8768_s4 + $0x660] sm:$0xff]  ;;  %v4043_v53 = vld [vmem:[%s8768_s4 + $0x8a8] sm:$0xff] }
 0x2a3   :  { %4399 = vmatmul.mubr.f32.vlgmr.msra.gmra.mrb[150].mxu0 %v3477_v37  ;;  %5734 = vmatprep.subr.bf16.mxu1 %v5733_v7  ;;  %v3550_v47 = vpop.f32.mrb[143].mxu0  ;;  %v5785_v7 = vpack.c.bf16 %v4013_v22, %v4012_v50  ;;  %v4014_v37 = vld [vmem:[%s8768_s4 + $0x7c0] sm:$0xff]  ;;  %v5811_v22 = vpack.c.bf16 %v4025_v27, %v4024_v2 }
 0x2a4   :  { %4468 = vmatprep.mubr.f32.mxu1 %v3550_v47  ;;  %5744 = vmatpush3.bf16.msra.mxu0 %v5743_v42  ;;  %v5765_v42 = vpack.c.bf16 %v3987_v40, %v3986_v48  ;;  %v4042_v20 = vld [vmem:[%s8768_s4 + $0x8a0] sm:$0xff] }
 0x2a5   :  { %5746 = vmatprep.subr.bf16.mxu0 %v5745_v12  ;;  %v3971_v12 = vld [vmem:[%s8768_s4 + $0x668] sm:$0xff] }
 0x2a6   :  { %5736 = vmatpush3.bf16.msra.mxu1 %v5735_v43  ;;  %v3989_v43 = vld [vmem:[%s8768_s4 + $0x6f8] sm:$0xff]  ;;  %v5767_v4 = vpack.c.bf16 %v3971_v12, %v3970_v25  ;;  %v4031_v25 = vld [vmem:[%s8768_s4 + $0x848] sm:$0xff]  ;;  %v4048_v12 = vld [vmem:[%s8768_s4 + $0x8d0] sm:$0xff] }
 0x2a7   :  { %5738 = vmatprep.subr.bf16.mxu1 %v5737_v61  ;;  %v4016_v61 = vld [vmem:[%s8768_s4 + $0x7d0] sm:$0xff]  ;;  %v5769_v47 = vpack.c.bf16 %v3989_v43, %v3988_v63 }
 0x2a8   :  { %5748 = vmatpush3.bf16.msra.mxu0 %v5747_v14  ;;  %v5791_v14 = vpack.c.bf16 %v3999_v1, %v3998_v60  ;;  %v5793_v21 = vpack.c.bf16 %v4017_v49, %v4016_v61  ;;  %v4033_v60 = vld [vmem:[%s8768_s4 + $0x858] sm:$0xff]  ;;  %v4050_v1 = vld [vmem:[%s8768_s4 + $0x8e0] sm:$0xff]  ;;  %v4051_v61 = vld [vmem:[%s8768_s4 + $0x8e8] sm:$0xff] }
 0x2a9   :  { %5750 = vmatprep.subr.bf16.mxu0 %v5749_v28  ;;  %v4038_v28 = vld [vmem:[%s8768_s4 + $0x880] sm:$0xff] }
 0x2aa   :  { %5740 = vmatpush3.bf16.msra.mxu1 %v5739_v56  ;;  %v4000_v56 = vld [vmem:[%s8768_s4 + $0x750] sm:$0xff]  ;;  %v5805_v44 = vpack.c.bf16 %v4039_v29, %v4038_v28 }
 0x2ab   :  { %5774 = vmatprep.subr.bf16.mxu1 %v5773_v6  ;;  %v4019_v6 = vld [vmem:[%s8768_s4 + $0x7e8] sm:$0xff]  ;;  %v5795_v0 = vpack.c.bf16 %v4001_v59, %v4000_v56  ;;  %v4037_v56 = vld [vmem:[%s8768_s4 + $0x878] sm:$0xff] }
 0x2ac   :  { %5752 = vmatpush3.bf16.msra.mxu0 %v5751_v35  ;;  %v5797_v11 = vpack.c.bf16 %v4019_v6, %v4018_v62  ;;  %v4002_v35 = vld [vmem:[%s8768_s4 + $0x760] sm:$0xff] }
 0x2ad   :  { %4469 = vmatmul.mubr.f32.vlgmr.msra.gmra.mrb[128].mxu1 %v3548_v58  ;;  %5754 = vmatprep.subr.bf16.mxu0 %v5753_v13  ;;  %v5789_v58 = vpack.c.bf16 %v4015_v57, %v4014_v37  ;;  %v4003_v13 = vld [vmem:[%s8768_s4 + $0x768] sm:$0xff] }
 0x2ae   :  { %5776 = vmatpush3.bf16.msra.mxu1 %v5775_v31  ;;  %v5799_v31 = vpack.c.bf16 %v4003_v13, %v4002_v35  ;;  %v4047_v37 = vld [vmem:[%s8768_s4 + $0x8c8] sm:$0xff] }
 0x2af   :  { %5778 = vmatprep.subr.bf16.mxu1 %v5777_v3  ;;  %v4005_v3 = vld [vmem:[%s8768_s4 + $0x778] sm:$0xff] }
 0x2b0   :  { %5756 = vmatpush3.bf16.msra.mxu0 %v5755_v30  ;;  %v5803_v46 = vpack.c.bf16 %v4005_v3, %v4004_v36  ;;  %v4041_v30 = vld [vmem:[%s8768_s4 + $0x898] sm:$0xff] }
 0x2b1   :  { %5758 = vmatprep.subr.bf16.mxu0 %v5757_v24 }
 0x2b2   :  { %5780 = vmatpush3.bf16.msra.mxu1 %v5779_v33  ;;  %v5809_v33 = vpack.c.bf16 %v4041_v30, %v4040_v18 }
 0x2b3   :  { %5782 = vmatprep.subr.bf16.mxu1 %v5781_v19 }
 0x2b4   :  { %5760 = vmatpush3.bf16.msra.mxu0 %v5759_v26  ;;  %v5813_v26 = vpack.c.bf16 %v4043_v53, %v4042_v20 }
 0x2b5   :  { %5762 = vmatprep.subr.bf16.mxu0 %v5761_v54  ;;  %v4026_v54 = vld [vmem:[%s8768_s4 + $0x820] sm:$0xff] }
 0x2b6   :  { %5784 = vmatpush3.bf16.msra.mxu1 %v5783_v45  ;;  %v4045_v45 = vld [vmem:[%s8768_s4 + $0x8b8] sm:$0xff]  ;;  %v5815_v48 = vpack.c.bf16 %v4027_v34, %v4026_v54 }
 0x2b7   :  { %5786 = vmatprep.subr.bf16.mxu1 %v5785_v7  ;;  %v5817_v40 = vpack.c.bf16 %v4045_v45, %v4044_v38  ;;  %v4028_v7 = vld [vmem:[%s8768_s4 + $0x830] sm:$0xff] }
 0x2b8   :  { %5764 = vmatpush3.bf16.msra.mxu0 %v5763_v17  ;;  %v5819_v57 = vpack.c.bf16 %v4029_v55, %v4028_v7  ;;  %v5821_v17 = vpack.c.bf16 %v4047_v37, %v4046_v39 }
 0x2b9   :  { %5766 = vmatprep.subr.bf16.mxu0 %v5765_v42  ;;  %v4030_v42 = vld [vmem:[%s8768_s4 + $0x840] sm:$0xff] }
 0x2ba   :  { %5788 = vmatpush3.bf16.msra.mxu1 %v5787_v41  ;;  %v4049_v41 = vld [vmem:[%s8768_s4 + $0x8d8] sm:$0xff]  ;;  %v5823_v63 = vpack.c.bf16 %v4031_v25, %v4030_v42 }
 0x2bb   :  { %5790 = vmatprep.subr.bf16.mxu1 %v5789_v58  ;;  %v5825_v43 = vpack.c.bf16 %v4049_v41, %v4048_v12  ;;  %v4032_v58 = vld [vmem:[%s8768_s4 + $0x850] sm:$0xff] }
 0x2bc   :  { %5768 = vmatpush3.bf16.msra.mxu0 %v5767_v4  ;;  %v5827_v49 = vpack.c.bf16 %v4033_v60, %v4032_v58  ;;  %v5829_v4 = vpack.c.bf16 %v4051_v61, %v4050_v1 }
 0x2bd   :  { %5770 = vmatprep.subr.bf16.mxu0 %v5769_v47  ;;  %v4034_v47 = vld [vmem:[%s8768_s4 + $0x860] sm:$0xff] }
 0x2be   :  { %5792 = vmatpush3.bf16.msra.mxu1 %v5791_v14  ;;  %v4053_v14 = vld [vmem:[%s8768_s4 + $0x8f8] sm:$0xff]  ;;  %v5831_v28 = vpack.c.bf16 %v4035_v51, %v4034_v47 }
 0x2bf   :  { %5794 = vmatprep.subr.bf16.mxu1 %v5793_v21  ;;  %v5833_v29 = vpack.c.bf16 %v4053_v14, %v4052_v52  ;;  %v4036_v21 = vld [vmem:[%s8768_s4 + $0x870] sm:$0xff] }
 0x2c0   :  { %5772 = vmatpush3.bf16.msra.mxu0 %v5771_v9  ;;  %v5835_v59 = vpack.c.bf16 %v4037_v56, %v4036_v21 }
 0x2c1   :  { %5806 = vmatprep.subr.bf16.mxu0 %v5805_v44 }
 0x2c2   :  { %5796 = vmatpush3.bf16.msra.mxu1 %v5795_v0 }
 0x2c3   :  { %5798 = vmatprep.subr.bf16.mxu1 %v5797_v11 }
 0x2c6   :  { %5800 = vmatpush3.bf16.msra.mxu1 %v5799_v31 }
 0x2c7   :  { %5802 = vmatprep.subr.bf16.mxu1 %v5801_v10 }
 0x2ca   :  { %5804 = vmatpush3.bf16.msra.mxu1 %v5803_v46 }
 0x2e0   :  { %v3619_v24 = vpop.f32.mrb[120].mxu1 }
 0x2e1   :  { %v3621_v5 = vpop.f32.mrb[121].mxu1 }
 0x2e2   :  { %v3690_v19 = vpop.f32.mrb[144].mxu0  ;;  %4538 = vmatprep.mubr.f32.mxu0 %v3621_v5 }
 0x2e3   :  { %v3692_v50 = vpop.f32.mrb[145].mxu0  ;;  %4539 = vmatmul.mubr.f32.vlgmr.msra.gmra.mrb[152].mxu0 %v3619_v24 }
 0x2e4   :  { %4608 = vmatprep.mubr.f32.mxu1 %v3692_v50  ;;  %5808 = vmatpush3.bf16.msra.mxu0 %v5807_v8 }
 0x2e5   :  { %4609 = vmatmul.mubr.f32.vlgmr.msra.gmra.mrb[130].mxu1 %v3690_v19  ;;  %5810 = vmatprep.subr.bf16.mxu0 %v5809_v33 }
 0x2e8   :  { %5812 = vmatpush3.bf16.msra.mxu0 %v5811_v22 }
 0x2e9   :  { %5814 = vmatprep.subr.bf16.mxu0 %v5813_v26 }
 0x2ec   :  { %5816 = vmatpush3.bf16.msra.mxu0 %v5815_v48 }
 0x2ed   :  { %5818 = vmatprep.subr.bf16.mxu0 %v5817_v40 }
 0x2f0   :  { %5820 = vmatpush3.bf16.msra.mxu0 %v5819_v57 }
 0x2f1   :  { %5822 = vmatprep.subr.bf16.mxu0 %v5821_v17 }
 0x2f4   :  { %5824 = vmatpush3.bf16.msra.mxu0 %v5823_v63 }
 0x2f5   :  { %5826 = vmatprep.subr.bf16.mxu0 %v5825_v43 }
 0x2f8   :  { %5828 = vmatpush3.bf16.msra.mxu0 %v5827_v49 }
 0x2f9   :  { %5830 = vmatprep.subr.bf16.mxu0 %v5829_v4 }
 0x2fc   :  { %5832 = vmatpush3.bf16.msra.mxu0 %v5831_v28 }
 0x2fd   :  { %5834 = vmatprep.subr.bf16.mxu0 %v5833_v29 }
 0x300   :  { %5836 = vmatpush3.bf16.msra.mxu0 %v5835_v59 }
 0x302   :  { %v5050_v62 = vpop.f32.mrb[146].mxu0 }
 0x303   :  { %v5051_v6 = vpop.f32.mrb[147].mxu0 }
 0x304   :  { %v5052_v9 = vadd.f32 %v5051_v6, %v5050_v62 }
 0x320   :  { %v3761_v44 = vpop.f32.mrb[122].mxu1 }
 0x321   :  { %v3763_v0 = vpop.f32.mrb[123].mxu1 }
 0x322   :  { %4678 = vmatprep.mubr.f32.mxu0 %v3763_v0 }
 0x323   :  { %4679 = vmatmul.mubr.f32.vlgmr.msra.gmra.mrb[154].mxu0 %v3761_v44 }
 0x336   :  { %v5120_v11 = vpop.f32.mrb[148].mxu0 }
 0x337   :  { %v5121_v35 = vpop.f32.mrb[149].mxu0 }
 0x338   :  { %v5122_v13 = vadd.f32 %v5121_v35, %v5120_v11 }
 0x340   :  { %v5085_v15 = vpop.f32.mrb[124].mxu1 }
 0x341   :  { %v5086_v23 = vpop.f32.mrb[125].mxu1 }
 0x342   :  { %v5087_v31 = vadd.f32 %v5086_v23, %v5085_v15 }
 0x344   :  { %v4191_v10 = vadd.f32 %v5087_v31, %v5052_v9 }
 0x346   :  { %v4261_v36 = vadd.f32 %v5122_v13, %v4191_v10 }
 0x360   :  { %v5155_v3 = vpop.f32.mrb[126].mxu1 }
 0x361   :  { %v5156_v46 = vpop.f32.mrb[127].mxu1 }
 0x362   :  { %v5157_v32 = vadd.f32 %v5156_v46, %v5155_v3 }
 0x364   :  { %v4331_v16 = vadd.f32 %v5157_v32, %v4261_v36 }
 0x376   :  { %v5190_v18 = vpop.f32.mrb[150].mxu0 }
 0x377   :  { %v5191_v30 = vpop.f32.mrb[151].mxu0 }
 0x378   :  { %v5192_v24 = vadd.f32 %v5191_v30, %v5190_v18 }
 0x37a   :  { %v4401_v8 = vadd.f32 %v5192_v24, %v4331_v16 }
 0x380   :  { %v5225_v5 = vpop.f32.mrb[128].mxu1 }
 0x381   :  { %v5226_v33 = vpop.f32.mrb[129].mxu1 }
 0x382   :  { %v5227_v2 = vadd.f32 %v5226_v33, %v5225_v5 }
 0x384   :  { %v4471_v27 = vadd.f32 %v5227_v2, %v4401_v8 }
 0x3b6   :  { %v5260_v19 = vpop.f32.mrb[152].mxu0 }
 0x3b7   :  { %v5261_v20 = vpop.f32.mrb[153].mxu0 }
 0x3b8   :  { %v5262_v53 = vadd.f32 %v5261_v20, %v5260_v19  ;;  %v5295_v50 = vpop.f32.mrb[130].mxu1 }
 0x3b9   :  { %v5296_v22 = vpop.f32.mrb[131].mxu1 }
 0x3ba   :  { %v4541_v26 = vadd.f32 %v5262_v53, %v4471_v27  ;;  %v5297_v54 = vadd.f32 %v5296_v22, %v5295_v50 }
 0x3bc   :  { %v4611_v34 = vadd.f32 %v5297_v54, %v4541_v26 }
 0x3f6   :  { %v5330_v38 = vpop.f32.mrb[154].mxu0 }
 0x3f7   :  { %v5331_v45 = vpop.f32.mrb[155].mxu0 }
 0x3f8   :  { %v5332_v48 = vadd.f32 %v5331_v45, %v5330_v38 }
 0x3fa   :  { %v4681_v40 = vadd.f32 %v5332_v48, %v4611_v34 }
 0x3fc   :  { %4684 = vst [vmem:[%s8769_s5] sm:$0x3] %v4681_v40 }

</bundles_post_ra>
